<compile_context>
chip_gen: v6e
topology: v6e:2x2x1
jax: 0.10.0
libtpu: 0.0.40
codegen_flags: <defaults>
</compile_context>

<pallas_src>
import numpy as np

import jax
import jax.numpy as jnp
from jax.experimental import pallas as pl
from jax.experimental.pallas import tpu as pltpu


NUM_CLASSES = 10
FC_PAD = 128            # lane-dense padded logits width
CONV0_K = 384           # 11*11*3 = 363 im2col features, zero-padded to 384

_PARAM_ORDER = ("w0", "b0",
                "m1", "w1", "b1", "a2",
                "m2", "w2", "b2",
                "m3", "w3", "b3",
                "m4", "w4", "b4",
                "a3", "wfc", "bfc")


# --------------------------- constant builders (host, once) ------------------------

def _tap_shifts(k, pad, width, nrows):
    """Non-negative sublane roll amounts so that rolled[r] = x[(r + raw_shift) mod N]."""
    return [(-((di - pad) * width + (dj - pad))) % nrows
            for di in range(k) for dj in range(k)]


def _conv_tap_params(w, hw, k, pad, bb):
    """PyTorch (Co,Ci,k,k) weight -> per-tap (k*k,Ci,Co) weights + (k*k, bb*hw*hw, 1)
    0/1 validity masks for the roll+mask stride-1 'same' convolution on an hw x hw grid."""
    co, ci, kk, _ = w.shape
    assert kk == k
    P = hw * hw
    wt = np.transpose(w, (2, 3, 1, 0)).reshape(k * k, ci, co)          # t = di*k + dj
    masks = np.zeros((k * k, P), np.float32)
    for di in range(k):
        for dj in range(k):
            t = di * k + dj
            for oh in range(hw):
                for ow in range(hw):
                    ih, iw = oh + di - pad, ow + dj - pad
                    if 0 <= ih < hw and 0 <= iw < hw:
                        masks[t, oh * hw + ow] = 1.0
    masks = np.tile(masks, (1, bb)).reshape(k * k, bb * P, 1)          # rows = (image, pos)
    return wt, masks


def _avgpool_block_matrix(hw, bb):
    """(bb*(hw/2)^2, bb*hw^2) block-diagonal AvgPool2d(2,2) matrix (0.25 entries)."""
    ho = hw // 2
    pin, pout = hw * hw, ho * ho
    a = np.zeros((bb * pout, bb * pin), np.float32)
    for b in range(bb):
        for ph in range(ho):
            for pw in range(ho):
                r = b * pout + ph * ho + pw
                for di in range(2):
                    for dj in range(2):
                        a[r, b * pin + (2 * ph + di) * hw + (2 * pw + dj)] = 0.25
    return a


def _global_pool_matrix(bb):
    """(bb, bb*4) matrix: final AvgPool2d(2,2) on the 2x2 map (mean of 4 rows per image)."""
    a = np.zeros((bb, bb * 4), np.float32)
    for b in range(bb):
        a[b, b * 4:(b + 1) * 4] = 0.25
    return a


# ------------------------------- parameter prep ------------------------------------

def init_torch_params(key, num_classes=NUM_CLASSES):
    """Random parameters in the original PyTorch layout (Conv2d / Linear init style)."""
    conv_specs = [
        (64, 3, 11, 11),
        (192, 64, 5, 5),
        (384, 192, 3, 3),
        (256, 384, 3, 3),
        (256, 256, 3, 3),
    ]
    params = {}
    for idx, s in enumerate(conv_specs):
        key, k1, k2 = jax.random.split(key, 3)
        fan_in = s[1] * s[2] * s[3]
        scale = 1.0 / float(np.sqrt(fan_in))
        params[f"conv{idx}_w"] = jax.random.uniform(k1, s, jnp.float32, -scale, scale)
        params[f"conv{idx}_b"] = jax.random.uniform(k2, (s[0],), jnp.float32, -scale, scale)
    key, k1, k2 = jax.random.split(key, 3)
    scale = 1.0 / float(np.sqrt(256))
    params["fc_w"] = jax.random.uniform(k1, (num_classes, 256), jnp.float32, -scale, scale)
    params["fc_b"] = jax.random.uniform(k2, (num_classes,), jnp.float32, -scale, scale)
    return params


def prepare_params(torch_params, block_batch):
    """One-time preprocessing (off the hot path): im2col-matrix for conv0, per-tap
    weights + roll masks for conv1..4, pooling matrices, FC padded to 128 lanes."""
    bb = block_batch
    assert bb >= 2 and bb % 2 == 0, "block_batch must be even and >= 2"
    p = {}

    # conv0: (64,3,11,11) -> (363, 64) im2col weight, zero-padded K to 384.
    w0 = np.asarray(torch_params["conv0_w"], np.float32)
    w0m = np.transpose(w0, (2, 3, 1, 0)).reshape(11 * 11 * 3, 64)     # row = (di*11+dj)*3+c
    w0m = np.pad(w0m, ((0, CONV0_K - w0m.shape[0]), (0, 0)))
    p["w0"] = w0m
    p["b0"] = np.asarray(torch_params["conv0_b"], np.float32).reshape(1, -1)

    # conv1..conv4: stride-1 same-size convs on tiny grids -> roll+mask taps.
    layer_specs = [("1", 4, 5, 2), ("2", 2, 3, 1), ("3", 2, 3, 1), ("4", 2, 3, 1)]
    for name, hw, k, pad in layer_specs:
        w = np.asarray(torch_params[f"conv{name}_w"], np.float32)
        wt, masks = _conv_tap_params(w, hw, k, pad, bb)
        p[f"w{name}"] = wt
        p[f"m{name}"] = masks
        p[f"b{name}"] = np.asarray(torch_params[f"conv{name}_b"], np.float32).reshape(1, -1)

    p["a2"] = _avgpool_block_matrix(4, bb)     # 4x4 -> 2x2 (after conv1)
    p["a3"] = _global_pool_matrix(bb)          # 2x2 -> 1x1 (fused with classifier)

    wfc = np.asarray(torch_params["fc_w"], np.float32)                # (num_classes, 256)
    nc = wfc.shape[0]
    wfc_pad = np.zeros((256, FC_PAD), np.float32)
    wfc_pad[:, :nc] = wfc.T
    bfc_pad = np.zeros((1, FC_PAD), np.float32)
    bfc_pad[0, :nc] = np.asarray(torch_params["fc_b"], np.float32)
    p["wfc"] = wfc_pad
    p["bfc"] = bfc_pad

    bf16_keys = {"w0", "w1", "w2", "w3", "w4", "a2", "a3", "wfc"}
    return {k: jnp.asarray(v, jnp.bfloat16 if k in bf16_keys else jnp.float32)
            for k, v in p.items()}


# --------------------------------- host input prep ---------------------------------

def _prep_input(x_nchw, bb):
    """(B,3,32,32) -> (num_blocks, 4*bb*16, 384) bf16 im2col blocks for conv0.
    Row order per block: (pool-window offset d, image-in-block, pooled position ph*4+pw),
    so the in-kernel AvgPool(8x8->4x4) is four contiguous row-slice adds."""
    b = x_nchw.shape[0]
    assert x_nchw.shape[1:] == (3, 32, 32), x_nchw.shape
    pad_b = (-b) % bb
    if pad_b:
        x_nchw = jnp.concatenate(
            [x_nchw, jnp.zeros((pad_b,) + x_nchw.shape[1:], x_nchw.dtype)], axis=0)
    bt = x_nchw.shape[0]
    nblk = bt // bb

    x = jnp.transpose(x_nchw, (0, 2, 3, 1))                 # NHWC (bt,32,32,3)
    x = jnp.pad(x, ((0, 0), (5, 2), (5, 2), (0, 0)))        # (bt,39,39,3), pad=5 each side
    cols = []
    for di in range(11):
        for dj in range(11):
            cols.append(x[:, di:di + 29:4, dj:dj + 29:4, :])        # (bt,8,8,3)
    patches = jnp.stack(cols, axis=3).reshape(bt, 8, 8, 363)        # feat = (di*11+dj)*3+c
    patches = patches.reshape(bt, 4, 2, 4, 2, 363)                  # (bt, ph, dh, pw, dw, K)
    patches = jnp.transpose(patches, (0, 2, 4, 1, 3, 5))            # (bt, dh, dw, ph, pw, K)
    patches = patches.reshape(nblk, bb, 2, 2, 4, 4, 363)
    patches = jnp.transpose(patches, (0, 2, 3, 1, 4, 5, 6))         # (nblk, dh, dw, img, ph, pw, K)
    patches = patches.reshape(nblk, 4 * bb * 16, 363)
    patches = jnp.pad(patches, ((0, 0), (0, 0), (0, CONV0_K - 363)))
    return patches.astype(jnp.bfloat16), bt


# --------------------------------- Pallas kernel -----------------------------------

def _make_kernel(bb):
    n1 = bb * 16                      # conv1 rows (4x4 grid per image)
    n2 = bb * 4                       # conv2-4 rows (2x2 grid per image)
    shifts1 = _tap_shifts(5, 2, 4, n1)
    shifts3 = _tap_shifts(3, 1, 2, n2)

    def conv_taps(x, m_ref, w_ref, b_ref, shifts):
        """Stride-1 'same' conv on the batched row-major grid: per tap, sublane roll +
        0/1 mask + (rows, Cin) @ (Cin, Cout) MXU matmul, accumulated in f32."""
        co = w_ref.shape[-1]
        acc = jnp.zeros((x.shape[0], co), jnp.float32)
        for t, s in enumerate(shifts):
            xt = x if s == 0 else pltpu.roll(x, shift=s, axis=0)
            xt = (xt * m_ref[t]).astype(jnp.bfloat16)
            acc = acc + jnp.dot(xt, w_ref[t], preferred_element_type=jnp.float32)
        # TODO(synk): SRelu() is not defined in the reference snippet; using standard ReLU.
        return jnp.maximum(acc + b_ref[...], 0.0)

    def kernel(x_ref, w0_ref, b0_ref,
               m1_ref, w1_ref, b1_ref, a2_ref,
               m2_ref, w2_ref, b2_ref,
               m3_ref, w3_ref, b3_ref,
               m4_ref, w4_ref, b4_ref,
               a3_ref, wfc_ref, bfc_ref,
               o_ref):
        # conv0 as one dense im2col matmul: (4*bb*16, 384) @ (384, 64)
        f0 = jnp.dot(x_ref[...], w0_ref[...], preferred_element_type=jnp.float32)
        f0 = jnp.maximum(f0 + b0_ref[...], 0.0)
        # AvgPool 8x8 -> 4x4: rows are pool-window-major -> four contiguous slice adds.
        p1 = 0.25 * (f0[0:n1] + f0[n1:2 * n1] + f0[2 * n1:3 * n1] + f0[3 * n1:4 * n1])

        f1 = conv_taps(p1, m1_ref, w1_ref, b1_ref, shifts1)          # (bb*16, 192)
        # AvgPool 4x4 -> 2x2 as a small block-diagonal constant matmul.
        p2 = jnp.dot(a2_ref[...], f1.astype(jnp.bfloat16),
                     preferred_element_type=jnp.float32)             # (bb*4, 192)

        f2 = conv_taps(p2, m2_ref, w2_ref, b2_ref, shifts3)          # (bb*4, 384)
        f3 = conv_taps(f2, m3_ref, w3_ref, b3_ref, shifts3)          # (bb*4, 256)
        f4 = conv_taps(f3, m4_ref, w4_ref, b4_ref, shifts3)          # (bb*4, 256)

        # AvgPool 2x2 -> 1x1 (mean of 4 rows per image) fused ahead of the classifier.
        g = jnp.dot(a3_ref[...], f4.astype(jnp.bfloat16),
                    preferred_element_type=jnp.float32)              # (bb, 256)
        logits = jnp.dot(g.astype(jnp.bfloat16), wfc_ref[...],
                         preferred_element_type=jnp.float32) + bfc_ref[...]
        o_ref[...] = logits.astype(o_ref.dtype)                      # (bb, 128) lane-dense

    return kernel


def _const_spec(arr):
    nd = arr.ndim
    return pl.BlockSpec(arr.shape, lambda i, _nd=nd: (0,) * _nd)


def alexnet_forward(params, x_nchw, block_batch):
    bb = block_batch
    assert params["m1"].shape[1] == bb * 16, "params were prepared for a different block_batch"
    b = x_nchw.shape[0]
    x0, bt = _prep_input(x_nchw.astype(jnp.float32), bb)
    nblk = bt // bb
    rows0 = 4 * bb * 16
    if nblk > 1:
        assert bb % 8 == 0, "for multi-block grids use a block_batch that is a multiple of 8"

    const_ins = [params[k] for k in _PARAM_ORDER]
    const_specs = [_const_spec(params[k]) for k in _PARAM_ORDER]

    out = pl.pallas_call(
        _make_kernel(bb),
        out_shape=jax.ShapeDtypeStruct((bt, FC_PAD), jnp.float32),
        grid=(nblk,),
        in_specs=[pl.BlockSpec((None, rows0, CONV0_K), lambda i: (i, 0, 0))] + const_specs,
        out_specs=pl.BlockSpec((bb, FC_PAD), lambda i: (i, 0)),
        compiler_params=pltpu.CompilerParams(
            dimension_semantics=("parallel",),
            vmem_limit_bytes=48 * 1024 * 1024,
        ),
    )(x0, *const_ins)
    return out[:b, :NUM_CLASSES]


# ------------------------------ pure-JAX reference ----------------------------------

def alexnet_reference(tp, x):
    def conv(v, w, b, stride, pad):
        y = jax.lax.conv_general_dilated(
            v, w, window_strides=(stride, stride),
            padding=((pad, pad), (pad, pad)),
            dimension_numbers=("NCHW", "OIHW", "NCHW"))
        return y + b.reshape(1, -1, 1, 1)

    def avgpool2(v):
        bsz, c, h, w = v.shape
        return v.reshape(bsz, c, h // 2, 2, w // 2, 2).mean(axis=(3, 5))

    relu = lambda v: jnp.maximum(v, 0.0)
    y = avgpool2(relu(conv(x, tp["conv0_w"], tp["conv0_b"], 4, 5)))
    y = avgpool2(relu(conv(y, tp["conv1_w"], tp["conv1_b"], 1, 2)))
    y = relu(conv(y, tp["conv2_w"], tp["conv2_b"], 1, 1))
    y = relu(conv(y, tp["conv3_w"], tp["conv3_b"], 1, 1))
    y = avgpool2(relu(conv(y, tp["conv4_w"], tp["conv4_b"], 1, 1)))
    y = y.reshape(y.shape[0], -1)
    return y @ tp["fc_w"].T + tp["fc_b"]


if __name__ == "__main__":
    key = jax.random.PRNGKey(0)
    k_in, k_par = jax.random.split(key)
    # Input must be 3x32x32 so the final feature map is (256,1,1) matching Linear(256, 10).
    x = jax.random.normal(k_in, (2, 3, 32, 32), dtype=jnp.float32)

    BB = 2   # demo block size (== batch). Use 32 (v5e) / 64 (v6e, v7x) for real workloads.
    torch_params = init_torch_params(k_par, num_classes=NUM_CLASSES)
    params = prepare_params(torch_params, block_batch=BB)

    forward = jax.jit(lambda p, xx: alexnet_forward(p, xx, block_batch=BB))
    logits = forward(params, x)
    jax.block_until_ready(logits)
    assert logits.shape == (2, NUM_CLASSES), logits.shape

    # Loose correctness check vs. a pure-JAX reference (bf16 operands / f32 accumulation).
    ref = np.asarray(jax.jit(alexnet_reference)(torch_params, x))
    out = np.asarray(logits)
    rel_err = float(np.max(np.abs(out - ref)) / (np.max(np.abs(ref)) + 1e-6))
    assert rel_err < 0.06, f"kernel/reference mismatch: rel-to-max error {rel_err:.4f}"

    print("KERNEL_OK")
</pallas_src>

<mosaic_0001>
module attributes {stable_mosaic.version = 11 : i64} {
  func.func @kernel(%arg0: i32, %arg1: memref<1x128x384xbf16, #tpu.memory_space<vmem>>, %arg2: memref<384x64xbf16, #tpu.memory_space<vmem>>, %arg3: memref<1x64xf32, #tpu.memory_space<vmem>>, %arg4: memref<25x32x1xf32, #tpu.memory_space<vmem>>, %arg5: memref<25x64x192xbf16, #tpu.memory_space<vmem>>, %arg6: memref<1x192xf32, #tpu.memory_space<vmem>>, %arg7: memref<8x32xbf16, #tpu.memory_space<vmem>>, %arg8: memref<9x8x1xf32, #tpu.memory_space<vmem>>, %arg9: memref<9x192x384xbf16, #tpu.memory_space<vmem>>, %arg10: memref<1x384xf32, #tpu.memory_space<vmem>>, %arg11: memref<9x8x1xf32, #tpu.memory_space<vmem>>, %arg12: memref<9x384x256xbf16, #tpu.memory_space<vmem>>, %arg13: memref<1x256xf32, #tpu.memory_space<vmem>>, %arg14: memref<9x8x1xf32, #tpu.memory_space<vmem>>, %arg15: memref<9x256x256xbf16, #tpu.memory_space<vmem>>, %arg16: memref<1x256xf32, #tpu.memory_space<vmem>>, %arg17: memref<2x8xbf16, #tpu.memory_space<vmem>>, %arg18: memref<256x128xbf16, #tpu.memory_space<vmem>>, %arg19: memref<1x128xf32, #tpu.memory_space<vmem>>, %arg20: memref<2x128xf32, #tpu.memory_space<vmem>>) attributes {dimension_semantics = [#tpu.dimension_semantics<parallel>], iteration_bounds = array<i64: 1>, scalar_prefetch = 0 : i64, scratch_operands = 0 : i64, tpu.core_type = #tpu.core_type<tc>, window_params = [{transform_indices = @transform_0, window_bounds = array<i64: 1, 128, 384>}, {pipeline_mode = #tpu.pipeline_mode<synchronous>, transform_indices = @transform_1, window_bounds = array<i64: 384, 64>}, {pipeline_mode = #tpu.pipeline_mode<synchronous>, transform_indices = @transform_2, window_bounds = array<i64: 1, 64>}, {pipeline_mode = #tpu.pipeline_mode<synchronous>, transform_indices = @transform_3, window_bounds = array<i64: 25, 32, 1>}, {pipeline_mode = #tpu.pipeline_mode<synchronous>, transform_indices = @transform_4, window_bounds = array<i64: 25, 64, 192>}, {pipeline_mode = #tpu.pipeline_mode<synchronous>, transform_indices = @transform_5, window_bounds = array<i64: 1, 192>}, {pipeline_mode = #tpu.pipeline_mode<synchronous>, transform_indices = @transform_6, window_bounds = array<i64: 8, 32>}, {pipeline_mode = #tpu.pipeline_mode<synchronous>, transform_indices = @transform_7, window_bounds = array<i64: 9, 8, 1>}, {pipeline_mode = #tpu.pipeline_mode<synchronous>, transform_indices = @transform_8, window_bounds = array<i64: 9, 192, 384>}, {pipeline_mode = #tpu.pipeline_mode<synchronous>, transform_indices = @transform_9, window_bounds = array<i64: 1, 384>}, {pipeline_mode = #tpu.pipeline_mode<synchronous>, transform_indices = @transform_10, window_bounds = array<i64: 9, 8, 1>}, {pipeline_mode = #tpu.pipeline_mode<synchronous>, transform_indices = @transform_11, window_bounds = array<i64: 9, 384, 256>}, {pipeline_mode = #tpu.pipeline_mode<synchronous>, transform_indices = @transform_12, window_bounds = array<i64: 1, 256>}, {pipeline_mode = #tpu.pipeline_mode<synchronous>, transform_indices = @transform_13, window_bounds = array<i64: 9, 8, 1>}, {pipeline_mode = #tpu.pipeline_mode<synchronous>, transform_indices = @transform_14, window_bounds = array<i64: 9, 256, 256>}, {pipeline_mode = #tpu.pipeline_mode<synchronous>, transform_indices = @transform_15, window_bounds = array<i64: 1, 256>}, {pipeline_mode = #tpu.pipeline_mode<synchronous>, transform_indices = @transform_16, window_bounds = array<i64: 2, 8>}, {pipeline_mode = #tpu.pipeline_mode<synchronous>, transform_indices = @transform_17, window_bounds = array<i64: 256, 128>}, {pipeline_mode = #tpu.pipeline_mode<synchronous>, transform_indices = @transform_18, window_bounds = array<i64: 1, 128>}, {transform_indices = @transform_19, window_bounds = array<i64: 2, 128>}]} {
    %c0 = arith.constant 0 : index
    %c0_0 = arith.constant 0 : index
    %c0_1 = arith.constant 0 : index
    %0 = vector.load %arg1[%c0, %c0_0, %c0_1] : memref<1x128x384xbf16, #tpu.memory_space<vmem>>, vector<1x128x384xbf16>
    %1 = vector.shape_cast %0 : vector<1x128x384xbf16> to vector<128x384xbf16>
    %c0_2 = arith.constant 0 : index
    %c0_3 = arith.constant 0 : index
    %2 = vector.load %arg2[%c0_2, %c0_3] : memref<384x64xbf16, #tpu.memory_space<vmem>>, vector<384x64xbf16>
    %cst = arith.constant dense<0.000000e+00> : vector<128x64xf32>
    %3 = tpu.matmul %1, %2, %cst {dimension_numbers = #tpu.dot_dimension_numbers<[1], [0], [0], [1], [0, 0, 1, 1], [], []>} : vector<128x384xbf16>, vector<384x64xbf16>, vector<128x64xf32> -> vector<128x64xf32>
    %c0_4 = arith.constant 0 : index
    %c0_5 = arith.constant 0 : index
    %4 = vector.load %arg3[%c0_4, %c0_5] : memref<1x64xf32, #tpu.memory_space<vmem>>, vector<1x64xf32>
    %5 = vector.broadcast %4 : vector<1x64xf32> to vector<128x64xf32>
    %6 = arith.addf %3, %5 : vector<128x64xf32>
    %cst_6 = arith.constant 0.000000e+00 : f32
    %7 = vector.broadcast %cst_6 : f32 to vector<128x64xf32>
    %8 = arith.maximumf %6, %7 : vector<128x64xf32>
    %9 = vector.extract_strided_slice %8 {offsets = [0, 0], sizes = [32, 64], strides = [1, 1]} : vector<128x64xf32> to vector<32x64xf32>
    %10 = vector.extract_strided_slice %8 {offsets = [32, 0], sizes = [32, 64], strides = [1, 1]} : vector<128x64xf32> to vector<32x64xf32>
    %11 = arith.addf %9, %10 : vector<32x64xf32>
    %12 = vector.extract_strided_slice %8 {offsets = [64, 0], sizes = [32, 64], strides = [1, 1]} : vector<128x64xf32> to vector<32x64xf32>
    %13 = arith.addf %11, %12 : vector<32x64xf32>
    %14 = vector.extract_strided_slice %8 {offsets = [96, 0], sizes = [32, 64], strides = [1, 1]} : vector<128x64xf32> to vector<32x64xf32>
    %15 = arith.addf %13, %14 : vector<32x64xf32>
    %cst_7 = arith.constant 2.500000e-01 : f32
    %16 = vector.broadcast %cst_7 : f32 to vector<32x64xf32>
    %17 = arith.mulf %16, %15 : vector<32x64xf32>
    %cst_8 = arith.constant 0.000000e+00 : f32
    %18 = vector.broadcast %cst_8 : f32 to vector<32x192xf32>
    %c10_i32 = arith.constant 10 : i32
    %19 = tpu.dynamic_rotate %17 by %c10_i32 dim 0 : vector<32x64xf32>, i32 -> vector<32x64xf32>
    %c0_9 = arith.constant 0 : index
    %c0_10 = arith.constant 0 : index
    %c0_11 = arith.constant 0 : index
    %20 = vector.load %arg4[%c0_9, %c0_10, %c0_11] : memref<25x32x1xf32, #tpu.memory_space<vmem>>, vector<1x32x1xf32>
    %21 = vector.shape_cast %20 : vector<1x32x1xf32> to vector<32x1xf32>
    %22 = vector.broadcast %21 : vector<32x1xf32> to vector<32x64xf32>
    %23 = arith.mulf %19, %22 : vector<32x64xf32>
    %24 = arith.truncf %23 : vector<32x64xf32> to vector<32x64xbf16>
    %c0_12 = arith.constant 0 : index
    %c0_13 = arith.constant 0 : index
    %c0_14 = arith.constant 0 : index
    %25 = vector.load %arg5[%c0_12, %c0_13, %c0_14] : memref<25x64x192xbf16, #tpu.memory_space<vmem>>, vector<1x64x192xbf16>
    %26 = vector.shape_cast %25 : vector<1x64x192xbf16> to vector<64x192xbf16>
    %cst_15 = arith.constant dense<0.000000e+00> : vector<32x192xf32>
    %27 = tpu.matmul %24, %26, %cst_15 {dimension_numbers = #tpu.dot_dimension_numbers<[1], [0], [0], [1], [0, 0, 1, 1], [], []>} : vector<32x64xbf16>, vector<64x192xbf16>, vector<32x192xf32> -> vector<32x192xf32>
    %28 = arith.addf %18, %27 : vector<32x192xf32>
    %c9_i32 = arith.constant 9 : i32
    %29 = tpu.dynamic_rotate %17 by %c9_i32 dim 0 : vector<32x64xf32>, i32 -> vector<32x64xf32>
    %c1 = arith.constant 1 : index
    %c0_16 = arith.constant 0 : index
    %c0_17 = arith.constant 0 : index
    %30 = vector.load %arg4[%c1, %c0_16, %c0_17] : memref<25x32x1xf32, #tpu.memory_space<vmem>>, vector<1x32x1xf32>
    %31 = vector.shape_cast %30 : vector<1x32x1xf32> to vector<32x1xf32>
    %32 = vector.broadcast %31 : vector<32x1xf32> to vector<32x64xf32>
    %33 = arith.mulf %29, %32 : vector<32x64xf32>
    %34 = arith.truncf %33 : vector<32x64xf32> to vector<32x64xbf16>
    %c1_18 = arith.constant 1 : index
    %c0_19 = arith.constant 0 : index
    %c0_20 = arith.constant 0 : index
    %35 = vector.load %arg5[%c1_18, %c0_19, %c0_20] : memref<25x64x192xbf16, #tpu.memory_space<vmem>>, vector<1x64x192xbf16>
    %36 = vector.shape_cast %35 : vector<1x64x192xbf16> to vector<64x192xbf16>
    %cst_21 = arith.constant dense<0.000000e+00> : vector<32x192xf32>
    %37 = tpu.matmul %34, %36, %cst_21 {dimension_numbers = #tpu.dot_dimension_numbers<[1], [0], [0], [1], [0, 0, 1, 1], [], []>} : vector<32x64xbf16>, vector<64x192xbf16>, vector<32x192xf32> -> vector<32x192xf32>
    %38 = arith.addf %28, %37 : vector<32x192xf32>
    %c8_i32 = arith.constant 8 : i32
    %39 = tpu.dynamic_rotate %17 by %c8_i32 dim 0 : vector<32x64xf32>, i32 -> vector<32x64xf32>
    %c2 = arith.constant 2 : index
    %c0_22 = arith.constant 0 : index
    %c0_23 = arith.constant 0 : index
    %40 = vector.load %arg4[%c2, %c0_22, %c0_23] : memref<25x32x1xf32, #tpu.memory_space<vmem>>, vector<1x32x1xf32>
    %41 = vector.shape_cast %40 : vector<1x32x1xf32> to vector<32x1xf32>
    %42 = vector.broadcast %41 : vector<32x1xf32> to vector<32x64xf32>
    %43 = arith.mulf %39, %42 : vector<32x64xf32>
    %44 = arith.truncf %43 : vector<32x64xf32> to vector<32x64xbf16>
    %c2_24 = arith.constant 2 : index
    %c0_25 = arith.constant 0 : index
    %c0_26 = arith.constant 0 : index
    %45 = vector.load %arg5[%c2_24, %c0_25, %c0_26] : memref<25x64x192xbf16, #tpu.memory_space<vmem>>, vector<1x64x192xbf16>
    %46 = vector.shape_cast %45 : vector<1x64x192xbf16> to vector<64x192xbf16>
    %cst_27 = arith.constant dense<0.000000e+00> : vector<32x192xf32>
    %47 = tpu.matmul %44, %46, %cst_27 {dimension_numbers = #tpu.dot_dimension_numbers<[1], [0], [0], [1], [0, 0, 1, 1], [], []>} : vector<32x64xbf16>, vector<64x192xbf16>, vector<32x192xf32> -> vector<32x192xf32>
    %48 = arith.addf %38, %47 : vector<32x192xf32>
    %c7_i32 = arith.constant 7 : i32
    %49 = tpu.dynamic_rotate %17 by %c7_i32 dim 0 : vector<32x64xf32>, i32 -> vector<32x64xf32>
    %c3 = arith.constant 3 : index
    %c0_28 = arith.constant 0 : index
    %c0_29 = arith.constant 0 : index
    %50 = vector.load %arg4[%c3, %c0_28, %c0_29] : memref<25x32x1xf32, #tpu.memory_space<vmem>>, vector<1x32x1xf32>
    %51 = vector.shape_cast %50 : vector<1x32x1xf32> to vector<32x1xf32>
    %52 = vector.broadcast %51 : vector<32x1xf32> to vector<32x64xf32>
    %53 = arith.mulf %49, %52 : vector<32x64xf32>
    %54 = arith.truncf %53 : vector<32x64xf32> to vector<32x64xbf16>
    %c3_30 = arith.constant 3 : index
    %c0_31 = arith.constant 0 : index
    %c0_32 = arith.constant 0 : index
    %55 = vector.load %arg5[%c3_30, %c0_31, %c0_32] : memref<25x64x192xbf16, #tpu.memory_space<vmem>>, vector<1x64x192xbf16>
    %56 = vector.shape_cast %55 : vector<1x64x192xbf16> to vector<64x192xbf16>
    %cst_33 = arith.constant dense<0.000000e+00> : vector<32x192xf32>
    %57 = tpu.matmul %54, %56, %cst_33 {dimension_numbers = #tpu.dot_dimension_numbers<[1], [0], [0], [1], [0, 0, 1, 1], [], []>} : vector<32x64xbf16>, vector<64x192xbf16>, vector<32x192xf32> -> vector<32x192xf32>
    %58 = arith.addf %48, %57 : vector<32x192xf32>
    %c6_i32 = arith.constant 6 : i32
    %59 = tpu.dynamic_rotate %17 by %c6_i32 dim 0 : vector<32x64xf32>, i32 -> vector<32x64xf32>
    %c4 = arith.constant 4 : index
    %c0_34 = arith.constant 0 : index
    %c0_35 = arith.constant 0 : index
    %60 = vector.load %arg4[%c4, %c0_34, %c0_35] : memref<25x32x1xf32, #tpu.memory_space<vmem>>, vector<1x32x1xf32>
    %61 = vector.shape_cast %60 : vector<1x32x1xf32> to vector<32x1xf32>
    %62 = vector.broadcast %61 : vector<32x1xf32> to vector<32x64xf32>
    %63 = arith.mulf %59, %62 : vector<32x64xf32>
    %64 = arith.truncf %63 : vector<32x64xf32> to vector<32x64xbf16>
    %c4_36 = arith.constant 4 : index
    %c0_37 = arith.constant 0 : index
    %c0_38 = arith.constant 0 : index
    %65 = vector.load %arg5[%c4_36, %c0_37, %c0_38] : memref<25x64x192xbf16, #tpu.memory_space<vmem>>, vector<1x64x192xbf16>
    %66 = vector.shape_cast %65 : vector<1x64x192xbf16> to vector<64x192xbf16>
    %cst_39 = arith.constant dense<0.000000e+00> : vector<32x192xf32>
    %67 = tpu.matmul %64, %66, %cst_39 {dimension_numbers = #tpu.dot_dimension_numbers<[1], [0], [0], [1], [0, 0, 1, 1], [], []>} : vector<32x64xbf16>, vector<64x192xbf16>, vector<32x192xf32> -> vector<32x192xf32>
    %68 = arith.addf %58, %67 : vector<32x192xf32>
    %c6_i32_40 = arith.constant 6 : i32
    %69 = tpu.dynamic_rotate %17 by %c6_i32_40 dim 0 : vector<32x64xf32>, i32 -> vector<32x64xf32>
    %c5 = arith.constant 5 : index
    %c0_41 = arith.constant 0 : index
    %c0_42 = arith.constant 0 : index
    %70 = vector.load %arg4[%c5, %c0_41, %c0_42] : memref<25x32x1xf32, #tpu.memory_space<vmem>>, vector<1x32x1xf32>
    %71 = vector.shape_cast %70 : vector<1x32x1xf32> to vector<32x1xf32>
    %72 = vector.broadcast %71 : vector<32x1xf32> to vector<32x64xf32>
    %73 = arith.mulf %69, %72 : vector<32x64xf32>
    %74 = arith.truncf %73 : vector<32x64xf32> to vector<32x64xbf16>
    %c5_43 = arith.constant 5 : index
    %c0_44 = arith.constant 0 : index
    %c0_45 = arith.constant 0 : index
    %75 = vector.load %arg5[%c5_43, %c0_44, %c0_45] : memref<25x64x192xbf16, #tpu.memory_space<vmem>>, vector<1x64x192xbf16>
    %76 = vector.shape_cast %75 : vector<1x64x192xbf16> to vector<64x192xbf16>
    %cst_46 = arith.constant dense<0.000000e+00> : vector<32x192xf32>
    %77 = tpu.matmul %74, %76, %cst_46 {dimension_numbers = #tpu.dot_dimension_numbers<[1], [0], [0], [1], [0, 0, 1, 1], [], []>} : vector<32x64xbf16>, vector<64x192xbf16>, vector<32x192xf32> -> vector<32x192xf32>
    %78 = arith.addf %68, %77 : vector<32x192xf32>
    %c5_i32 = arith.constant 5 : i32
    %79 = tpu.dynamic_rotate %17 by %c5_i32 dim 0 : vector<32x64xf32>, i32 -> vector<32x64xf32>
    %c6 = arith.constant 6 : index
    %c0_47 = arith.constant 0 : index
    %c0_48 = arith.constant 0 : index
    %80 = vector.load %arg4[%c6, %c0_47, %c0_48] : memref<25x32x1xf32, #tpu.memory_space<vmem>>, vector<1x32x1xf32>
    %81 = vector.shape_cast %80 : vector<1x32x1xf32> to vector<32x1xf32>
    %82 = vector.broadcast %81 : vector<32x1xf32> to vector<32x64xf32>
    %83 = arith.mulf %79, %82 : vector<32x64xf32>
    %84 = arith.truncf %83 : vector<32x64xf32> to vector<32x64xbf16>
    %c6_49 = arith.constant 6 : index
    %c0_50 = arith.constant 0 : index
    %c0_51 = arith.constant 0 : index
    %85 = vector.load %arg5[%c6_49, %c0_50, %c0_51] : memref<25x64x192xbf16, #tpu.memory_space<vmem>>, vector<1x64x192xbf16>
    %86 = vector.shape_cast %85 : vector<1x64x192xbf16> to vector<64x192xbf16>
    %cst_52 = arith.constant dense<0.000000e+00> : vector<32x192xf32>
    %87 = tpu.matmul %84, %86, %cst_52 {dimension_numbers = #tpu.dot_dimension_numbers<[1], [0], [0], [1], [0, 0, 1, 1], [], []>} : vector<32x64xbf16>, vector<64x192xbf16>, vector<32x192xf32> -> vector<32x192xf32>
    %88 = arith.addf %78, %87 : vector<32x192xf32>
    %c4_i32 = arith.constant 4 : i32
    %89 = tpu.dynamic_rotate %17 by %c4_i32 dim 0 : vector<32x64xf32>, i32 -> vector<32x64xf32>
    %c7 = arith.constant 7 : index
    %c0_53 = arith.constant 0 : index
    %c0_54 = arith.constant 0 : index
    %90 = vector.load %arg4[%c7, %c0_53, %c0_54] : memref<25x32x1xf32, #tpu.memory_space<vmem>>, vector<1x32x1xf32>
    %91 = vector.shape_cast %90 : vector<1x32x1xf32> to vector<32x1xf32>
    %92 = vector.broadcast %91 : vector<32x1xf32> to vector<32x64xf32>
    %93 = arith.mulf %89, %92 : vector<32x64xf32>
    %94 = arith.truncf %93 : vector<32x64xf32> to vector<32x64xbf16>
    %c7_55 = arith.constant 7 : index
    %c0_56 = arith.constant 0 : index
    %c0_57 = arith.constant 0 : index
    %95 = vector.load %arg5[%c7_55, %c0_56, %c0_57] : memref<25x64x192xbf16, #tpu.memory_space<vmem>>, vector<1x64x192xbf16>
    %96 = vector.shape_cast %95 : vector<1x64x192xbf16> to vector<64x192xbf16>
    %cst_58 = arith.constant dense<0.000000e+00> : vector<32x192xf32>
    %97 = tpu.matmul %94, %96, %cst_58 {dimension_numbers = #tpu.dot_dimension_numbers<[1], [0], [0], [1], [0, 0, 1, 1], [], []>} : vector<32x64xbf16>, vector<64x192xbf16>, vector<32x192xf32> -> vector<32x192xf32>
    %98 = arith.addf %88, %97 : vector<32x192xf32>
    %c3_i32 = arith.constant 3 : i32
    %99 = tpu.dynamic_rotate %17 by %c3_i32 dim 0 : vector<32x64xf32>, i32 -> vector<32x64xf32>
    %c8 = arith.constant 8 : index
    %c0_59 = arith.constant 0 : index
    %c0_60 = arith.constant 0 : index
    %100 = vector.load %arg4[%c8, %c0_59, %c0_60] : memref<25x32x1xf32, #tpu.memory_space<vmem>>, vector<1x32x1xf32>
    %101 = vector.shape_cast %100 : vector<1x32x1xf32> to vector<32x1xf32>
    %102 = vector.broadcast %101 : vector<32x1xf32> to vector<32x64xf32>
    %103 = arith.mulf %99, %102 : vector<32x64xf32>
    %104 = arith.truncf %103 : vector<32x64xf32> to vector<32x64xbf16>
    %c8_61 = arith.constant 8 : index
    %c0_62 = arith.constant 0 : index
    %c0_63 = arith.constant 0 : index
    %105 = vector.load %arg5[%c8_61, %c0_62, %c0_63] : memref<25x64x192xbf16, #tpu.memory_space<vmem>>, vector<1x64x192xbf16>
    %106 = vector.shape_cast %105 : vector<1x64x192xbf16> to vector<64x192xbf16>
    %cst_64 = arith.constant dense<0.000000e+00> : vector<32x192xf32>
    %107 = tpu.matmul %104, %106, %cst_64 {dimension_numbers = #tpu.dot_dimension_numbers<[1], [0], [0], [1], [0, 0, 1, 1], [], []>} : vector<32x64xbf16>, vector<64x192xbf16>, vector<32x192xf32> -> vector<32x192xf32>
    %108 = arith.addf %98, %107 : vector<32x192xf32>
    %c2_i32 = arith.constant 2 : i32
    %109 = tpu.dynamic_rotate %17 by %c2_i32 dim 0 : vector<32x64xf32>, i32 -> vector<32x64xf32>
    %c9 = arith.constant 9 : index
    %c0_65 = arith.constant 0 : index
    %c0_66 = arith.constant 0 : index
    %110 = vector.load %arg4[%c9, %c0_65, %c0_66] : memref<25x32x1xf32, #tpu.memory_space<vmem>>, vector<1x32x1xf32>
    %111 = vector.shape_cast %110 : vector<1x32x1xf32> to vector<32x1xf32>
    %112 = vector.broadcast %111 : vector<32x1xf32> to vector<32x64xf32>
    %113 = arith.mulf %109, %112 : vector<32x64xf32>
    %114 = arith.truncf %113 : vector<32x64xf32> to vector<32x64xbf16>
    %c9_67 = arith.constant 9 : index
    %c0_68 = arith.constant 0 : index
    %c0_69 = arith.constant 0 : index
    %115 = vector.load %arg5[%c9_67, %c0_68, %c0_69] : memref<25x64x192xbf16, #tpu.memory_space<vmem>>, vector<1x64x192xbf16>
    %116 = vector.shape_cast %115 : vector<1x64x192xbf16> to vector<64x192xbf16>
    %cst_70 = arith.constant dense<0.000000e+00> : vector<32x192xf32>
    %117 = tpu.matmul %114, %116, %cst_70 {dimension_numbers = #tpu.dot_dimension_numbers<[1], [0], [0], [1], [0, 0, 1, 1], [], []>} : vector<32x64xbf16>, vector<64x192xbf16>, vector<32x192xf32> -> vector<32x192xf32>
    %118 = arith.addf %108, %117 : vector<32x192xf32>
    %c2_i32_71 = arith.constant 2 : i32
    %119 = tpu.dynamic_rotate %17 by %c2_i32_71 dim 0 : vector<32x64xf32>, i32 -> vector<32x64xf32>
    %c10 = arith.constant 10 : index
    %c0_72 = arith.constant 0 : index
    %c0_73 = arith.constant 0 : index
    %120 = vector.load %arg4[%c10, %c0_72, %c0_73] : memref<25x32x1xf32, #tpu.memory_space<vmem>>, vector<1x32x1xf32>
    %121 = vector.shape_cast %120 : vector<1x32x1xf32> to vector<32x1xf32>
    %122 = vector.broadcast %121 : vector<32x1xf32> to vector<32x64xf32>
    %123 = arith.mulf %119, %122 : vector<32x64xf32>
    %124 = arith.truncf %123 : vector<32x64xf32> to vector<32x64xbf16>
    %c10_74 = arith.constant 10 : index
    %c0_75 = arith.constant 0 : index
    %c0_76 = arith.constant 0 : index
    %125 = vector.load %arg5[%c10_74, %c0_75, %c0_76] : memref<25x64x192xbf16, #tpu.memory_space<vmem>>, vector<1x64x192xbf16>
    %126 = vector.shape_cast %125 : vector<1x64x192xbf16> to vector<64x192xbf16>
    %cst_77 = arith.constant dense<0.000000e+00> : vector<32x192xf32>
    %127 = tpu.matmul %124, %126, %cst_77 {dimension_numbers = #tpu.dot_dimension_numbers<[1], [0], [0], [1], [0, 0, 1, 1], [], []>} : vector<32x64xbf16>, vector<64x192xbf16>, vector<32x192xf32> -> vector<32x192xf32>
    %128 = arith.addf %118, %127 : vector<32x192xf32>
    %c1_i32 = arith.constant 1 : i32
    %129 = tpu.dynamic_rotate %17 by %c1_i32 dim 0 : vector<32x64xf32>, i32 -> vector<32x64xf32>
    %c11 = arith.constant 11 : index
    %c0_78 = arith.constant 0 : index
    %c0_79 = arith.constant 0 : index
    %130 = vector.load %arg4[%c11, %c0_78, %c0_79] : memref<25x32x1xf32, #tpu.memory_space<vmem>>, vector<1x32x1xf32>
    %131 = vector.shape_cast %130 : vector<1x32x1xf32> to vector<32x1xf32>
    %132 = vector.broadcast %131 : vector<32x1xf32> to vector<32x64xf32>
    %133 = arith.mulf %129, %132 : vector<32x64xf32>
    %134 = arith.truncf %133 : vector<32x64xf32> to vector<32x64xbf16>
    %c11_80 = arith.constant 11 : index
    %c0_81 = arith.constant 0 : index
    %c0_82 = arith.constant 0 : index
    %135 = vector.load %arg5[%c11_80, %c0_81, %c0_82] : memref<25x64x192xbf16, #tpu.memory_space<vmem>>, vector<1x64x192xbf16>
    %136 = vector.shape_cast %135 : vector<1x64x192xbf16> to vector<64x192xbf16>
    %cst_83 = arith.constant dense<0.000000e+00> : vector<32x192xf32>
    %137 = tpu.matmul %134, %136, %cst_83 {dimension_numbers = #tpu.dot_dimension_numbers<[1], [0], [0], [1], [0, 0, 1, 1], [], []>} : vector<32x64xbf16>, vector<64x192xbf16>, vector<32x192xf32> -> vector<32x192xf32>
    %138 = arith.addf %128, %137 : vector<32x192xf32>
    %c12 = arith.constant 12 : index
    %c0_84 = arith.constant 0 : index
    %c0_85 = arith.constant 0 : index
    %139 = vector.load %arg4[%c12, %c0_84, %c0_85] : memref<25x32x1xf32, #tpu.memory_space<vmem>>, vector<1x32x1xf32>
    %140 = vector.shape_cast %139 : vector<1x32x1xf32> to vector<32x1xf32>
    %141 = vector.broadcast %140 : vector<32x1xf32> to vector<32x64xf32>
    %142 = arith.mulf %17, %141 : vector<32x64xf32>
    %143 = arith.truncf %142 : vector<32x64xf32> to vector<32x64xbf16>
    %c12_86 = arith.constant 12 : index
    %c0_87 = arith.constant 0 : index
    %c0_88 = arith.constant 0 : index
    %144 = vector.load %arg5[%c12_86, %c0_87, %c0_88] : memref<25x64x192xbf16, #tpu.memory_space<vmem>>, vector<1x64x192xbf16>
    %145 = vector.shape_cast %144 : vector<1x64x192xbf16> to vector<64x192xbf16>
    %cst_89 = arith.constant dense<0.000000e+00> : vector<32x192xf32>
    %146 = tpu.matmul %143, %145, %cst_89 {dimension_numbers = #tpu.dot_dimension_numbers<[1], [0], [0], [1], [0, 0, 1, 1], [], []>} : vector<32x64xbf16>, vector<64x192xbf16>, vector<32x192xf32> -> vector<32x192xf32>
    %147 = arith.addf %138, %146 : vector<32x192xf32>
    %c31_i32 = arith.constant 31 : i32
    %148 = tpu.dynamic_rotate %17 by %c31_i32 dim 0 : vector<32x64xf32>, i32 -> vector<32x64xf32>
    %c13 = arith.constant 13 : index
    %c0_90 = arith.constant 0 : index
    %c0_91 = arith.constant 0 : index
    %149 = vector.load %arg4[%c13, %c0_90, %c0_91] : memref<25x32x1xf32, #tpu.memory_space<vmem>>, vector<1x32x1xf32>
    %150 = vector.shape_cast %149 : vector<1x32x1xf32> to vector<32x1xf32>
    %151 = vector.broadcast %150 : vector<32x1xf32> to vector<32x64xf32>
    %152 = arith.mulf %148, %151 : vector<32x64xf32>
    %153 = arith.truncf %152 : vector<32x64xf32> to vector<32x64xbf16>
    %c13_92 = arith.constant 13 : index
    %c0_93 = arith.constant 0 : index
    %c0_94 = arith.constant 0 : index
    %154 = vector.load %arg5[%c13_92, %c0_93, %c0_94] : memref<25x64x192xbf16, #tpu.memory_space<vmem>>, vector<1x64x192xbf16>
    %155 = vector.shape_cast %154 : vector<1x64x192xbf16> to vector<64x192xbf16>
    %cst_95 = arith.constant dense<0.000000e+00> : vector<32x192xf32>
    %156 = tpu.matmul %153, %155, %cst_95 {dimension_numbers = #tpu.dot_dimension_numbers<[1], [0], [0], [1], [0, 0, 1, 1], [], []>} : vector<32x64xbf16>, vector<64x192xbf16>, vector<32x192xf32> -> vector<32x192xf32>
    %157 = arith.addf %147, %156 : vector<32x192xf32>
    %c30_i32 = arith.constant 30 : i32
    %158 = tpu.dynamic_rotate %17 by %c30_i32 dim 0 : vector<32x64xf32>, i32 -> vector<32x64xf32>
    %c14 = arith.constant 14 : index
    %c0_96 = arith.constant 0 : index
    %c0_97 = arith.constant 0 : index
    %159 = vector.load %arg4[%c14, %c0_96, %c0_97] : memref<25x32x1xf32, #tpu.memory_space<vmem>>, vector<1x32x1xf32>
    %160 = vector.shape_cast %159 : vector<1x32x1xf32> to vector<32x1xf32>
    %161 = vector.broadcast %160 : vector<32x1xf32> to vector<32x64xf32>
    %162 = arith.mulf %158, %161 : vector<32x64xf32>
    %163 = arith.truncf %162 : vector<32x64xf32> to vector<32x64xbf16>
    %c14_98 = arith.constant 14 : index
    %c0_99 = arith.constant 0 : index
    %c0_100 = arith.constant 0 : index
    %164 = vector.load %arg5[%c14_98, %c0_99, %c0_100] : memref<25x64x192xbf16, #tpu.memory_space<vmem>>, vector<1x64x192xbf16>
    %165 = vector.shape_cast %164 : vector<1x64x192xbf16> to vector<64x192xbf16>
    %cst_101 = arith.constant dense<0.000000e+00> : vector<32x192xf32>
    %166 = tpu.matmul %163, %165, %cst_101 {dimension_numbers = #tpu.dot_dimension_numbers<[1], [0], [0], [1], [0, 0, 1, 1], [], []>} : vector<32x64xbf16>, vector<64x192xbf16>, vector<32x192xf32> -> vector<32x192xf32>
    %167 = arith.addf %157, %166 : vector<32x192xf32>
    %c30_i32_102 = arith.constant 30 : i32
    %168 = tpu.dynamic_rotate %17 by %c30_i32_102 dim 0 : vector<32x64xf32>, i32 -> vector<32x64xf32>
    %c15 = arith.constant 15 : index
    %c0_103 = arith.constant 0 : index
    %c0_104 = arith.constant 0 : index
    %169 = vector.load %arg4[%c15, %c0_103, %c0_104] : memref<25x32x1xf32, #tpu.memory_space<vmem>>, vector<1x32x1xf32>
    %170 = vector.shape_cast %169 : vector<1x32x1xf32> to vector<32x1xf32>
    %171 = vector.broadcast %170 : vector<32x1xf32> to vector<32x64xf32>
    %172 = arith.mulf %168, %171 : vector<32x64xf32>
    %173 = arith.truncf %172 : vector<32x64xf32> to vector<32x64xbf16>
    %c15_105 = arith.constant 15 : index
    %c0_106 = arith.constant 0 : index
    %c0_107 = arith.constant 0 : index
    %174 = vector.load %arg5[%c15_105, %c0_106, %c0_107] : memref<25x64x192xbf16, #tpu.memory_space<vmem>>, vector<1x64x192xbf16>
    %175 = vector.shape_cast %174 : vector<1x64x192xbf16> to vector<64x192xbf16>
    %cst_108 = arith.constant dense<0.000000e+00> : vector<32x192xf32>
    %176 = tpu.matmul %173, %175, %cst_108 {dimension_numbers = #tpu.dot_dimension_numbers<[1], [0], [0], [1], [0, 0, 1, 1], [], []>} : vector<32x64xbf16>, vector<64x192xbf16>, vector<32x192xf32> -> vector<32x192xf32>
    %177 = arith.addf %167, %176 : vector<32x192xf32>
    %c29_i32 = arith.constant 29 : i32
    %178 = tpu.dynamic_rotate %17 by %c29_i32 dim 0 : vector<32x64xf32>, i32 -> vector<32x64xf32>
    %c16 = arith.constant 16 : index
    %c0_109 = arith.constant 0 : index
    %c0_110 = arith.constant 0 : index
    %179 = vector.load %arg4[%c16, %c0_109, %c0_110] : memref<25x32x1xf32, #tpu.memory_space<vmem>>, vector<1x32x1xf32>
    %180 = vector.shape_cast %179 : vector<1x32x1xf32> to vector<32x1xf32>
    %181 = vector.broadcast %180 : vector<32x1xf32> to vector<32x64xf32>
    %182 = arith.mulf %178, %181 : vector<32x64xf32>
    %183 = arith.truncf %182 : vector<32x64xf32> to vector<32x64xbf16>
    %c16_111 = arith.constant 16 : index
    %c0_112 = arith.constant 0 : index
    %c0_113 = arith.constant 0 : index
    %184 = vector.load %arg5[%c16_111, %c0_112, %c0_113] : memref<25x64x192xbf16, #tpu.memory_space<vmem>>, vector<1x64x192xbf16>
    %185 = vector.shape_cast %184 : vector<1x64x192xbf16> to vector<64x192xbf16>
    %cst_114 = arith.constant dense<0.000000e+00> : vector<32x192xf32>
    %186 = tpu.matmul %183, %185, %cst_114 {dimension_numbers = #tpu.dot_dimension_numbers<[1], [0], [0], [1], [0, 0, 1, 1], [], []>} : vector<32x64xbf16>, vector<64x192xbf16>, vector<32x192xf32> -> vector<32x192xf32>
    %187 = arith.addf %177, %186 : vector<32x192xf32>
    %c28_i32 = arith.constant 28 : i32
    %188 = tpu.dynamic_rotate %17 by %c28_i32 dim 0 : vector<32x64xf32>, i32 -> vector<32x64xf32>
    %c17 = arith.constant 17 : index
    %c0_115 = arith.constant 0 : index
    %c0_116 = arith.constant 0 : index
    %189 = vector.load %arg4[%c17, %c0_115, %c0_116] : memref<25x32x1xf32, #tpu.memory_space<vmem>>, vector<1x32x1xf32>
    %190 = vector.shape_cast %189 : vector<1x32x1xf32> to vector<32x1xf32>
    %191 = vector.broadcast %190 : vector<32x1xf32> to vector<32x64xf32>
    %192 = arith.mulf %188, %191 : vector<32x64xf32>
    %193 = arith.truncf %192 : vector<32x64xf32> to vector<32x64xbf16>
    %c17_117 = arith.constant 17 : index
    %c0_118 = arith.constant 0 : index
    %c0_119 = arith.constant 0 : index
    %194 = vector.load %arg5[%c17_117, %c0_118, %c0_119] : memref<25x64x192xbf16, #tpu.memory_space<vmem>>, vector<1x64x192xbf16>
    %195 = vector.shape_cast %194 : vector<1x64x192xbf16> to vector<64x192xbf16>
    %cst_120 = arith.constant dense<0.000000e+00> : vector<32x192xf32>
    %196 = tpu.matmul %193, %195, %cst_120 {dimension_numbers = #tpu.dot_dimension_numbers<[1], [0], [0], [1], [0, 0, 1, 1], [], []>} : vector<32x64xbf16>, vector<64x192xbf16>, vector<32x192xf32> -> vector<32x192xf32>
    %197 = arith.addf %187, %196 : vector<32x192xf32>
    %c27_i32 = arith.constant 27 : i32
    %198 = tpu.dynamic_rotate %17 by %c27_i32 dim 0 : vector<32x64xf32>, i32 -> vector<32x64xf32>
    %c18 = arith.constant 18 : index
    %c0_121 = arith.constant 0 : index
    %c0_122 = arith.constant 0 : index
    %199 = vector.load %arg4[%c18, %c0_121, %c0_122] : memref<25x32x1xf32, #tpu.memory_space<vmem>>, vector<1x32x1xf32>
    %200 = vector.shape_cast %199 : vector<1x32x1xf32> to vector<32x1xf32>
    %201 = vector.broadcast %200 : vector<32x1xf32> to vector<32x64xf32>
    %202 = arith.mulf %198, %201 : vector<32x64xf32>
    %203 = arith.truncf %202 : vector<32x64xf32> to vector<32x64xbf16>
    %c18_123 = arith.constant 18 : index
    %c0_124 = arith.constant 0 : index
    %c0_125 = arith.constant 0 : index
    %204 = vector.load %arg5[%c18_123, %c0_124, %c0_125] : memref<25x64x192xbf16, #tpu.memory_space<vmem>>, vector<1x64x192xbf16>
    %205 = vector.shape_cast %204 : vector<1x64x192xbf16> to vector<64x192xbf16>
    %cst_126 = arith.constant dense<0.000000e+00> : vector<32x192xf32>
    %206 = tpu.matmul %203, %205, %cst_126 {dimension_numbers = #tpu.dot_dimension_numbers<[1], [0], [0], [1], [0, 0, 1, 1], [], []>} : vector<32x64xbf16>, vector<64x192xbf16>, vector<32x192xf32> -> vector<32x192xf32>
    %207 = arith.addf %197, %206 : vector<32x192xf32>
    %c26_i32 = arith.constant 26 : i32
    %208 = tpu.dynamic_rotate %17 by %c26_i32 dim 0 : vector<32x64xf32>, i32 -> vector<32x64xf32>
    %c19 = arith.constant 19 : index
    %c0_127 = arith.constant 0 : index
    %c0_128 = arith.constant 0 : index
    %209 = vector.load %arg4[%c19, %c0_127, %c0_128] : memref<25x32x1xf32, #tpu.memory_space<vmem>>, vector<1x32x1xf32>
    %210 = vector.shape_cast %209 : vector<1x32x1xf32> to vector<32x1xf32>
    %211 = vector.broadcast %210 : vector<32x1xf32> to vector<32x64xf32>
    %212 = arith.mulf %208, %211 : vector<32x64xf32>
    %213 = arith.truncf %212 : vector<32x64xf32> to vector<32x64xbf16>
    %c19_129 = arith.constant 19 : index
    %c0_130 = arith.constant 0 : index
    %c0_131 = arith.constant 0 : index
    %214 = vector.load %arg5[%c19_129, %c0_130, %c0_131] : memref<25x64x192xbf16, #tpu.memory_space<vmem>>, vector<1x64x192xbf16>
    %215 = vector.shape_cast %214 : vector<1x64x192xbf16> to vector<64x192xbf16>
    %cst_132 = arith.constant dense<0.000000e+00> : vector<32x192xf32>
    %216 = tpu.matmul %213, %215, %cst_132 {dimension_numbers = #tpu.dot_dimension_numbers<[1], [0], [0], [1], [0, 0, 1, 1], [], []>} : vector<32x64xbf16>, vector<64x192xbf16>, vector<32x192xf32> -> vector<32x192xf32>
    %217 = arith.addf %207, %216 : vector<32x192xf32>
    %c26_i32_133 = arith.constant 26 : i32
    %218 = tpu.dynamic_rotate %17 by %c26_i32_133 dim 0 : vector<32x64xf32>, i32 -> vector<32x64xf32>
    %c20 = arith.constant 20 : index
    %c0_134 = arith.constant 0 : index
    %c0_135 = arith.constant 0 : index
    %219 = vector.load %arg4[%c20, %c0_134, %c0_135] : memref<25x32x1xf32, #tpu.memory_space<vmem>>, vector<1x32x1xf32>
    %220 = vector.shape_cast %219 : vector<1x32x1xf32> to vector<32x1xf32>
    %221 = vector.broadcast %220 : vector<32x1xf32> to vector<32x64xf32>
    %222 = arith.mulf %218, %221 : vector<32x64xf32>
    %223 = arith.truncf %222 : vector<32x64xf32> to vector<32x64xbf16>
    %c20_136 = arith.constant 20 : index
    %c0_137 = arith.constant 0 : index
    %c0_138 = arith.constant 0 : index
    %224 = vector.load %arg5[%c20_136, %c0_137, %c0_138] : memref<25x64x192xbf16, #tpu.memory_space<vmem>>, vector<1x64x192xbf16>
    %225 = vector.shape_cast %224 : vector<1x64x192xbf16> to vector<64x192xbf16>
    %cst_139 = arith.constant dense<0.000000e+00> : vector<32x192xf32>
    %226 = tpu.matmul %223, %225, %cst_139 {dimension_numbers = #tpu.dot_dimension_numbers<[1], [0], [0], [1], [0, 0, 1, 1], [], []>} : vector<32x64xbf16>, vector<64x192xbf16>, vector<32x192xf32> -> vector<32x192xf32>
    %227 = arith.addf %217, %226 : vector<32x192xf32>
    %c25_i32 = arith.constant 25 : i32
    %228 = tpu.dynamic_rotate %17 by %c25_i32 dim 0 : vector<32x64xf32>, i32 -> vector<32x64xf32>
    %c21 = arith.constant 21 : index
    %c0_140 = arith.constant 0 : index
    %c0_141 = arith.constant 0 : index
    %229 = vector.load %arg4[%c21, %c0_140, %c0_141] : memref<25x32x1xf32, #tpu.memory_space<vmem>>, vector<1x32x1xf32>
    %230 = vector.shape_cast %229 : vector<1x32x1xf32> to vector<32x1xf32>
    %231 = vector.broadcast %230 : vector<32x1xf32> to vector<32x64xf32>
    %232 = arith.mulf %228, %231 : vector<32x64xf32>
    %233 = arith.truncf %232 : vector<32x64xf32> to vector<32x64xbf16>
    %c21_142 = arith.constant 21 : index
    %c0_143 = arith.constant 0 : index
    %c0_144 = arith.constant 0 : index
    %234 = vector.load %arg5[%c21_142, %c0_143, %c0_144] : memref<25x64x192xbf16, #tpu.memory_space<vmem>>, vector<1x64x192xbf16>
    %235 = vector.shape_cast %234 : vector<1x64x192xbf16> to vector<64x192xbf16>
    %cst_145 = arith.constant dense<0.000000e+00> : vector<32x192xf32>
    %236 = tpu.matmul %233, %235, %cst_145 {dimension_numbers = #tpu.dot_dimension_numbers<[1], [0], [0], [1], [0, 0, 1, 1], [], []>} : vector<32x64xbf16>, vector<64x192xbf16>, vector<32x192xf32> -> vector<32x192xf32>
    %237 = arith.addf %227, %236 : vector<32x192xf32>
    %c24_i32 = arith.constant 24 : i32
    %238 = tpu.dynamic_rotate %17 by %c24_i32 dim 0 : vector<32x64xf32>, i32 -> vector<32x64xf32>
    %c22 = arith.constant 22 : index
    %c0_146 = arith.constant 0 : index
    %c0_147 = arith.constant 0 : index
    %239 = vector.load %arg4[%c22, %c0_146, %c0_147] : memref<25x32x1xf32, #tpu.memory_space<vmem>>, vector<1x32x1xf32>
    %240 = vector.shape_cast %239 : vector<1x32x1xf32> to vector<32x1xf32>
    %241 = vector.broadcast %240 : vector<32x1xf32> to vector<32x64xf32>
    %242 = arith.mulf %238, %241 : vector<32x64xf32>
    %243 = arith.truncf %242 : vector<32x64xf32> to vector<32x64xbf16>
    %c22_148 = arith.constant 22 : index
    %c0_149 = arith.constant 0 : index
    %c0_150 = arith.constant 0 : index
    %244 = vector.load %arg5[%c22_148, %c0_149, %c0_150] : memref<25x64x192xbf16, #tpu.memory_space<vmem>>, vector<1x64x192xbf16>
    %245 = vector.shape_cast %244 : vector<1x64x192xbf16> to vector<64x192xbf16>
    %cst_151 = arith.constant dense<0.000000e+00> : vector<32x192xf32>
    %246 = tpu.matmul %243, %245, %cst_151 {dimension_numbers = #tpu.dot_dimension_numbers<[1], [0], [0], [1], [0, 0, 1, 1], [], []>} : vector<32x64xbf16>, vector<64x192xbf16>, vector<32x192xf32> -> vector<32x192xf32>
    %247 = arith.addf %237, %246 : vector<32x192xf32>
    %c23_i32 = arith.constant 23 : i32
    %248 = tpu.dynamic_rotate %17 by %c23_i32 dim 0 : vector<32x64xf32>, i32 -> vector<32x64xf32>
    %c23 = arith.constant 23 : index
    %c0_152 = arith.constant 0 : index
    %c0_153 = arith.constant 0 : index
    %249 = vector.load %arg4[%c23, %c0_152, %c0_153] : memref<25x32x1xf32, #tpu.memory_space<vmem>>, vector<1x32x1xf32>
    %250 = vector.shape_cast %249 : vector<1x32x1xf32> to vector<32x1xf32>
    %251 = vector.broadcast %250 : vector<32x1xf32> to vector<32x64xf32>
    %252 = arith.mulf %248, %251 : vector<32x64xf32>
    %253 = arith.truncf %252 : vector<32x64xf32> to vector<32x64xbf16>
    %c23_154 = arith.constant 23 : index
    %c0_155 = arith.constant 0 : index
    %c0_156 = arith.constant 0 : index
    %254 = vector.load %arg5[%c23_154, %c0_155, %c0_156] : memref<25x64x192xbf16, #tpu.memory_space<vmem>>, vector<1x64x192xbf16>
    %255 = vector.shape_cast %254 : vector<1x64x192xbf16> to vector<64x192xbf16>
    %cst_157 = arith.constant dense<0.000000e+00> : vector<32x192xf32>
    %256 = tpu.matmul %253, %255, %cst_157 {dimension_numbers = #tpu.dot_dimension_numbers<[1], [0], [0], [1], [0, 0, 1, 1], [], []>} : vector<32x64xbf16>, vector<64x192xbf16>, vector<32x192xf32> -> vector<32x192xf32>
    %257 = arith.addf %247, %256 : vector<32x192xf32>
    %c22_i32 = arith.constant 22 : i32
    %258 = tpu.dynamic_rotate %17 by %c22_i32 dim 0 : vector<32x64xf32>, i32 -> vector<32x64xf32>
    %c24 = arith.constant 24 : index
    %c0_158 = arith.constant 0 : index
    %c0_159 = arith.constant 0 : index
    %259 = vector.load %arg4[%c24, %c0_158, %c0_159] : memref<25x32x1xf32, #tpu.memory_space<vmem>>, vector<1x32x1xf32>
    %260 = vector.shape_cast %259 : vector<1x32x1xf32> to vector<32x1xf32>
    %261 = vector.broadcast %260 : vector<32x1xf32> to vector<32x64xf32>
    %262 = arith.mulf %258, %261 : vector<32x64xf32>
    %263 = arith.truncf %262 : vector<32x64xf32> to vector<32x64xbf16>
    %c24_160 = arith.constant 24 : index
    %c0_161 = arith.constant 0 : index
    %c0_162 = arith.constant 0 : index
    %264 = vector.load %arg5[%c24_160, %c0_161, %c0_162] : memref<25x64x192xbf16, #tpu.memory_space<vmem>>, vector<1x64x192xbf16>
    %265 = vector.shape_cast %264 : vector<1x64x192xbf16> to vector<64x192xbf16>
    %cst_163 = arith.constant dense<0.000000e+00> : vector<32x192xf32>
    %266 = tpu.matmul %263, %265, %cst_163 {dimension_numbers = #tpu.dot_dimension_numbers<[1], [0], [0], [1], [0, 0, 1, 1], [], []>} : vector<32x64xbf16>, vector<64x192xbf16>, vector<32x192xf32> -> vector<32x192xf32>
    %267 = arith.addf %257, %266 : vector<32x192xf32>
    %c0_164 = arith.constant 0 : index
    %c0_165 = arith.constant 0 : index
    %268 = vector.load %arg6[%c0_164, %c0_165] : memref<1x192xf32, #tpu.memory_space<vmem>>, vector<1x192xf32>
    %269 = vector.broadcast %268 : vector<1x192xf32> to vector<32x192xf32>
    %270 = arith.addf %267, %269 : vector<32x192xf32>
    %cst_166 = arith.constant 0.000000e+00 : f32
    %271 = vector.broadcast %cst_166 : f32 to vector<32x192xf32>
    %272 = arith.maximumf %270, %271 : vector<32x192xf32>
    %c0_167 = arith.constant 0 : index
    %c0_168 = arith.constant 0 : index
    %273 = vector.load %arg7[%c0_167, %c0_168] : memref<8x32xbf16, #tpu.memory_space<vmem>>, vector<8x32xbf16>
    %274 = arith.truncf %272 : vector<32x192xf32> to vector<32x192xbf16>
    %cst_169 = arith.constant dense<0.000000e+00> : vector<8x192xf32>
    %275 = tpu.matmul %273, %274, %cst_169 {dimension_numbers = #tpu.dot_dimension_numbers<[1], [0], [0], [1], [0, 0, 1, 1], [], []>} : vector<8x32xbf16>, vector<32x192xbf16>, vector<8x192xf32> -> vector<8x192xf32>
    %cst_170 = arith.constant 0.000000e+00 : f32
    %276 = vector.broadcast %cst_170 : f32 to vector<8x384xf32>
    %c3_i32_171 = arith.constant 3 : i32
    %277 = tpu.dynamic_rotate %275 by %c3_i32_171 dim 0 : vector<8x192xf32>, i32 -> vector<8x192xf32>
    %c0_172 = arith.constant 0 : index
    %c0_173 = arith.constant 0 : index
    %c0_174 = arith.constant 0 : index
    %278 = vector.load %arg8[%c0_172, %c0_173, %c0_174] : memref<9x8x1xf32, #tpu.memory_space<vmem>>, vector<1x8x1xf32>
    %279 = vector.shape_cast %278 : vector<1x8x1xf32> to vector<8x1xf32>
    %280 = vector.broadcast %279 : vector<8x1xf32> to vector<8x192xf32>
    %281 = arith.mulf %277, %280 : vector<8x192xf32>
    %282 = arith.truncf %281 : vector<8x192xf32> to vector<8x192xbf16>
    %c0_175 = arith.constant 0 : index
    %c0_176 = arith.constant 0 : index
    %c0_177 = arith.constant 0 : index
    %283 = vector.load %arg9[%c0_175, %c0_176, %c0_177] : memref<9x192x384xbf16, #tpu.memory_space<vmem>>, vector<1x192x384xbf16>
    %284 = vector.shape_cast %283 : vector<1x192x384xbf16> to vector<192x384xbf16>
    %cst_178 = arith.constant dense<0.000000e+00> : vector<8x384xf32>
    %285 = tpu.matmul %282, %284, %cst_178 {dimension_numbers = #tpu.dot_dimension_numbers<[1], [0], [0], [1], [0, 0, 1, 1], [], []>} : vector<8x192xbf16>, vector<192x384xbf16>, vector<8x384xf32> -> vector<8x384xf32>
    %286 = arith.addf %276, %285 : vector<8x384xf32>
    %c2_i32_179 = arith.constant 2 : i32
    %287 = tpu.dynamic_rotate %275 by %c2_i32_179 dim 0 : vector<8x192xf32>, i32 -> vector<8x192xf32>
    %c1_180 = arith.constant 1 : index
    %c0_181 = arith.constant 0 : index
    %c0_182 = arith.constant 0 : index
    %288 = vector.load %arg8[%c1_180, %c0_181, %c0_182] : memref<9x8x1xf32, #tpu.memory_space<vmem>>, vector<1x8x1xf32>
    %289 = vector.shape_cast %288 : vector<1x8x1xf32> to vector<8x1xf32>
    %290 = vector.broadcast %289 : vector<8x1xf32> to vector<8x192xf32>
    %291 = arith.mulf %287, %290 : vector<8x192xf32>
    %292 = arith.truncf %291 : vector<8x192xf32> to vector<8x192xbf16>
    %c1_183 = arith.constant 1 : index
    %c0_184 = arith.constant 0 : index
    %c0_185 = arith.constant 0 : index
    %293 = vector.load %arg9[%c1_183, %c0_184, %c0_185] : memref<9x192x384xbf16, #tpu.memory_space<vmem>>, vector<1x192x384xbf16>
    %294 = vector.shape_cast %293 : vector<1x192x384xbf16> to vector<192x384xbf16>
    %cst_186 = arith.constant dense<0.000000e+00> : vector<8x384xf32>
    %295 = tpu.matmul %292, %294, %cst_186 {dimension_numbers = #tpu.dot_dimension_numbers<[1], [0], [0], [1], [0, 0, 1, 1], [], []>} : vector<8x192xbf16>, vector<192x384xbf16>, vector<8x384xf32> -> vector<8x384xf32>
    %296 = arith.addf %286, %295 : vector<8x384xf32>
    %c1_i32_187 = arith.constant 1 : i32
    %297 = tpu.dynamic_rotate %275 by %c1_i32_187 dim 0 : vector<8x192xf32>, i32 -> vector<8x192xf32>
    %c2_188 = arith.constant 2 : index
    %c0_189 = arith.constant 0 : index
    %c0_190 = arith.constant 0 : index
    %298 = vector.load %arg8[%c2_188, %c0_189, %c0_190] : memref<9x8x1xf32, #tpu.memory_space<vmem>>, vector<1x8x1xf32>
    %299 = vector.shape_cast %298 : vector<1x8x1xf32> to vector<8x1xf32>
    %300 = vector.broadcast %299 : vector<8x1xf32> to vector<8x192xf32>
    %301 = arith.mulf %297, %300 : vector<8x192xf32>
    %302 = arith.truncf %301 : vector<8x192xf32> to vector<8x192xbf16>
    %c2_191 = arith.constant 2 : index
    %c0_192 = arith.constant 0 : index
    %c0_193 = arith.constant 0 : index
    %303 = vector.load %arg9[%c2_191, %c0_192, %c0_193] : memref<9x192x384xbf16, #tpu.memory_space<vmem>>, vector<1x192x384xbf16>
    %304 = vector.shape_cast %303 : vector<1x192x384xbf16> to vector<192x384xbf16>
    %cst_194 = arith.constant dense<0.000000e+00> : vector<8x384xf32>
    %305 = tpu.matmul %302, %304, %cst_194 {dimension_numbers = #tpu.dot_dimension_numbers<[1], [0], [0], [1], [0, 0, 1, 1], [], []>} : vector<8x192xbf16>, vector<192x384xbf16>, vector<8x384xf32> -> vector<8x384xf32>
    %306 = arith.addf %296, %305 : vector<8x384xf32>
    %c1_i32_195 = arith.constant 1 : i32
    %307 = tpu.dynamic_rotate %275 by %c1_i32_195 dim 0 : vector<8x192xf32>, i32 -> vector<8x192xf32>
    %c3_196 = arith.constant 3 : index
    %c0_197 = arith.constant 0 : index
    %c0_198 = arith.constant 0 : index
    %308 = vector.load %arg8[%c3_196, %c0_197, %c0_198] : memref<9x8x1xf32, #tpu.memory_space<vmem>>, vector<1x8x1xf32>
    %309 = vector.shape_cast %308 : vector<1x8x1xf32> to vector<8x1xf32>
    %310 = vector.broadcast %309 : vector<8x1xf32> to vector<8x192xf32>
    %311 = arith.mulf %307, %310 : vector<8x192xf32>
    %312 = arith.truncf %311 : vector<8x192xf32> to vector<8x192xbf16>
    %c3_199 = arith.constant 3 : index
    %c0_200 = arith.constant 0 : index
    %c0_201 = arith.constant 0 : index
    %313 = vector.load %arg9[%c3_199, %c0_200, %c0_201] : memref<9x192x384xbf16, #tpu.memory_space<vmem>>, vector<1x192x384xbf16>
    %314 = vector.shape_cast %313 : vector<1x192x384xbf16> to vector<192x384xbf16>
    %cst_202 = arith.constant dense<0.000000e+00> : vector<8x384xf32>
    %315 = tpu.matmul %312, %314, %cst_202 {dimension_numbers = #tpu.dot_dimension_numbers<[1], [0], [0], [1], [0, 0, 1, 1], [], []>} : vector<8x192xbf16>, vector<192x384xbf16>, vector<8x384xf32> -> vector<8x384xf32>
    %316 = arith.addf %306, %315 : vector<8x384xf32>
    %c4_203 = arith.constant 4 : index
    %c0_204 = arith.constant 0 : index
    %c0_205 = arith.constant 0 : index
    %317 = vector.load %arg8[%c4_203, %c0_204, %c0_205] : memref<9x8x1xf32, #tpu.memory_space<vmem>>, vector<1x8x1xf32>
    %318 = vector.shape_cast %317 : vector<1x8x1xf32> to vector<8x1xf32>
    %319 = vector.broadcast %318 : vector<8x1xf32> to vector<8x192xf32>
    %320 = arith.mulf %275, %319 : vector<8x192xf32>
    %321 = arith.truncf %320 : vector<8x192xf32> to vector<8x192xbf16>
    %c4_206 = arith.constant 4 : index
    %c0_207 = arith.constant 0 : index
    %c0_208 = arith.constant 0 : index
    %322 = vector.load %arg9[%c4_206, %c0_207, %c0_208] : memref<9x192x384xbf16, #tpu.memory_space<vmem>>, vector<1x192x384xbf16>
    %323 = vector.shape_cast %322 : vector<1x192x384xbf16> to vector<192x384xbf16>
    %cst_209 = arith.constant dense<0.000000e+00> : vector<8x384xf32>
    %324 = tpu.matmul %321, %323, %cst_209 {dimension_numbers = #tpu.dot_dimension_numbers<[1], [0], [0], [1], [0, 0, 1, 1], [], []>} : vector<8x192xbf16>, vector<192x384xbf16>, vector<8x384xf32> -> vector<8x384xf32>
    %325 = arith.addf %316, %324 : vector<8x384xf32>
    %c7_i32_210 = arith.constant 7 : i32
    %326 = tpu.dynamic_rotate %275 by %c7_i32_210 dim 0 : vector<8x192xf32>, i32 -> vector<8x192xf32>
    %c5_211 = arith.constant 5 : index
    %c0_212 = arith.constant 0 : index
    %c0_213 = arith.constant 0 : index
    %327 = vector.load %arg8[%c5_211, %c0_212, %c0_213] : memref<9x8x1xf32, #tpu.memory_space<vmem>>, vector<1x8x1xf32>
    %328 = vector.shape_cast %327 : vector<1x8x1xf32> to vector<8x1xf32>
    %329 = vector.broadcast %328 : vector<8x1xf32> to vector<8x192xf32>
    %330 = arith.mulf %326, %329 : vector<8x192xf32>
    %331 = arith.truncf %330 : vector<8x192xf32> to vector<8x192xbf16>
    %c5_214 = arith.constant 5 : index
    %c0_215 = arith.constant 0 : index
    %c0_216 = arith.constant 0 : index
    %332 = vector.load %arg9[%c5_214, %c0_215, %c0_216] : memref<9x192x384xbf16, #tpu.memory_space<vmem>>, vector<1x192x384xbf16>
    %333 = vector.shape_cast %332 : vector<1x192x384xbf16> to vector<192x384xbf16>
    %cst_217 = arith.constant dense<0.000000e+00> : vector<8x384xf32>
    %334 = tpu.matmul %331, %333, %cst_217 {dimension_numbers = #tpu.dot_dimension_numbers<[1], [0], [0], [1], [0, 0, 1, 1], [], []>} : vector<8x192xbf16>, vector<192x384xbf16>, vector<8x384xf32> -> vector<8x384xf32>
    %335 = arith.addf %325, %334 : vector<8x384xf32>
    %c7_i32_218 = arith.constant 7 : i32
    %336 = tpu.dynamic_rotate %275 by %c7_i32_218 dim 0 : vector<8x192xf32>, i32 -> vector<8x192xf32>
    %c6_219 = arith.constant 6 : index
    %c0_220 = arith.constant 0 : index
    %c0_221 = arith.constant 0 : index
    %337 = vector.load %arg8[%c6_219, %c0_220, %c0_221] : memref<9x8x1xf32, #tpu.memory_space<vmem>>, vector<1x8x1xf32>
    %338 = vector.shape_cast %337 : vector<1x8x1xf32> to vector<8x1xf32>
    %339 = vector.broadcast %338 : vector<8x1xf32> to vector<8x192xf32>
    %340 = arith.mulf %336, %339 : vector<8x192xf32>
    %341 = arith.truncf %340 : vector<8x192xf32> to vector<8x192xbf16>
    %c6_222 = arith.constant 6 : index
    %c0_223 = arith.constant 0 : index
    %c0_224 = arith.constant 0 : index
    %342 = vector.load %arg9[%c6_222, %c0_223, %c0_224] : memref<9x192x384xbf16, #tpu.memory_space<vmem>>, vector<1x192x384xbf16>
    %343 = vector.shape_cast %342 : vector<1x192x384xbf16> to vector<192x384xbf16>
    %cst_225 = arith.constant dense<0.000000e+00> : vector<8x384xf32>
    %344 = tpu.matmul %341, %343, %cst_225 {dimension_numbers = #tpu.dot_dimension_numbers<[1], [0], [0], [1], [0, 0, 1, 1], [], []>} : vector<8x192xbf16>, vector<192x384xbf16>, vector<8x384xf32> -> vector<8x384xf32>
    %345 = arith.addf %335, %344 : vector<8x384xf32>
    %c6_i32_226 = arith.constant 6 : i32
    %346 = tpu.dynamic_rotate %275 by %c6_i32_226 dim 0 : vector<8x192xf32>, i32 -> vector<8x192xf32>
    %c7_227 = arith.constant 7 : index
    %c0_228 = arith.constant 0 : index
    %c0_229 = arith.constant 0 : index
    %347 = vector.load %arg8[%c7_227, %c0_228, %c0_229] : memref<9x8x1xf32, #tpu.memory_space<vmem>>, vector<1x8x1xf32>
    %348 = vector.shape_cast %347 : vector<1x8x1xf32> to vector<8x1xf32>
    %349 = vector.broadcast %348 : vector<8x1xf32> to vector<8x192xf32>
    %350 = arith.mulf %346, %349 : vector<8x192xf32>
    %351 = arith.truncf %350 : vector<8x192xf32> to vector<8x192xbf16>
    %c7_230 = arith.constant 7 : index
    %c0_231 = arith.constant 0 : index
    %c0_232 = arith.constant 0 : index
    %352 = vector.load %arg9[%c7_230, %c0_231, %c0_232] : memref<9x192x384xbf16, #tpu.memory_space<vmem>>, vector<1x192x384xbf16>
    %353 = vector.shape_cast %352 : vector<1x192x384xbf16> to vector<192x384xbf16>
    %cst_233 = arith.constant dense<0.000000e+00> : vector<8x384xf32>
    %354 = tpu.matmul %351, %353, %cst_233 {dimension_numbers = #tpu.dot_dimension_numbers<[1], [0], [0], [1], [0, 0, 1, 1], [], []>} : vector<8x192xbf16>, vector<192x384xbf16>, vector<8x384xf32> -> vector<8x384xf32>
    %355 = arith.addf %345, %354 : vector<8x384xf32>
    %c5_i32_234 = arith.constant 5 : i32
    %356 = tpu.dynamic_rotate %275 by %c5_i32_234 dim 0 : vector<8x192xf32>, i32 -> vector<8x192xf32>
    %c8_235 = arith.constant 8 : index
    %c0_236 = arith.constant 0 : index
    %c0_237 = arith.constant 0 : index
    %357 = vector.load %arg8[%c8_235, %c0_236, %c0_237] : memref<9x8x1xf32, #tpu.memory_space<vmem>>, vector<1x8x1xf32>
    %358 = vector.shape_cast %357 : vector<1x8x1xf32> to vector<8x1xf32>
    %359 = vector.broadcast %358 : vector<8x1xf32> to vector<8x192xf32>
    %360 = arith.mulf %356, %359 : vector<8x192xf32>
    %361 = arith.truncf %360 : vector<8x192xf32> to vector<8x192xbf16>
    %c8_238 = arith.constant 8 : index
    %c0_239 = arith.constant 0 : index
    %c0_240 = arith.constant 0 : index
    %362 = vector.load %arg9[%c8_238, %c0_239, %c0_240] : memref<9x192x384xbf16, #tpu.memory_space<vmem>>, vector<1x192x384xbf16>
    %363 = vector.shape_cast %362 : vector<1x192x384xbf16> to vector<192x384xbf16>
    %cst_241 = arith.constant dense<0.000000e+00> : vector<8x384xf32>
    %364 = tpu.matmul %361, %363, %cst_241 {dimension_numbers = #tpu.dot_dimension_numbers<[1], [0], [0], [1], [0, 0, 1, 1], [], []>} : vector<8x192xbf16>, vector<192x384xbf16>, vector<8x384xf32> -> vector<8x384xf32>
    %365 = arith.addf %355, %364 : vector<8x384xf32>
    %c0_242 = arith.constant 0 : index
    %c0_243 = arith.constant 0 : index
    %366 = vector.load %arg10[%c0_242, %c0_243] : memref<1x384xf32, #tpu.memory_space<vmem>>, vector<1x384xf32>
    %367 = vector.broadcast %366 : vector<1x384xf32> to vector<8x384xf32>
    %368 = arith.addf %365, %367 : vector<8x384xf32>
    %cst_244 = arith.constant 0.000000e+00 : f32
    %369 = vector.broadcast %cst_244 : f32 to vector<8x384xf32>
    %370 = arith.maximumf %368, %369 : vector<8x384xf32>
    %cst_245 = arith.constant 0.000000e+00 : f32
    %371 = vector.broadcast %cst_245 : f32 to vector<8x256xf32>
    %c3_i32_246 = arith.constant 3 : i32
    %372 = tpu.dynamic_rotate %370 by %c3_i32_246 dim 0 : vector<8x384xf32>, i32 -> vector<8x384xf32>
    %c0_247 = arith.constant 0 : index
    %c0_248 = arith.constant 0 : index
    %c0_249 = arith.constant 0 : index
    %373 = vector.load %arg11[%c0_247, %c0_248, %c0_249] : memref<9x8x1xf32, #tpu.memory_space<vmem>>, vector<1x8x1xf32>
    %374 = vector.shape_cast %373 : vector<1x8x1xf32> to vector<8x1xf32>
    %375 = vector.broadcast %374 : vector<8x1xf32> to vector<8x384xf32>
    %376 = arith.mulf %372, %375 : vector<8x384xf32>
    %377 = arith.truncf %376 : vector<8x384xf32> to vector<8x384xbf16>
    %c0_250 = arith.constant 0 : index
    %c0_251 = arith.constant 0 : index
    %c0_252 = arith.constant 0 : index
    %378 = vector.load %arg12[%c0_250, %c0_251, %c0_252] : memref<9x384x256xbf16, #tpu.memory_space<vmem>>, vector<1x384x256xbf16>
    %379 = vector.shape_cast %378 : vector<1x384x256xbf16> to vector<384x256xbf16>
    %cst_253 = arith.constant dense<0.000000e+00> : vector<8x256xf32>
    %380 = tpu.matmul %377, %379, %cst_253 {dimension_numbers = #tpu.dot_dimension_numbers<[1], [0], [0], [1], [0, 0, 1, 1], [], []>} : vector<8x384xbf16>, vector<384x256xbf16>, vector<8x256xf32> -> vector<8x256xf32>
    %381 = arith.addf %371, %380 : vector<8x256xf32>
    %c2_i32_254 = arith.constant 2 : i32
    %382 = tpu.dynamic_rotate %370 by %c2_i32_254 dim 0 : vector<8x384xf32>, i32 -> vector<8x384xf32>
    %c1_255 = arith.constant 1 : index
    %c0_256 = arith.constant 0 : index
    %c0_257 = arith.constant 0 : index
    %383 = vector.load %arg11[%c1_255, %c0_256, %c0_257] : memref<9x8x1xf32, #tpu.memory_space<vmem>>, vector<1x8x1xf32>
    %384 = vector.shape_cast %383 : vector<1x8x1xf32> to vector<8x1xf32>
    %385 = vector.broadcast %384 : vector<8x1xf32> to vector<8x384xf32>
    %386 = arith.mulf %382, %385 : vector<8x384xf32>
    %387 = arith.truncf %386 : vector<8x384xf32> to vector<8x384xbf16>
    %c1_258 = arith.constant 1 : index
    %c0_259 = arith.constant 0 : index
    %c0_260 = arith.constant 0 : index
    %388 = vector.load %arg12[%c1_258, %c0_259, %c0_260] : memref<9x384x256xbf16, #tpu.memory_space<vmem>>, vector<1x384x256xbf16>
    %389 = vector.shape_cast %388 : vector<1x384x256xbf16> to vector<384x256xbf16>
    %cst_261 = arith.constant dense<0.000000e+00> : vector<8x256xf32>
    %390 = tpu.matmul %387, %389, %cst_261 {dimension_numbers = #tpu.dot_dimension_numbers<[1], [0], [0], [1], [0, 0, 1, 1], [], []>} : vector<8x384xbf16>, vector<384x256xbf16>, vector<8x256xf32> -> vector<8x256xf32>
    %391 = arith.addf %381, %390 : vector<8x256xf32>
    %c1_i32_262 = arith.constant 1 : i32
    %392 = tpu.dynamic_rotate %370 by %c1_i32_262 dim 0 : vector<8x384xf32>, i32 -> vector<8x384xf32>
    %c2_263 = arith.constant 2 : index
    %c0_264 = arith.constant 0 : index
    %c0_265 = arith.constant 0 : index
    %393 = vector.load %arg11[%c2_263, %c0_264, %c0_265] : memref<9x8x1xf32, #tpu.memory_space<vmem>>, vector<1x8x1xf32>
    %394 = vector.shape_cast %393 : vector<1x8x1xf32> to vector<8x1xf32>
    %395 = vector.broadcast %394 : vector<8x1xf32> to vector<8x384xf32>
    %396 = arith.mulf %392, %395 : vector<8x384xf32>
    %397 = arith.truncf %396 : vector<8x384xf32> to vector<8x384xbf16>
    %c2_266 = arith.constant 2 : index
    %c0_267 = arith.constant 0 : index
    %c0_268 = arith.constant 0 : index
    %398 = vector.load %arg12[%c2_266, %c0_267, %c0_268] : memref<9x384x256xbf16, #tpu.memory_space<vmem>>, vector<1x384x256xbf16>
    %399 = vector.shape_cast %398 : vector<1x384x256xbf16> to vector<384x256xbf16>
    %cst_269 = arith.constant dense<0.000000e+00> : vector<8x256xf32>
    %400 = tpu.matmul %397, %399, %cst_269 {dimension_numbers = #tpu.dot_dimension_numbers<[1], [0], [0], [1], [0, 0, 1, 1], [], []>} : vector<8x384xbf16>, vector<384x256xbf16>, vector<8x256xf32> -> vector<8x256xf32>
    %401 = arith.addf %391, %400 : vector<8x256xf32>
    %c1_i32_270 = arith.constant 1 : i32
    %402 = tpu.dynamic_rotate %370 by %c1_i32_270 dim 0 : vector<8x384xf32>, i32 -> vector<8x384xf32>
    %c3_271 = arith.constant 3 : index
    %c0_272 = arith.constant 0 : index
    %c0_273 = arith.constant 0 : index
    %403 = vector.load %arg11[%c3_271, %c0_272, %c0_273] : memref<9x8x1xf32, #tpu.memory_space<vmem>>, vector<1x8x1xf32>
    %404 = vector.shape_cast %403 : vector<1x8x1xf32> to vector<8x1xf32>
    %405 = vector.broadcast %404 : vector<8x1xf32> to vector<8x384xf32>
    %406 = arith.mulf %402, %405 : vector<8x384xf32>
    %407 = arith.truncf %406 : vector<8x384xf32> to vector<8x384xbf16>
    %c3_274 = arith.constant 3 : index
    %c0_275 = arith.constant 0 : index
    %c0_276 = arith.constant 0 : index
    %408 = vector.load %arg12[%c3_274, %c0_275, %c0_276] : memref<9x384x256xbf16, #tpu.memory_space<vmem>>, vector<1x384x256xbf16>
    %409 = vector.shape_cast %408 : vector<1x384x256xbf16> to vector<384x256xbf16>
    %cst_277 = arith.constant dense<0.000000e+00> : vector<8x256xf32>
    %410 = tpu.matmul %407, %409, %cst_277 {dimension_numbers = #tpu.dot_dimension_numbers<[1], [0], [0], [1], [0, 0, 1, 1], [], []>} : vector<8x384xbf16>, vector<384x256xbf16>, vector<8x256xf32> -> vector<8x256xf32>
    %411 = arith.addf %401, %410 : vector<8x256xf32>
    %c4_278 = arith.constant 4 : index
    %c0_279 = arith.constant 0 : index
    %c0_280 = arith.constant 0 : index
    %412 = vector.load %arg11[%c4_278, %c0_279, %c0_280] : memref<9x8x1xf32, #tpu.memory_space<vmem>>, vector<1x8x1xf32>
    %413 = vector.shape_cast %412 : vector<1x8x1xf32> to vector<8x1xf32>
    %414 = vector.broadcast %413 : vector<8x1xf32> to vector<8x384xf32>
    %415 = arith.mulf %370, %414 : vector<8x384xf32>
    %416 = arith.truncf %415 : vector<8x384xf32> to vector<8x384xbf16>
    %c4_281 = arith.constant 4 : index
    %c0_282 = arith.constant 0 : index
    %c0_283 = arith.constant 0 : index
    %417 = vector.load %arg12[%c4_281, %c0_282, %c0_283] : memref<9x384x256xbf16, #tpu.memory_space<vmem>>, vector<1x384x256xbf16>
    %418 = vector.shape_cast %417 : vector<1x384x256xbf16> to vector<384x256xbf16>
    %cst_284 = arith.constant dense<0.000000e+00> : vector<8x256xf32>
    %419 = tpu.matmul %416, %418, %cst_284 {dimension_numbers = #tpu.dot_dimension_numbers<[1], [0], [0], [1], [0, 0, 1, 1], [], []>} : vector<8x384xbf16>, vector<384x256xbf16>, vector<8x256xf32> -> vector<8x256xf32>
    %420 = arith.addf %411, %419 : vector<8x256xf32>
    %c7_i32_285 = arith.constant 7 : i32
    %421 = tpu.dynamic_rotate %370 by %c7_i32_285 dim 0 : vector<8x384xf32>, i32 -> vector<8x384xf32>
    %c5_286 = arith.constant 5 : index
    %c0_287 = arith.constant 0 : index
    %c0_288 = arith.constant 0 : index
    %422 = vector.load %arg11[%c5_286, %c0_287, %c0_288] : memref<9x8x1xf32, #tpu.memory_space<vmem>>, vector<1x8x1xf32>
    %423 = vector.shape_cast %422 : vector<1x8x1xf32> to vector<8x1xf32>
    %424 = vector.broadcast %423 : vector<8x1xf32> to vector<8x384xf32>
    %425 = arith.mulf %421, %424 : vector<8x384xf32>
    %426 = arith.truncf %425 : vector<8x384xf32> to vector<8x384xbf16>
    %c5_289 = arith.constant 5 : index
    %c0_290 = arith.constant 0 : index
    %c0_291 = arith.constant 0 : index
    %427 = vector.load %arg12[%c5_289, %c0_290, %c0_291] : memref<9x384x256xbf16, #tpu.memory_space<vmem>>, vector<1x384x256xbf16>
    %428 = vector.shape_cast %427 : vector<1x384x256xbf16> to vector<384x256xbf16>
    %cst_292 = arith.constant dense<0.000000e+00> : vector<8x256xf32>
    %429 = tpu.matmul %426, %428, %cst_292 {dimension_numbers = #tpu.dot_dimension_numbers<[1], [0], [0], [1], [0, 0, 1, 1], [], []>} : vector<8x384xbf16>, vector<384x256xbf16>, vector<8x256xf32> -> vector<8x256xf32>
    %430 = arith.addf %420, %429 : vector<8x256xf32>
    %c7_i32_293 = arith.constant 7 : i32
    %431 = tpu.dynamic_rotate %370 by %c7_i32_293 dim 0 : vector<8x384xf32>, i32 -> vector<8x384xf32>
    %c6_294 = arith.constant 6 : index
    %c0_295 = arith.constant 0 : index
    %c0_296 = arith.constant 0 : index
    %432 = vector.load %arg11[%c6_294, %c0_295, %c0_296] : memref<9x8x1xf32, #tpu.memory_space<vmem>>, vector<1x8x1xf32>
    %433 = vector.shape_cast %432 : vector<1x8x1xf32> to vector<8x1xf32>
    %434 = vector.broadcast %433 : vector<8x1xf32> to vector<8x384xf32>
    %435 = arith.mulf %431, %434 : vector<8x384xf32>
    %436 = arith.truncf %435 : vector<8x384xf32> to vector<8x384xbf16>
    %c6_297 = arith.constant 6 : index
    %c0_298 = arith.constant 0 : index
    %c0_299 = arith.constant 0 : index
    %437 = vector.load %arg12[%c6_297, %c0_298, %c0_299] : memref<9x384x256xbf16, #tpu.memory_space<vmem>>, vector<1x384x256xbf16>
    %438 = vector.shape_cast %437 : vector<1x384x256xbf16> to vector<384x256xbf16>
    %cst_300 = arith.constant dense<0.000000e+00> : vector<8x256xf32>
    %439 = tpu.matmul %436, %438, %cst_300 {dimension_numbers = #tpu.dot_dimension_numbers<[1], [0], [0], [1], [0, 0, 1, 1], [], []>} : vector<8x384xbf16>, vector<384x256xbf16>, vector<8x256xf32> -> vector<8x256xf32>
    %440 = arith.addf %430, %439 : vector<8x256xf32>
    %c6_i32_301 = arith.constant 6 : i32
    %441 = tpu.dynamic_rotate %370 by %c6_i32_301 dim 0 : vector<8x384xf32>, i32 -> vector<8x384xf32>
    %c7_302 = arith.constant 7 : index
    %c0_303 = arith.constant 0 : index
    %c0_304 = arith.constant 0 : index
    %442 = vector.load %arg11[%c7_302, %c0_303, %c0_304] : memref<9x8x1xf32, #tpu.memory_space<vmem>>, vector<1x8x1xf32>
    %443 = vector.shape_cast %442 : vector<1x8x1xf32> to vector<8x1xf32>
    %444 = vector.broadcast %443 : vector<8x1xf32> to vector<8x384xf32>
    %445 = arith.mulf %441, %444 : vector<8x384xf32>
    %446 = arith.truncf %445 : vector<8x384xf32> to vector<8x384xbf16>
    %c7_305 = arith.constant 7 : index
    %c0_306 = arith.constant 0 : index
    %c0_307 = arith.constant 0 : index
    %447 = vector.load %arg12[%c7_305, %c0_306, %c0_307] : memref<9x384x256xbf16, #tpu.memory_space<vmem>>, vector<1x384x256xbf16>
    %448 = vector.shape_cast %447 : vector<1x384x256xbf16> to vector<384x256xbf16>
    %cst_308 = arith.constant dense<0.000000e+00> : vector<8x256xf32>
    %449 = tpu.matmul %446, %448, %cst_308 {dimension_numbers = #tpu.dot_dimension_numbers<[1], [0], [0], [1], [0, 0, 1, 1], [], []>} : vector<8x384xbf16>, vector<384x256xbf16>, vector<8x256xf32> -> vector<8x256xf32>
    %450 = arith.addf %440, %449 : vector<8x256xf32>
    %c5_i32_309 = arith.constant 5 : i32
    %451 = tpu.dynamic_rotate %370 by %c5_i32_309 dim 0 : vector<8x384xf32>, i32 -> vector<8x384xf32>
    %c8_310 = arith.constant 8 : index
    %c0_311 = arith.constant 0 : index
    %c0_312 = arith.constant 0 : index
    %452 = vector.load %arg11[%c8_310, %c0_311, %c0_312] : memref<9x8x1xf32, #tpu.memory_space<vmem>>, vector<1x8x1xf32>
    %453 = vector.shape_cast %452 : vector<1x8x1xf32> to vector<8x1xf32>
    %454 = vector.broadcast %453 : vector<8x1xf32> to vector<8x384xf32>
    %455 = arith.mulf %451, %454 : vector<8x384xf32>
    %456 = arith.truncf %455 : vector<8x384xf32> to vector<8x384xbf16>
    %c8_313 = arith.constant 8 : index
    %c0_314 = arith.constant 0 : index
    %c0_315 = arith.constant 0 : index
    %457 = vector.load %arg12[%c8_313, %c0_314, %c0_315] : memref<9x384x256xbf16, #tpu.memory_space<vmem>>, vector<1x384x256xbf16>
    %458 = vector.shape_cast %457 : vector<1x384x256xbf16> to vector<384x256xbf16>
    %cst_316 = arith.constant dense<0.000000e+00> : vector<8x256xf32>
    %459 = tpu.matmul %456, %458, %cst_316 {dimension_numbers = #tpu.dot_dimension_numbers<[1], [0], [0], [1], [0, 0, 1, 1], [], []>} : vector<8x384xbf16>, vector<384x256xbf16>, vector<8x256xf32> -> vector<8x256xf32>
    %460 = arith.addf %450, %459 : vector<8x256xf32>
    %c0_317 = arith.constant 0 : index
    %c0_318 = arith.constant 0 : index
    %461 = vector.load %arg13[%c0_317, %c0_318] : memref<1x256xf32, #tpu.memory_space<vmem>>, vector<1x256xf32>
    %462 = vector.broadcast %461 : vector<1x256xf32> to vector<8x256xf32>
    %463 = arith.addf %460, %462 : vector<8x256xf32>
    %cst_319 = arith.constant 0.000000e+00 : f32
    %464 = vector.broadcast %cst_319 : f32 to vector<8x256xf32>
    %465 = arith.maximumf %463, %464 : vector<8x256xf32>
    %cst_320 = arith.constant 0.000000e+00 : f32
    %466 = vector.broadcast %cst_320 : f32 to vector<8x256xf32>
    %c3_i32_321 = arith.constant 3 : i32
    %467 = tpu.dynamic_rotate %465 by %c3_i32_321 dim 0 : vector<8x256xf32>, i32 -> vector<8x256xf32>
    %c0_322 = arith.constant 0 : index
    %c0_323 = arith.constant 0 : index
    %c0_324 = arith.constant 0 : index
    %468 = vector.load %arg14[%c0_322, %c0_323, %c0_324] : memref<9x8x1xf32, #tpu.memory_space<vmem>>, vector<1x8x1xf32>
    %469 = vector.shape_cast %468 : vector<1x8x1xf32> to vector<8x1xf32>
    %470 = vector.broadcast %469 : vector<8x1xf32> to vector<8x256xf32>
    %471 = arith.mulf %467, %470 : vector<8x256xf32>
    %472 = arith.truncf %471 : vector<8x256xf32> to vector<8x256xbf16>
    %c0_325 = arith.constant 0 : index
    %c0_326 = arith.constant 0 : index
    %c0_327 = arith.constant 0 : index
    %473 = vector.load %arg15[%c0_325, %c0_326, %c0_327] : memref<9x256x256xbf16, #tpu.memory_space<vmem>>, vector<1x256x256xbf16>
    %474 = vector.shape_cast %473 : vector<1x256x256xbf16> to vector<256x256xbf16>
    %cst_328 = arith.constant dense<0.000000e+00> : vector<8x256xf32>
    %475 = tpu.matmul %472, %474, %cst_328 {dimension_numbers = #tpu.dot_dimension_numbers<[1], [0], [0], [1], [0, 0, 1, 1], [], []>} : vector<8x256xbf16>, vector<256x256xbf16>, vector<8x256xf32> -> vector<8x256xf32>
    %476 = arith.addf %466, %475 : vector<8x256xf32>
    %c2_i32_329 = arith.constant 2 : i32
    %477 = tpu.dynamic_rotate %465 by %c2_i32_329 dim 0 : vector<8x256xf32>, i32 -> vector<8x256xf32>
    %c1_330 = arith.constant 1 : index
    %c0_331 = arith.constant 0 : index
    %c0_332 = arith.constant 0 : index
    %478 = vector.load %arg14[%c1_330, %c0_331, %c0_332] : memref<9x8x1xf32, #tpu.memory_space<vmem>>, vector<1x8x1xf32>
    %479 = vector.shape_cast %478 : vector<1x8x1xf32> to vector<8x1xf32>
    %480 = vector.broadcast %479 : vector<8x1xf32> to vector<8x256xf32>
    %481 = arith.mulf %477, %480 : vector<8x256xf32>
    %482 = arith.truncf %481 : vector<8x256xf32> to vector<8x256xbf16>
    %c1_333 = arith.constant 1 : index
    %c0_334 = arith.constant 0 : index
    %c0_335 = arith.constant 0 : index
    %483 = vector.load %arg15[%c1_333, %c0_334, %c0_335] : memref<9x256x256xbf16, #tpu.memory_space<vmem>>, vector<1x256x256xbf16>
    %484 = vector.shape_cast %483 : vector<1x256x256xbf16> to vector<256x256xbf16>
    %cst_336 = arith.constant dense<0.000000e+00> : vector<8x256xf32>
    %485 = tpu.matmul %482, %484, %cst_336 {dimension_numbers = #tpu.dot_dimension_numbers<[1], [0], [0], [1], [0, 0, 1, 1], [], []>} : vector<8x256xbf16>, vector<256x256xbf16>, vector<8x256xf32> -> vector<8x256xf32>
    %486 = arith.addf %476, %485 : vector<8x256xf32>
    %c1_i32_337 = arith.constant 1 : i32
    %487 = tpu.dynamic_rotate %465 by %c1_i32_337 dim 0 : vector<8x256xf32>, i32 -> vector<8x256xf32>
    %c2_338 = arith.constant 2 : index
    %c0_339 = arith.constant 0 : index
    %c0_340 = arith.constant 0 : index
    %488 = vector.load %arg14[%c2_338, %c0_339, %c0_340] : memref<9x8x1xf32, #tpu.memory_space<vmem>>, vector<1x8x1xf32>
    %489 = vector.shape_cast %488 : vector<1x8x1xf32> to vector<8x1xf32>
    %490 = vector.broadcast %489 : vector<8x1xf32> to vector<8x256xf32>
    %491 = arith.mulf %487, %490 : vector<8x256xf32>
    %492 = arith.truncf %491 : vector<8x256xf32> to vector<8x256xbf16>
    %c2_341 = arith.constant 2 : index
    %c0_342 = arith.constant 0 : index
    %c0_343 = arith.constant 0 : index
    %493 = vector.load %arg15[%c2_341, %c0_342, %c0_343] : memref<9x256x256xbf16, #tpu.memory_space<vmem>>, vector<1x256x256xbf16>
    %494 = vector.shape_cast %493 : vector<1x256x256xbf16> to vector<256x256xbf16>
    %cst_344 = arith.constant dense<0.000000e+00> : vector<8x256xf32>
    %495 = tpu.matmul %492, %494, %cst_344 {dimension_numbers = #tpu.dot_dimension_numbers<[1], [0], [0], [1], [0, 0, 1, 1], [], []>} : vector<8x256xbf16>, vector<256x256xbf16>, vector<8x256xf32> -> vector<8x256xf32>
    %496 = arith.addf %486, %495 : vector<8x256xf32>
    %c1_i32_345 = arith.constant 1 : i32
    %497 = tpu.dynamic_rotate %465 by %c1_i32_345 dim 0 : vector<8x256xf32>, i32 -> vector<8x256xf32>
    %c3_346 = arith.constant 3 : index
    %c0_347 = arith.constant 0 : index
    %c0_348 = arith.constant 0 : index
    %498 = vector.load %arg14[%c3_346, %c0_347, %c0_348] : memref<9x8x1xf32, #tpu.memory_space<vmem>>, vector<1x8x1xf32>
    %499 = vector.shape_cast %498 : vector<1x8x1xf32> to vector<8x1xf32>
    %500 = vector.broadcast %499 : vector<8x1xf32> to vector<8x256xf32>
    %501 = arith.mulf %497, %500 : vector<8x256xf32>
    %502 = arith.truncf %501 : vector<8x256xf32> to vector<8x256xbf16>
    %c3_349 = arith.constant 3 : index
    %c0_350 = arith.constant 0 : index
    %c0_351 = arith.constant 0 : index
    %503 = vector.load %arg15[%c3_349, %c0_350, %c0_351] : memref<9x256x256xbf16, #tpu.memory_space<vmem>>, vector<1x256x256xbf16>
    %504 = vector.shape_cast %503 : vector<1x256x256xbf16> to vector<256x256xbf16>
    %cst_352 = arith.constant dense<0.000000e+00> : vector<8x256xf32>
    %505 = tpu.matmul %502, %504, %cst_352 {dimension_numbers = #tpu.dot_dimension_numbers<[1], [0], [0], [1], [0, 0, 1, 1], [], []>} : vector<8x256xbf16>, vector<256x256xbf16>, vector<8x256xf32> -> vector<8x256xf32>
    %506 = arith.addf %496, %505 : vector<8x256xf32>
    %c4_353 = arith.constant 4 : index
    %c0_354 = arith.constant 0 : index
    %c0_355 = arith.constant 0 : index
    %507 = vector.load %arg14[%c4_353, %c0_354, %c0_355] : memref<9x8x1xf32, #tpu.memory_space<vmem>>, vector<1x8x1xf32>
    %508 = vector.shape_cast %507 : vector<1x8x1xf32> to vector<8x1xf32>
    %509 = vector.broadcast %508 : vector<8x1xf32> to vector<8x256xf32>
    %510 = arith.mulf %465, %509 : vector<8x256xf32>
    %511 = arith.truncf %510 : vector<8x256xf32> to vector<8x256xbf16>
    %c4_356 = arith.constant 4 : index
    %c0_357 = arith.constant 0 : index
    %c0_358 = arith.constant 0 : index
    %512 = vector.load %arg15[%c4_356, %c0_357, %c0_358] : memref<9x256x256xbf16, #tpu.memory_space<vmem>>, vector<1x256x256xbf16>
    %513 = vector.shape_cast %512 : vector<1x256x256xbf16> to vector<256x256xbf16>
    %cst_359 = arith.constant dense<0.000000e+00> : vector<8x256xf32>
    %514 = tpu.matmul %511, %513, %cst_359 {dimension_numbers = #tpu.dot_dimension_numbers<[1], [0], [0], [1], [0, 0, 1, 1], [], []>} : vector<8x256xbf16>, vector<256x256xbf16>, vector<8x256xf32> -> vector<8x256xf32>
    %515 = arith.addf %506, %514 : vector<8x256xf32>
    %c7_i32_360 = arith.constant 7 : i32
    %516 = tpu.dynamic_rotate %465 by %c7_i32_360 dim 0 : vector<8x256xf32>, i32 -> vector<8x256xf32>
    %c5_361 = arith.constant 5 : index
    %c0_362 = arith.constant 0 : index
    %c0_363 = arith.constant 0 : index
    %517 = vector.load %arg14[%c5_361, %c0_362, %c0_363] : memref<9x8x1xf32, #tpu.memory_space<vmem>>, vector<1x8x1xf32>
    %518 = vector.shape_cast %517 : vector<1x8x1xf32> to vector<8x1xf32>
    %519 = vector.broadcast %518 : vector<8x1xf32> to vector<8x256xf32>
    %520 = arith.mulf %516, %519 : vector<8x256xf32>
    %521 = arith.truncf %520 : vector<8x256xf32> to vector<8x256xbf16>
    %c5_364 = arith.constant 5 : index
    %c0_365 = arith.constant 0 : index
    %c0_366 = arith.constant 0 : index
    %522 = vector.load %arg15[%c5_364, %c0_365, %c0_366] : memref<9x256x256xbf16, #tpu.memory_space<vmem>>, vector<1x256x256xbf16>
    %523 = vector.shape_cast %522 : vector<1x256x256xbf16> to vector<256x256xbf16>
    %cst_367 = arith.constant dense<0.000000e+00> : vector<8x256xf32>
    %524 = tpu.matmul %521, %523, %cst_367 {dimension_numbers = #tpu.dot_dimension_numbers<[1], [0], [0], [1], [0, 0, 1, 1], [], []>} : vector<8x256xbf16>, vector<256x256xbf16>, vector<8x256xf32> -> vector<8x256xf32>
    %525 = arith.addf %515, %524 : vector<8x256xf32>
    %c7_i32_368 = arith.constant 7 : i32
    %526 = tpu.dynamic_rotate %465 by %c7_i32_368 dim 0 : vector<8x256xf32>, i32 -> vector<8x256xf32>
    %c6_369 = arith.constant 6 : index
    %c0_370 = arith.constant 0 : index
    %c0_371 = arith.constant 0 : index
    %527 = vector.load %arg14[%c6_369, %c0_370, %c0_371] : memref<9x8x1xf32, #tpu.memory_space<vmem>>, vector<1x8x1xf32>
    %528 = vector.shape_cast %527 : vector<1x8x1xf32> to vector<8x1xf32>
    %529 = vector.broadcast %528 : vector<8x1xf32> to vector<8x256xf32>
    %530 = arith.mulf %526, %529 : vector<8x256xf32>
    %531 = arith.truncf %530 : vector<8x256xf32> to vector<8x256xbf16>
    %c6_372 = arith.constant 6 : index
    %c0_373 = arith.constant 0 : index
    %c0_374 = arith.constant 0 : index
    %532 = vector.load %arg15[%c6_372, %c0_373, %c0_374] : memref<9x256x256xbf16, #tpu.memory_space<vmem>>, vector<1x256x256xbf16>
    %533 = vector.shape_cast %532 : vector<1x256x256xbf16> to vector<256x256xbf16>
    %cst_375 = arith.constant dense<0.000000e+00> : vector<8x256xf32>
    %534 = tpu.matmul %531, %533, %cst_375 {dimension_numbers = #tpu.dot_dimension_numbers<[1], [0], [0], [1], [0, 0, 1, 1], [], []>} : vector<8x256xbf16>, vector<256x256xbf16>, vector<8x256xf32> -> vector<8x256xf32>
    %535 = arith.addf %525, %534 : vector<8x256xf32>
    %c6_i32_376 = arith.constant 6 : i32
    %536 = tpu.dynamic_rotate %465 by %c6_i32_376 dim 0 : vector<8x256xf32>, i32 -> vector<8x256xf32>
    %c7_377 = arith.constant 7 : index
    %c0_378 = arith.constant 0 : index
    %c0_379 = arith.constant 0 : index
    %537 = vector.load %arg14[%c7_377, %c0_378, %c0_379] : memref<9x8x1xf32, #tpu.memory_space<vmem>>, vector<1x8x1xf32>
    %538 = vector.shape_cast %537 : vector<1x8x1xf32> to vector<8x1xf32>
    %539 = vector.broadcast %538 : vector<8x1xf32> to vector<8x256xf32>
    %540 = arith.mulf %536, %539 : vector<8x256xf32>
    %541 = arith.truncf %540 : vector<8x256xf32> to vector<8x256xbf16>
    %c7_380 = arith.constant 7 : index
    %c0_381 = arith.constant 0 : index
    %c0_382 = arith.constant 0 : index
    %542 = vector.load %arg15[%c7_380, %c0_381, %c0_382] : memref<9x256x256xbf16, #tpu.memory_space<vmem>>, vector<1x256x256xbf16>
    %543 = vector.shape_cast %542 : vector<1x256x256xbf16> to vector<256x256xbf16>
    %cst_383 = arith.constant dense<0.000000e+00> : vector<8x256xf32>
    %544 = tpu.matmul %541, %543, %cst_383 {dimension_numbers = #tpu.dot_dimension_numbers<[1], [0], [0], [1], [0, 0, 1, 1], [], []>} : vector<8x256xbf16>, vector<256x256xbf16>, vector<8x256xf32> -> vector<8x256xf32>
    %545 = arith.addf %535, %544 : vector<8x256xf32>
    %c5_i32_384 = arith.constant 5 : i32
    %546 = tpu.dynamic_rotate %465 by %c5_i32_384 dim 0 : vector<8x256xf32>, i32 -> vector<8x256xf32>
    %c8_385 = arith.constant 8 : index
    %c0_386 = arith.constant 0 : index
    %c0_387 = arith.constant 0 : index
    %547 = vector.load %arg14[%c8_385, %c0_386, %c0_387] : memref<9x8x1xf32, #tpu.memory_space<vmem>>, vector<1x8x1xf32>
    %548 = vector.shape_cast %547 : vector<1x8x1xf32> to vector<8x1xf32>
    %549 = vector.broadcast %548 : vector<8x1xf32> to vector<8x256xf32>
    %550 = arith.mulf %546, %549 : vector<8x256xf32>
    %551 = arith.truncf %550 : vector<8x256xf32> to vector<8x256xbf16>
    %c8_388 = arith.constant 8 : index
    %c0_389 = arith.constant 0 : index
    %c0_390 = arith.constant 0 : index
    %552 = vector.load %arg15[%c8_388, %c0_389, %c0_390] : memref<9x256x256xbf16, #tpu.memory_space<vmem>>, vector<1x256x256xbf16>
    %553 = vector.shape_cast %552 : vector<1x256x256xbf16> to vector<256x256xbf16>
    %cst_391 = arith.constant dense<0.000000e+00> : vector<8x256xf32>
    %554 = tpu.matmul %551, %553, %cst_391 {dimension_numbers = #tpu.dot_dimension_numbers<[1], [0], [0], [1], [0, 0, 1, 1], [], []>} : vector<8x256xbf16>, vector<256x256xbf16>, vector<8x256xf32> -> vector<8x256xf32>
    %555 = arith.addf %545, %554 : vector<8x256xf32>
    %c0_392 = arith.constant 0 : index
    %c0_393 = arith.constant 0 : index
    %556 = vector.load %arg16[%c0_392, %c0_393] : memref<1x256xf32, #tpu.memory_space<vmem>>, vector<1x256xf32>
    %557 = vector.broadcast %556 : vector<1x256xf32> to vector<8x256xf32>
    %558 = arith.addf %555, %557 : vector<8x256xf32>
    %cst_394 = arith.constant 0.000000e+00 : f32
    %559 = vector.broadcast %cst_394 : f32 to vector<8x256xf32>
    %560 = arith.maximumf %558, %559 : vector<8x256xf32>
    %c0_395 = arith.constant 0 : index
    %c0_396 = arith.constant 0 : index
    %561 = vector.load %arg17[%c0_395, %c0_396] : memref<2x8xbf16, #tpu.memory_space<vmem>>, vector<2x8xbf16>
    %562 = arith.truncf %560 : vector<8x256xf32> to vector<8x256xbf16>
    %cst_397 = arith.constant dense<0.000000e+00> : vector<2x256xf32>
    %563 = tpu.matmul %561, %562, %cst_397 {dimension_numbers = #tpu.dot_dimension_numbers<[1], [0], [0], [1], [0, 0, 1, 1], [], []>} : vector<2x8xbf16>, vector<8x256xbf16>, vector<2x256xf32> -> vector<2x256xf32>
    %564 = arith.truncf %563 : vector<2x256xf32> to vector<2x256xbf16>
    %c0_398 = arith.constant 0 : index
    %c0_399 = arith.constant 0 : index
    %565 = vector.load %arg18[%c0_398, %c0_399] : memref<256x128xbf16, #tpu.memory_space<vmem>>, vector<256x128xbf16>
    %cst_400 = arith.constant dense<0.000000e+00> : vector<2x128xf32>
    %566 = tpu.matmul %564, %565, %cst_400 {dimension_numbers = #tpu.dot_dimension_numbers<[1], [0], [0], [1], [0, 0, 1, 1], [], []>} : vector<2x256xbf16>, vector<256x128xbf16>, vector<2x128xf32> -> vector<2x128xf32>
    %c0_401 = arith.constant 0 : index
    %c0_402 = arith.constant 0 : index
    %567 = vector.load %arg19[%c0_401, %c0_402] : memref<1x128xf32, #tpu.memory_space<vmem>>, vector<1x128xf32>
    %568 = vector.broadcast %567 : vector<1x128xf32> to vector<2x128xf32>
    %569 = arith.addf %566, %568 : vector<2x128xf32>
    %c0_403 = arith.constant 0 : index
    %c0_404 = arith.constant 0 : index
    %570 = vector.load %arg20[%c0_403, %c0_404] : memref<2x128xf32, #tpu.memory_space<vmem>>, vector<2x128xf32>
    tpu.vector_store %arg20[%c0_403, %c0_404], %569 {strides = array<i32>} : memref<2x128xf32, #tpu.memory_space<vmem>>, vector<2x128xf32>,
    return
  }
  func.func @transform_0(%arg0: i32) -> (i32, i32, i32) {
    %c0_i32 = arith.constant 0 : i32
    %c0_i32_0 = arith.constant 0 : i32
    %c0_i32_1 = arith.constant 0 : i32
    return %arg0, %c0_i32, %c0_i32_0 : i32, i32, i32
  }
  func.func @transform_1(%arg0: i32) -> (i32, i32) {
    %c0_i32 = arith.constant 0 : i32
    %c0_i32_0 = arith.constant 0 : i32
    %c0_i32_1 = arith.constant 0 : i32
    return %c0_i32, %c0_i32_0 : i32, i32
  }
  func.func @transform_2(%arg0: i32) -> (i32, i32) {
    %c0_i32 = arith.constant 0 : i32
    %c0_i32_0 = arith.constant 0 : i32
    %c0_i32_1 = arith.constant 0 : i32
    return %c0_i32, %c0_i32_0 : i32, i32
  }
  func.func @transform_3(%arg0: i32) -> (i32, i32, i32) {
    %c0_i32 = arith.constant 0 : i32
    %c0_i32_0 = arith.constant 0 : i32
    %c0_i32_1 = arith.constant 0 : i32
    %c0_i32_2 = arith.constant 0 : i32
    return %c0_i32, %c0_i32_0, %c0_i32_1 : i32, i32, i32
  }
  func.func @transform_4(%arg0: i32) -> (i32, i32, i32) {
    %c0_i32 = arith.constant 0 : i32
    %c0_i32_0 = arith.constant 0 : i32
    %c0_i32_1 = arith.constant 0 : i32
    %c0_i32_2 = arith.constant 0 : i32
    return %c0_i32, %c0_i32_0, %c0_i32_1 : i32, i32, i32
  }
  func.func @transform_5(%arg0: i32) -> (i32, i32) {
    %c0_i32 = arith.constant 0 : i32
    %c0_i32_0 = arith.constant 0 : i32
    %c0_i32_1 = arith.constant 0 : i32
    return %c0_i32, %c0_i32_0 : i32, i32
  }
  func.func @transform_6(%arg0: i32) -> (i32, i32) {
    %c0_i32 = arith.constant 0 : i32
    %c0_i32_0 = arith.constant 0 : i32
    %c0_i32_1 = arith.constant 0 : i32
    return %c0_i32, %c0_i32_0 : i32, i32
  }
  func.func @transform_7(%arg0: i32) -> (i32, i32, i32) {
    %c0_i32 = arith.constant 0 : i32
    %c0_i32_0 = arith.constant 0 : i32
    %c0_i32_1 = arith.constant 0 : i32
    %c0_i32_2 = arith.constant 0 : i32
    return %c0_i32, %c0_i32_0, %c0_i32_1 : i32, i32, i32
  }
  func.func @transform_8(%arg0: i32) -> (i32, i32, i32) {
    %c0_i32 = arith.constant 0 : i32
    %c0_i32_0 = arith.constant 0 : i32
    %c0_i32_1 = arith.constant 0 : i32
    %c0_i32_2 = arith.constant 0 : i32
    return %c0_i32, %c0_i32_0, %c0_i32_1 : i32, i32, i32
  }
  func.func @transform_9(%arg0: i32) -> (i32, i32) {
    %c0_i32 = arith.constant 0 : i32
    %c0_i32_0 = arith.constant 0 : i32
    %c0_i32_1 = arith.constant 0 : i32
    return %c0_i32, %c0_i32_0 : i32, i32
  }
  func.func @transform_10(%arg0: i32) -> (i32, i32, i32) {
    %c0_i32 = arith.constant 0 : i32
    %c0_i32_0 = arith.constant 0 : i32
    %c0_i32_1 = arith.constant 0 : i32
    %c0_i32_2 = arith.constant 0 : i32
    return %c0_i32, %c0_i32_0, %c0_i32_1 : i32, i32, i32
  }
  func.func @transform_11(%arg0: i32) -> (i32, i32, i32) {
    %c0_i32 = arith.constant 0 : i32
    %c0_i32_0 = arith.constant 0 : i32
    %c0_i32_1 = arith.constant 0 : i32
    %c0_i32_2 = arith.constant 0 : i32
    return %c0_i32, %c0_i32_0, %c0_i32_1 : i32, i32, i32
  }
  func.func @transform_12(%arg0: i32) -> (i32, i32) {
    %c0_i32 = arith.constant 0 : i32
    %c0_i32_0 = arith.constant 0 : i32
    %c0_i32_1 = arith.constant 0 : i32
    return %c0_i32, %c0_i32_0 : i32, i32
  }
  func.func @transform_13(%arg0: i32) -> (i32, i32, i32) {
    %c0_i32 = arith.constant 0 : i32
    %c0_i32_0 = arith.constant 0 : i32
    %c0_i32_1 = arith.constant 0 : i32
    %c0_i32_2 = arith.constant 0 : i32
    return %c0_i32, %c0_i32_0, %c0_i32_1 : i32, i32, i32
  }
  func.func @transform_14(%arg0: i32) -> (i32, i32, i32) {
    %c0_i32 = arith.constant 0 : i32
    %c0_i32_0 = arith.constant 0 : i32
    %c0_i32_1 = arith.constant 0 : i32
    %c0_i32_2 = arith.constant 0 : i32
    return %c0_i32, %c0_i32_0, %c0_i32_1 : i32, i32, i32
  }
  func.func @transform_15(%arg0: i32) -> (i32, i32) {
    %c0_i32 = arith.constant 0 : i32
    %c0_i32_0 = arith.constant 0 : i32
    %c0_i32_1 = arith.constant 0 : i32
    return %c0_i32, %c0_i32_0 : i32, i32
  }
  func.func @transform_16(%arg0: i32) -> (i32, i32) {
    %c0_i32 = arith.constant 0 : i32
    %c0_i32_0 = arith.constant 0 : i32
    %c0_i32_1 = arith.constant 0 : i32
    return %c0_i32, %c0_i32_0 : i32, i32
  }
  func.func @transform_17(%arg0: i32) -> (i32, i32) {
    %c0_i32 = arith.constant 0 : i32
    %c0_i32_0 = arith.constant 0 : i32
    %c0_i32_1 = arith.constant 0 : i32
    return %c0_i32, %c0_i32_0 : i32, i32
  }
  func.func @transform_18(%arg0: i32) -> (i32, i32) {
    %c0_i32 = arith.constant 0 : i32
    %c0_i32_0 = arith.constant 0 : i32
    %c0_i32_1 = arith.constant 0 : i32
    return %c0_i32, %c0_i32_0 : i32, i32
  }
  func.func @transform_19(%arg0: i32) -> (i32, i32) {
    %c0_i32 = arith.constant 0 : i32
    %c0_i32_0 = arith.constant 0 : i32
    return %arg0, %c0_i32 : i32, i32
  }
}

</mosaic_0001>

<bundles_post_ra>
// kernel: _lambda_.1
= control target key start
LH: loop header
LB: loop body
LE: loop exit
PB: predicated region body
PF: predicated region fallthrough
CT: control target
= control target key end

     0   :  { %s24429_s0 = inlined_call_operand.vmem [shape: bf16[1,128,384], index: 0, kind: input, shape index: {}]   ;;  %s24430_s1 = inlined_call_operand.vmem [shape: bf16[384,64], index: 1, kind: input, shape index: {}]   ;;  %s24431_s2 = inlined_call_operand.vmem [shape: f32[1,64], index: 2, kind: input, shape index: {}]   ;;  %s24432_s3 = inlined_call_operand.vmem [shape: f32[25,32,1], index: 3, kind: input, shape index: {}]   ;;  %s24433_s4 = inlined_call_operand.vmem [shape: bf16[25,64,192], index: 4, kind: input, shape index: {}]   ;;  %s24434_s5 = inlined_call_operand.vmem [shape: f32[1,192], index: 5, kind: input, shape index: {}]   ;;  %s24435_s6 = inlined_call_operand.vmem [shape: bf16[8,32], index: 6, kind: input, shape index: {}]   ;;  %s24436_s7 = inlined_call_operand.vmem [shape: f32[9,8,1], index: 7, kind: input, shape index: {}]   ;;  %s24437_s8 = inlined_call_operand.vmem [shape: bf16[9,192,384], index: 8, kind: input, shape index: {}]   ;;  %s24438_s9 = inlined_call_operand.vmem [shape: f32[1,384], index: 9, kind: input, shape index: {}]   ;;  %s24439_s10 = inlined_call_operand.vmem [shape: f32[9,8,1], index: 10, kind: input, shape index: {}]   ;;  %s24440_s11 = inlined_call_operand.vmem [shape: bf16[9,384,256], index: 11, kind: input, shape index: {}]   ;;  %s24441_s12 = inlined_call_operand.vmem [shape: f32[1,256], index: 12, kind: input, shape index: {}]   ;;  %s24442_s13 = inlined_call_operand.vmem [shape: f32[9,8,1], index: 13, kind: input, shape index: {}]   ;;  %s24443_s14 = inlined_call_operand.vmem [shape: bf16[9,256,256], index: 14, kind: input, shape index: {}]   ;;  %s24444_s15 = inlined_call_operand.vmem [shape: f32[1,256], index: 15, kind: input, shape index: {}]   ;;  %s24445_s16 = inlined_call_operand.vmem [shape: bf16[2,8], index: 16, kind: input, shape index: {}]   ;;  %s24446_s17 = inlined_call_operand.vmem [shape: bf16[256,128], index: 17, kind: input, shape index: {}]   ;;  %s24447_s18 = inlined_call_operand.vmem [shape: f32[1,128], index: 18, kind: input, shape index: {}]   ;;  %s24448_s19 = inlined_call_operand.hbm [shape: f32[2,128], index: 19, kind: output, shape index: {}]  }
   0x1   :  { %24484 = sst [smem:[#allocation82_spill]] %s24429_s0 }
   0x2   :  { %24485 = sst [smem:[#allocation83_spill]] %s24430_s1 }
   0x3   :  { %24486 = sst [smem:[#allocation84_spill]] %s24431_s2 }
   0x4   :  { %24487 = sst [smem:[#allocation85_spill]] %s24432_s3 }
   0x5   :  { %s24488_s20 = sld [smem:[#allocation85_spill]]  ;;  %v24452_v2 = vmov 0   ;;  %vm787_vm2 = vcmask 523264  }
   0x6   :  { %16376 = vset.pattern.permute.xlu1 %v24452_v2  ;;  %16375 = vset.pattern.permute.xlu0 %v24452_v2  ;;  %s24489_s23 = sld [smem:[#allocation83_spill]] }
   0x7   :  { %s24490_s22 = sld [smem:[#allocation82_spill]] }
   0x8   :  { %s24546_s1 = sld [smem:[#allocation84_spill]] }
   0xb   :  { %v13573_v0 = vld [vmem:[%s24488_s20 + $0x30] sm:$0xff]  ;;  %v13571_v1 = vld [vmem:[%s24488_s20 + $0x20] sm:$0xff]  ;;  %v13574_v5 = vld [vmem:[%s24488_s20 + $0x38] sm:$0xff] }
   0xc   :  { %v16377_v3 = vld [vmem:[%s24489_s23 + $0x78] sm:$0xff]   ;;  %724 = vperm.xlu1 %16376, %v13573_v0   ;;  %714 = vperm.xlu0 %16375, %v13571_v1   ;;  %v13572_v6 = vld [vmem:[%s24488_s20 + $0x28] sm:$0xff]  ;;  %v16379_v7 = vld [vmem:[%s24489_s23 + $0x70] sm:$0xff]  }
   0xd   :  { %v16378_v4 = vld [vmem:[%s24489_s23 + $0x38] sm:$0xff]   ;;  %16239 = vmatprep.subr.bf16.mxu0 %v16377_v3  ;;  %v16381_v9 = vld [vmem:[%s24489_s23 + $0x30] sm:$0xff]   ;;  %v661_v10 = vld [vmem:[%s24488_s20 + $0x8] sm:$0xff] }
   0xe   :  { %16240 = vmatpush3.bf16.msra.mxu0 %v16378_v4  ;;  %v16380_v8 = vld [vmem:[%s24489_s23 + $0xb8] sm:$0xff]   ;;  %v660_v11 = vld [vmem:[%s24488_s20] sm:$0xff]  ;;  %v16382_v12 = vld [vmem:[%s24489_s23 + $0x68] sm:$0xff]  }
   0xf   :  { %16241 = vmatprep.subr.bf16.mxu0 %v16379_v7  ;;  %16341 = vmatprep.subr.bf16.mxu1 %v16380_v8  ;;  %v16383_v13 = vld [vmem:[%s24489_s23 + $0xb0] sm:$0xff]   ;;  %v16384_v14 = vld [vmem:[%s24489_s23 + $0x28] sm:$0xff]   ;;  %v13603_v16 = vld [vmem:[%s24488_s20 + $0x40] sm:$0xff] }
  0x10   :  { %729 = vperm.xlu1 %16376, %v13574_v5   ;;  %719 = vperm.xlu0 %16375, %v13572_v6   ;;  %v13604_v15 = vld [vmem:[%s24488_s20 + $0x48] sm:$0xff]  ;;  %v16385_v17 = vld [vmem:[%s24489_s23 + $0x60] sm:$0xff]   ;;  %v663_v20 = vld [vmem:[%s24488_s20 + $0x18] sm:$0xff] }
  0x11   :  { %16342 = vmatpush3.bf16.msra.mxu1 %v16380_v8  ;;  %v16386_v18 = vld [vmem:[%s24489_s23 + $0xa8] sm:$0xff]   ;;  %v16387_v19 = vld [vmem:[%s24489_s23 + $0x20] sm:$0xff]   ;;  %v662_v21 = vld [vmem:[%s24488_s20 + $0x10] sm:$0xff] }
  0x12   :  { %16242 = vmatpush3.bf16.msra.mxu0 %v16381_v9  ;;  %16343 = vmatprep.subr.bf16.mxu1 %v16383_v13  ;;  %v16388_v22 = vld [vmem:[%s24489_s23 + $0x58] sm:$0xff]   ;;  %v16389_v23 = vld [vmem:[%s24489_s23 + $0xa0] sm:$0xff]   ;;  %v13605_v26 = vld [vmem:[%s24488_s20 + $0x50] sm:$0xff] }
  0x13   :  { %16243 = vmatprep.subr.bf16.mxu0 %v16382_v12  ;;  %v16390_v24 = vld [vmem:[%s24489_s23 + $0x18] sm:$0xff]   ;;  %v16391_v27 = vld [vmem:[%s24489_s23 + $0x50] sm:$0xff]   ;;  %v13626_v30 = vld [vmem:[%s24488_s20 + $0x68] sm:$0xff] }
  0x14   :  { %671 = vperm.xlu1 %16376, %v661_v10   ;;  %666 = vperm.xlu0 %16375, %v660_v11   ;;  %v13606_v25 = vld [vmem:[%s24488_s20 + $0x58] sm:$0xff]  ;;  %v16393_v29 = vld [vmem:[%s24489_s23 + $0x10] sm:$0xff]   ;;  %v13625_v31 = vld [vmem:[%s24488_s20 + $0x60] sm:$0xff] }
  0x15   :  { %16344 = vmatpush3.bf16.msra.mxu1 %v16383_v13  ;;  %v16392_v28 = vld [vmem:[%s24489_s23 + $0x98] sm:$0xff]   ;;  %v16394_v32 = vld [vmem:[%s24489_s23 + $0x48] sm:$0xff]   ;;  %v16395_v33 = vld [vmem:[%s24489_s23 + $0x90] sm:$0xff]  }
  0x16   :  { %16244 = vmatpush3.bf16.msra.mxu0 %v16384_v14  ;;  %16345 = vmatprep.subr.bf16.mxu1 %v16386_v18  ;;  %v16396_v34 = vld [vmem:[%s24489_s23 + $0x8] sm:$0xff]   ;;  %v13647_v36 = vld [vmem:[%s24488_s20 + $0x80] sm:$0xff]  ;;  %v13628_v40 = vld [vmem:[%s24488_s20 + $0x78] sm:$0xff] }
  0x17   :  { %16245 = vmatprep.subr.bf16.mxu0 %v16385_v17  ;;  %v13648_v35 = vld [vmem:[%s24488_s20 + $0x88] sm:$0xff]  ;;  %v16397_v37 = vld [vmem:[%s24489_s23 + $0x40] sm:$0xff]   ;;  %v13627_v42 = vld [vmem:[%s24488_s20 + $0x70] sm:$0xff] }
  0x18   :  { %958 = vperm.xlu1 %16376, %v13604_v15   ;;  %953 = vperm.xlu0 %16375, %v13603_v16   ;;  %v16398_v38 = vld [vmem:[%s24489_s23 + $0x88] sm:$0xff]   ;;  %v16399_v39 = vld [vmem:[%s24489_s23] sm:$0xff]   ;;  %v13650_v46 = vld [vmem:[%s24488_s20 + $0x98] sm:$0xff] }
  0x19   :  { %16346 = vmatpush3.bf16.msra.mxu1 %v16386_v18  ;;  %v16402_v41 = vld [vmem:[%s24490_s22 + $0x4] ss:$12 sps:$4 sm:$0xff]   ;;  %v16400_v43 = vld [vmem:[%s24490_s22] ss:$12 sps:$4 sm:$0xff]   ;;  %v16404_v45 = vld [vmem:[%s24490_s22 + $0x8] ss:$12 sps:$4 sm:$0xff]  }
  0x1a   :  { %16246 = vmatpush3.bf16.msra.mxu0 %v16387_v19  ;;  %16347 = vmatprep.subr.bf16.mxu1 %v16389_v23  ;;  %v16403_v44 = vld [vmem:[%s24489_s23 + $0x80] sm:$0xff]   ;;  %v13649_v47 = vld [vmem:[%s24488_s20 + $0x90] sm:$0xff]  ;;  %v16406_v49 = vld [vmem:[%s24490_s22 + $0x1c] ss:$12 sps:$4 sm:$0xff]  }
  0x1b   :  { %16247 = vmatprep.subr.bf16.mxu0 %v16388_v22  ;;  %455 = vmatprep.mubr.bf16.mxu0 %v16402_v41  ;;  %v16405_v48 = vld [vmem:[%s24490_s22 + $0x20] ss:$12 sps:$4 sm:$0xff]   ;;  %v16408_v52 = vld [vmem:[%s24490_s22 + $0x18] ss:$12 sps:$4 sm:$0xff]   ;;  %v16413_v57 = vld [vmem:[%s24490_s22 + $0x50] ss:$12 sps:$4 sm:$0xff]  }
  0x1c   :  { %681 = vperm.xlu1 %16376, %v663_v20   ;;  %676 = vperm.xlu0 %16375, %v662_v21   ;;  %v13670_v50 = vld [vmem:[%s24488_s20 + $0xa8] sm:$0xff]  ;;  %v13669_v51 = vld [vmem:[%s24488_s20 + $0xa0] sm:$0xff]  ;;  %v13672_v58 = vld [vmem:[%s24488_s20 + $0xb8] sm:$0xff] }
  0x1d   :  { %16348 = vmatpush3.bf16.msra.mxu1 %v16389_v23  ;;  %16357 = vmatprep.mubr.bf16.mxu1 %v16404_v45  ;;  %v16409_v53 = vld [vmem:[%s24490_s22 + $0x34] ss:$12 sps:$4 sm:$0xff]   ;;  %v16412_v54 = vld [vmem:[%s24490_s22 + $0x38] ss:$12 sps:$4 sm:$0xff]   ;;  %v13692_v55 = vld [vmem:[%s24488_s20 + $0xc8] sm:$0xff] }
  0x1e   :  { %16248 = vmatpush3.bf16.msra.mxu0 %v16390_v24  ;;  %16349 = vmatprep.subr.bf16.mxu1 %v16392_v28  ;;  %v13691_v56 = vld [vmem:[%s24488_s20 + $0xc0] sm:$0xff]  ;;  %v13671_v59 = vld [vmem:[%s24488_s20 + $0xb0] sm:$0xff]  ;;  %v16414_v62 = vld [vmem:[%s24490_s22 + $0x4c] ss:$12 sps:$4 sm:$0xff]  }
  0x1f   :  { %16249 = vmatprep.subr.bf16.mxu0 %v16391_v27  ;;  %v16411_v60 = vld [vmem:[%s24490_s22 + $0x30] ss:$12 sps:$4 sm:$0xff]   ;;  %v16420_v61 = vld [vmem:[%s24490_s22 + $0x68] ss:$12 sps:$4 sm:$0xff]   ;;  %v16421_v1 = vld [vmem:[%s24490_s22 + $0x80] ss:$12 sps:$4 sm:$0xff]  }
  0x20   :  { %968 = vperm.xlu1 %16376, %v13606_v25   ;;  %963 = vperm.xlu0 %16375, %v13605_v26   ;;  %v13694_v63 = vld [vmem:[%s24488_s20 + $0xd8] sm:$0xff]  ;;  %v13693_v0 = vld [vmem:[%s24488_s20 + $0xd0] sm:$0xff]  ;;  %v13714_v3 = vld [vmem:[%s24488_s20 + $0xe8] sm:$0xff] }
  0x21   :  { %16350 = vmatpush3.bf16.msra.mxu1 %v16392_v28  ;;  %v13713_v4 = vld [vmem:[%s24488_s20 + $0xe0] sm:$0xff]  ;;  %v16416_v6 = vld [vmem:[%s24490_s22 + $0x48] ss:$12 sps:$4 sm:$0xff]   ;;  %v16429_v10 = vld [vmem:[%s24490_s22 + $0xb0] ss:$12 sps:$4 sm:$0xff]  }
  0x22   :  { %16250 = vmatpush3.bf16.msra.mxu0 %v16393_v29  ;;  %16351 = vmatprep.subr.bf16.mxu1 %v16395_v33  ;;  %v16428_v5 = vld [vmem:[%s24490_s22 + $0x98] ss:$12 sps:$4 sm:$0xff]   ;;  %v13736_v8 = vld [vmem:[%s24488_s20 + $0x108] sm:$0xff]  ;;  %v13715_v12 = vld [vmem:[%s24488_s20 + $0xf0] sm:$0xff] }
  0x23   :  { %16251 = vmatprep.subr.bf16.mxu0 %v16394_v32  ;;  %v16417_v7 = vld [vmem:[%s24490_s22 + $0x64] ss:$12 sps:$4 sm:$0xff]   ;;  %v13716_v11 = vld [vmem:[%s24488_s20 + $0xf8] sm:$0xff]  ;;  %v16419_v13 = vld [vmem:[%s24490_s22 + $0x60] ss:$12 sps:$4 sm:$0xff]  }
  0x24   :  { %1114 = vperm.xlu1 %16376, %v13626_v30   ;;  %1109 = vperm.xlu0 %16375, %v13625_v31   ;;  %v13735_v9 = vld [vmem:[%s24488_s20 + $0x100] sm:$0xff]  ;;  %v16422_v14 = vld [vmem:[%s24490_s22 + $0x7c] ss:$12 sps:$4 sm:$0xff]   ;;  %v13737_v16 = vld [vmem:[%s24488_s20 + $0x110] sm:$0xff] }
  0x25   :  { %16352 = vmatpush3.bf16.msra.mxu1 %v16395_v33  ;;  %v13738_v15 = vld [vmem:[%s24488_s20 + $0x118] sm:$0xff]  ;;  %v13758_v17 = vld [vmem:[%s24488_s20 + $0x128] sm:$0xff]  ;;  %v13757_v18 = vld [vmem:[%s24488_s20 + $0x120] sm:$0xff] }
  0x26   :  { %16252 = vmatpush3.bf16.msra.mxu0 %v16396_v34  ;;  %16353 = vmatprep.subr.bf16.mxu1 %v16398_v38  ;;  %v16424_v19 = vld [vmem:[%s24490_s22 + $0x78] ss:$12 sps:$4 sm:$0xff]   ;;  %v16425_v20 = vld [vmem:[%s24490_s22 + $0x94] ss:$12 sps:$4 sm:$0xff]   ;;  %v13780_v21 = vld [vmem:[%s24488_s20 + $0x148] sm:$0xff] }
  0x27   :  { %16253 = vmatprep.subr.bf16.mxu0 %v16397_v37  ;;  %v13779_v22 = vld [vmem:[%s24488_s20 + $0x140] sm:$0xff]  ;;  %v13760_v23 = vld [vmem:[%s24488_s20 + $0x138] sm:$0xff]  ;;  %v13759_v24 = vld [vmem:[%s24488_s20 + $0x130] sm:$0xff] }
  0x28   :  { %1270 = vperm.xlu1 %16376, %v13648_v35   ;;  %1265 = vperm.xlu0 %16375, %v13647_v36   ;;  %v16427_v25 = vld [vmem:[%s24490_s22 + $0x90] ss:$12 sps:$4 sm:$0xff]   ;;  %v16430_v26 = vld [vmem:[%s24490_s22 + $0xac] ss:$12 sps:$4 sm:$0xff]   ;;  %v13801_v30 = vld [vmem:[%s24488_s20 + $0x160] sm:$0xff] }
  0x29   :  { %16354 = vmatpush3.bf16.msra.mxu1 %v16398_v38  ;;  %v13782_v27 = vld [vmem:[%s24488_s20 + $0x158] sm:$0xff]  ;;  %v13781_v28 = vld [vmem:[%s24488_s20 + $0x150] sm:$0xff]  ;;  %v13802_v29 = vld [vmem:[%s24488_s20 + $0x168] sm:$0xff] }
  0x2a   :  { %16254 = vmatpush3.bf16.msra.mxu0 %v16399_v39  ;;  %16355 = vmatprep.subr.bf16.mxu1 %v16403_v44  ;;  %v16432_v31 = vld [vmem:[%s24490_s22 + $0xa8] ss:$12 sps:$4 sm:$0xff]   ;;  %v13823_v33 = vld [vmem:[%s24488_s20 + $0x180] sm:$0xff]  ;;  %v13804_v34 = vld [vmem:[%s24488_s20 + $0x178] sm:$0xff] }
  0x2b   :  { %v13824_v32 = vld [vmem:[%s24488_s20 + $0x188] sm:$0xff]  ;;  %v13803_v35 = vld [vmem:[%s24488_s20 + $0x170] sm:$0xff]  ;;  %v13826_v36 = vld [vmem:[%s24488_s20 + $0x198] sm:$0xff] }
  0x2c   :  { %1124 = vperm.xlu1 %16376, %v13628_v40   ;;  %1119 = vperm.xlu0 %16375, %v13627_v42   ;;  %v13825_v37 = vld [vmem:[%s24488_s20 + $0x190] sm:$0xff]  ;;  %v13846_v38 = vld [vmem:[%s24488_s20 + $0x1a8] sm:$0xff]  ;;  %v13845_v39 = vld [vmem:[%s24488_s20 + $0x1a0] sm:$0xff] }
  0x2d   :  { %456 = vmatmul.mubr.bf16.vlgmr.msra.gmra.mxu0 %v16400_v43  ;;  %16356 = vmatpush3.bf16.msra.mxu1 %v16403_v44  ;;  %v13868_v40 = vld [vmem:[%s24488_s20 + $0x1c8] sm:$0xff]  ;;  %v13867_v41 = vld [vmem:[%s24488_s20 + $0x1c0] sm:$0xff]  ;;  %v13848_v42 = vld [vmem:[%s24488_s20 + $0x1b8] sm:$0xff] }
  0x2e   :  { %463 = vmatprep.mubr.bf16.mxu0 %v16406_v49  ;;  %v13847_v43 = vld [vmem:[%s24488_s20 + $0x1b0] sm:$0xff]  ;;  %v13870_v44 = vld [vmem:[%s24488_s20 + $0x1d8] sm:$0xff]  ;;  %v13911_v49 = vld [vmem:[%s24488_s20 + $0x200] sm:$0xff] }
  0x2f   :  { %v13869_v45 = vld [vmem:[%s24488_s20 + $0x1d0] sm:$0xff] }
  0x30   :  { %1280 = vperm.xlu1 %16376, %v13650_v46   ;;  %1275 = vperm.xlu0 %16375, %v13649_v47   ;;  %v13890_v46 = vld [vmem:[%s24488_s20 + $0x1e8] sm:$0xff]  ;;  %v13889_v47 = vld [vmem:[%s24488_s20 + $0x1e0] sm:$0xff] }
  0x31   :  { %16358 = vmatmul.mubr.bf16.vlgmr.msra.gmra.mxu1 %v16405_v48  ;;  %v13912_v48 = vld [vmem:[%s24488_s20 + $0x208] sm:$0xff] }
  0x32   :  { %16361 = vmatprep.mubr.bf16.mxu1 %v16412_v54 }
  0x34   :  { %1417 = vperm.xlu1 %16376, %v13670_v50   ;;  %1412 = vperm.xlu0 %16375, %v13669_v51  }
  0x35   :  { %464 = vmatmul.mubr.bf16.gmra.mxu0 %v16408_v52  ;;  %v13892_v52 = vld [vmem:[%s24488_s20 + $0x1f8] sm:$0xff] }
  0x36   :  { %471 = vmatprep.mubr.bf16.mxu0 %v16409_v53  ;;  %v13891_v53 = vld [vmem:[%s24488_s20 + $0x1f0] sm:$0xff] }
  0x38   :  { %1573 = vperm.xlu1 %16376, %v13692_v55   ;;  %1568 = vperm.xlu0 %16375, %v13691_v56   ;;  %v13914_v56 = vld [vmem:[%s24488_s20 + $0x218] sm:$0xff] }
  0x39   :  { %16362 = vmatmul.mubr.bf16.gmra.mxu1 %v16413_v57  ;;  %v13913_v57 = vld [vmem:[%s24488_s20 + $0x210] sm:$0xff] }
  0x3a   :  { %16365 = vmatprep.mubr.bf16.mxu1 %v16420_v61  ;;  %v13933_v61 = vld [vmem:[%s24488_s20 + $0x220] sm:$0xff] }
  0x3c   :  { %1427 = vperm.xlu1 %16376, %v13672_v58   ;;  %1422 = vperm.xlu0 %16375, %v13671_v59  }
  0x3d   :  { %472 = vmatmul.mubr.bf16.gmra.mxu0 %v16411_v60  ;;  %v13934_v60 = vld [vmem:[%s24488_s20 + $0x228] sm:$0xff] }
  0x3e   :  { %479 = vmatprep.mubr.bf16.mxu0 %v16414_v62 }
  0x40   :  { %1583 = vperm.xlu1 %16376, %v13694_v63   ;;  %1578 = vperm.xlu0 %16375, %v13693_v0   ;;  %v13956_v0 = vld [vmem:[%s24488_s20 + $0x248] sm:$0xff] }
  0x41   :  { %16366 = vmatmul.mubr.bf16.gmra.mxu1 %v16421_v1  ;;  %v13955_v1 = vld [vmem:[%s24488_s20 + $0x240] sm:$0xff] }
  0x42   :  { %16369 = vmatprep.mubr.bf16.mxu1 %v16428_v5  ;;  %v13936_v5 = vld [vmem:[%s24488_s20 + $0x238] sm:$0xff] }
  0x44   :  { %1729 = vperm.xlu1 %16376, %v13714_v3   ;;  %1724 = vperm.xlu0 %16375, %v13713_v4  }
  0x45   :  { %480 = vmatmul.mubr.bf16.gmra.mxu0 %v16416_v6  ;;  %v13935_v6 = vld [vmem:[%s24488_s20 + $0x230] sm:$0xff] }
  0x46   :  { %487 = vmatprep.mubr.bf16.mxu0 %v16417_v7 }
  0x48   :  { %1885 = vperm.xlu1 %16376, %v13736_v8   ;;  %1880 = vperm.xlu0 %16375, %v13735_v9   ;;  %v13958_v9 = vld [vmem:[%s24488_s20 + $0x258] sm:$0xff] }
  0x49   :  { %16370 = vmatmul.mubr.bf16.gmra.mxu1 %v16429_v10  ;;  %v13957_v10 = vld [vmem:[%s24488_s20 + $0x250] sm:$0xff] }
  0x4a   :  { %826 = vmatprep.mubr.bf16.mxu1 %v24452_v2 }
  0x4c   :  { %1739 = vperm.xlu1 %16376, %v13716_v11   ;;  %1734 = vperm.xlu0 %16375, %v13715_v12  }
  0x4d   :  { %488 = vmatmul.mubr.bf16.gmra.mxu0 %v16419_v13  ;;  %v13978_v13 = vld [vmem:[%s24488_s20 + $0x268] sm:$0xff] }
  0x4e   :  { %495 = vmatprep.mubr.bf16.mxu0 %v16422_v14  ;;  %v13977_v14 = vld [vmem:[%s24488_s20 + $0x260] sm:$0xff] }
  0x50   :  { %1895 = vperm.xlu1 %16376, %v13738_v15   ;;  %1890 = vperm.xlu0 %16375, %v13737_v16   ;;  %v16433_v15 = vld [vmem:[%s24433_s4 + $0xb0] ss:$8 sps:$4 sm:$0xff]   ;;  %v16435_v16 = vld [vmem:[%s24433_s4 + $0xb4] ss:$8 sps:$4 sm:$0xff]  }
  0x51   :  { %1040 = vmatprep.subr.bf16.mxu0 %v16435_v16 }
  0x52   :  { %1041 = vmatpush1.bf16.msra.mxu0 %v16433_v15  ;;  %v14065_v15 = vld [vmem:[%s24488_s20 + $0x2e0] sm:$0xff] }
  0x54   :  { %2032 = vperm.xlu1 %16376, %v13758_v17   ;;  %2027 = vperm.xlu0 %16375, %v13757_v18  }
  0x55   :  { %496 = vmatmul.mubr.bf16.gmra.mxu0 %v16424_v19  ;;  %v14000_v19 = vld [vmem:[%s24488_s20 + $0x288] sm:$0xff] }
  0x56   :  { %503 = vmatprep.mubr.bf16.mxu0 %v16425_v20  ;;  %v13999_v20 = vld [vmem:[%s24488_s20 + $0x280] sm:$0xff] }
  0x58   :  { %2179 = vperm.xlu1 %16376, %v13780_v21   ;;  %2174 = vperm.xlu0 %16375, %v13779_v22  }
  0x5c   :  { %2042 = vperm.xlu1 %16376, %v13760_v23   ;;  %2037 = vperm.xlu0 %16375, %v13759_v24   ;;  %v13980_v23 = vld [vmem:[%s24488_s20 + $0x278] sm:$0xff]  ;;  %v13979_v24 = vld [vmem:[%s24488_s20 + $0x270] sm:$0xff] }
  0x5d   :  { %504 = vmatmul.mubr.bf16.gmra.mxu0 %v16427_v25 }
  0x5e   :  { %511 = vmatprep.mubr.bf16.mxu0 %v16430_v26 }
  0x60   :  { %2189 = vperm.xlu1 %16376, %v13782_v27   ;;  %2184 = vperm.xlu0 %16375, %v13781_v28   ;;  %v14002_v27 = vld [vmem:[%s24488_s20 + $0x298] sm:$0xff]  ;;  %v14001_v28 = vld [vmem:[%s24488_s20 + $0x290] sm:$0xff] }
  0x64   :  { %2326 = vperm.xlu1 %16376, %v13802_v29   ;;  %2321 = vperm.xlu0 %16375, %v13801_v30   ;;  %v16438_v29 = vld [vmem:[%s24433_s4 + $0x74] ss:$8 sps:$4 sm:$0xff]  }
  0x65   :  { %512 = vmatmul.mubr.bf16.gmra.mxu0 %v16432_v31  ;;  %802 = vmatprep.subr.bf16.mxu1 %v16438_v29  ;;  %v14067_v29 = vld [vmem:[%s24488_s20 + $0x2f0] sm:$0xff] }
  0x66   :  { %1064 = vmatprep.mubr.bf16.mxu0 %v24452_v2 }
  0x68   :  { %2473 = vperm.xlu1 %16376, %v13824_v32   ;;  %2468 = vperm.xlu0 %16375, %v13823_v33   ;;  %v14022_v32 = vld [vmem:[%s24488_s20 + $0x2a8] sm:$0xff]  ;;  %v14021_v33 = vld [vmem:[%s24488_s20 + $0x2a0] sm:$0xff] }
  0x6c   :  { %2336 = vperm.xlu1 %16376, %v13804_v34   ;;  %2331 = vperm.xlu0 %16375, %v13803_v35   ;;  %v16436_v34 = vld [vmem:[%s24433_s4 + $0x70] ss:$8 sps:$4 sm:$0xff]   ;;  %v16441_v35 = vld [vmem:[%s24433_s4 + $0xa4] ss:$8 sps:$4 sm:$0xff]  }
  0x6d   :  { %1042 = vmatprep.subr.bf16.mxu0 %v16441_v35  ;;  %803 = vmatpush1.bf16.msra.mxu1 %v16436_v34  ;;  %v14090_v34 = vld [vmem:[%s24488_s20 + $0x318] sm:$0xff]  ;;  %v14089_v35 = vld [vmem:[%s24488_s20 + $0x310] sm:$0xff] }
  0x70   :  { %2483 = vperm.xlu1 %16376, %v13826_v36   ;;  %2478 = vperm.xlu0 %16375, %v13825_v37   ;;  %v16439_v36 = vld [vmem:[%s24433_s4 + $0xa0] ss:$8 sps:$4 sm:$0xff]   ;;  %v16444_v37 = vld [vmem:[%s24433_s4 + $0x64] ss:$8 sps:$4 sm:$0xff]  }
  0x71   :  { %1043 = vmatpush1.bf16.msra.mxu0 %v16439_v36  ;;  %804 = vmatprep.subr.bf16.mxu1 %v16444_v37 }
  0x74   :  { %2620 = vperm.xlu1 %16376, %v13846_v38   ;;  %2615 = vperm.xlu0 %16375, %v13845_v39  }
  0x78   :  { %2767 = vperm.xlu1 %16376, %v13868_v40   ;;  %2762 = vperm.xlu0 %16375, %v13867_v41   ;;  %v14044_v40 = vld [vmem:[%s24488_s20 + $0x2c8] sm:$0xff]  ;;  %v14043_v41 = vld [vmem:[%s24488_s20 + $0x2c0] sm:$0xff] }
  0x7c   :  { %2630 = vperm.xlu1 %16376, %v13848_v42   ;;  %2625 = vperm.xlu0 %16375, %v13847_v43   ;;  %v16442_v42 = vld [vmem:[%s24433_s4 + $0x60] ss:$8 sps:$4 sm:$0xff]   ;;  %v16447_v43 = vld [vmem:[%s24433_s4 + $0x94] ss:$8 sps:$4 sm:$0xff]  }
  0x7d   :  { %1044 = vmatprep.subr.bf16.mxu0 %v16447_v43  ;;  %805 = vmatpush1.bf16.msra.mxu1 %v16442_v42 }
  0x80   :  { %2777 = vperm.xlu1 %16376, %v13870_v44   ;;  %2772 = vperm.xlu0 %16375, %v13869_v45   ;;  %v16445_v44 = vld [vmem:[%s24433_s4 + $0x90] ss:$8 sps:$4 sm:$0xff]  }
  0x81   :  { %1045 = vmatpush1.bf16.msra.mxu0 %v16445_v44  ;;  %v14322_v44 = vld [vmem:[%s24436_s7 + $0x18] sm:$0xff] }
  0x84   :  { %2914 = vperm.xlu1 %16376, %v13890_v46   ;;  %2909 = vperm.xlu0 %16375, %v13889_v47   ;;  %v14024_v47 = vld [vmem:[%s24488_s20 + $0x2b8] sm:$0xff] }
  0x87   :  { %v18725_v50 = vpop.permute.xlu1 %724  ;;  %v18727_v51 = vpop.permute.xlu0 %714 }
  0x88   :  { %3061 = vperm.xlu1 %16376, %v13912_v48   ;;  %3056 = vperm.xlu0 %16375, %v13911_v49   ;;  %v14023_v48 = vld [vmem:[%s24488_s20 + $0x2b0] sm:$0xff] }
  0x89   :  { %v16450_v49 = vld [vmem:[%s24433_s4 + $0x54] ss:$8 sps:$4 sm:$0xff]  }
  0x8a   :  { %806 = vmatprep.subr.bf16.mxu1 %v16450_v49 }
  0x8b   :  { %v18735_v54 = vpop.permute.xlu1 %729  ;;  %v18737_v55 = vpop.permute.xlu0 %719 }
  0x8c   :  { %2924 = vperm.xlu1 %16376, %v13892_v52   ;;  %2919 = vperm.xlu0 %16375, %v13891_v53   ;;  %v16448_v52 = vld [vmem:[%s24433_s4 + $0x50] ss:$8 sps:$4 sm:$0xff]   ;;  %v16453_v53 = vld [vmem:[%s24433_s4 + $0x84] ss:$8 sps:$4 sm:$0xff]  }
  0x8d   :  { %807 = vmatpush1.bf16.msra.mxu1 %v16448_v52  ;;  %1046 = vmatprep.subr.bf16.mxu0 %v16453_v53  ;;  %v14496_v52 = vld [vmem:[%s24436_s7 + $0x28] sm:$0xff]  ;;  %v14409_v53 = vld [vmem:[%s24436_s7 + $0x20] sm:$0xff] }
  0x8f   :  { %v18745_v58 = vpop.permute.xlu1 %671  ;;  %v18747_v59 = vpop.permute.xlu0 %666 }
  0x90   :  { %24491 = vst [vmem:[#allocation5_spill] sm:$0xff] %v18745_v58  ;;  %24492 = vst [vmem:[#allocation6_spill] sm:$0xff] %v18747_v59  ;;  %3071 = vperm.xlu1 %16376, %v13914_v56   ;;  %3066 = vperm.xlu0 %16375, %v13913_v57   ;;  %v16451_v56 = vld [vmem:[%s24433_s4 + $0x80] ss:$8 sps:$4 sm:$0xff]  }
  0x91   :  { %1047 = vmatpush1.bf16.msra.mxu0 %v16451_v56 }
  0x93   :  { %v18755_v62 = vpop.permute.xlu1 %958  ;;  %v18757_v63 = vpop.permute.xlu0 %953 }
  0x94   :  { %3208 = vperm.xlu1 %16376, %v13934_v60   ;;  %3203 = vperm.xlu0 %16375, %v13933_v61   ;;  %v14046_v61 = vld [vmem:[%s24488_s20 + $0x2d8] sm:$0xff] }
  0x97   :  { %v18765_v3 = vpop.permute.xlu1 %681  ;;  %v18767_v4 = vpop.permute.xlu0 %676 }
  0x98   :  { %24493 = vst [vmem:[#allocation7_spill] sm:$0xff] %v18765_v3  ;;  %24494 = vst [vmem:[#allocation8_spill] sm:$0xff] %v18767_v4  ;;  %3355 = vperm.xlu1 %16376, %v13956_v0   ;;  %3350 = vperm.xlu0 %16375, %v13955_v1   ;;  %v16456_v0 = vld [vmem:[%s24433_s4 + $0x44] ss:$8 sps:$4 sm:$0xff]   ;;  %v16454_v1 = vld [vmem:[%s24433_s4 + $0x40] ss:$8 sps:$4 sm:$0xff]  }
  0x99   :  { %808 = vmatprep.subr.bf16.mxu1 %v16456_v0  ;;  %v14670_v0 = vld [vmem:[%s24436_s7 + $0x38] sm:$0xff] }
  0x9a   :  { %809 = vmatpush1.bf16.msra.mxu1 %v16454_v1  ;;  %v14583_v1 = vld [vmem:[%s24436_s7 + $0x30] sm:$0xff] }
  0x9b   :  { %v18775_v7 = vpop.permute.xlu1 %968  ;;  %v18777_v8 = vpop.permute.xlu0 %963 }
  0x9c   :  { %3218 = vperm.xlu1 %16376, %v13936_v5   ;;  %3213 = vperm.xlu0 %16375, %v13935_v6   ;;  %v16459_v5 = vld [vmem:[%s24433_s4 + $0x134] ss:$8 sps:$4 sm:$0xff]  }
  0x9d   :  { %v14045_v6 = vld [vmem:[%s24488_s20 + $0x2d0] sm:$0xff]  ;;  %1352 = vmatprep.subr.bf16.mxu0 %v16459_v5 }
  0x9f   :  { %v18785_v11 = vpop.permute.xlu1 %1114  ;;  %v18787_v12 = vpop.permute.xlu0 %1109 }
  0xa0   :  { %24495 = vst [vmem:[#allocation9_spill] sm:$0xff] %v18785_v11  ;;  %24496 = vst [vmem:[#allocation10_spill] sm:$0xff] %v18787_v12  ;;  %3365 = vperm.xlu1 %16376, %v13958_v9   ;;  %3360 = vperm.xlu0 %16375, %v13957_v10  }
  0xa3   :  { %v18801_v17 = vpop.permute.xlu1 %1270  ;;  %v18803_v18 = vpop.permute.xlu0 %1265 }
  0xa4   :  { %24497 = vst [vmem:[#allocation11_spill] sm:$0xff] %v18801_v17  ;;  %24498 = vst [vmem:[#allocation12_spill] sm:$0xff] %v18803_v18  ;;  %3502 = vperm.xlu1 %16376, %v13978_v13   ;;  %3497 = vperm.xlu0 %16375, %v13977_v14   ;;  %v16462_v13 = vld [vmem:[%s24433_s4 + $0x34] ss:$8 sps:$4 sm:$0xff]   ;;  %v14066_v14 = vld [vmem:[%s24488_s20 + $0x2e8] sm:$0xff] }
  0xa5   :  { %901 = vmatprep.subr.bf16.mxu1 %v16462_v13  ;;  %v14844_v13 = vld [vmem:[%s24439_s10 + $0x8] sm:$0xff] }
  0xa7   :  { %v18811_v21 = vpop.permute.xlu1 %1124  ;;  %v18813_v22 = vpop.permute.xlu0 %1119 }
  0xa8   :  { %24499 = vst [vmem:[#allocation13_spill] sm:$0xff] %v18811_v21  ;;  %24500 = vst [vmem:[#allocation14_spill] sm:$0xff] %v18813_v22  ;;  %3649 = vperm.xlu1 %16376, %v14000_v19   ;;  %3644 = vperm.xlu0 %16375, %v13999_v20   ;;  %v14088_v20 = vld [vmem:[%s24488_s20 + $0x308] sm:$0xff] }
  0xab   :  { %v18821_v25 = vpop.permute.xlu1 %1280  ;;  %v18823_v26 = vpop.permute.xlu0 %1275 }
  0xac   :  { %24501 = vst [vmem:[#allocation15_spill] sm:$0xff] %v18821_v25  ;;  %24502 = vst [vmem:[#allocation16_spill] sm:$0xff] %v18823_v26  ;;  %3512 = vperm.xlu1 %16376, %v13980_v23   ;;  %3507 = vperm.xlu0 %16375, %v13979_v24   ;;  %v14087_v23 = vld [vmem:[%s24488_s20 + $0x300] sm:$0xff] }
  0xaf   :  { %v18834_v30 = vpop.permute.xlu1 %1417  ;;  %v18836_v31 = vpop.permute.xlu0 %1412 }
  0xb0   :  { %24503 = vst [vmem:[#allocation17_spill] sm:$0xff] %v18834_v30  ;;  %24504 = vst [vmem:[#allocation18_spill] sm:$0xff] %v18836_v31  ;;  %3659 = vperm.xlu1 %16376, %v14002_v27   ;;  %3654 = vperm.xlu0 %16375, %v14001_v28   ;;  %v14068_v28 = vld [vmem:[%s24488_s20 + $0x2f8] sm:$0xff] }
  0xb3   :  { %v18856_v38 = vpop.permute.xlu1 %1573  ;;  %v18858_v39 = vpop.permute.xlu0 %1568 }
  0xb4   :  { %24505 = vst [vmem:[#allocation19_spill] sm:$0xff] %v18856_v38  ;;  %24506 = vst [vmem:[#allocation20_spill] sm:$0xff] %v18858_v39  ;;  %3796 = vperm.xlu1 %16376, %v14022_v32   ;;  %3791 = vperm.xlu0 %16375, %v14021_v33  }
  0xb7   :  { %v18875_v45 = vpop.permute.xlu1 %1427  ;;  %v18877_v46 = vpop.permute.xlu0 %1422 }
  0xb8   :  { %24507 = vst [vmem:[#allocation21_spill] sm:$0xff] %v18875_v45  ;;  %24508 = vst [vmem:[#allocation22_spill] sm:$0xff] %v18877_v46  ;;  %3943 = vperm.xlu1 %16376, %v14044_v40   ;;  %3938 = vperm.xlu0 %16375, %v14043_v41   ;;  %v4452_v40 = vld [vmem:[%s24436_s7] sm:$0xff]  ;;  %v14110_v41 = vld [vmem:[%s24436_s7 + $0x8] sm:$0xff] }
  0xbb   :  { %v18897_v57 = vpop.permute.xlu1 %1583  ;;  %v18899_v60 = vpop.permute.xlu0 %1578 }
  0xbc   :  { %24509 = vst [vmem:[#allocation23_spill] sm:$0xff] %v18897_v57  ;;  %24510 = vst [vmem:[#allocation24_spill] sm:$0xff] %v18899_v60  ;;  %3806 = vperm.xlu1 %16376, %v14024_v47   ;;  %3801 = vperm.xlu0 %16375, %v14023_v48   ;;  %v14235_v47 = vld [vmem:[%s24436_s7 + $0x10] sm:$0xff] }
  0xbf   :  { %v18916_v9 = vpop.permute.xlu1 %1729  ;;  %v18918_v10 = vpop.permute.xlu0 %1724 }
  0xc0   :  { %24511 = vst [vmem:[#allocation25_spill] sm:$0xff] %v18916_v9  ;;  %24512 = vst [vmem:[#allocation26_spill] sm:$0xff] %v18918_v10  ;;  %3953 = vperm.xlu1 %16376, %v14046_v61   ;;  %3948 = vperm.xlu0 %16375, %v14045_v6  }
  0xc3   :  { %v18929_v16 = vpop.permute.xlu1 %1885  ;;  %v18931_v19 = vpop.permute.xlu0 %1880 }
  0xc4   :  { %24513 = vst [vmem:[#allocation27_spill] sm:$0xff] %v18929_v16  ;;  %24514 = vst [vmem:[#allocation28_spill] sm:$0xff] %v18931_v19  ;;  %4090 = vperm.xlu1 %16376, %v14066_v14   ;;  %4085 = vperm.xlu0 %16375, %v14065_v15   ;;  %v14757_v14 = vld [vmem:[%s24436_s7 + $0x40] sm:$0xff] }
  0xc7   :  { %v18939_v24 = vpop.permute.xlu1 %1739  ;;  %v18941_v27 = vpop.permute.xlu0 %1734 }
  0xc8   :  { %24515 = vst [vmem:[#allocation29_spill] sm:$0xff] %v18939_v24  ;;  %24516 = vst [vmem:[#allocation30_spill] sm:$0xff] %v18941_v27  ;;  %4237 = vperm.xlu1 %16376, %v14088_v20   ;;  %4232 = vperm.xlu0 %16375, %v14087_v23   ;;  %v14989_v23 = vld [vmem:[%s24439_s10 + $0x10] sm:$0xff] }
  0xcb   :  { %v18949_v32 = vpop.permute.xlu1 %1895  ;;  %v18951_v33 = vpop.permute.xlu0 %1890 }
  0xcc   :  { %24517 = vst [vmem:[#allocation31_spill] sm:$0xff] %v18949_v32  ;;  %24518 = vst [vmem:[#allocation32_spill] sm:$0xff] %v18951_v33  ;;  %4100 = vperm.xlu1 %16376, %v14068_v28   ;;  %4095 = vperm.xlu0 %16375, %v14067_v29   ;;  %v7531_v28 = vld [vmem:[%s24439_s10] sm:$0xff] }
  0xcf   :  { %v18959_v36 = vpop.permute.xlu1 %2032  ;;  %v18961_v37 = vpop.permute.xlu0 %2027 }
  0xd0   :  { %24519 = vst [vmem:[#allocation33_spill] sm:$0xff] %v18959_v36  ;;  %24520 = vst [vmem:[#allocation34_spill] sm:$0xff] %v18961_v37  ;;  %4247 = vperm.xlu1 %16376, %v14090_v34   ;;  %4242 = vperm.xlu0 %16375, %v14089_v35   ;;  %v15183_v35 = vld [vmem:[%s24439_s10 + $0x20] sm:$0xff]  ;;  %v15668_v37 = vld [vmem:[%s24442_s13 + $0x8] sm:$0xff] }
  0xd3   :  { %v18969_v42 = vpop.permute.xlu1 %2179  ;;  %v18971_v43 = vpop.permute.xlu0 %2174 }
  0xd4   :  { %24521 = vst [vmem:[#allocation35_spill] sm:$0xff] %v18969_v42  ;;  %24522 = vst [vmem:[#allocation36_spill] sm:$0xff] %v18971_v43  ;;  %4455 = vperm.xlu1 %16376, %v4452_v40   ;;  %4516 = vperm.xlu0 %16375, %v14110_v41   ;;  %v15086_v40 = vld [vmem:[%s24439_s10 + $0x18] sm:$0xff] }
  0xd7   :  { %v18979_v48 = vpop.permute.xlu1 %2042  ;;  %v18981_v49 = vpop.permute.xlu0 %2037 }
  0xd8   :  { %24523 = vst [vmem:[#allocation37_spill] sm:$0xff] %v18979_v48  ;;  %24524 = vst [vmem:[#allocation38_spill] sm:$0xff] %v18981_v49  ;;  %5469 = vperm.xlu1 %16376, %v14322_v44   ;;  %5130 = vperm.xlu0 %16375, %v14235_v47  }
  0xdb   :  { %v18989_v56 = vpop.permute.xlu1 %2189  ;;  %v18991_v61 = vpop.permute.xlu0 %2184 }
  0xdc   :  { %24525 = vst [vmem:[#allocation39_spill] sm:$0xff] %v18989_v56  ;;  %24526 = vst [vmem:[#allocation40_spill] sm:$0xff] %v18991_v61  ;;  %6149 = vperm.xlu1 %16376, %v14496_v52   ;;  %5808 = vperm.xlu0 %16375, %v14409_v53   ;;  %v15377_v52 = vld [vmem:[%s24439_s10 + $0x30] sm:$0xff]  ;;  %v15280_v53 = vld [vmem:[%s24439_s10 + $0x28] sm:$0xff] }
  0xdf   :  { %v18999_v5 = vpop.permute.xlu1 %2326  ;;  %v19001_v6 = vpop.permute.xlu0 %2321 }
  0xe0   :  { %6829 = vperm.xlu1 %16376, %v14670_v0   ;;  %6488 = vperm.xlu0 %16375, %v14583_v1  }
  0xe3   :  { %v19009_v15 = vpop.permute.xlu1 %2473  ;;  %v19011_v20 = vpop.permute.xlu0 %2468 }
  0xe4   :  { %24527 = vst [vmem:[#allocation41_spill] sm:$0xff] %v19009_v15  ;;  %24528 = vst [vmem:[#allocation42_spill] sm:$0xff] %v19011_v20  ;;  %7598 = vperm.xlu1 %16376, %v14844_v13   ;;  %7170 = vperm.xlu0 %16375, %v14757_v14  }
  0xe7   :  { %v19019_v29 = vpop.permute.xlu1 %2336  ;;  %v19021_v34 = vpop.permute.xlu0 %2331 }
  0xe8   :  { %8307 = vperm.xlu1 %16376, %v14989_v23   ;;  %7534 = vperm.xlu0 %16375, %v7531_v28   ;;  %v15571_v23 = vld [vmem:[%s24439_s10 + $0x40] sm:$0xff]  ;;  %v15474_v28 = vld [vmem:[%s24439_s10 + $0x38] sm:$0xff] }
  0xeb   :  { %v19029_v41 = vpop.permute.xlu1 %2483  ;;  %v19031_v44 = vpop.permute.xlu0 %2478 }
  0xec   :  { %24529 = vst [vmem:[#allocation43_spill] sm:$0xff] %v19029_v41  ;;  %24530 = vst [vmem:[#allocation44_spill] sm:$0xff] %v19031_v44  ;;  %9079 = vperm.xlu1 %16376, %v15183_v35   ;;  %8693 = vperm.xlu0 %16375, %v15086_v40  }
  0xed   :  { %v19033_v47 = vpop.f32.mrf.mxu0 }
  0xef   :  { %v19041_v0 = vpop.permute.xlu1 %2620  ;;  %v19043_v1 = vpop.permute.xlu0 %2615 }
  0xf0   :  { %v19045_v13 = vpop.f32.mrf.mxu0  ;;  %9854 = vperm.xlu1 %16376, %v15377_v52   ;;  %9468 = vperm.xlu0 %16375, %v15280_v53   ;;  %v11032_v53 = vld [vmem:[%s24442_s13] sm:$0xff] }
  0xf1   :  { %v19047_v14 = vpop.f32.mrf.mxu1  ;;  %v16257_v21 = vadd.f32 %v19045_v13, %v19033_v47 }
  0xf2   :  { %v19055_v35 = vpop.f32.mrf.mxu0 }
  0xf3   :  { %v19057_v40 = vpop.permute.xlu1 %2767  ;;  %v19059_v2 = vpop.permute.xlu0 %2762 }
  0xf4   :  { %v19061_v36 = vpop.f32.mrf.mxu0  ;;  %v19063_v52 = vpop.f32.mrf.mxu1  ;;  %10632 = vperm.xlu1 %16376, %v15571_v23   ;;  %10243 = vperm.xlu0 %16375, %v15474_v28   ;;  %v15830_v23 = vld [vmem:[%s24442_s13 + $0x18] sm:$0xff]  ;;  %v15765_v28 = vld [vmem:[%s24442_s13 + $0x10] sm:$0xff] }
  0xf6   :  { %v19071_v61 = vpop.f32.mrf.mxu0  ;;  %v19077_v43 = vpop.f32.mrf.mxu1 }
  0xf7   :  { %v19073_v56 = vpop.permute.xlu1 %2630  ;;  %v19075_v42 = vpop.permute.xlu0 %2625 }
  0xf8   :  { %v19079_v46 = vpop.f32.mrf.mxu0  ;;  %11035 = vperm.xlu1 %16376, %v11032_v53   ;;  %11080 = vperm.xlu0 %16375, %v15668_v37   ;;  %v19093_v30 = vpop.f32.mrf.mxu1  ;;  %v15960_v37 = vld [vmem:[%s24442_s13 + $0x28] sm:$0xff]  ;;  %v15895_v53 = vld [vmem:[%s24442_s13 + $0x20] sm:$0xff] }
  0xfa   :  { %v19087_v45 = vpop.f32.mrf.mxu0  ;;  %v19103_v19 = vpop.f32.mrf.mxu1 }
  0xfb   :  { %v19089_v33 = vpop.permute.xlu1 %2777  ;;  %v19091_v32 = vpop.permute.xlu0 %2772 }
  0xfc   :  { %24531 = vst [vmem:[#allocation45_spill] sm:$0xff] %v19089_v33  ;;  %24532 = vst [vmem:[#allocation46_spill] sm:$0xff] %v19091_v32  ;;  %v19095_v31 = vpop.f32.mrf.mxu0  ;;  %11775 = vperm.xlu1 %16376, %v15830_v23   ;;  %11528 = vperm.xlu0 %16375, %v15765_v28   ;;  %v16090_v23 = vld [vmem:[%s24442_s13 + $0x38] sm:$0xff]  ;;  %v16025_v28 = vld [vmem:[%s24442_s13 + $0x30] sm:$0xff]  ;;  %v570_v41 = vpop.f32.mrf.mxu1 }
  0xfe   :  { %v16267_v16 = vpop.f32.mrf.mxu0  ;;  %v19122_v24 = vpop.f32.mrf.mxu1 }
  0xff   :  { %v19105_v33 = vpop.permute.xlu1 %2914  ;;  %v19107_v32 = vpop.permute.xlu0 %2909 }
 0x100   :  { %24533 = vst [vmem:[#allocation47_spill] sm:$0xff] %v19107_v32  ;;  %v16268_v48 = vpop.f32.mrf.mxu0  ;;  %12271 = vperm.xlu1 %16376, %v15960_v37   ;;  %12022 = vperm.xlu0 %16375, %v15895_v53   ;;  %v16155_v37 = vld [vmem:[%s24442_s13 + $0x40] sm:$0xff]  ;;  %v573_v10 = vpop.f32.mrf.mxu1 }
 0x102   :  { %v16270_v49 = vpop.f32.mrf.mxu0 }
 0x103   :  { %v19115_v44 = vpop.permute.xlu1 %3061  ;;  %v19117_v15 = vpop.permute.xlu0 %3056 }
 0x104   :  { %24534 = vst [vmem:[#allocation48_spill] sm:$0xff] %v19115_v44  ;;  %24535 = vst [vmem:[#allocation49_spill] sm:$0xff] %v19117_v15  ;;  %v16271_v60 = vpop.f32.mrf.mxu0  ;;  %12767 = vperm.xlu1 %16376, %v16090_v23   ;;  %12518 = vperm.xlu0 %16375, %v16025_v28   ;;  %v19132_v28 = vpop.f32.mrf.mxu1 }
 0x106   :  { %v16273_v53 = vpop.f32.mrf.mxu0 }
 0x107   :  { %v19124_v27 = vpop.permute.xlu1 %2924  ;;  %v19126_v57 = vpop.permute.xlu0 %2919 }
 0x108   :  { %24536 = vst [vmem:[#allocation50_spill] sm:$0xff] %v19124_v27  ;;  %24537 = vst [vmem:[#allocation51_spill] sm:$0xff] %v19126_v57  ;;  %v16274_v9 = vpop.f32.mrf.mxu0  ;;  %13016 = vperm.xlu0 %16375, %v16155_v37   ;;  %v586_v27 = vpop.f32.mrf.mxu1 }
 0x10a   :  { %v16276_v38 = vpop.f32.mrf.mxu0  ;;  %v19142_v26 = vpop.f32.mrf.mxu1 }
 0x10b   :  { %v19128_v11 = vpop.permute.xlu1 %3071  ;;  %v19130_v39 = vpop.permute.xlu0 %3066 }
 0x10c   :  { %24538 = vst [vmem:[#allocation52_spill] sm:$0xff] %v19128_v11  ;;  %24539 = vst [vmem:[#allocation53_spill] sm:$0xff] %v19130_v39  ;;  %v16277_v23 = vpop.f32.mrf.mxu0  ;;  %v16269_v11 = vadd.f32 %v16268_v48, %v16267_v16  ;;  %v589_v58 = vpop.f32.mrf.mxu1  ;;  %v16272_v16 = vadd.f32 %v16271_v60, %v16270_v49 }
 0x10e   :  { %v16279_v4 = vpop.f32.mrf.mxu0  ;;  %v19158_v13 = vpop.f32.mrf.mxu1 }
 0x10f   :  { %v19134_v3 = vpop.permute.xlu1 %3208  ;;  %v19136_v12 = vpop.permute.xlu0 %3203 }
 0x110   :  { %24540 = vst [vmem:[#allocation54_spill] sm:$0xff] %v19134_v3  ;;  %24541 = vst [vmem:[#allocation55_spill] sm:$0xff] %v19136_v12  ;;  %v16280_v22 = vpop.f32.mrf.mxu0  ;;  %v16260_v3 = vadd.f32 %v19061_v36, %v19055_v35  ;;  %v602_v18 = vpop.f32.mrf.mxu1 }
 0x112   :  { %v16282_v44 = vpop.f32.mrf.mxu0 }
 0x113   :  { %v19138_v57 = vpop.permute.xlu1 %3355  ;;  %v19140_v37 = vpop.permute.xlu0 %3350 }
 0x114   :  { %24542 = vst [vmem:[#allocation56_spill] sm:$0xff] %v19138_v57  ;;  %24543 = vst [vmem:[#allocation57_spill] sm:$0xff] %v19140_v37  ;;  %v16283_v15 = vpop.f32.mrf.mxu0  ;;  %v19155_v57 = vld [vmem:[%s24546_s1] ss:$0 sm:$0xff]  ;;  %v16281_v37 = vadd.f32 %v16280_v22, %v16279_v4  ;;  %v16263_v4 = vadd.f32 %v19079_v46, %v19071_v61  ;;  %v16275_v22 = vadd.f32 %v16274_v9, %v16273_v53 }
 0x115   :  { %v474_v48 = vadd.f32 %v16269_v11, %v19155_v57  ;;  %v16284_v59 = vadd.f32 %v16283_v15, %v16282_v44  ;;  %v458_v36 = vadd.f32 %v16257_v21, %v19155_v57  ;;  %v461_v35 = vadd.f32 %v16260_v3, %v19155_v57 }
 0x116   :  { %v16285_v39 = vpop.f32.mrf.mxu0  ;;  %v490_v60 = vadd.f32 %v16281_v37, %v19155_v57  ;;  %v477_v11 = vadd.f32 %v16272_v16, %v19155_v57  ;;  %v466_v46 = vadd.f32 %v16263_v4, %v19155_v57  ;;  %v482_v9 = vadd.f32 %v16275_v22, %v19155_v57 }
 0x117   :  { %v19148_v25 = vpop.permute.xlu1 %3218  ;;  %v19150_v12 = vpop.permute.xlu0 %3213  ;;  %v571_v15 = vadd.f32 %v570_v41, %v474_v48  ;;  %v493_v17 = vadd.f32 %v16284_v59, %v19155_v57  ;;  %v555_v3 = vadd.f32 %v19063_v52, %v458_v36  ;;  %v16266_v59 = vadd.f32 %v19095_v31, %v19087_v45 }
 0x118   :  { %24544 = vst [vmem:[#allocation58_spill] sm:$0xff] %v19148_v25  ;;  %24545 = vst [vmem:[#allocation59_spill] sm:$0xff] %v19150_v12  ;;  %v16286_v20 = vpop.f32.mrf.mxu0  ;;  %v587_v61 = vadd.f32 %v586_v27, %v490_v60  ;;  %v574_v41 = vadd.f32 %v573_v10, %v477_v11  ;;  %v19182_v48 = vpop.f32.mrf.mxu1  ;;  %v563_v10 = vadd.f32 %v19047_v14, %v466_v46 }
 0x119   :  { %v16287_v44 = vadd.f32 %v16286_v20, %v16285_v39  ;;  %v16278_v39 = vadd.f32 %v16277_v23, %v16276_v38  ;;  %v621_v37 = vmax.f32 %v571_v15, 0.0  ;;  %v617_v36 = vmax.f32 %v555_v3, 0.0 }
 0x11a   :  { %v16288_v47 = vpop.f32.mrf.mxu0  ;;  %v579_v31 = vadd.f32 %v19103_v19, %v482_v9  ;;  %v625_v45 = vmax.f32 %v587_v61, 0.0  ;;  %v622_v22 = vmax.f32 %v574_v41, 0.0 }
 0x11b   :  { %v19162_v25 = vpop.permute.xlu1 %3365  ;;  %v19164_v12 = vpop.permute.xlu0 %3360  ;;  %v498_v52 = vadd.f32 %v16287_v44, %v19155_v57 }
 0x11c   :  { %24547 = vst [vmem:[#allocation60_spill] sm:$0xff] %v19162_v25  ;;  %24548 = vst [vmem:[#allocation61_spill] sm:$0xff] %v19164_v12  ;;  %v16289_v49 = vpop.f32.mrf.mxu0  ;;  %v558_v25 = vadd.f32 %v19093_v30, %v461_v35  ;;  %v590_v30 = vadd.f32 %v589_v58, %v493_v17  ;;  %v485_v58 = vadd.f32 %v16278_v39, %v19155_v57  ;;  %v605_v44 = vpop.f32.mrf.mxu1  ;;  %v623_v9 = vmax.f32 %v579_v31, 0.0 }
 0x11d   :  { %v16290_v4 = vadd.f32 %v16289_v49, %v16288_v47  ;;  %v633_v47 = vadd.f32 %v621_v37, %v617_v36  ;;  %v595_v49 = vadd.f32 %v19132_v28, %v498_v52 }
 0x11e   :  { %v16291_v21 = vpop.f32.mrf.mxu0  ;;  %v618_v35 = vmax.f32 %v558_v25, 0.0  ;;  %v469_v25 = vadd.f32 %v16266_v59, %v19155_v57  ;;  %v626_v11 = vmax.f32 %v590_v30, 0.0  ;;  %v582_v39 = vadd.f32 %v19122_v24, %v485_v58 }
 0x11f   :  { %v19173_v12 = vpop.permute.xlu1 %3502  ;;  %v19175_v32 = vpop.permute.xlu0 %3497  ;;  %v637_v61 = vadd.f32 %v633_v47, %v625_v45  ;;  %v619_v59 = vmax.f32 %v563_v10, 0.0  ;;  %v627_v52 = vmax.f32 %v595_v49, 0.0 }
 0x120   :  { %24549 = vst [vmem:[#allocation62_spill] sm:$0xff] %v19173_v12  ;;  %v16292_v53 = vpop.f32.mrf.mxu0  ;;  %v634_v41 = vadd.f32 %v622_v22, %v618_v35  ;;  %v566_v37 = vadd.f32 %v19077_v43, %v469_v25  ;;  %v624_v10 = vmax.f32 %v582_v39, 0.0 }
 0x121   :  { %v16293_v20 = vadd.f32 %v16292_v53, %v16291_v21  ;;  %v501_v21 = vadd.f32 %v16290_v4, %v19155_v57  ;;  %v653_v53 = vlaneseq  ;;  %v635_v35 = vadd.f32 %v623_v9, %v619_v59 }
 0x122   :  { %v16294_v16 = vpop.f32.mrf.mxu0  ;;  %v638_v36 = vadd.f32 %v634_v41, %v626_v11 }
 0x123   :  { %v19184_v12 = vpop.permute.xlu1 %3649  ;;  %v19186_v27 = vpop.permute.xlu0 %3644  ;;  %v506_v38 = vadd.f32 %v16293_v20, %v19155_v57  ;;  %v598_v4 = vadd.f32 %v19142_v26, %v501_v21  ;;  %v19208_v22 = vshrl.u32 %v653_v53, 7  ;;  %v639_v25 = vadd.f32 %v635_v35, %v627_v52 }
 0x124   :  { %v16295_v23 = vpop.f32.mrf.mxu0 }
 0x125   :  { %v16296_v17 = vadd.f32 %v16295_v23, %v16294_v16  ;;  %v603_v60 = vadd.f32 %v602_v18, %v506_v38  ;;  %24550 = vst [vmem:[#allocation63_spill] sm:$0xff] %v19208_v22  ;;  %v628_v26 = vmax.f32 %v598_v4, 0.0  ;;  %vm702_vm0 = vcmp.lt.s32.totalorder %v19208_v22, 1 }
 0x126   :  { %v16297_v15 = vpop.f32.mrf.mxu0  ;;  %vm1097_vm1 = vcmp.lt.s32.totalorder %v19208_v22, 7  ;;  %vm1253_vm3 = vcmp.lt.s32.totalorder %v19208_v22, 6  ;;  %vm655_vm4 = vcmp.lt.s32.totalorder %v19208_v22, 2  ;;  %vm1556_vm5 = vcmp.lt.s32.totalorder %v19208_v22, 5 }
 0x127   :  { %v629_v14 = vmax.f32 %v603_v60, 0.0  ;;  %v19195_v3 = vpop.permute.xlu1 %3512  ;;  %v19197_v19 = vpop.permute.xlu0 %3507  ;;  %v509_v46 = vadd.f32 %v16296_v17, %v19155_v57  ;;  %v620_v60 = vmax.f32 %v566_v37, 0.0  ;;  %vm1868_vm6 = vcmp.lt.s32.totalorder %v19208_v22, 3 }
 0x128   :  { %v16298_v18 = vpop.f32.mrf.mxu0  ;;  %vm1712_vm7 = vcmp.lt.s32.totalorder %v19208_v22, 4 }
 0x129   :  { %v16299_v28 = vadd.f32 %v16298_v18, %v16297_v15  ;;  %v606_v20 = vadd.f32 %v605_v44, %v509_v46  ;;  %v641_v30 = vadd.f32 %v637_v61, %v629_v14  ;;  %v636_v14 = vadd.f32 %v624_v10, %v620_v60  ;;  %v16480_v10 = vld [vmem:[%s24433_s4 + $0x4] ss:$8 sps:$4 sm:$0xff]  }
 0x12a   :  { %v16300_v16 = vpop.f32.mrf.mxu0 }
 0x12b   :  { %v514_v38 = vadd.f32 %v16299_v28, %v19155_v57  ;;  %v630_v31 = vmax.f32 %v606_v20, 0.0  ;;  %v19204_v45 = vpop.permute.xlu1 %3659  ;;  %v19206_v23 = vpop.permute.xlu0 %3654  ;;  %v19211_v47 = vmul.f32 0.25, %v641_v30  ;;  %v640_v53 = vadd.f32 %v636_v14, %v628_v26 }
 0x12c   :  { %v16301_v24 = vpop.f32.mrf.mxu0 }
 0x12d   :  { %v611_v43 = vadd.f32 %v19158_v13, %v514_v38  ;;  %v642_v58 = vadd.f32 %v638_v36, %v630_v31  ;;  %v16302_v17 = vadd.f32 %v16301_v24, %v16300_v16  ;;  %v698_v61 = vrot.slane %v19211_v47, 7 }
 0x12e   :  { %v972_v59 = vmul.f32 %v18755_v62, %v19211_v47  ;;  %v1093_v37 = vrot.slane %v19211_v47, 1  ;;  %v1249_v31 = vrot.slane %v19211_v47, 2 }
 0x12f   :  { %v631_v49 = vmax.f32 %v611_v43, 0.0  ;;  %v19213_v11 = vmul.f32 0.25, %v642_v58  ;;  %v517_v15 = vadd.f32 %v16302_v17, %v19155_v57  ;;  %v3797_v44 = vpop.permute.xlu1 %3796  ;;  %v3792_v21 = vpop.permute.xlu0 %3791 }
 0x131   :  { %v643_v46 = vadd.f32 %v639_v25, %v631_v49  ;;  %v614_v13 = vadd.f32 %v19182_v48, %v517_v15  ;;  %v699_v9 = vrot.slane %v19213_v11, 7  ;;  %v1094_v18 = vrot.slane %v19213_v11, 1 }
 0x132   :  { %v1250_v4 = vrot.slane %v19213_v11, 2  ;;  %v19241_v38 = vmul.f32 %v18777_v8, %v19213_v11 }
 0x133   :  { %v19222_v41 = vmul.f32 0.25, %v643_v46  ;;  %v632_v57 = vmax.f32 %v614_v13, 0.0  ;;  %v3944_v39 = vpop.permute.xlu1 %3943  ;;  %v3939_v28 = vpop.permute.xlu0 %3938  ;;  %v705_v20 = vsel %vm702_vm0, %v698_v61, %v699_v9  ;;  %v19247_v62 = vsel %vm1097_vm1, %v1093_v37, %v1094_v18 }
 0x134   :  { %v19227_v48 = vmul.f32 %v3939_v28, %v19213_v11  ;;  %v19263_v60 = vmul.f32 %v18725_v50, %v705_v20  ;;  %v19266_v25 = vmul.f32 %v18999_v5, %v705_v20  ;;  %v19268_v26 = vmul.f32 %v3792_v21, %v705_v20  ;;  %v16457_v5 = vld [vmem:[%s24433_s4 + $0x130] ss:$8 sps:$4 sm:$0xff]  }
 0x135   :  { %v644_v52 = vadd.f32 %v640_v53, %v632_v57  ;;  %v700_v30 = vrot.slane %v19222_v41, 7  ;;  %v19234_v16 = vmul.f32 %v3944_v39, %v19222_v41  ;;  %v1095_v36 = vrot.slane %v19222_v41, 1 }
 0x136   :  { %24551 = vst [vmem:[#allocation64_spill] sm:$0xff] %v19227_v48  ;;  %24554 = vst [vmem:[#allocation67_spill] sm:$0xff] %v19268_v26  ;;  %v1251_v46 = vrot.slane %v19222_v41, 2  ;;  %v24584_v26 = vrot.slane %v19211_v47, 6 }
 0x137   :  { %24552 = vst [vmem:[#allocation65_spill] sm:$0xff] %v19234_v16  ;;  %v19250_v35 = vmul.f32 0.25, %v644_v52  ;;  %v704_v24 = vsel %vm702_vm0, %v699_v9, %v700_v30  ;;  %v3807_v43 = vpop.permute.xlu1 %3806  ;;  %v3802_v58 = vpop.permute.xlu0 %3801  ;;  %v19258_v8 = vsel %vm1097_vm1, %v1094_v18, %v1095_v36 }
 0x138   :  { %v19260_v17 = vmul.f32 %v3797_v44, %v704_v24  ;;  %v19276_v44 = vmul.f32 %v19021_v34, %v704_v24  ;;  %v19285_v21 = vmul.f32 %v19041_v0, %v19258_v8  ;;  %v16460_v0 = vld [vmem:[%s24433_s4 + $0x30] ss:$8 sps:$4 sm:$0xff]  }
 0x139   :  { %v701_v49 = vrot.slane %v19250_v35, 7  ;;  %v971_v15 = vmul.f32 %v18757_v63, %v19250_v35  ;;  %v1096_v14 = vrot.slane %v19250_v35, 1  ;;  %v16465_v63 = vld [vmem:[%s24433_s4 + $0x124] ss:$8 sps:$4 sm:$0xff]   ;;  %v1252_v13 = vrot.slane %v19250_v35, 2 }
 0x13a   :  { %24553 = vst [vmem:[#allocation66_spill] sm:$0xff] %v19260_v17  ;;  %24555 = vst [vmem:[#allocation68_spill] sm:$0xff] %v19285_v21  ;;  %v24580_v17 = vld [vmem:[#allocation15_spill] sm:$0xff] }
 0x13b   :  { %v706_v34 = vsel %vm702_vm0, %v701_v49, %v698_v61  ;;  %v703_v9 = vsel %vm702_vm0, %v700_v30, %v701_v49  ;;  %v3954_v18 = vpop.permute.xlu1 %3953  ;;  %v3949_v53 = vpop.permute.xlu0 %3948  ;;  %v975_v57 = vpack.c.bf16 %v972_v59, %v971_v15  ;;  %v19297_v39 = vsel %vm1097_vm1, %v1095_v36, %v1096_v14  ;;  %v16463_v59 = vld [vmem:[%s24433_s4 + $0x120] ss:$8 sps:$4 sm:$0xff]  }
 0x13c   :  { %v733_v28 = vmul.f32 %v18737_v55, %v706_v34  ;;  %v19304_v20 = vmul.f32 %v19001_v6, %v706_v34  ;;  %v19306_v61 = vmul.f32 %v3807_v43, %v706_v34  ;;  %v732_v52 = vmul.f32 %v18727_v51, %v703_v9  ;;  %v16468_v51 = vld [vmem:[%s24433_s4 + $0x24] ss:$8 sps:$4 sm:$0xff]   ;;  %v16471_v6 = vld [vmem:[%s24433_s4 + $0x114] ss:$8 sps:$4 sm:$0xff]  }
 0x13d   :  { %v19313_v30 = vmul.f32 %v19019_v29, %v703_v9  ;;  %v19315_v36 = vmul.f32 %v3802_v58, %v703_v9  ;;  %v19318_v49 = vmul.f32 %v3954_v18, %v19211_v47  ;;  %v19321_v55 = vmul.f32 %v3949_v53, %v19250_v35  ;;  %13623 = vmatmul.mubr.msk.bf16.vlgmr.msra.gmra.mxu0 %vm787_vm2, %v975_v57 }
 0x13e   :  { %24556 = vst [vmem:[#allocation69_spill] sm:$0xff] %v19306_v61  ;;  %v736_v43 = vpack.c.bf16 %v733_v28, %v732_v52  ;;  %1353 = vmatpush1.bf16.msra.mxu0 %v16457_v5  ;;  %v19336_v58 = vsel %vm1253_vm3, %v1250_v4, %v1251_v46  ;;  %v974_v15 = vmul.f32 %v18775_v7, %v19222_v41  ;;  %v1552_v29 = vrot.slane %v19211_v47, 3 }
 0x13f   :  { %24557 = vst [vmem:[#allocation70_spill] sm:$0xff] %v19315_v36  ;;  %24558 = vst [vmem:[#allocation71_spill] sm:$0xff] %v19318_v49  ;;  %v4091_v53 = vpop.permute.xlu1 %4090  ;;  %v4086_v5 = vpop.permute.xlu0 %4085  ;;  %1354 = vmatprep.subr.bf16.mxu0 %v16465_v63  ;;  %v19348_v57 = vmul.f32 %v19043_v1, %v19247_v62  ;;  %v735_v28 = vmul.f32 %v18735_v54, %v704_v24  ;;  %v19353_v7 = vmul.f32 %v19075_v42, %v19297_v39  ;;  %v16466_v42 = vld [vmem:[%s24433_s4 + $0x20] ss:$8 sps:$4 sm:$0xff]   ;;  %v24564_v24 = vmov 0  }
 0x140   :  { %24559 = vst [vmem:[#allocation72_spill] sm:$0xff] %v19321_v55  ;;  %v19356_v52 = vmul.f32 %v4091_v53, %v19297_v39  ;;  %v19359_v9 = vmul.f32 %v4086_v5, %v19258_v8  ;;  %13591 = vmatmul.mubr.msk.bf16.vlgmr.msra.gmra.mxu1 %vm787_vm2, %v736_v43  ;;  %v19366_v1 = vsel %vm1253_vm3, %v1251_v46, %v1252_v13  ;;  %v16469_v63 = vld [vmem:[%s24433_s4 + $0x110] ss:$8 sps:$4 sm:$0xff]   ;;  %v16474_v43 = vld [vmem:[%s24433_s4 + $0x14] ss:$8 sps:$4 sm:$0xff]   ;;  %v1553_v36 = vrot.slane %v19213_v11, 3 }
 0x141   :  { %24560 = vst [vmem:[#allocation73_spill] sm:$0xff] %v19348_v57  ;;  %24561 = vst [vmem:[#allocation74_spill] sm:$0xff] %v19353_v7  ;;  %902 = vmatpush1.bf16.msra.mxu1 %v16460_v0  ;;  %v19370_v54 = vmul.f32 %v19057_v40, %v19336_v58  ;;  %1074 = vmatprep.mubr.bf16.mxu0 %v24564_v24  ;;  %v19387_v40 = vsel %vm1097_vm1, %v1096_v14, %v1093_v37  ;;  %v16477_v53 = vld [vmem:[%s24433_s4 + $0x104] ss:$8 sps:$4 sm:$0xff]   ;;  %v1709_v49 = vrot.slane %v19213_v11, 4 }
 0x142   :  { %24562 = vst [vmem:[#allocation75_spill] sm:$0xff] %v19356_v52  ;;  %24563 = vst [vmem:[#allocation76_spill] sm:$0xff] %v19359_v9  ;;  %1355 = vmatpush1.bf16.msra.mxu0 %v16463_v59  ;;  %903 = vmatprep.subr.bf16.mxu1 %v16468_v51  ;;  %v19401_v59 = vsel %vm1253_vm3, %v1249_v31, %v1250_v4  ;;  %v19405_v37 = vmul.f32 %v19105_v33, %v19336_v58  ;;  %v16472_v4 = vld [vmem:[%s24433_s4 + $0x10] ss:$8 sps:$4 sm:$0xff]   ;;  %v16475_v33 = vld [vmem:[%s24433_s4 + $0x100] ss:$8 sps:$4 sm:$0xff]  }
 0x143   :  { %v4238_v51 = vpop.permute.xlu1 %4237  ;;  %v4233_v5 = vpop.permute.xlu0 %4232  ;;  %v976_v14 = vpack.c.bf16 %v974_v15, %v19241_v38  ;;  %1356 = vmatprep.subr.bf16.mxu0 %v16471_v6  ;;  %836 = vmatprep.mubr.bf16.mxu1 %v24564_v24  ;;  %v19411_v46 = vmul.f32 %v19073_v56, %v19387_v40  ;;  %v19427_v38 = vmul.f32 %v19059_v2, %v19401_v59  ;;  %v652_v56 = vrot.slane %v19250_v35, 6  ;;  %v16483_v2 = vld [vmem:[%s24433_s4 + $0x1b4] ss:$8 sps:$4 sm:$0xff]   ;;  %v16489_v52 = vld [vmem:[%s24433_s4 + $0x1a4] ss:$8 sps:$4 sm:$0xff]  }
 0x144   :  { %24565 = vst [vmem:[#allocation77_spill] sm:$0xff] %v19405_v37  ;;  %v19417_v50 = vmul.f32 %v4238_v51, %v19366_v1  ;;  %v19420_v18 = vmul.f32 %v4233_v5, %v19336_v58  ;;  %v737_v6 = vpack.c.bf16 %v735_v28, %v19263_v60  ;;  %v24569_v51 = vld [vmem:[#allocation47_spill] sm:$0xff]  ;;  %v24454_v60 = vrot.slane %v19211_v47, 6  ;;  %v24612_v57 = vld [vmem:[#allocation54_spill] sm:$0xff] }
 0x145   :  { %24566 = vst [vmem:[#allocation78_spill] sm:$0xff] %v19411_v46  ;;  %904 = vmatpush1.bf16.msra.mxu1 %v16466_v42  ;;  %13624 = vmatmul.mubr.msk.bf16.gmra.mxu0 %vm787_vm2, %v976_v14  ;;  %v19436_v5 = vmul.f32 %v24569_v51, %v19401_v59  ;;  %v19455_v14 = vsel %vm1253_vm3, %v1252_v13, %v1249_v31  ;;  %v651_v51 = vrot.slane %v19222_v41, 6  ;;  %v16478_v13 = vld [vmem:[%s24433_s4] ss:$8 sps:$4 sm:$0xff]   ;;  %v16486_v9 = vld [vmem:[%s24433_s4 + $0xf4] ss:$8 sps:$4 sm:$0xff]  }
 0x146   :  { %24567 = vst [vmem:[#allocation79_spill] sm:$0xff] %v19417_v50  ;;  %24568 = vst [vmem:[#allocation80_spill] sm:$0xff] %v19420_v18  ;;  %1357 = vmatpush1.bf16.msra.mxu0 %v16469_v63  ;;  %905 = vmatprep.subr.bf16.mxu1 %v16474_v43  ;;  %v24571_v43 = vld [vmem:[#allocation12_spill] sm:$0xff]  ;;  %v650_v63 = vrot.slane %v19213_v11, 6  ;;  %v24576_v42 = vld [vmem:[#allocation5_spill] sm:$0xff]  ;;  %v1286_v18 = vmul.f32 %v24580_v17, %v19366_v1  ;;  %v1710_v46 = vrot.slane %v19222_v41, 4 }
 0x147   :  { %24570 = vst [vmem:[#allocation47_spill] sm:$0xff] %v19436_v5  ;;  %v4101_v15 = vpop.permute.xlu1 %4100  ;;  %v4096_v0 = vpop.permute.xlu0 %4095  ;;  %1358 = vmatprep.subr.bf16.mxu0 %v16477_v53  ;;  %v1283_v28 = vmul.f32 %v24571_v43, %v19455_v14  ;;  %1376 = vmatprep.mubr.bf16.mxu0 %v24564_v24  ;;  %v19476_v53 = vsel %vm655_vm4, %v651_v51, %v652_v56  ;;  %v16490_v17 = vld [vmem:[%s24433_s4 + $0xe0] ss:$8 sps:$4 sm:$0xff]  }
 0x148   :  { %v19465_v34 = vmul.f32 %v4101_v15, %v19247_v62  ;;  %v19468_v31 = vmul.f32 %v4096_v0, %v19387_v40  ;;  %13592 = vmatmul.mubr.msk.bf16.gmra.mxu1 %vm787_vm2, %v737_v6  ;;  %v19482_v43 = vsel %vm655_vm4, %v652_v56, %v24454_v60  ;;  %v24574_v0 = vld [vmem:[#allocation11_spill] sm:$0xff]  ;;  %v24591_v50 = vld [vmem:[#allocation10_spill] sm:$0xff]  ;;  %v24598_v5 = vld [vmem:[#allocation56_spill] sm:$0xff] }
 0x149   :  { %906 = vmatpush1.bf16.msra.mxu1 %v16472_v4  ;;  %v1284_v15 = vmul.f32 %v24574_v0, %v19401_v59  ;;  %v16481_v6 = vld [vmem:[%s24433_s4 + $0x1b0] ss:$8 sps:$4 sm:$0xff]   ;;  %925 = vmatprep.mubr.bf16.mxu1 %v24564_v24  ;;  %v685_v60 = vmul.f32 %v24576_v42, %v19482_v43 }
 0x14a   :  { %24572 = vst [vmem:[#allocation12_spill] sm:$0xff] %v19465_v34  ;;  %24573 = vst [vmem:[#allocation81_spill] sm:$0xff] %v19468_v31  ;;  %1359 = vmatpush1.bf16.msra.mxu0 %v16475_v33  ;;  %907 = vmatprep.subr.bf16.mxu1 %v16480_v10  ;;  %v24575_v4 = vld [vmem:[#allocation6_spill] sm:$0xff] }
 0x14b   :  { %v684_v0 = vmul.f32 %v24575_v4, %v19476_v53  ;;  %v4248_v61 = vpop.permute.xlu1 %4247  ;;  %v4243_v56 = vpop.permute.xlu0 %4242  ;;  %v1287_v33 = vpack.c.bf16 %v1284_v15, %v1283_v28  ;;  %1655 = vmatprep.subr.bf16.mxu0 %v16483_v2  ;;  %v16484_v10 = vld [vmem:[%s24433_s4 + $0xf0] ss:$8 sps:$4 sm:$0xff]   ;;  %v16487_v34 = vld [vmem:[%s24433_s4 + $0x1a0] ss:$8 sps:$4 sm:$0xff]   ;;  %v16492_v2 = vld [vmem:[%s24433_s4 + $0xe4] ss:$8 sps:$4 sm:$0xff]  }
 0x14c   :  { %v19511_v4 = vmul.f32 %v4248_v61, %v19401_v59  ;;  %v19514_v31 = vmul.f32 %v4243_v56, %v19455_v14  ;;  %v16495_v61 = vld [vmem:[%s24433_s4 + $0x194] ss:$8 sps:$4 sm:$0xff]   ;;  %v1865_v15 = vrot.slane %v19213_v11, 5  ;;  %v24579_v56 = vld [vmem:[#allocation42_spill] sm:$0xff]  ;;  %v24581_v28 = vrot.slane %v19222_v41, 3 }
 0x14d   :  { %908 = vmatpush1.bf16.msra.mxu1 %v16478_v13  ;;  %13667 = vmatmul.mubr.msk.bf16.vlgmr.msra.gmra.mxu0 %vm787_vm2, %v1287_v33  ;;  %v19532_v42 = vmul.f32 %v24579_v56, %v19211_v47  ;;  %v688_v13 = vpack.c.bf16 %v685_v60, %v684_v0  ;;  %v1559_v33 = vsel %vm1556_vm5, %v1552_v29, %v1553_v36 }
 0x14e   :  { %24577 = vst [vmem:[#allocation11_spill] sm:$0xff] %v19511_v4  ;;  %24578 = vst [vmem:[#allocation6_spill] sm:$0xff] %v19514_v31  ;;  %1656 = vmatpush1.bf16.msra.mxu0 %v16481_v6  ;;  %1196 = vmatprep.subr.bf16.mxu1 %v16486_v9  ;;  %v19544_v56 = vsel %vm655_vm4, %v650_v63, %v651_v51  ;;  %v19550_v9 = vsel %vm1556_vm5, %v1553_v36, %v24581_v28  ;;  %v24582_v6 = vld [vmem:[#allocation13_spill] sm:$0xff]  ;;  %v24583_v51 = vld [vmem:[#allocation16_spill] sm:$0xff]  ;;  %v24585_v28 = vrot.slane %v19250_v35, 3 }
 0x14f   :  { %1657 = vmatprep.subr.bf16.mxu0 %v16489_v52  ;;  %1386 = vmatprep.mubr.bf16.mxu0 %v24564_v24  ;;  %v19555_v52 = vmul.f32 %v24582_v6, %v19297_v39  ;;  %v1285_v0 = vmul.f32 %v24583_v51, %v19336_v58  ;;  %v19567_v36 = vsel %vm655_vm4, %v24584_v26, %v650_v63  ;;  %v16498_v6 = vld [vmem:[%s24433_s4 + $0xd4] ss:$8 sps:$4 sm:$0xff]   ;;  %v24586_v51 = vld [vmem:[#allocation49_spill] sm:$0xff]  ;;  %v24590_v31 = vld [vmem:[#allocation14_spill] sm:$0xff] }
 0x150   :  { %13601 = vmatmul.mubr.msk.bf16.vlgmr.msra.gmra.mxu1 %vm787_vm2, %v688_v13  ;;  %v19573_v39 = vsel %vm1556_vm5, %v24585_v28, %v1552_v29  ;;  %v16493_v13 = vld [vmem:[%s24433_s4 + $0x190] ss:$8 sps:$4 sm:$0xff]   ;;  %v19583_v26 = vmul.f32 %v24586_v51, %v1559_v33  ;;  %v24589_v29 = vrot.slane %v19211_v47, 5  ;;  %v1708_v28 = vrot.slane %v19211_v47, 4 }
 0x151   :  { %1197 = vmatpush1.bf16.msra.mxu1 %v16484_v10  ;;  %935 = vmatprep.mubr.bf16.mxu1 %v24564_v24  ;;  %v24588_v63 = vld [vmem:[#allocation48_spill] sm:$0xff]  ;;  %v19598_v4 = vmul.f32 %v24590_v31, %v19258_v8  ;;  %v19602_v51 = vmul.f32 %v24591_v50, %v19387_v40  ;;  %v1288_v48 = vpack.c.bf16 %v1286_v18, %v1285_v0  ;;  %v1711_v31 = vrot.slane %v19250_v35, 4  ;;  %v24596_v50 = vld [vmem:[#allocation57_spill] sm:$0xff] }
 0x152   :  { %24587 = vst [vmem:[#allocation5_spill] sm:$0xff] %v19583_v26  ;;  %v19587_v60 = vmul.f32 %v24588_v63, %v19550_v9  ;;  %v19593_v10 = vsel %vm1868_vm6, %v24589_v29, %v1865_v15  ;;  %1658 = vmatpush1.bf16.msra.mxu0 %v16487_v34  ;;  %1198 = vmatprep.subr.bf16.mxu1 %v16492_v2  ;;  %v24592_v63 = vld [vmem:[#allocation7_spill] sm:$0xff]  ;;  %v16501_v29 = vld [vmem:[%s24433_s4 + $0x184] ss:$8 sps:$4 sm:$0xff]   ;;  %v24593_v34 = vrot.slane %v19222_v41, 5  ;;  %v24594_v2 = vld [vmem:[#allocation8_spill] sm:$0xff] }
 0x153   :  { %v687_v55 = vmul.f32 %v24592_v63, %v19544_v56  ;;  %1659 = vmatprep.subr.bf16.mxu0 %v16495_v61  ;;  %v16496_v8 = vld [vmem:[%s24433_s4 + $0xd0] ss:$8 sps:$4 sm:$0xff]   ;;  %v686_v63 = vmul.f32 %v24594_v2, %v19567_v36  ;;  %v16499_v18 = vld [vmem:[%s24433_s4 + $0x180] ss:$8 sps:$4 sm:$0xff]   ;;  %v19631_v16 = vmul.f32 %v24596_v50, %v19593_v10 }
 0x154   :  { %v19619_v40 = vsel %vm1868_vm6, %v1865_v15, %v24593_v34  ;;  %v24595_v61 = vld [vmem:[#allocation20_spill] sm:$0xff]  ;;  %v24600_v2 = vld [vmem:[#allocation9_spill] sm:$0xff]  ;;  %v24601_v50 = vld [vmem:[#allocation19_spill] sm:$0xff] }
 0x155   :  { %v1586_v0 = vmul.f32 %v24595_v61, %v19573_v39  ;;  %24597 = vst [vmem:[#allocation42_spill] sm:$0xff] %v19631_v16  ;;  %v19635_v15 = vmul.f32 %v24598_v5, %v19619_v40  ;;  %v19641_v37 = vmul.f32 %v24600_v2, %v19247_v62  ;;  %1199 = vmatpush1.bf16.msra.mxu1 %v16490_v17  ;;  %v16504_v61 = vld [vmem:[%s24433_s4 + $0xc4] ss:$8 sps:$4 sm:$0xff]   ;;  %v16507_v5 = vld [vmem:[%s24433_s4 + $0x234] ss:$8 sps:$4 sm:$0xff]   ;;  %v24602_v62 = vrot.slane %v19250_v35, 3 }
 0x156   :  { %13668 = vmatmul.mubr.msk.bf16.gmra.mxu0 %vm787_vm2, %v1288_v48  ;;  %v1587_v7 = vmul.f32 %v24601_v50, %v1559_v33  ;;  %v689_v34 = vpack.c.bf16 %v687_v55, %v686_v63  ;;  %1200 = vmatprep.subr.bf16.mxu1 %v16498_v6  ;;  %v24603_v17 = vrot.slane %v19222_v41, 3  ;;  %v1715_v55 = vsel %vm1712_vm7, %v1708_v28, %v1709_v49  ;;  %v24604_v50 = vld [vmem:[#allocation26_spill] sm:$0xff] }
 0x157   :  { %24599 = vst [vmem:[#allocation15_spill] sm:$0xff] %v19635_v15  ;;  %1660 = vmatpush1.bf16.msra.mxu0 %v16493_v13  ;;  %v1131_v33 = vpack.c.bf16 %v19641_v37, %v19602_v51  ;;  %1679 = vmatprep.mubr.bf16.mxu0 %v24564_v24  ;;  %v19667_v13 = vsel %vm1712_vm7, %v1711_v31, %v1708_v28  ;;  %v1867_v63 = vrot.slane %v19250_v35, 5  ;;  %v24605_v37 = vld [vmem:[#allocation25_spill] sm:$0xff]  ;;  %v16505_v28 = vld [vmem:[%s24433_s4 + $0x230] ss:$8 sps:$4 sm:$0xff]  }
 0x158   :  { %v1557_v48 = vsel %vm1556_vm5, %v24603_v17, %v24602_v62  ;;  %1661 = vmatprep.subr.bf16.mxu0 %v16501_v29  ;;  %13602 = vmatmul.mubr.msk.bf16.gmra.mxu1 %vm787_vm2, %v689_v34  ;;  %v1590_v6 = vpack.c.bf16 %v1587_v7, %v1586_v0  ;;  %v19673_v62 = vmul.f32 %v24604_v50, %v19667_v13  ;;  %v16502_v29 = vld [vmem:[%s24433_s4 + $0xc0] ss:$8 sps:$4 sm:$0xff]   ;;  %v24606_v7 = vld [vmem:[#allocation23_spill] sm:$0xff]  ;;  %v16513_v50 = vld [vmem:[%s24433_s4 + $0x224] ss:$8 sps:$4 sm:$0xff]  }
 0x159   :  { %v19676_v51 = vmul.f32 %v24605_v37, %v1715_v55  ;;  %1201 = vmatpush1.bf16.msra.mxu1 %v16496_v8  ;;  %1220 = vmatprep.mubr.bf16.mxu1 %v24564_v24  ;;  %v19686_v0 = vmul.f32 %v24606_v7, %v1557_v48  ;;  %v19690_v34 = vsel %vm1712_vm7, %v1710_v46, %v1711_v31  ;;  %v16510_v17 = vld [vmem:[%s24433_s4 + $0x174] ss:$8 sps:$4 sm:$0xff]   ;;  %v24607_v7 = vld [vmem:[#allocation30_spill] sm:$0xff]  ;;  %v24608_v31 = vld [vmem:[#allocation29_spill] sm:$0xff] }
 0x15a   :  { %v1714_v8 = vsel %vm1712_vm7, %v1709_v49, %v1710_v46  ;;  %1202 = vmatprep.subr.bf16.mxu1 %v16504_v61  ;;  %v19707_v16 = vmul.f32 %v24608_v31, %v19690_v34  ;;  %v16508_v49 = vld [vmem:[%s24433_s4 + $0x170] ss:$8 sps:$4 sm:$0xff]   ;;  %v24614_v31 = vrot.slane %v19211_v47, 5  ;;  %v16516_v47 = vld [vmem:[%s24433_s4 + $0x164] ss:$8 sps:$4 sm:$0xff]  }
 0x15b   :  { %1662 = vmatpush1.bf16.msra.mxu0 %v16499_v18  ;;  %v19703_v2 = vmul.f32 %v24607_v7, %v1714_v8  ;;  %v24609_v46 = vld [vmem:[#allocation24_spill] sm:$0xff]  ;;  %v24610_v61 = vld [vmem:[#allocation55_spill] sm:$0xff]  ;;  %v19718_v37 = vmul.f32 %v24612_v57, %v1714_v8  ;;  %v24613_v7 = vld [vmem:[#allocation41_spill] sm:$0xff] }
 0x15c   :  { %1967 = vmatprep.subr.bf16.mxu0 %v16507_v5  ;;  %v1588_v18 = vmul.f32 %v24609_v46, %v19550_v9  ;;  %v19715_v15 = vmul.f32 %v24610_v61, %v1715_v55  ;;  %v19722_v21 = vmul.f32 %v24613_v7, %v19213_v11  ;;  %v16511_v5 = vld [vmem:[%s24433_s4 + $0x220] ss:$8 sps:$4 sm:$0xff]   ;;  %v19731_v26 = vsel %vm1868_vm6, %v1867_v63, %v24614_v31  ;;  %v16519_v46 = vld [vmem:[%s24433_s4 + $0x214] ss:$8 sps:$4 sm:$0xff]  }
 0x15d   :  { %v24615_v9 = vrot.slane %v19222_v41, 5  ;;  %v24616_v55 = vld [vmem:[#allocation44_spill] sm:$0xff]  ;;  %1203 = vmatpush1.bf16.msra.mxu1 %v16502_v29  ;;  %v24618_v29 = vld [vmem:[#allocation38_spill] sm:$0xff]  ;;  %v19834_v11 = vmul.f32 %v19184_v12, %v19544_v56 }
 0x15e   :  { %24611 = vst [vmem:[#allocation13_spill] sm:$0xff] %v19715_v15  ;;  %v19743_v8 = vmul.f32 %v24616_v55, %v19222_v41  ;;  %13711 = vmatmul.mubr.msk.bf16.vlgmr.msra.gmra.mxu0 %vm787_vm2, %v1590_v6  ;;  %v24617_v41 = vld [vmem:[#allocation43_spill] sm:$0xff]  ;;  %1499 = vmatprep.subr.bf16.mxu1 %v16510_v17  ;;  %v1591_v6 = vpack.c.bf16 %v19686_v0, %v1588_v18  ;;  %v24621_v0 = vld [vmem:[#allocation45_spill] sm:$0xff]  ;;  %v24629_v12 = vld [vmem:[#allocation58_spill] sm:$0xff] }
 0x15f   :  { %v19737_v57 = vsel %vm1868_vm6, %v24615_v9, %v1867_v63  ;;  %v19758_v7 = vmul.f32 %v24617_v41, %v19250_v35  ;;  %1968 = vmatpush1.bf16.msra.mxu0 %v16505_v28  ;;  %v19763_v31 = vmul.f32 %v24618_v29, %v19544_v56  ;;  %v24619_v9 = vld [vmem:[#allocation37_spill] sm:$0xff]  ;;  %1689 = vmatprep.mubr.bf16.mxu0 %v24564_v24  ;;  %v24620_v35 = vld [vmem:[#allocation46_spill] sm:$0xff]  ;;  %v24623_v29 = vld [vmem:[#allocation52_spill] sm:$0xff] }
 0x160   :  { %v19767_v55 = vmul.f32 %v24619_v9, %v19476_v53  ;;  %1969 = vmatprep.subr.bf16.mxu0 %v16513_v50  ;;  %v19774_v28 = vmul.f32 %v24620_v35, %v19366_v1  ;;  %v19778_v17 = vmul.f32 %v24621_v0, %v19455_v14  ;;  %13645 = vmatmul.mubr.msk.bf16.vlgmr.msra.gmra.mxu1 %vm787_vm2, %v1131_v33  ;;  %v24622_v41 = vld [vmem:[#allocation53_spill] sm:$0xff]  ;;  %v16517_v33 = vld [vmem:[%s24433_s4 + $0x210] ss:$8 sps:$4 sm:$0xff]  }
 0x161   :  { %v19784_v50 = vmul.f32 %v24622_v41, %v1557_v48  ;;  %v19788_v9 = vmul.f32 %v24623_v29, %v19573_v39  ;;  %v24624_v63 = vld [vmem:[#allocation61_spill] sm:$0xff]  ;;  %1500 = vmatpush1.bf16.msra.mxu1 %v16508_v49  ;;  %1230 = vmatprep.mubr.bf16.mxu1 %v24564_v24  ;;  %v24625_v39 = vld [vmem:[#allocation60_spill] sm:$0xff]  ;;  %v19855_v15 = vmul.f32 %v24629_v12, %v19667_v13 }
 0x162   :  { %v19792_v35 = vmul.f32 %v24624_v63, %v19737_v57  ;;  %v16514_v0 = vld [vmem:[%s24433_s4 + $0x160] ss:$8 sps:$4 sm:$0xff]   ;;  %v19805_v41 = vmul.f32 %v24625_v39, %v19731_v26  ;;  %v24626_v63 = vld [vmem:[#allocation51_spill] sm:$0xff]  ;;  %1501 = vmatprep.subr.bf16.mxu1 %v16516_v47  ;;  %v16525_v18 = vld [vmem:[%s24433_s4 + $0x204] ss:$8 sps:$4 sm:$0xff]   ;;  %v19884_v48 = vmul.f32 %v19195_v3, %v19482_v43 }
 0x163   :  { %v19809_v49 = vmul.f32 %v24626_v63, %v19366_v1  ;;  %1970 = vmatpush1.bf16.msra.mxu0 %v16511_v5  ;;  %v16522_v29 = vld [vmem:[%s24433_s4 + $0x154] ss:$8 sps:$4 sm:$0xff]   ;;  %v24627_v39 = vld [vmem:[#allocation50_spill] sm:$0xff]  ;;  %v19825_v63 = vmul.f32 %v19186_v27, %v19567_v36  ;;  %v19842_v27 = vmul.f32 %v19204_v45, %v19482_v43 }
 0x164   :  { %v19821_v61 = vmul.f32 %v24627_v39, %v19455_v14  ;;  %1971 = vmatprep.subr.bf16.mxu0 %v16519_v46  ;;  %v16520_v5 = vld [vmem:[%s24433_s4 + $0x150] ss:$8 sps:$4 sm:$0xff]   ;;  %v19838_v39 = vmul.f32 %v19206_v23, %v19476_v53  ;;  %v16523_v46 = vld [vmem:[%s24433_s4 + $0x200] ss:$8 sps:$4 sm:$0xff]   ;;  %v19859_v23 = vmul.f32 %v19175_v32, %v19567_v36  ;;  %v16528_v45 = vld [vmem:[%s24433_s4 + $0x144] ss:$8 sps:$4 sm:$0xff]  }
 0x165   :  { %v24628_v47 = vld [vmem:[#allocation59_spill] sm:$0xff]  ;;  %1502 = vmatpush1.bf16.msra.mxu1 %v16514_v0  ;;  %v24630_v32 = vld [vmem:[#allocation62_spill] sm:$0xff]  ;;  %v19880_v0 = vmul.f32 %v19197_v19, %v19476_v53  ;;  %v24631_v13 = vld [vmem:[#allocation28_spill] sm:$0xff] }
 0x166   :  { %v19851_v22 = vmul.f32 %v24628_v47, %v19690_v34  ;;  %13712 = vmatmul.mubr.msk.bf16.gmra.mxu0 %vm787_vm2, %v1591_v6  ;;  %v16531_v34 = vld [vmem:[%s24433_s4 + $0x2b4] ss:$8 sps:$4 sm:$0xff]   ;;  %v3666_v47 = vpack.c.bf16 %v19834_v11, %v19825_v63  ;;  %v19874_v12 = vmul.f32 %v24630_v32, %v19544_v56  ;;  %1503 = vmatprep.subr.bf16.mxu1 %v16522_v29  ;;  %v16526_v3 = vld [vmem:[%s24433_s4 + $0x140] ss:$8 sps:$4 sm:$0xff]   ;;  %v16685_v11 = vld [vmem:[%s24433_s4 + $0x590] ss:$8 sps:$4 sm:$0xff]  }
 0x167   :  { %1972 = vmatpush1.bf16.msra.mxu0 %v16517_v33  ;;  %1991 = vmatprep.mubr.bf16.mxu0 %v24564_v24  ;;  %v1898_v32 = vmul.f32 %v24631_v13, %v19731_v26  ;;  %v24632_v29 = vpack.c.bf16 %v19555_v52, %v19598_v4  ;;  %v16529_v26 = vld [vmem:[%s24433_s4 + $0x2b0] ss:$8 sps:$4 sm:$0xff]   ;;  %v16537_v13 = vld [vmem:[%s24433_s4 + $0x2a4] ss:$8 sps:$4 sm:$0xff]   ;;  %v16690_v63 = vld [vmem:[%s24433_s4 + $0x4d4] ss:$8 sps:$4 sm:$0xff]  }
 0x168   :  { %1973 = vmatprep.subr.bf16.mxu0 %v16525_v18  ;;  %v3519_v33 = vpack.c.bf16 %v19874_v12, %v19859_v23  ;;  %v24633_v18 = vld [vmem:[#allocation27_spill] sm:$0xff]  ;;  %v24634_v4 = vld [vmem:[#allocation18_spill] sm:$0xff] }
 0x169   :  { %13646 = vmatmul.mubr.msk.bf16.gmra.mxu1 %vm787_vm2, %v24632_v29  ;;  %v1899_v6 = vmul.f32 %v24633_v18, %v19593_v10  ;;  %v1430_v52 = vmul.f32 %v24634_v4, %v19455_v14  ;;  %v16532_v29 = vld [vmem:[%s24433_s4 + $0x1f0] ss:$8 sps:$4 sm:$0xff]   ;;  %v24635_v18 = vld [vmem:[#allocation17_spill] sm:$0xff] }
 0x16a   :  { %1504 = vmatpush1.bf16.msra.mxu1 %v16520_v5  ;;  %1523 = vmatprep.mubr.bf16.mxu1 %v24564_v24  ;;  %v16534_v5 = vld [vmem:[%s24433_s4 + $0x1f4] ss:$8 sps:$4 sm:$0xff]   ;;  %v1431_v19 = vmul.f32 %v24635_v18, %v19401_v59  ;;  %v16535_v14 = vld [vmem:[%s24433_s4 + $0x2a0] ss:$8 sps:$4 sm:$0xff]   ;;  %v16549_v4 = vld [vmem:[%s24433_s4 + $0x284] ss:$8 sps:$4 sm:$0xff]  }
 0x16b   :  { %1974 = vmatpush1.bf16.msra.mxu0 %v16523_v46  ;;  %1505 = vmatprep.subr.bf16.mxu1 %v16528_v45  ;;  %v1902_v10 = vpack.c.bf16 %v1899_v6, %v1898_v32  ;;  %v16540_v46 = vld [vmem:[%s24433_s4 + $0x1e4] ss:$8 sps:$4 sm:$0xff]   ;;  %v16543_v45 = vld [vmem:[%s24433_s4 + $0x294] ss:$8 sps:$4 sm:$0xff]   ;;  %v16538_v32 = vld [vmem:[%s24433_s4 + $0x1e0] ss:$8 sps:$4 sm:$0xff]  }
 0x16c   :  { %2261 = vmatprep.subr.bf16.mxu0 %v16531_v34  ;;  %v1434_v34 = vpack.c.bf16 %v1431_v19, %v1430_v52  ;;  %v24636_v59 = vld [vmem:[#allocation31_spill] sm:$0xff]  ;;  %v24637_v19 = vld [vmem:[#allocation32_spill] sm:$0xff]  ;;  %v24638_v52 = vld [vmem:[#allocation21_spill] sm:$0xff] }
 0x16d   :  { %v1901_v6 = vmul.f32 %v24636_v59, %v19737_v57  ;;  %v16546_v57 = vld [vmem:[%s24433_s4 + $0x1d4] ss:$8 sps:$4 sm:$0xff]   ;;  %v16547_v18 = vld [vmem:[%s24433_s4 + $0x280] ss:$8 sps:$4 sm:$0xff]   ;;  %v16553_v59 = vld [vmem:[%s24433_s4 + $0x330] ss:$8 sps:$4 sm:$0xff]  }
 0x16e   :  { %1506 = vmatpush1.bf16.msra.mxu1 %v16526_v3  ;;  %13755 = vmatmul.mubr.msk.bf16.vlgmr.msra.gmra.mxu0 %vm787_vm2, %v1902_v10  ;;  %v16541_v3 = vld [vmem:[%s24433_s4 + $0x290] ss:$8 sps:$4 sm:$0xff]   ;;  %v16715_v12 = vld [vmem:[%s24433_s4 + $0x600] ss:$8 sps:$4 sm:$0xff]  }
 0x16f   :  { %2262 = vmatpush1.bf16.msra.mxu0 %v16529_v26  ;;  %1811 = vmatprep.subr.bf16.mxu1 %v16534_v5  ;;  %v1900_v26 = vmul.f32 %v24637_v19, %v19619_v40  ;;  %v1433_v5 = vmul.f32 %v24638_v52, %v19366_v1  ;;  %v16544_v40 = vld [vmem:[%s24433_s4 + $0x1d0] ss:$8 sps:$4 sm:$0xff]   ;;  %v16555_v1 = vld [vmem:[%s24433_s4 + $0x334] ss:$8 sps:$4 sm:$0xff]   ;;  %v16561_v19 = vld [vmem:[%s24433_s4 + $0x324] ss:$8 sps:$4 sm:$0xff]  }
 0x170   :  { %2263 = vmatprep.subr.bf16.mxu0 %v16537_v13  ;;  %2001 = vmatprep.mubr.bf16.mxu0 %v24564_v24  ;;  %v24639_v10 = vld [vmem:[#allocation22_spill] sm:$0xff] }
 0x171   :  { %13689 = vmatmul.mubr.msk.bf16.vlgmr.msra.gmra.mxu1 %vm787_vm2, %v1434_v34  ;;  %v1903_v13 = vpack.c.bf16 %v1901_v6, %v1900_v26  ;;  %v16550_v34 = vld [vmem:[%s24433_s4 + $0x1c0] ss:$8 sps:$4 sm:$0xff]   ;;  %v24641_v6 = vld [vmem:[#allocation35_spill] sm:$0xff]  ;;  %v16564_v52 = vld [vmem:[%s24433_s4 + $0x264] ss:$8 sps:$4 sm:$0xff]  }
 0x172   :  { %1812 = vmatpush1.bf16.msra.mxu1 %v16532_v29  ;;  %1533 = vmatprep.mubr.bf16.mxu1 %v24564_v24  ;;  %v1432_v29 = vmul.f32 %v24639_v10, %v19336_v58  ;;  %v24640_v58 = vld [vmem:[#allocation36_spill] sm:$0xff] }
 0x173   :  { %2264 = vmatpush1.bf16.msra.mxu0 %v16535_v14  ;;  %1813 = vmatprep.subr.bf16.mxu1 %v16540_v46  ;;  %v16552_v14 = vld [vmem:[%s24433_s4 + $0x1c4] ss:$8 sps:$4 sm:$0xff]   ;;  %v16712_v23 = vld [vmem:[%s24433_s4 + $0x550] ss:$8 sps:$4 sm:$0xff]  }
 0x174   :  { %2265 = vmatprep.subr.bf16.mxu0 %v16543_v45  ;;  %v1435_v46 = vpack.c.bf16 %v1433_v5, %v1432_v29  ;;  %v2192_v45 = vmul.f32 %v24640_v58, %v19482_v43  ;;  %v16567_v5 = vld [vmem:[%s24433_s4 + $0x314] ss:$8 sps:$4 sm:$0xff]   ;;  %v24643_v29 = vpack.c.bf16 %v19676_v51, %v19673_v62  ;;  %v16568_v51 = vld [vmem:[%s24433_s4 + $0x250] ss:$8 sps:$4 sm:$0xff]   ;;  %v16571_v58 = vld [vmem:[%s24433_s4 + $0x300] ss:$8 sps:$4 sm:$0xff]  }
 0x176   :  { %1814 = vmatpush1.bf16.msra.mxu1 %v16538_v32  ;;  %13756 = vmatmul.mubr.msk.bf16.gmra.mxu0 %vm787_vm2, %v1903_v13  ;;  %v2193_v32 = vmul.f32 %v24641_v6, %v19567_v36  ;;  %v16562_v13 = vld [vmem:[%s24433_s4 + $0x260] ss:$8 sps:$4 sm:$0xff]   ;;  %v16577_v6 = vld [vmem:[%s24433_s4 + $0x3b0] ss:$8 sps:$4 sm:$0xff]  }
 0x177   :  { %2266 = vmatpush1.bf16.msra.mxu0 %v16541_v3  ;;  %1815 = vmatprep.subr.bf16.mxu1 %v16546_v57  ;;  %v16558_v3 = vld [vmem:[%s24433_s4 + $0x274] ss:$8 sps:$4 sm:$0xff]   ;;  %v16556_v57 = vld [vmem:[%s24433_s4 + $0x270] ss:$8 sps:$4 sm:$0xff]  }
 0x178   :  { %2267 = vmatprep.subr.bf16.mxu0 %v16549_v4  ;;  %2285 = vmatprep.mubr.bf16.mxu0 %v24564_v24  ;;  %v2196_v26 = vpack.c.bf16 %v2193_v32, %v2192_v45  ;;  %v16559_v4 = vld [vmem:[%s24433_s4 + $0x320] ss:$8 sps:$4 sm:$0xff]   ;;  %v16579_v45 = vld [vmem:[%s24433_s4 + $0x3b4] ss:$8 sps:$4 sm:$0xff]  }
 0x179   :  { %13690 = vmatmul.mubr.msk.bf16.gmra.mxu1 %vm787_vm2, %v1435_v46  ;;  %v16582_v32 = vld [vmem:[%s24433_s4 + $0x2f4] ss:$8 sps:$4 sm:$0xff]  }
 0x17a   :  { %1816 = vmatpush1.bf16.msra.mxu1 %v16544_v40  ;;  %1835 = vmatprep.mubr.bf16.mxu1 %v24564_v24  ;;  %v24642_v40 = vld [vmem:[#allocation39_spill] sm:$0xff] }
 0x17b   :  { %2268 = vmatpush1.bf16.msra.mxu0 %v16547_v18  ;;  %1817 = vmatprep.subr.bf16.mxu1 %v16552_v14  ;;  %v2195_v10 = vmul.f32 %v24642_v40, %v19476_v53  ;;  %v16565_v18 = vld [vmem:[%s24433_s4 + $0x310] ss:$8 sps:$4 sm:$0xff]   ;;  %v16570_v14 = vld [vmem:[%s24433_s4 + $0x254] ss:$8 sps:$4 sm:$0xff]   ;;  %v16573_v53 = vld [vmem:[%s24433_s4 + $0x304] ss:$8 sps:$4 sm:$0xff]  }
 0x17c   :  { %2555 = vmatprep.subr.bf16.mxu0 %v16555_v1  ;;  %v24644_v1 = vld [vmem:[#allocation40_spill] sm:$0xff]  ;;  %v16597_v40 = vld [vmem:[%s24433_s4 + $0x384] ss:$8 sps:$4 sm:$0xff]  }
 0x17d   :  { %v2194_v46 = vmul.f32 %v24644_v1, %v19544_v56  ;;  %v16576_v56 = vld [vmem:[%s24433_s4 + $0x244] ss:$8 sps:$4 sm:$0xff]   ;;  %v16603_v1 = vld [vmem:[%s24433_s4 + $0x434] ss:$8 sps:$4 sm:$0xff]  }
 0x17e   :  { %1818 = vmatpush1.bf16.msra.mxu1 %v16550_v34  ;;  %13799 = vmatmul.mubr.msk.bf16.vlgmr.msra.gmra.mxu0 %vm787_vm2, %v2196_v26  ;;  %v16574_v34 = vld [vmem:[%s24433_s4 + $0x240] ss:$8 sps:$4 sm:$0xff]  }
 0x17f   :  { %2556 = vmatpush1.bf16.msra.mxu0 %v16553_v59  ;;  %2114 = vmatprep.subr.bf16.mxu1 %v16558_v3  ;;  %v2197_v62 = vpack.c.bf16 %v2195_v10, %v2194_v46  ;;  %v24645_v59 = vpack.c.bf16 %v19707_v16, %v19703_v2  ;;  %v16585_v3 = vld [vmem:[%s24433_s4 + $0x3a4] ss:$8 sps:$4 sm:$0xff]   ;;  %v16592_v10 = vld [vmem:[%s24433_s4 + $0x2d0] ss:$8 sps:$4 sm:$0xff]   ;;  %v16598_v46 = vld [vmem:[%s24433_s4 + $0x2c0] ss:$8 sps:$4 sm:$0xff]  }
 0x180   :  { %2557 = vmatprep.subr.bf16.mxu0 %v16561_v19  ;;  %2295 = vmatprep.mubr.bf16.mxu0 %v24564_v24  ;;  %v24646_v16 = vld [vmem:[#allocation34_spill] sm:$0xff]  ;;  %v24647_v26 = vld [vmem:[#allocation33_spill] sm:$0xff] }
 0x181   :  { %13733 = vmatmul.mubr.msk.bf16.vlgmr.msra.gmra.mxu1 %vm787_vm2, %v24643_v29  ;;  %v2045_v2 = vmul.f32 %v24646_v16, %v19482_v43  ;;  %v16580_v19 = vld [vmem:[%s24433_s4 + $0x2f0] ss:$8 sps:$4 sm:$0xff]   ;;  %v24648_v43 = vpack.c.bf16 %v19722_v21, %v19532_v42  ;;  %v16594_v42 = vld [vmem:[%s24433_s4 + $0x2d4] ss:$8 sps:$4 sm:$0xff]   ;;  %v16595_v29 = vld [vmem:[%s24433_s4 + $0x380] ss:$8 sps:$4 sm:$0xff]  }
 0x182   :  { %2115 = vmatpush1.bf16.msra.mxu1 %v16556_v57  ;;  %1845 = vmatprep.mubr.bf16.mxu1 %v24564_v24  ;;  %v2046_v57 = vmul.f32 %v24647_v26, %v19567_v36  ;;  %v16589_v21 = vld [vmem:[%s24433_s4 + $0x390] ss:$8 sps:$4 sm:$0xff]   ;;  %v16622_v16 = vld [vmem:[%s24433_s4 + $0x340] ss:$8 sps:$4 sm:$0xff]   ;;  %v16636_v26 = vld [vmem:[%s24433_s4 + $0x3e4] ss:$8 sps:$4 sm:$0xff]  }
 0x183   :  { %2558 = vmatpush1.bf16.msra.mxu0 %v16559_v4  ;;  %2116 = vmatprep.subr.bf16.mxu1 %v16564_v52  ;;  %v16583_v4 = vld [vmem:[%s24433_s4 + $0x3a0] ss:$8 sps:$4 sm:$0xff]   ;;  %v16588_v52 = vld [vmem:[%s24433_s4 + $0x2e4] ss:$8 sps:$4 sm:$0xff]  }
 0x184   :  { %2559 = vmatprep.subr.bf16.mxu0 %v16567_v5  ;;  %v16591_v5 = vld [vmem:[%s24433_s4 + $0x394] ss:$8 sps:$4 sm:$0xff]   ;;  %v2049_v36 = vpack.c.bf16 %v2046_v57, %v2045_v2  ;;  %v24654_v2 = vpack.c.bf16 %v19313_v30, %v19276_v44  ;;  %v16628_v44 = vld [vmem:[%s24433_s4 + $0x3f0] ss:$8 sps:$4 sm:$0xff]   ;;  %v16631_v30 = vld [vmem:[%s24433_s4 + $0x4a0] ss:$8 sps:$4 sm:$0xff]  }
 0x185   :  { %v24655_v57 = vld [vmem:[#allocation5_spill] sm:$0xff] }
 0x186   :  { %2117 = vmatpush1.bf16.msra.mxu1 %v16562_v13  ;;  %13800 = vmatmul.mubr.msk.bf16.gmra.mxu0 %vm787_vm2, %v2197_v62  ;;  %v16586_v13 = vld [vmem:[%s24433_s4 + $0x2e0] ss:$8 sps:$4 sm:$0xff]   ;;  %v16609_v62 = vld [vmem:[%s24433_s4 + $0x424] ss:$8 sps:$4 sm:$0xff]  }
 0x187   :  { %2560 = vmatpush1.bf16.msra.mxu0 %v16565_v18  ;;  %2118 = vmatprep.subr.bf16.mxu1 %v16570_v14  ;;  %v16600_v18 = vld [vmem:[%s24433_s4 + $0x2c4] ss:$8 sps:$4 sm:$0xff]   ;;  %v24649_v14 = vpack.c.bf16 %v19758_v7, %v19743_v8  ;;  %v16601_v8 = vld [vmem:[%s24433_s4 + $0x430] ss:$8 sps:$4 sm:$0xff]   ;;  %v16606_v7 = vld [vmem:[%s24433_s4 + $0x374] ss:$8 sps:$4 sm:$0xff]  }
 0x188   :  { %2561 = vmatprep.subr.bf16.mxu0 %v16573_v53  ;;  %2579 = vmatprep.mubr.bf16.mxu0 %v24564_v24  ;;  %v24650_v53 = vpack.c.bf16 %v19767_v55, %v19763_v31  ;;  %v16604_v31 = vld [vmem:[%s24433_s4 + $0x370] ss:$8 sps:$4 sm:$0xff]   ;;  %v16607_v55 = vld [vmem:[%s24433_s4 + $0x420] ss:$8 sps:$4 sm:$0xff]  }
 0x189   :  { %13734 = vmatmul.mubr.msk.bf16.gmra.mxu1 %vm787_vm2, %v24645_v59  ;;  %v16621_v59 = vld [vmem:[%s24433_s4 + $0x404] ss:$8 sps:$4 sm:$0xff]  }
 0x18a   :  { %2119 = vmatpush1.bf16.msra.mxu1 %v16568_v51  ;;  %2138 = vmatprep.mubr.bf16.mxu1 %v24564_v24  ;;  %v16612_v51 = vld [vmem:[%s24433_s4 + $0x364] ss:$8 sps:$4 sm:$0xff]  }
 0x18b   :  { %2562 = vmatpush1.bf16.msra.mxu0 %v16571_v58  ;;  %2120 = vmatprep.subr.bf16.mxu1 %v16576_v56  ;;  %v24651_v58 = vpack.c.bf16 %v19370_v54, %v19427_v38  ;;  %v16615_v56 = vld [vmem:[%s24433_s4 + $0x414] ss:$8 sps:$4 sm:$0xff]   ;;  %v16613_v54 = vld [vmem:[%s24433_s4 + $0x410] ss:$8 sps:$4 sm:$0xff]  }
 0x18c   :  { %2849 = vmatprep.subr.bf16.mxu0 %v16579_v45  ;;  %v16610_v45 = vld [vmem:[%s24433_s4 + $0x360] ss:$8 sps:$4 sm:$0xff]   ;;  %v16618_v38 = vld [vmem:[%s24433_s4 + $0x354] ss:$8 sps:$4 sm:$0xff]  }
 0x18e   :  { %2121 = vmatpush1.bf16.msra.mxu1 %v16574_v34  ;;  %13843 = vmatmul.mubr.msk.bf16.vlgmr.msra.gmra.mxu0 %vm787_vm2, %v24648_v43  ;;  %v24652_v34 = vpack.c.bf16 %v19266_v25, %v19304_v20  ;;  %v16616_v25 = vld [vmem:[%s24433_s4 + $0x350] ss:$8 sps:$4 sm:$0xff]   ;;  %v16619_v20 = vld [vmem:[%s24433_s4 + $0x400] ss:$8 sps:$4 sm:$0xff]  }
 0x18f   :  { %2850 = vmatpush1.bf16.msra.mxu0 %v16577_v6  ;;  %2408 = vmatprep.subr.bf16.mxu1 %v16582_v32  ;;  %v16624_v6 = vld [vmem:[%s24433_s4 + $0x344] ss:$8 sps:$4 sm:$0xff]   ;;  %v24653_v32 = vpack.c.bf16 %v19778_v17, %v19774_v28  ;;  %v16625_v28 = vld [vmem:[%s24433_s4 + $0x4b0] ss:$8 sps:$4 sm:$0xff]   ;;  %v16630_v17 = vld [vmem:[%s24433_s4 + $0x3f4] ss:$8 sps:$4 sm:$0xff]  }
 0x190   :  { %2851 = vmatprep.subr.bf16.mxu0 %v16585_v3  ;;  %2589 = vmatprep.mubr.bf16.mxu0 %v24564_v24  ;;  %v16627_v3 = vld [vmem:[%s24433_s4 + $0x4b4] ss:$8 sps:$4 sm:$0xff]   ;;  %v16634_v43 = vld [vmem:[%s24433_s4 + $0x3e0] ss:$8 sps:$4 sm:$0xff]  }
 0x191   :  { %13777 = vmatmul.mubr.msk.bf16.vlgmr.msra.gmra.mxu1 %vm787_vm2, %v2049_v36  ;;  %v24658_v36 = vld [vmem:[#allocation73_spill] sm:$0xff] }
 0x192   :  { %2409 = vmatpush1.bf16.msra.mxu1 %v16580_v19  ;;  %2148 = vmatprep.mubr.bf16.mxu1 %v24564_v24  ;;  %v16633_v19 = vld [vmem:[%s24433_s4 + $0x4a4] ss:$8 sps:$4 sm:$0xff]  }
 0x193   :  { %2852 = vmatpush1.bf16.msra.mxu0 %v16583_v4  ;;  %2410 = vmatprep.subr.bf16.mxu1 %v16588_v52  ;;  %v24656_v4 = vpack.c.bf16 %v19587_v60, %v24655_v57  ;;  %v16639_v52 = vld [vmem:[%s24433_s4 + $0x494] ss:$8 sps:$4 sm:$0xff]   ;;  %v16637_v60 = vld [vmem:[%s24433_s4 + $0x490] ss:$8 sps:$4 sm:$0xff]   ;;  %v16682_v57 = vld [vmem:[%s24433_s4 + $0x4e0] ss:$8 sps:$4 sm:$0xff]  }
 0x194   :  { %2853 = vmatprep.subr.bf16.mxu0 %v16591_v5  ;;  %v24657_v5 = vld [vmem:[#allocation68_spill] sm:$0xff] }
 0x196   :  { %2411 = vmatpush1.bf16.msra.mxu1 %v16586_v13  ;;  %13844 = vmatmul.mubr.msk.bf16.gmra.mxu0 %vm787_vm2, %v24649_v14  ;;  %v24659_v13 = vpack.c.bf16 %v24657_v5, %v24658_v36  ;;  %v16651_v14 = vld [vmem:[%s24433_s4 + $0x534] ss:$8 sps:$4 sm:$0xff]   ;;  %v16696_v5 = vld [vmem:[%s24433_s4 + $0x4c4] ss:$8 sps:$4 sm:$0xff]   ;;  %v24674_v36 = vpack.c.bf16 %v19842_v27, %v19838_v39  ;;  %v16697_v39 = vld [vmem:[%s24433_s4 + $0x630] ss:$8 sps:$4 sm:$0xff]  }
 0x197   :  { %2854 = vmatpush1.bf16.msra.mxu0 %v16589_v21  ;;  %2412 = vmatprep.subr.bf16.mxu1 %v16594_v42  ;;  %v16642_v21 = vld [vmem:[%s24433_s4 + $0x3d4] ss:$8 sps:$4 sm:$0xff]   ;;  %v16645_v42 = vld [vmem:[%s24433_s4 + $0x484] ss:$8 sps:$4 sm:$0xff]  }
 0x198   :  { %2855 = vmatprep.subr.bf16.mxu0 %v16597_v40  ;;  %2873 = vmatprep.mubr.bf16.mxu0 %v24564_v24  ;;  %v16640_v40 = vld [vmem:[%s24433_s4 + $0x3d0] ss:$8 sps:$4 sm:$0xff]   ;;  %v16702_v27 = vld [vmem:[%s24433_s4 + $0x574] ss:$8 sps:$4 sm:$0xff]  }
 0x199   :  { %13778 = vmatmul.mubr.msk.bf16.gmra.mxu1 %vm787_vm2, %v24650_v53  ;;  %v24662_v53 = vld [vmem:[#allocation74_spill] sm:$0xff] }
 0x19a   :  { %2413 = vmatpush1.bf16.msra.mxu1 %v16592_v10  ;;  %2432 = vmatprep.mubr.bf16.mxu1 %v24564_v24  ;;  %v16643_v10 = vld [vmem:[%s24433_s4 + $0x480] ss:$8 sps:$4 sm:$0xff]  }
 0x19b   :  { %2856 = vmatpush1.bf16.msra.mxu0 %v16595_v29  ;;  %2414 = vmatprep.subr.bf16.mxu1 %v16600_v18  ;;  %v16648_v29 = vld [vmem:[%s24433_s4 + $0x3c4] ss:$8 sps:$4 sm:$0xff]   ;;  %v24660_v18 = vpack.c.bf16 %v19788_v9, %v19784_v50  ;;  %v16649_v50 = vld [vmem:[%s24433_s4 + $0x530] ss:$8 sps:$4 sm:$0xff]   ;;  %v16654_v9 = vld [vmem:[%s24433_s4 + $0x474] ss:$8 sps:$4 sm:$0xff]  }
 0x19c   :  { %3143 = vmatprep.subr.bf16.mxu0 %v16603_v1  ;;  %v16646_v1 = vld [vmem:[%s24433_s4 + $0x3c0] ss:$8 sps:$4 sm:$0xff]  }
 0x19e   :  { %2415 = vmatpush1.bf16.msra.mxu1 %v16598_v46  ;;  %13887 = vmatmul.mubr.msk.bf16.vlgmr.msra.gmra.mxu0 %vm787_vm2, %v24651_v58  ;;  %v24661_v46 = vld [vmem:[#allocation78_spill] sm:$0xff] }
 0x19f   :  { %3144 = vmatpush1.bf16.msra.mxu0 %v16601_v8  ;;  %2702 = vmatprep.subr.bf16.mxu1 %v16606_v7  ;;  %v24663_v8 = vpack.c.bf16 %v24661_v46, %v24662_v53  ;;  %v16657_v7 = vld [vmem:[%s24433_s4 + $0x524] ss:$8 sps:$4 sm:$0xff]   ;;  %v16709_v46 = vld [vmem:[%s24433_s4 + $0x610] ss:$8 sps:$4 sm:$0xff]   ;;  %v16714_v53 = vld [vmem:[%s24433_s4 + $0x554] ss:$8 sps:$4 sm:$0xff]  }
 0x1a0   :  { %3145 = vmatprep.subr.bf16.mxu0 %v16609_v62  ;;  %2883 = vmatprep.mubr.bf16.mxu0 %v24564_v24  ;;  %v16652_v62 = vld [vmem:[%s24433_s4 + $0x470] ss:$8 sps:$4 sm:$0xff]  }
 0x1a1   :  { %13821 = vmatmul.mubr.msk.bf16.vlgmr.msra.gmra.mxu1 %vm787_vm2, %v24652_v34  ;;  %v24665_v58 = vld [vmem:[#allocation42_spill] sm:$0xff] }
 0x1a2   :  { %2703 = vmatpush1.bf16.msra.mxu1 %v16604_v31  ;;  %2442 = vmatprep.mubr.bf16.mxu1 %v24564_v24  ;;  %v16655_v31 = vld [vmem:[%s24433_s4 + $0x520] ss:$8 sps:$4 sm:$0xff]  }
 0x1a3   :  { %3146 = vmatpush1.bf16.msra.mxu0 %v16607_v55  ;;  %2704 = vmatprep.subr.bf16.mxu1 %v16612_v51  ;;  %v16660_v55 = vld [vmem:[%s24433_s4 + $0x464] ss:$8 sps:$4 sm:$0xff]   ;;  %v24664_v51 = vld [vmem:[#allocation15_spill] sm:$0xff]  ;;  %v16658_v34 = vld [vmem:[%s24433_s4 + $0x460] ss:$8 sps:$4 sm:$0xff]  }
 0x1a4   :  { %3147 = vmatprep.subr.bf16.mxu0 %v16615_v56  ;;  %v24666_v56 = vpack.c.bf16 %v24664_v51, %v24665_v58  ;;  %v16721_v51 = vld [vmem:[%s24433_s4 + $0x5f0] ss:$8 sps:$4 sm:$0xff]   ;;  %v16726_v58 = vld [vmem:[%s24433_s4 + $0x5e4] ss:$8 sps:$4 sm:$0xff]  }
 0x1a6   :  { %2705 = vmatpush1.bf16.msra.mxu1 %v16610_v45  ;;  %13888 = vmatmul.mubr.msk.bf16.gmra.mxu0 %vm787_vm2, %v24653_v32  ;;  %v16663_v45 = vld [vmem:[%s24433_s4 + $0x514] ss:$8 sps:$4 sm:$0xff]   ;;  %v16664_v32 = vld [vmem:[%s24433_s4 + $0x450] ss:$8 sps:$4 sm:$0xff]  }
 0x1a7   :  { %3148 = vmatpush1.bf16.msra.mxu0 %v16613_v54  ;;  %2706 = vmatprep.subr.bf16.mxu1 %v16618_v38  ;;  %v24667_v54 = vld [vmem:[#allocation77_spill] sm:$0xff]  ;;  %v24668_v38 = vld [vmem:[#allocation47_spill] sm:$0xff] }
 0x1a8   :  { %3149 = vmatprep.subr.bf16.mxu0 %v16621_v59  ;;  %3167 = vmatprep.mubr.bf16.mxu0 %v24564_v24  ;;  %v24669_v59 = vpack.c.bf16 %v24667_v54, %v24668_v38  ;;  %v24687_v54 = vld [vmem:[#allocation67_spill] sm:$0xff] }
 0x1a9   :  { %13822 = vmatmul.mubr.msk.bf16.gmra.mxu1 %vm787_vm2, %v24654_v2  ;;  %v24670_v2 = vpack.c.bf16 %v19805_v41, %v19792_v35  ;;  %v16673_v35 = vld [vmem:[%s24433_s4 + $0x5b0] ss:$8 sps:$4 sm:$0xff]   ;;  %v16678_v41 = vld [vmem:[%s24433_s4 + $0x4f4] ss:$8 sps:$4 sm:$0xff]  }
 0x1aa   :  { %2707 = vmatpush1.bf16.msra.mxu1 %v16616_v25  ;;  %2726 = vmatprep.mubr.bf16.mxu1 %v24564_v24  ;;  %v16661_v25 = vld [vmem:[%s24433_s4 + $0x510] ss:$8 sps:$4 sm:$0xff]  }
 0x1ab   :  { %3150 = vmatpush1.bf16.msra.mxu0 %v16619_v20  ;;  %2708 = vmatprep.subr.bf16.mxu1 %v16624_v6  ;;  %v16666_v20 = vld [vmem:[%s24433_s4 + $0x454] ss:$8 sps:$4 sm:$0xff]   ;;  %v16669_v6 = vld [vmem:[%s24433_s4 + $0x504] ss:$8 sps:$4 sm:$0xff]  }
 0x1ac   :  { %3437 = vmatprep.subr.bf16.mxu0 %v16627_v3  ;;  %v16667_v3 = vld [vmem:[%s24433_s4 + $0x500] ss:$8 sps:$4 sm:$0xff]  }
 0x1ae   :  { %2709 = vmatpush1.bf16.msra.mxu1 %v16622_v16  ;;  %13931 = vmatmul.mubr.msk.bf16.vlgmr.msra.gmra.mxu0 %vm787_vm2, %v24656_v4  ;;  %v16672_v16 = vld [vmem:[%s24433_s4 + $0x444] ss:$8 sps:$4 sm:$0xff]  }
 0x1af   :  { %3438 = vmatpush1.bf16.msra.mxu0 %v16625_v28  ;;  %2996 = vmatprep.subr.bf16.mxu1 %v16630_v17  ;;  %v16675_v28 = vld [vmem:[%s24433_s4 + $0x5b4] ss:$8 sps:$4 sm:$0xff]   ;;  %v16670_v17 = vld [vmem:[%s24433_s4 + $0x440] ss:$8 sps:$4 sm:$0xff]  }
 0x1b0   :  { %3439 = vmatprep.subr.bf16.mxu0 %v16633_v19  ;;  %3177 = vmatprep.mubr.bf16.mxu0 %v24564_v24  ;;  %v24671_v19 = vpack.c.bf16 %v19821_v61, %v19809_v49  ;;  %v16676_v61 = vld [vmem:[%s24433_s4 + $0x4f0] ss:$8 sps:$4 sm:$0xff]   ;;  %v16679_v49 = vld [vmem:[%s24433_s4 + $0x5a0] ss:$8 sps:$4 sm:$0xff]  }
 0x1b1   :  { %13865 = vmatmul.mubr.msk.bf16.vlgmr.msra.gmra.mxu1 %vm787_vm2, %v24659_v13  ;;  %v24672_v4 = vld [vmem:[#allocation13_spill] sm:$0xff]  ;;  %v16699_v13 = vld [vmem:[%s24433_s4 + $0x634] ss:$8 sps:$4 sm:$0xff]  }
 0x1b2   :  { %2997 = vmatpush1.bf16.msra.mxu1 %v16628_v44  ;;  %2736 = vmatprep.mubr.bf16.mxu1 %v24564_v24  ;;  %v16681_v44 = vld [vmem:[%s24433_s4 + $0x5a4] ss:$8 sps:$4 sm:$0xff]  }
 0x1b3   :  { %3440 = vmatpush1.bf16.msra.mxu0 %v16631_v30  ;;  %2998 = vmatprep.subr.bf16.mxu1 %v16636_v26  ;;  %v16684_v30 = vld [vmem:[%s24433_s4 + $0x4e4] ss:$8 sps:$4 sm:$0xff]   ;;  %v16687_v26 = vld [vmem:[%s24433_s4 + $0x594] ss:$8 sps:$4 sm:$0xff]  }
 0x1b4   :  { %3441 = vmatprep.subr.bf16.mxu0 %v16639_v52  ;;  %v24673_v52 = vpack.c.bf16 %v19718_v37, %v24672_v4  ;;  %v16688_v37 = vld [vmem:[%s24433_s4 + $0x4d0] ss:$8 sps:$4 sm:$0xff]  }
 0x1b6   :  { %2999 = vmatpush1.bf16.msra.mxu1 %v16634_v43  ;;  %13932 = vmatmul.mubr.msk.bf16.gmra.mxu0 %vm787_vm2, %v24660_v18  ;;  %v16691_v43 = vld [vmem:[%s24433_s4 + $0x580] ss:$8 sps:$4 sm:$0xff]  }
 0x1b7   :  { %3442 = vmatpush1.bf16.msra.mxu0 %v16637_v60  ;;  %3000 = vmatprep.subr.bf16.mxu1 %v16642_v21  ;;  %v16694_v60 = vld [vmem:[%s24433_s4 + $0x4c0] ss:$8 sps:$4 sm:$0xff]   ;;  %v24675_v21 = vpack.c.bf16 %v19855_v15, %v19851_v22  ;;  %v16700_v22 = vld [vmem:[%s24433_s4 + $0x570] ss:$8 sps:$4 sm:$0xff]  }
 0x1b8   :  { %3443 = vmatprep.subr.bf16.mxu0 %v16645_v42  ;;  %3461 = vmatprep.mubr.bf16.mxu0 %v24564_v24  ;;  %v16705_v42 = vld [vmem:[%s24433_s4 + $0x624] ss:$8 sps:$4 sm:$0xff]   ;;  %v16703_v15 = vld [vmem:[%s24433_s4 + $0x620] ss:$8 sps:$4 sm:$0xff]  }
 0x1b9   :  { %13866 = vmatmul.mubr.msk.bf16.gmra.mxu1 %vm787_vm2, %v24663_v8  ;;  %v16717_v8 = vld [vmem:[%s24433_s4 + $0x604] ss:$8 sps:$4 sm:$0xff]  }
 0x1ba   :  { %3001 = vmatpush1.bf16.msra.mxu1 %v16640_v40  ;;  %3020 = vmatprep.mubr.bf16.mxu1 %v24564_v24  ;;  %v16708_v40 = vld [vmem:[%s24433_s4 + $0x564] ss:$8 sps:$4 sm:$0xff]  }
 0x1bb   :  { %3444 = vmatpush1.bf16.msra.mxu0 %v16643_v10  ;;  %3002 = vmatprep.subr.bf16.mxu1 %v16648_v29  ;;  %v24676_v10 = vld [vmem:[#allocation65_spill] sm:$0xff]  ;;  %v24677_v29 = vld [vmem:[#allocation64_spill] sm:$0xff] }
 0x1bc   :  { %3731 = vmatprep.subr.bf16.mxu0 %v16651_v14  ;;  %v24678_v18 = vpack.c.bf16 %v24676_v10, %v24677_v29  ;;  %v16711_v14 = vld [vmem:[%s24433_s4 + $0x614] ss:$8 sps:$4 sm:$0xff]  }
 0x1be   :  { %3003 = vmatpush1.bf16.msra.mxu1 %v16646_v1  ;;  %13975 = vmatmul.mubr.msk.bf16.vlgmr.msra.gmra.mxu0 %vm787_vm2, %v24666_v56  ;;  %v16706_v1 = vld [vmem:[%s24433_s4 + $0x560] ss:$8 sps:$4 sm:$0xff]  }
 0x1bf   :  { %3732 = vmatpush1.bf16.msra.mxu0 %v16649_v50  ;;  %3290 = vmatprep.subr.bf16.mxu1 %v16654_v9  ;;  %v24679_v50 = vld [vmem:[#allocation71_spill] sm:$0xff]  ;;  %v24680_v9 = vld [vmem:[#allocation72_spill] sm:$0xff] }
 0x1c0   :  { %3733 = vmatprep.subr.bf16.mxu0 %v16657_v7  ;;  %3471 = vmatprep.mubr.bf16.mxu0 %v24564_v24  ;;  %v24681_v7 = vpack.c.bf16 %v24679_v50, %v24680_v9 }
 0x1c1   :  { %13909 = vmatmul.mubr.msk.bf16.vlgmr.msra.gmra.mxu1 %vm787_vm2, %v24669_v59  ;;  %v16729_v59 = vld [vmem:[%s24433_s4 + $0x5d4] ss:$8 sps:$4 sm:$0xff]  }
 0x1c2   :  { %3291 = vmatpush1.bf16.msra.mxu1 %v16652_v62  ;;  %3030 = vmatprep.mubr.bf16.mxu1 %v24564_v24  ;;  %v16718_v62 = vld [vmem:[%s24433_s4 + $0x540] ss:$8 sps:$4 sm:$0xff]  }
 0x1c3   :  { %3734 = vmatpush1.bf16.msra.mxu0 %v16655_v31  ;;  %3292 = vmatprep.subr.bf16.mxu1 %v16660_v55  ;;  %v24682_v31 = vpack.c.bf16 %v19884_v48, %v19880_v0  ;;  %v16723_v55 = vld [vmem:[%s24433_s4 + $0x5f4] ss:$8 sps:$4 sm:$0xff]  }
 0x1c4   :  { %3735 = vmatprep.subr.bf16.mxu0 %v16663_v45  ;;  %v24683_v48 = vld [vmem:[#allocation79_spill] sm:$0xff]  ;;  %v24684_v0 = vld [vmem:[#allocation80_spill] sm:$0xff] }
 0x1c5   :  { %v24685_v56 = vpack.c.bf16 %v24683_v48, %v24684_v0  ;;  %v16724_v45 = vld [vmem:[%s24433_s4 + $0x5e0] ss:$8 sps:$4 sm:$0xff]  }
 0x1c6   :  { %3293 = vmatpush1.bf16.msra.mxu1 %v16658_v34  ;;  %13976 = vmatmul.mubr.msk.bf16.gmra.mxu0 %vm787_vm2, %v24670_v2  ;;  %v24686_v34 = vld [vmem:[#allocation66_spill] sm:$0xff]  ;;  %v24692_v2 = vld [vmem:[#allocation69_spill] sm:$0xff] }
 0x1c7   :  { %3736 = vmatpush1.bf16.msra.mxu0 %v16661_v25  ;;  %3294 = vmatprep.subr.bf16.mxu1 %v16666_v20  ;;  %v24688_v38 = vpack.c.bf16 %v24686_v34, %v24687_v54  ;;  %v16727_v25 = vld [vmem:[%s24433_s4 + $0x5d0] ss:$8 sps:$4 sm:$0xff]   ;;  %v16732_v20 = vld [vmem:[%s24433_s4 + $0x5c4] ss:$8 sps:$4 sm:$0xff]  }
 0x1c8   :  { %3737 = vmatprep.subr.bf16.mxu0 %v16669_v6  ;;  %3755 = vmatprep.mubr.bf16.mxu0 %v24564_v24  ;;  %v24689_v6 = vld [vmem:[#allocation11_spill] sm:$0xff] }
 0x1c9   :  { %13910 = vmatmul.mubr.msk.bf16.gmra.mxu1 %vm787_vm2, %v24671_v19 }
 0x1ca   :  { %3295 = vmatpush1.bf16.msra.mxu1 %v16664_v32  ;;  %3314 = vmatprep.mubr.bf16.mxu1 %v24564_v24  ;;  %v24690_v32 = vld [vmem:[#allocation6_spill] sm:$0xff] }
 0x1cb   :  { %3738 = vmatpush1.bf16.msra.mxu0 %v16667_v3  ;;  %3296 = vmatprep.subr.bf16.mxu1 %v16672_v16  ;;  %v24691_v3 = vpack.c.bf16 %v24689_v6, %v24690_v32  ;;  %v16730_v16 = vld [vmem:[%s24433_s4 + $0x5c0] ss:$8 sps:$4 sm:$0xff]  }
 0x1cc   :  { %4025 = vmatprep.subr.bf16.mxu0 %v16675_v28  ;;  %v24693_v28 = vld [vmem:[#allocation70_spill] sm:$0xff] }
 0x1ce   :  { %3297 = vmatpush1.bf16.msra.mxu1 %v16670_v17  ;;  %14019 = vmatmul.mubr.msk.bf16.vlgmr.msra.gmra.mxu0 %vm787_vm2, %v3666_v47  ;;  %v16693_v47 = vld [vmem:[%s24433_s4 + $0x584] ss:$8 sps:$4 sm:$0xff]   ;;  %v24694_v17 = vpack.c.bf16 %v24692_v2, %v24693_v28 }
 0x1cf   :  { %4026 = vmatpush1.bf16.msra.mxu0 %v16673_v35  ;;  %3584 = vmatprep.subr.bf16.mxu1 %v16678_v41 }
 0x1d0   :  { %4027 = vmatprep.subr.bf16.mxu0 %v16681_v44  ;;  %3765 = vmatprep.mubr.bf16.mxu0 %v24564_v24  ;;  %v24695_v44 = vld [vmem:[#allocation75_spill] sm:$0xff] }
 0x1d1   :  { %13953 = vmatmul.mubr.msk.bf16.vlgmr.msra.gmra.mxu1 %vm787_vm2, %v24673_v52 }
 0x1d2   :  { %3585 = vmatpush1.bf16.msra.mxu1 %v16676_v61  ;;  %3324 = vmatprep.mubr.bf16.mxu1 %v24564_v24  ;;  %v24696_v61 = vld [vmem:[#allocation76_spill] sm:$0xff] }
 0x1d3   :  { %4028 = vmatpush1.bf16.msra.mxu0 %v16679_v49  ;;  %3586 = vmatprep.subr.bf16.mxu1 %v16684_v30  ;;  %v24697_v49 = vpack.c.bf16 %v24695_v44, %v24696_v61 }
 0x1d4   :  { %4029 = vmatprep.subr.bf16.mxu0 %v16687_v26 }
 0x1d6   :  { %3587 = vmatpush1.bf16.msra.mxu1 %v16682_v57  ;;  %14020 = vmatmul.mubr.msk.bf16.gmra.mxu0 %vm787_vm2, %v24674_v36 }
 0x1d7   :  { %4030 = vmatpush1.bf16.msra.mxu0 %v16685_v11  ;;  %3588 = vmatprep.subr.bf16.mxu1 %v16690_v63 }
 0x1d8   :  { %4031 = vmatprep.subr.bf16.mxu0 %v16693_v47  ;;  %4049 = vmatprep.mubr.bf16.mxu0 %v24564_v24 }
 0x1d9   :  { %13954 = vmatmul.mubr.msk.bf16.gmra.mxu1 %vm787_vm2, %v24675_v21 }
 0x1da   :  { %3589 = vmatpush1.bf16.msra.mxu1 %v16688_v37  ;;  %3608 = vmatprep.mubr.bf16.mxu1 %v24564_v24  ;;  %v24698_v37 = vld [vmem:[#allocation12_spill] sm:$0xff] }
 0x1db   :  { %4032 = vmatpush1.bf16.msra.mxu0 %v16691_v43  ;;  %3590 = vmatprep.subr.bf16.mxu1 %v16696_v5  ;;  %v24699_v43 = vld [vmem:[#allocation81_spill] sm:$0xff] }
 0x1dc   :  { %4319 = vmatprep.subr.bf16.mxu0 %v16699_v13  ;;  %v24700_v5 = vpack.c.bf16 %v24698_v37, %v24699_v43 }
 0x1de   :  { %3591 = vmatpush1.bf16.msra.mxu1 %v16694_v60  ;;  %14063 = vmatmul.mubr.msk.bf16.vlgmr.msra.gmra.mxu0 %vm787_vm2, %v24678_v18 }
 0x1df   :  { %4320 = vmatpush1.bf16.msra.mxu0 %v16697_v39  ;;  %3878 = vmatprep.subr.bf16.mxu1 %v16702_v27 }
 0x1e0   :  { %4321 = vmatprep.subr.bf16.mxu0 %v16705_v42  ;;  %4059 = vmatprep.mubr.bf16.mxu0 %v24564_v24 }
 0x1e1   :  { %13997 = vmatmul.mubr.msk.bf16.vlgmr.msra.gmra.mxu1 %vm787_vm2, %v3519_v33  ;;  %v16720_v33 = vld [vmem:[%s24433_s4 + $0x544] ss:$8 sps:$4 sm:$0xff]  }
 0x1e2   :  { %3879 = vmatpush1.bf16.msra.mxu1 %v16700_v22  ;;  %3618 = vmatprep.mubr.bf16.mxu1 %v24564_v24 }
 0x1e3   :  { %4322 = vmatpush1.bf16.msra.mxu0 %v16703_v15  ;;  %3880 = vmatprep.subr.bf16.mxu1 %v16708_v40 }
 0x1e4   :  { %4323 = vmatprep.subr.bf16.mxu0 %v16711_v14 }
 0x1e6   :  { %3881 = vmatpush1.bf16.msra.mxu1 %v16706_v1  ;;  %14064 = vmatmul.mubr.msk.bf16.gmra.mxu0 %vm787_vm2, %v24681_v7 }
 0x1e7   :  { %4324 = vmatpush1.bf16.msra.mxu0 %v16709_v46  ;;  %3882 = vmatprep.subr.bf16.mxu1 %v16714_v53 }
 0x1e8   :  { %4325 = vmatprep.subr.bf16.mxu0 %v16717_v8  ;;  %4343 = vmatprep.mubr.bf16.mxu0 %v24564_v24 }
 0x1e9   :  { %13998 = vmatmul.mubr.msk.bf16.gmra.mxu1 %vm787_vm2, %v24682_v31 }
 0x1ea   :  { %3883 = vmatpush1.bf16.msra.mxu1 %v16712_v23  ;;  %3902 = vmatprep.mubr.bf16.mxu1 %v24564_v24 }
 0x1eb   :  { %4326 = vmatpush1.bf16.msra.mxu0 %v16715_v12  ;;  %3884 = vmatprep.subr.bf16.mxu1 %v16720_v33 }
 0x1ee   :  { %3885 = vmatpush1.bf16.msra.mxu1 %v16718_v62  ;;  %14107 = vmatmul.mubr.msk.bf16.vlgmr.msra.gmra.mxu0 %vm787_vm2, %v24685_v56 }
 0x1ef   :  { %4172 = vmatprep.subr.bf16.mxu1 %v16723_v55  ;;  %4353 = vmatprep.mubr.bf16.mxu0 %v24564_v24 }
 0x1f1   :  { %14041 = vmatmul.mubr.msk.bf16.vlgmr.msra.gmra.mxu1 %vm787_vm2, %v24688_v38 }
 0x1f2   :  { %4173 = vmatpush1.bf16.msra.mxu1 %v16721_v51  ;;  %3912 = vmatprep.mubr.bf16.mxu1 %v24564_v24 }
 0x1f3   :  { %4174 = vmatprep.subr.bf16.mxu1 %v16726_v58 }
 0x1f6   :  { %4175 = vmatpush1.bf16.msra.mxu1 %v16724_v45  ;;  %14108 = vmatmul.mubr.msk.bf16.gmra.mxu0 %vm787_vm2, %v24691_v3 }
 0x1f7   :  { %4176 = vmatprep.subr.bf16.mxu1 %v16729_v59 }
 0x1f9   :  { %14042 = vmatmul.mubr.msk.bf16.gmra.mxu1 %vm787_vm2, %v24694_v17 }
 0x1fa   :  { %4177 = vmatpush1.bf16.msra.mxu1 %v16727_v25  ;;  %4196 = vmatprep.mubr.bf16.mxu1 %v24564_v24 }
 0x1fb   :  { %4178 = vmatprep.subr.bf16.mxu1 %v16732_v20 }
 0x1fd   :  { %v1066_v19 = vpop.f32.mrf.mxu0 }
 0x1fe   :  { %4179 = vmatpush1.bf16.msra.mxu1 %v16730_v16 }
 0x1ff   :  { %v1068_v35 = vpop.f32.mrf.mxu0 }
 0x200   :  { %v828_v41 = vpop.f32.mrf.mxu1 }
 0x201   :  { %14085 = vmatmul.mubr.msk.bf16.vlgmr.msra.gmra.mxu1 %vm787_vm2, %v24697_v49  ;;  %v1070_v30 = vpop.f32.mrf.mxu0 }
 0x202   :  { %4206 = vmatprep.mubr.bf16.mxu1 %v24564_v24  ;;  %v830_v26 = vpop.f32.mrf.mxu1 }
 0x203   :  { %v20495_v57 = vpop.f32.mrf.mxu0 }
 0x204   :  { %v832_v4 = vpop.f32.mrf.mxu1 }
 0x205   :  { %v1076_v52 = vpop.f32.mrf.mxu0 }
 0x206   :  { %v20497_v11 = vpop.f32.mrf.mxu1 }
 0x207   :  { %v1078_v63 = vpop.f32.mrf.mxu0 }
 0x208   :  { %v838_v47 = vpop.f32.mrf.mxu1 }
 0x209   :  { %14086 = vmatmul.mubr.msk.bf16.gmra.mxu1 %vm787_vm2, %v24700_v5  ;;  %v1080_v36 = vpop.f32.mrf.mxu0 }
 0x20a   :  { %4441 = vmatprep.mubr.bf16.mxu1 %v24564_v24  ;;  %v840_v13 = vpop.f32.mrf.mxu1 }
 0x20b   :  { %v20504_v60 = vpop.f32.mrf.mxu0 }
 0x20c   :  { %v842_v21 = vpop.f32.mrf.mxu1 }
 0x20d   :  { %v1378_v39 = vpop.f32.mrf.mxu0 }
 0x20e   :  { %v20506_v27 = vpop.f32.mrf.mxu1 }
 0x20f   :  { %v1380_v42 = vpop.f32.mrf.mxu0 }
 0x210   :  { %v927_v22 = vpop.f32.mrf.mxu1 }
 0x211   :  { %v928_v15 = vadd.f32 %v927_v22, %v828_v41  ;;  %v1382_v40 = vpop.f32.mrf.mxu0 }
 0x212   :  { %v929_v10 = vpop.f32.mrf.mxu1 }
 0x213   :  { %v930_v29 = vadd.f32 %v929_v10, %v830_v26  ;;  %v20508_v18 = vpop.f32.mrf.mxu0  ;;  %v1085_v14 = vadd.f32 %v1066_v19, %v928_v15 }
 0x214   :  { %v931_v1 = vpop.f32.mrf.mxu1 }
 0x215   :  { %v932_v46 = vadd.f32 %v931_v1, %v832_v4  ;;  %v1086_v8 = vadd.f32 %v1068_v35, %v930_v29 }
 0x216   :  { %v1388_v53 = vpop.f32.mrf.mxu0  ;;  %v20510_v23 = vpop.f32.mrf.mxu1 }
 0x217   :  { %v1087_v33 = vadd.f32 %v1070_v30, %v932_v46 }
 0x218   :  { %v1390_v12 = vpop.f32.mrf.mxu0  ;;  %v937_v50 = vpop.f32.mrf.mxu1 }
 0x219   :  { %v938_v9 = vadd.f32 %v937_v50, %v838_v47 }
 0x21a   :  { %v1392_v7 = vpop.f32.mrf.mxu0  ;;  %v939_v62 = vpop.f32.mrf.mxu1 }
 0x21b   :  { %v940_v31 = vadd.f32 %v939_v62, %v840_v13  ;;  %v1089_v51 = vadd.f32 %v1076_v52, %v938_v9 }
 0x21c   :  { %v20512_v55 = vpop.f32.mrf.mxu0  ;;  %v941_v58 = vpop.f32.mrf.mxu1 }
 0x21d   :  { %v942_v48 = vadd.f32 %v941_v58, %v842_v21  ;;  %v1090_v56 = vadd.f32 %v1078_v63, %v940_v31 }
 0x21e   :  { %v1681_v0 = vpop.f32.mrf.mxu0  ;;  %v20514_v45 = vpop.f32.mrf.mxu1 }
 0x21f   :  { %v1091_v54 = vadd.f32 %v1080_v36, %v942_v48 }
 0x220   :  { %v1683_v34 = vpop.f32.mrf.mxu0  ;;  %v1222_v38 = vpop.f32.mrf.mxu1 }
 0x221   :  { %v1241_v59 = vadd.f32 %v1222_v38, %v1085_v14 }
 0x222   :  { %v1685_v25 = vpop.f32.mrf.mxu0  ;;  %v1224_v20 = vpop.f32.mrf.mxu1 }
 0x223   :  { %v1242_v6 = vadd.f32 %v1224_v20, %v1086_v8  ;;  %v1397_v3 = vadd.f32 %v1378_v39, %v1241_v59 }
 0x224   :  { %v20516_v32 = vpop.f32.mrf.mxu0  ;;  %v1226_v16 = vpop.f32.mrf.mxu1 }
 0x225   :  { %v1243_v2 = vadd.f32 %v1226_v16, %v1087_v33  ;;  %v1398_v17 = vadd.f32 %v1380_v42, %v1242_v6 }
 0x226   :  { %v1691_v28 = vpop.f32.mrf.mxu0  ;;  %v20518_v19 = vpop.f32.mrf.mxu1 }
 0x227   :  { %v1399_v41 = vadd.f32 %v1382_v40, %v1243_v2 }
 0x228   :  { %v1693_v35 = vpop.f32.mrf.mxu0 }
 0x229   :  { %v1232_v44 = vpop.f32.mrf.mxu1 }
 0x22a   :  { %v1245_v61 = vadd.f32 %v1232_v44, %v1089_v51  ;;  %v1695_v49 = vpop.f32.mrf.mxu0 }
 0x22b   :  { %v1234_v30 = vpop.f32.mrf.mxu1 }
 0x22c   :  { %v1246_v26 = vadd.f32 %v1234_v30, %v1090_v56  ;;  %v20520_v4 = vpop.f32.mrf.mxu0  ;;  %v1401_v52 = vadd.f32 %v1388_v53, %v1245_v61 }
 0x22d   :  { %v1236_v63 = vpop.f32.mrf.mxu1 }
 0x22e   :  { %v1247_v47 = vadd.f32 %v1236_v63, %v1091_v54  ;;  %v1993_v37 = vpop.f32.mrf.mxu0  ;;  %v1402_v43 = vadd.f32 %v1390_v12, %v1246_v26 }
 0x22f   :  { %v20522_v5 = vpop.f32.mrf.mxu1 }
 0x230   :  { %v1995_v36 = vpop.f32.mrf.mxu0  ;;  %v1403_v13 = vadd.f32 %v1392_v7, %v1247_v47 }
 0x231   :  { %v1525_v21 = vpop.f32.mrf.mxu1 }
 0x232   :  { %v1544_v39 = vadd.f32 %v1525_v21, %v1397_v3  ;;  %v1997_v42 = vpop.f32.mrf.mxu0 }
 0x233   :  { %v1527_v22 = vpop.f32.mrf.mxu1 }
 0x234   :  { %v1545_v15 = vadd.f32 %v1527_v22, %v1398_v17  ;;  %v20524_v40 = vpop.f32.mrf.mxu0  ;;  %v1700_v10 = vadd.f32 %v1681_v0, %v1544_v39 }
 0x235   :  { %v1529_v29 = vpop.f32.mrf.mxu1 }
 0x236   :  { %v1546_v14 = vadd.f32 %v1529_v29, %v1399_v41  ;;  %v2003_v1 = vpop.f32.mrf.mxu0  ;;  %v1701_v46 = vadd.f32 %v1683_v34, %v1545_v15 }
 0x237   :  { %v20526_v53 = vpop.f32.mrf.mxu1 }
 0x238   :  { %v2005_v8 = vpop.f32.mrf.mxu0  ;;  %v1702_v12 = vadd.f32 %v1685_v25, %v1546_v14 }
 0x239   :  { %v1535_v33 = vpop.f32.mrf.mxu1 }
 0x23a   :  { %v1548_v50 = vadd.f32 %v1535_v33, %v1401_v52  ;;  %v2007_v9 = vpop.f32.mrf.mxu0 }
 0x23b   :  { %v1537_v7 = vpop.f32.mrf.mxu1 }
 0x23c   :  { %v1549_v62 = vadd.f32 %v1537_v7, %v1402_v43  ;;  %v20528_v31 = vpop.f32.mrf.mxu0  ;;  %v1704_v51 = vadd.f32 %v1691_v28, %v1548_v50 }
 0x23d   :  { %v1539_v58 = vpop.f32.mrf.mxu1 }
 0x23e   :  { %v1550_v48 = vadd.f32 %v1539_v58, %v1403_v13  ;;  %v2287_v56 = vpop.f32.mrf.mxu0  ;;  %v1705_v0 = vadd.f32 %v1693_v35, %v1549_v62 }
 0x23f   :  { %v20530_v54 = vpop.f32.mrf.mxu1 }
 0x240   :  { %v2289_v38 = vpop.f32.mrf.mxu0  ;;  %v1706_v34 = vadd.f32 %v1695_v49, %v1550_v48 }
 0x241   :  { %v1837_v59 = vpop.f32.mrf.mxu1 }
 0x242   :  { %v1856_v20 = vadd.f32 %v1837_v59, %v1700_v10  ;;  %v2291_v6 = vpop.f32.mrf.mxu0 }
 0x243   :  { %v1839_v25 = vpop.f32.mrf.mxu1 }
 0x244   :  { %v1857_v3 = vadd.f32 %v1839_v25, %v1701_v46  ;;  %v20532_v16 = vpop.f32.mrf.mxu0  ;;  %v2012_v2 = vadd.f32 %v1993_v37, %v1856_v20 }
 0x245   :  { %v1841_v17 = vpop.f32.mrf.mxu1 }
 0x246   :  { %v1858_v41 = vadd.f32 %v1841_v17, %v1702_v12  ;;  %v2297_v44 = vpop.f32.mrf.mxu0  ;;  %v2013_v28 = vadd.f32 %v1995_v36, %v1857_v3 }
 0x247   :  { %v20534_v61 = vpop.f32.mrf.mxu1 }
 0x248   :  { %v2299_v30 = vpop.f32.mrf.mxu0  ;;  %v2014_v35 = vadd.f32 %v1997_v42, %v1858_v41 }
 0x249   :  { %v1847_v26 = vpop.f32.mrf.mxu1 }
 0x24a   :  { %v1860_v52 = vadd.f32 %v1847_v26, %v1704_v51  ;;  %v2301_v63 = vpop.f32.mrf.mxu0 }
 0x24b   :  { %v1849_v49 = vpop.f32.mrf.mxu1 }
 0x24c   :  { %v1861_v47 = vadd.f32 %v1849_v49, %v1705_v0  ;;  %v20536_v43 = vpop.f32.mrf.mxu0  ;;  %v2016_v13 = vadd.f32 %v2003_v1, %v1860_v52 }
 0x24d   :  { %v1851_v21 = vpop.f32.mrf.mxu1 }
 0x24e   :  { %v1862_v39 = vadd.f32 %v1851_v21, %v1706_v34  ;;  %v2581_v22 = vpop.f32.mrf.mxu0  ;;  %v2017_v37 = vadd.f32 %v2005_v8, %v1861_v47 }
 0x24f   :  { %v20538_v15 = vpop.f32.mrf.mxu1 }
 0x250   :  { %v2583_v10 = vpop.f32.mrf.mxu0  ;;  %v2018_v36 = vadd.f32 %v2007_v9, %v1862_v39  ;;  %v16737_v39 = vld [vmem:[%s24437_s8 + $0x1b0] ss:$12 sps:$4 sm:$0xff]  }
 0x251   :  { %v2140_v29 = vpop.f32.mrf.mxu1 }
 0x252   :  { %v2159_v14 = vadd.f32 %v2140_v29, %v2012_v2  ;;  %v2585_v46 = vpop.f32.mrf.mxu0 }
 0x253   :  { %v2142_v42 = vpop.f32.mrf.mxu1 }
 0x254   :  { %v2160_v12 = vadd.f32 %v2142_v42, %v2013_v28  ;;  %v20540_v33 = vpop.f32.mrf.mxu0  ;;  %v2306_v50 = vadd.f32 %v2287_v56, %v2159_v14 }
 0x255   :  { %v2144_v7 = vpop.f32.mrf.mxu1 }
 0x256   :  { %v2161_v62 = vadd.f32 %v2144_v7, %v2014_v35  ;;  %v2591_v51 = vpop.f32.mrf.mxu0  ;;  %v2307_v1 = vadd.f32 %v2289_v38, %v2160_v12  ;;  %v16743_v12 = vld [vmem:[%s24437_s8 + $0x19c] ss:$12 sps:$4 sm:$0xff]  }
 0x257   :  { %v20542_v58 = vpop.f32.mrf.mxu1 }
 0x258   :  { %v2593_v48 = vpop.f32.mrf.mxu0  ;;  %v2308_v8 = vadd.f32 %v2291_v6, %v2161_v62  ;;  %v16733_v6 = vld [vmem:[%s24437_s8 + $0x1c8] ss:$12 sps:$4 sm:$0xff]  }
 0x259   :  { %v2150_v0 = vpop.f32.mrf.mxu1 }
 0x25a   :  { %v2163_v34 = vadd.f32 %v2150_v0, %v2016_v13  ;;  %v2595_v59 = vpop.f32.mrf.mxu0 }
 0x25b   :  { %v2152_v9 = vpop.f32.mrf.mxu1 }
 0x25c   :  { %v2164_v20 = vadd.f32 %v2152_v9, %v2017_v37  ;;  %v20544_v25 = vpop.f32.mrf.mxu0  ;;  %v2310_v3 = vadd.f32 %v2297_v44, %v2163_v34  ;;  %v16735_v44 = vld [vmem:[%s24437_s8 + $0x1cc] ss:$12 sps:$4 sm:$0xff]  }
 0x25d   :  { %v2154_v2 = vpop.f32.mrf.mxu1  ;;  %4767 = vmatprep.subr.bf16.mxu0 %v16735_v44 }
 0x25e   :  { %v2165_v17 = vadd.f32 %v2154_v2, %v2018_v36  ;;  %v2875_v41 = vpop.f32.mrf.mxu0  ;;  %v2311_v56 = vadd.f32 %v2299_v30, %v2164_v20  ;;  %v16739_v30 = vld [vmem:[%s24437_s8 + $0x1b4] ss:$12 sps:$4 sm:$0xff]   ;;  %4768 = vmatpush1.bf16.msra.mxu0 %v16733_v6  ;;  %v16751_v6 = vld [vmem:[%s24437_s8 + $0x16c] ss:$12 sps:$4 sm:$0xff]  }
 0x25f   :  { %v20546_v28 = vpop.f32.mrf.mxu1  ;;  %4769 = vmatprep.subr.bf16.mxu0 %v16739_v30 }
 0x260   :  { %v2877_v35 = vpop.f32.mrf.mxu0  ;;  %v2312_v38 = vadd.f32 %v2301_v63, %v2165_v17 }
 0x261   :  { %v2434_v26 = vpop.f32.mrf.mxu1 }
 0x262   :  { %v2453_v52 = vadd.f32 %v2434_v26, %v2306_v50  ;;  %v20548_v49 = vpop.f32.mrf.mxu0  ;;  %4770 = vmatpush1.bf16.msra.mxu0 %v16737_v39 }
 0x263   :  { %v2436_v47 = vpop.f32.mrf.mxu1  ;;  %4771 = vmatprep.subr.bf16.mxu0 %v16743_v12 }
 0x264   :  { %v2454_v13 = vadd.f32 %v2436_v47, %v2307_v1  ;;  %v20559_v21 = vpop.f32.mrf.mxu0  ;;  %v2600_v63 = vadd.f32 %v2581_v22, %v2453_v52  ;;  %v16741_v22 = vld [vmem:[%s24437_s8 + $0x198] ss:$12 sps:$4 sm:$0xff]  }
 0x265   :  { %v2438_v37 = vpop.f32.mrf.mxu1 }
 0x266   :  { %v2455_v36 = vadd.f32 %v2438_v37, %v2308_v8  ;;  %v2885_v29 = vpop.f32.mrf.mxu0  ;;  %v2601_v14 = vadd.f32 %v2583_v10, %v2454_v13  ;;  %v16747_v8 = vld [vmem:[%s24437_s8 + $0x184] ss:$12 sps:$4 sm:$0xff]   ;;  %4772 = vmatpush1.bf16.msra.mxu0 %v16741_v22  ;;  %v16755_v13 = vld [vmem:[%s24437_s8 + $0x154] ss:$12 sps:$4 sm:$0xff]  }
 0x267   :  { %v20564_v42 = vpop.f32.mrf.mxu1  ;;  %4773 = vmatprep.subr.bf16.mxu0 %v16747_v8 }
 0x268   :  { %v2887_v50 = vpop.f32.mrf.mxu0  ;;  %v2602_v7 = vadd.f32 %v2585_v46, %v2455_v36  ;;  %v16745_v46 = vld [vmem:[%s24437_s8 + $0x180] ss:$12 sps:$4 sm:$0xff]   ;;  %v16753_v36 = vld [vmem:[%s24437_s8 + $0x150] ss:$12 sps:$4 sm:$0xff]  }
 0x269   :  { %v2444_v62 = vpop.f32.mrf.mxu1 }
 0x26a   :  { %v2457_v1 = vadd.f32 %v2444_v62, %v2310_v3  ;;  %v20572_v0 = vpop.f32.mrf.mxu0  ;;  %4774 = vmatpush1.bf16.msra.mxu0 %v16745_v46 }
 0x26b   :  { %v2446_v10 = vpop.f32.mrf.mxu1  ;;  %4775 = vmatprep.subr.bf16.mxu0 %v16751_v6 }
 0x26c   :  { %v2458_v34 = vadd.f32 %v2446_v10, %v2311_v56  ;;  %v20577_v9 = vpop.f32.mrf.mxu0  ;;  %v2604_v20 = vadd.f32 %v2591_v51, %v2457_v1  ;;  %v16749_v51 = vld [vmem:[%s24437_s8 + $0x168] ss:$12 sps:$4 sm:$0xff]  }
 0x26d   :  { %v2448_v2 = vpop.f32.mrf.mxu1 }
 0x26e   :  { %v2459_v17 = vadd.f32 %v2448_v2, %v2312_v38  ;;  %v3169_v3 = vpop.f32.mrf.mxu0  ;;  %v2605_v26 = vadd.f32 %v2593_v48, %v2458_v34  ;;  %4776 = vmatpush1.bf16.msra.mxu0 %v16749_v51 }
 0x26f   :  { %v20582_v52 = vpop.f32.mrf.mxu1  ;;  %4777 = vmatprep.subr.bf16.mxu0 %v16755_v13 }
 0x270   :  { %v20587_v56 = vpop.f32.mrf.mxu0  ;;  %v20589_v44 = vadd.f32 %v2595_v59, %v2459_v17 }
 0x271   :  { %v2728_v47 = vpop.f32.mrf.mxu1 }
 0x272   :  { %v2747_v38 = vadd.f32 %v2728_v47, %v2600_v63  ;;  %v20594_v30 = vpop.f32.mrf.mxu0  ;;  %4778 = vmatpush1.bf16.msra.mxu0 %v16753_v36 }
 0x273   :  { %v2730_v48 = vpop.f32.mrf.mxu1 }
 0x274   :  { %v2748_v39 = vadd.f32 %v2730_v48, %v2601_v14  ;;  %v20599_v37 = vpop.f32.mrf.mxu0  ;;  %v2894_v59 = vadd.f32 %v2875_v41, %v2747_v38  ;;  %v16759_v14 = vld [vmem:[%s24437_s8 + $0x13c] ss:$12 sps:$4 sm:$0xff]  }
 0x275   :  { %v2732_v12 = vpop.f32.mrf.mxu1  ;;  %4779 = vmatprep.subr.bf16.mxu0 %v16759_v14 }
 0x276   :  { %v2749_v22 = vadd.f32 %v2732_v12, %v2602_v7  ;;  %v20604_v63 = vpop.f32.mrf.mxu0  ;;  %v20606_v62 = vadd.f32 %v2877_v35, %v2748_v39  ;;  %v16757_v7 = vld [vmem:[%s24437_s8 + $0x138] ss:$12 sps:$4 sm:$0xff]  }
 0x277   :  { %v20608_v1 = vpop.f32.mrf.mxu1 }
 0x278   :  { %v20613_v10 = vpop.f32.mrf.mxu0  ;;  %v20616_v41 = vadd.f32 %v20548_v49, %v2749_v22 }
 0x279   :  { %v2738_v8 = vpop.f32.mrf.mxu1 }
 0x27a   :  { %v2751_v35 = vadd.f32 %v2738_v8, %v2604_v20  ;;  %v20621_v34 = vpop.f32.mrf.mxu0 }
 0x27b   :  { %24 = vsyncpa [#allocation3], 0  ;;  %v2740_v46 = vpop.f32.mrf.mxu1  ;;  %v16763_v2 = vld [vmem:[%s24437_s8 + $0x124] ss:$12 sps:$4 sm:$0xff]   ;;  %4780 = vmatpush1.bf16.msra.mxu0 %v16757_v7  ;;  %v16761_v20 = vld [vmem:[%s24437_s8 + $0x120] ss:$12 sps:$4 sm:$0xff]  }
 0x27c   :  { %v2752_v17 = vadd.f32 %v2740_v46, %v2605_v26  ;;  %v20626_v6 = vpop.f32.mrf.mxu0  ;;  %v20628_v49 = vadd.f32 %v2885_v29, %v2751_v35  ;;  %4781 = vmatprep.subr.bf16.mxu0 %v16763_v2  ;;  %v16767_v26 = vld [vmem:[%s24437_s8 + $0x22c] ss:$12 sps:$4 sm:$0xff]   ;;  %v16765_v39 = vld [vmem:[%s24437_s8 + $0x228] ss:$12 sps:$4 sm:$0xff]   ;;  %v934_v2 = vadd.f32 %v20510_v23, %v20497_v11  ;;  %vm4405_vm8 = vcmask 261120   ;;  %s18284_s13 = smov [#allocation2]  }
 0x27d   :  { %v20630_v51 = vpop.f32.mrf.mxu1  ;;  %v16771_v22 = vld [vmem:[%s24437_s8 + $0x214] ss:$12 sps:$4 sm:$0xff]   ;;  %vm13282_vm9 = vcmask 1043456   ;;  %vm13278_vm10 = vcmask 64512   ;;  %s13514_s21 = sshll.u32 %s18284_s13, 4  ;;  %s13515_s21 = int_to_ptr.vmem [resolvable:$true] %s13514_s21 }
 0x27e   :  { %v20635_v47 = vpop.f32.mrf.mxu0  ;;  %v20637_v38 = vadd.f32 %v2887_v50, %v2752_v17  ;;  %p18266_p1 = scmp.lt.s32.totalorder %s13515_s21, %s13515_s21 }
 0x27f   :  { %v20639_v48 = vpop.f32.mrf.mxu1  ;;  %4782 = vmatpush1.bf16.msra.mxu0 %v16761_v20 }
 0x280   :  { %v20644_v29 = vpop.f32.mrf.mxu0  ;;  %4791 = vmatprep.subr.bf16.mxu0 %v16767_v26 }
 0x281   :  { %24701 = vst [vmem:[#allocation16_spill] sm:$0xff] %v20644_v29  ;;  %v3022_v13 = vpop.f32.mrf.mxu1 }
 0x282   :  { %v3041_v36 = vadd.f32 %v3022_v13, %v2894_v59  ;;  %v20649_v12 = vpop.f32.mrf.mxu0  ;;  %v16769_v59 = vld [vmem:[%s24437_s8 + $0x210] ss:$12 sps:$4 sm:$0xff]   ;;  %v1088_v13 = vadd.f32 %v20495_v57, %v934_v2 }
 0x283   :  { %v20651_v50 = vpop.f32.mrf.mxu1  ;;  %4792 = vmatpush2.bf16.msra.mxu0 %v16765_v39 }
 0x284   :  { %v20656_v14 = vpop.f32.mrf.mxu0  ;;  %v20658_v7 = vadd.f32 %v3169_v3, %v3041_v36  ;;  %4793 = vmatprep.subr.bf16.mxu0 %v16771_v22  ;;  %v944_v36 = vadd.f32 %v20514_v45, %v20506_v27  ;;  %v1244_v11 = vadd.f32 %v20518_v19, %v1088_v13 }
 0x285   :  { %v20660_v8 = vpop.f32.mrf.mxu1 }
 0x286   :  { %v20665_v35 = vpop.f32.mrf.mxu0  ;;  %v1400_v57 = vadd.f32 %v20508_v18, %v1244_v11 }
 0x287   :  { %24702 = vst [vmem:[#allocation49_spill] sm:$0xff] %v20665_v35  ;;  %v20667_v46 = vpop.f32.mrf.mxu1  ;;  %4794 = vmatpush2.bf16.msra.mxu0 %v16769_v59 }
 0x288   :  { %v20671_v17 = vpop.f32.mrf.mxu0  ;;  %v1547_v45 = vadd.f32 %v20526_v53, %v1400_v57 }
 0x289   :  { %24703 = vst [vmem:[#allocation48_spill] sm:$0xff] %v20671_v17  ;;  %v20673_v20 = vpop.f32.mrf.mxu1 }
 0x28a   :  { %v20675_v3 = vpop.f32.mrf.mxu0 }
 0x28b   :  { %24704 = vst [vmem:[#allocation14_spill] sm:$0xff] %v20675_v3  ;;  %v20677_v26 = vpop.f32.mrf.mxu1  ;;  %v1092_v3 = vadd.f32 %v20504_v60, %v944_v36  ;;  %v1703_v60 = vadd.f32 %v20516_v32, %v1547_v45 }
 0x28c   :  { %v20680_v39 = vpop.f32.mrf.mxu0 }
 0x28d   :  { %24705 = vst [vmem:[#allocation10_spill] sm:$0xff] %v20680_v39  ;;  %v20684_v22 = vpop.f32.mrf.mxu1  ;;  %v1248_v39 = vadd.f32 %v20522_v5, %v1092_v3  ;;  %v1859_v3 = vadd.f32 %v20534_v61, %v1703_v60 }
 0x28e   :  { %v20687_v23 = vpop.f32.mrf.mxu0 }
 0x28f   :  { %v20689_v24 = vpop.f32.mrf.mxu1  ;;  %v2015_v32 = vadd.f32 %v20524_v40, %v1859_v3 }
 0x290   :  { %v20691_v59 = vpop.f32.mrf.mxu0 }
 0x291   :  { %24706 = vst [vmem:[#allocation7_spill] sm:$0xff] %v20691_v59  ;;  %v3316_v17 = vpop.f32.mrf.mxu1  ;;  %v1404_v59 = vadd.f32 %v20512_v55, %v1248_v39  ;;  %v2162_v61 = vadd.f32 %v20542_v58, %v2015_v32 }
 0x292   :  { %v20695_v2 = vpop.f32.mrf.mxu0 }
 0x293   :  { %v20698_v27 = vpop.f32.mrf.mxu1  ;;  %v1551_v36 = vadd.f32 %v20530_v54, %v1404_v59 }
 0x294   :  { %v20701_v19 = vpop.f32.mrf.mxu0 }
 0x295   :  { %v3320_v13 = vpop.f32.mrf.mxu1  ;;  %v1707_v55 = vadd.f32 %v20520_v4, %v1551_v36  ;;  %v2309_v36 = vadd.f32 %v20532_v16, %v2162_v61 }
 0x296   :  { %v20703_v29 = vpop.f32.mrf.mxu0 }
 0x297   :  { %24707 = vst [vmem:[#allocation8_spill] sm:$0xff] %v20703_v29  ;;  %v20706_v35 = vpop.f32.mrf.mxu1  ;;  %v1863_v54 = vadd.f32 %v20538_v15, %v1707_v55  ;;  %v2456_v55 = vadd.f32 %v20564_v42, %v2309_v36  ;;  %v3043_v42 = vadd.f32 %v20660_v8, %v20616_v41  ;;  %v3045_v41 = vadd.f32 %v20673_v20, %v20628_v49 }
 0x298   :  { %v20709_v18 = vpop.f32.mrf.mxu0 }
 0x299   :  { %24708 = vst [vmem:[#allocation20_spill] sm:$0xff] %v20709_v18  ;;  %v20712_v5 = vpop.f32.mrf.mxu1 }
 0x29a   :  { %v20715_v53 = vpop.f32.mrf.mxu0 }
 0x29b   :  { %24709 = vst [vmem:[#allocation57_spill] sm:$0xff] %v20715_v53  ;;  %v20717_v11 = vpop.f32.mrf.mxu1 }
 0x29c   :  { %v20719_v57 = vpop.f32.mrf.mxu0 }
 0x29d   :  { %24710 = vst [vmem:[#allocation56_spill] sm:$0xff] %v20719_v57  ;;  %v20722_v39 = vpop.f32.mrf.mxu1  ;;  %v2019_v57 = vadd.f32 %v20528_v31, %v1863_v54  ;;  %v2603_v31 = vadd.f32 %v20540_v33, %v2456_v55  ;;  %v3335_v33 = vadd.f32 %v3316_v17, %v20658_v7  ;;  %v3046_v7 = vadd.f32 %v20677_v26, %v20637_v38 }
 0x29e   :  { %v20725_v45 = vpop.f32.mrf.mxu0 }
 0x29f   :  { %v20728_v59 = vpop.f32.mrf.mxu1  ;;  %v2166_v3 = vadd.f32 %v20546_v28, %v2019_v57  ;;  %v2750_v61 = vadd.f32 %v20608_v1, %v2603_v31  ;;  %v3193_v26 = vadd.f32 %v20613_v10, %v3046_v7  ;;  %v24718_v7 = vld [vmem:[#allocation14_spill] sm:$0xff] }
 0x2a0   :  { %v20731_v60 = vpop.f32.mrf.mxu0 }
 0x2a1   :  { %24711 = vst [vmem:[#allocation9_spill] sm:$0xff] %v20731_v60  ;;  %v3610_v53 = vpop.f32.mrf.mxu1  ;;  %v2313_v32 = vadd.f32 %v20536_v43, %v2166_v3  ;;  %v2897_v36 = vadd.f32 %v20559_v21, %v2750_v61  ;;  %v3042_v21 = vadd.f32 %v20651_v50, %v20606_v62 }
 0x2a2   :  { %v20733_v18 = vpop.f32.mrf.mxu0 }
 0x2a3   :  { %24712 = vst [vmem:[#allocation19_spill] sm:$0xff] %v20733_v18  ;;  %v20736_v4 = vpop.f32.mrf.mxu1  ;;  %v2460_v54 = vadd.f32 %v20582_v52, %v2313_v32  ;;  %v2753_v52 = vadd.f32 %v20630_v51, %v20589_v44  ;;  %v3044_v32 = vadd.f32 %v20667_v46, %v2897_v36  ;;  %v3482_v51 = vadd.f32 %v20635_v47, %v3335_v33  ;;  %v24716_v33 = vld [vmem:[#allocation48_spill] sm:$0xff] }
 0x2a4   :  { %v20739_v40 = vpop.f32.mrf.mxu0  ;;  %v3189_v50 = vadd.f32 %v20587_v56, %v3042_v21 }
 0x2a5   :  { %24713 = vst [vmem:[#allocation26_spill] sm:$0xff] %v20739_v40  ;;  %v3614_v15 = vpop.f32.mrf.mxu1  ;;  %v2607_v57 = vadd.f32 %v20544_v25, %v2460_v54  ;;  %v3190_v25 = vadd.f32 %v20594_v30, %v3043_v42  ;;  %v3191_v49 = vadd.f32 %v20599_v37, %v3044_v32  ;;  %v3192_v30 = vadd.f32 %v20604_v63, %v3045_v41  ;;  %v24717_v32 = vld [vmem:[#allocation63_spill] sm:$0xff] }
 0x2a6   :  { %v20743_v29 = vpop.f32.mrf.mxu0  ;;  %v3629_v20 = vadd.f32 %v3610_v53, %v3482_v51  ;;  %v3336_v37 = vadd.f32 %v20698_v27, %v3189_v50  ;;  %v3340_v63 = vadd.f32 %v20717_v11, %v3193_v26  ;;  %v20804_v41 = vsub.s32 0, %v24717_v32 }
 0x2a7   :  { %v3616_v58 = vpop.f32.mrf.mxu1  ;;  %v2754_v1 = vadd.f32 %v20639_v48, %v2607_v57  ;;  %v3337_v44 = vadd.f32 %v3320_v13, %v3190_v25  ;;  %v2900_v48 = vadd.f32 %v20572_v0, %v2753_v52  ;;  %v3338_v0 = vadd.f32 %v20706_v35, %v3191_v49  ;;  %v24715_v57 = vld [vmem:[#allocation16_spill] sm:$0xff] }
 0x2a8   :  { %v20746_v60 = vpop.f32.mrf.mxu0  ;;  %v3483_v36 = vadd.f32 %v24715_v57, %v3336_v37  ;;  %v24727_v57 = vld [vmem:[#allocation9_spill] sm:$0xff] }
 0x2a9   :  { %v3620_v18 = vpop.f32.mrf.mxu1  ;;  %v2901_v46 = vadd.f32 %v20577_v9, %v2754_v1  ;;  %v3047_v62 = vadd.f32 %v20684_v22, %v2900_v48  ;;  %v3339_v9 = vadd.f32 %v20712_v5, %v3192_v30  ;;  %v3484_v13 = vadd.f32 %v20649_v12, %v3337_v44  ;;  %v24714_v5 = vld [vmem:[#allocation49_spill] sm:$0xff] }
 0x2aa   :  { %v20751_v40 = vpop.f32.mrf.mxu0  ;;  %v3485_v35 = vadd.f32 %v20656_v14, %v3338_v0  ;;  %v3630_v14 = vadd.f32 %v20736_v4, %v3483_v36 }
 0x2ab   :  { %v3622_v16 = vpop.f32.mrf.mxu1  ;;  %v3048_v38 = vadd.f32 %v20689_v24, %v2901_v46  ;;  %v3631_v54 = vadd.f32 %v3614_v15, %v3484_v13  ;;  %v3776_v24 = vadd.f32 %v20687_v23, %v3629_v20  ;;  %v3194_v56 = vadd.f32 %v20621_v34, %v3047_v62  ;;  %v24720_v46 = vld [vmem:[#allocation8_spill] sm:$0xff]  ;;  %v24723_v13 = vld [vmem:[#allocation19_spill] sm:$0xff] }
 0x2ac   :  { %v20765_v3 = vpop.f32.mrf.mxu0  ;;  %v3486_v42 = vadd.f32 %v24714_v5, %v3339_v9  ;;  %v3487_v15 = vadd.f32 %v24716_v33, %v3340_v63  ;;  %v3632_v1 = vadd.f32 %v3616_v58, %v3485_v35  ;;  %v24719_v58 = vld [vmem:[#allocation10_spill] sm:$0xff]  ;;  %v24725_v35 = vld [vmem:[#allocation56_spill] sm:$0xff] }
 0x2ad   :  { %v20753_v28 = vpop.f32.mrf.mxu1  ;;  %v3195_v10 = vadd.f32 %v20626_v6, %v3048_v38  ;;  %v3341_v27 = vadd.f32 %v20722_v39, %v3194_v56  ;;  %v3778_v6 = vadd.f32 %v20695_v2, %v3631_v54  ;;  %v4372_v39 = vld [vmem:[%s24434_s5] sm:$0x3] }
 0x2ae   :  { %v4345_v17 = vpop.f32.mrf.mxu0  ;;  %v3633_v34 = vadd.f32 %v3620_v18, %v3486_v42  ;;  %v3779_v48 = vadd.f32 %v20701_v19, %v3632_v1 }
 0x2af   :  { %v20758_v43 = vpop.f32.mrf.mxu1  ;;  %v3342_v11 = vadd.f32 %v20728_v59, %v3195_v10  ;;  %v3488_v44 = vadd.f32 %v24718_v7, %v3341_v27  ;;  %v24724_v10 = vld [vmem:[#allocation57_spill] sm:$0xff]  ;;  %v24726_v27 = vld [vmem:[#allocation26_spill] sm:$0xff] }
 0x2b0   :  { %v20791_v53 = vpop.f32.mrf.mxu0  ;;  %v3780_v49 = vadd.f32 %v24720_v46, %v3633_v34 }
 0x2b1   :  { %v3904_v55 = vpop.f32.mrf.mxu1  ;;  %v3489_v18 = vadd.f32 %v24719_v58, %v3342_v11  ;;  %v3635_v30 = vadd.f32 %v20753_v28, %v3488_v44 }
 0x2b2   :  { %v3923_v12 = vadd.f32 %v3904_v55, %v3776_v24  ;;  %v4349_v52 = vpop.f32.mrf.mxu0  ;;  %v3634_v55 = vadd.f32 %v3622_v16, %v3487_v15  ;;  %v4377_v16 = vrot.slane %v4372_v39, %v20804_v41 }
 0x2b3   :  { %v20775_v8 = vpop.f32.mrf.mxu1  ;;  %v3636_v20 = vadd.f32 %v20758_v43, %v3489_v18  ;;  %v3782_v28 = vadd.f32 %v24724_v10, %v3635_v30  ;;  %v16748_v10 = vld [vmem:[%s24437_s8 + $0x188] ss:$12 sps:$4 sm:$0xff]  }
 0x2b4   :  { %v4070_v21 = vadd.f32 %v20725_v45, %v3923_v12  ;;  %v4351_v51 = vpop.f32.mrf.mxu0  ;;  %v24722_v45 = vld [vmem:[#allocation20_spill] sm:$0xff] }
 0x2b5   :  { %v3908_v31 = vpop.f32.mrf.mxu1  ;;  %v3781_v38 = vadd.f32 %v24722_v45, %v3634_v55  ;;  %v3783_v43 = vadd.f32 %v24725_v35, %v3636_v20  ;;  %v16756_v35 = vld [vmem:[%s24437_s8 + $0x158] ss:$12 sps:$4 sm:$0xff]  }
 0x2b6   :  { %v3925_v59 = vadd.f32 %v3908_v31, %v3778_v6  ;;  %v24721_v31 = vld [vmem:[#allocation7_spill] sm:$0xff]  ;;  %v4355_v63 = vpop.f32.mrf.mxu0  ;;  %v20829_v6 = vsub.s32 1, %v24717_v32 }
 0x2b7   :  { %v3910_v47 = vpop.f32.mrf.mxu1  ;;  %v3777_v62 = vadd.f32 %v24721_v31, %v3630_v14 }
 0x2b8   :  { %v3926_v26 = vadd.f32 %v3910_v47, %v3779_v48  ;;  %v4072_v37 = vadd.f32 %v24723_v13, %v3925_v59 }
 0x2b9   :  { %v3914_v22 = vpop.f32.mrf.mxu1  ;;  %v3924_v19 = vadd.f32 %v20775_v8, %v3777_v62 }
 0x2ba   :  { %v3927_v0 = vadd.f32 %v3914_v22, %v3780_v49  ;;  %v4073_v11 = vadd.f32 %v24726_v27, %v3926_v26  ;;  %v4381_v49 = vrot.slane %v4372_v39, %v20829_v6  ;;  %v16773_v27 = vld [vmem:[%s24437_s8 + $0x1f8] ss:$12 sps:$4 sm:$0xff]  }
 0x2bb   :  { %v3916_v61 = vpop.f32.mrf.mxu1  ;;  %v4071_v36 = vadd.f32 %v24727_v57, %v3924_v19  ;;  %v16780_v57 = vld [vmem:[%s24437_s8 + $0x1e8] ss:$12 sps:$4 sm:$0xff]  }
 0x2bc   :  { %v3928_v54 = vadd.f32 %v3916_v61, %v3781_v38  ;;  %v4074_v47 = vadd.f32 %v20743_v29, %v3927_v0 }
 0x2bd   :  { %v3918_v23 = vpop.f32.mrf.mxu1 }
 0x2be   :  { %v3929_v22 = vadd.f32 %v3918_v23, %v3782_v28  ;;  %v4075_v61 = vadd.f32 %v20746_v60, %v3928_v54  ;;  %v24728_v54 = vmov 0   ;;  %v16752_v28 = vld [vmem:[%s24437_s8 + $0x170] ss:$12 sps:$4 sm:$0xff]  }
 0x2bf   :  { %v3920_v25 = vpop.f32.mrf.mxu1 }
 0x2c0   :  { %v3930_v33 = vadd.f32 %v3920_v25, %v3783_v43  ;;  %v4076_v23 = vadd.f32 %v20751_v40, %v3929_v22  ;;  %v16760_v43 = vld [vmem:[%s24437_s8 + $0x140] ss:$12 sps:$4 sm:$0xff]  }
 0x2c1   :  { %v4198_v2 = vpop.f32.mrf.mxu1  ;;  %v16777_v22 = vld [vmem:[%s24437_s8 + $0x1e0] ss:$12 sps:$4 sm:$0xff]  }
 0x2c2   :  { %v4217_v4 = vadd.f32 %v4198_v2, %v4070_v21  ;;  %v4077_v25 = vadd.f32 %v20765_v3, %v3930_v33 }
 0x2c3   :  { %v4200_v50 = vpop.f32.mrf.mxu1 }
 0x2c4   :  { %v4364_v9 = vadd.f32 %v4345_v17, %v4217_v4  ;;  %v4357_v17 = vpop.f32.mrf.mxu0  ;;  %v4218_v55 = vadd.f32 %v4200_v50, %v4071_v36  ;;  %v16783_v36 = vld [vmem:[%s24437_s8 + $0xac] ss:$12 sps:$4 sm:$0xff]  }
 0x2c5   :  { %v4202_v24 = vpop.f32.mrf.mxu1 }
 0x2c6   :  { %v4219_v56 = vadd.f32 %v4202_v24, %v4072_v37  ;;  %v4384_v42 = vadd.f32 %v4377_v16, %v4364_v9  ;;  %v4359_v29 = vpop.f32.mrf.mxu0  ;;  %v4365_v46 = vadd.f32 %v20791_v53, %v4218_v55  ;;  %v16740_v24 = vld [vmem:[%s24437_s8 + $0x1b8] ss:$12 sps:$4 sm:$0xff]   ;;  %v20909_v55 = vpop.permute.xlu1 %4455 }
 0x2c7   :  { %v4204_v5 = vpop.f32.mrf.mxu1 }
 0x2c8   :  { %v4366_v12 = vadd.f32 %v4349_v52, %v4219_v56  ;;  %v4220_v1 = vadd.f32 %v4204_v5, %v4073_v11  ;;  %v4392_v52 = vmax.f32 %v4384_v42, 0.0  ;;  %v4361_v30 = vpop.f32.mrf.mxu0  ;;  %v4385_v50 = vadd.f32 %v4381_v49, %v4365_v46  ;;  %v16744_v56 = vld [vmem:[%s24437_s8 + $0x1a0] ss:$12 sps:$4 sm:$0xff]   ;;  %v16764_v5 = vld [vmem:[%s24437_s8 + $0x128] ss:$12 sps:$4 sm:$0xff]  }
 0x2c9   :  { %v4208_v8 = vpop.f32.mrf.mxu1  ;;  %v16768_v42 = vld [vmem:[%s24437_s8 + $0x230] ss:$12 sps:$4 sm:$0xff]   ;;  %v16789_v46 = vld [vmem:[%s24437_s8 + $0x78] ss:$12 sps:$4 sm:$0xff]  }
 0x2ca   :  { %v4386_v15 = vadd.f32 %v4377_v16, %v4366_v12  ;;  %v4221_v34 = vadd.f32 %v4208_v8, %v4074_v47  ;;  %v4367_v18 = vadd.f32 %v4351_v51, %v4220_v1  ;;  %v4393_v19 = vmax.f32 %v4385_v50, 0.0  ;;  %v16772_v12 = vld [vmem:[%s24437_s8 + $0x218] ss:$12 sps:$4 sm:$0xff]   ;;  %v16775_v11 = vld [vmem:[%s24437_s8 + $0x1fc] ss:$12 sps:$4 sm:$0xff]  }
 0x2cb   :  { %v4210_v14 = vpop.f32.mrf.mxu1  ;;  %v16776_v47 = vld [vmem:[%s24437_s8 + $0x200] ss:$12 sps:$4 sm:$0xff]   ;;  %4795 = vmatprep.subr.bf16.mxu0 %v16775_v11  ;;  %v16804_v50 = vld [vmem:[%s24437_s8 + $0x38] ss:$12 sps:$4 sm:$0xff]  }
 0x2cc   :  { %v4394_v59 = vmax.f32 %v4386_v15, 0.0  ;;  %v4222_v21 = vadd.f32 %v4210_v14, %v4075_v61  ;;  %v4368_v7 = vadd.f32 %v4355_v63, %v4221_v34  ;;  %v4387_v62 = vadd.f32 %v4381_v49, %v4367_v18  ;;  %v4400_v63 = vld [vmem:[%s24435_s6] sm:$0xf]  ;;  %4796 = vmatpush2.bf16.msra.mxu0 %v16773_v27  ;;  %v4517_v15 = vpop.permute.xlu0 %4516  ;;  %v16831_v11 = vld [vmem:[%s24437_s8 + $0x2ec] ss:$12 sps:$4 sm:$0xff]  }
 0x2cd   :  { %v4212_v44 = vpop.f32.mrf.mxu1  ;;  %v16787_v18 = vld [vmem:[%s24437_s8 + $0x94] ss:$12 sps:$4 sm:$0xff]  }
 0x2ce   :  { %v4401_v58 = vpack.c.bf16 %v4394_v59, %v4392_v52  ;;  %v4369_v60 = vadd.f32 %v4357_v17, %v4222_v21  ;;  %v4223_v2 = vadd.f32 %v4212_v44, %v4076_v23  ;;  %v4388_v20 = vadd.f32 %v4377_v16, %v4368_v7  ;;  %v16779_v17 = vld [vmem:[%s24437_s8 + $0x1e4] ss:$12 sps:$4 sm:$0xff]   ;;  %v16781_v23 = vld [vmem:[%s24437_s8 + $0xa8] ss:$12 sps:$4 sm:$0xff]  }
 0x2cf   :  { %v4214_v48 = vpop.f32.mrf.mxu1  ;;  %v4395_v9 = vmax.f32 %v4387_v62, 0.0  ;;  %4797 = vmatprep.subr.bf16.mxu0 %v16779_v17  ;;  %v16784_v44 = vld [vmem:[%s24437_s8 + $0xb0] ss:$12 sps:$4 sm:$0xff]   ;;  %v16797_v62 = vld [vmem:[%s24437_s8 + $0x48] ss:$12 sps:$4 sm:$0xff]  }
 0x2d0   :  { %v4224_v4 = vadd.f32 %v4214_v48, %v4077_v25  ;;  %v4370_v31 = vadd.f32 %v4359_v29, %v4223_v2  ;;  %v4389_v45 = vadd.f32 %v4381_v49, %v4369_v60  ;;  %v4396_v51 = vmax.f32 %v4388_v20, 0.0  ;;  %4798 = vmatpush2.bf16.msra.mxu0 %v16777_v22  ;;  %v16785_v25 = vld [vmem:[%s24437_s8 + $0x90] ss:$12 sps:$4 sm:$0xff]   ;;  %v16788_v2 = vld [vmem:[%s24437_s8 + $0x98] ss:$12 sps:$4 sm:$0xff]  }
 0x2d1   :  { %v4402_v39 = vpack.c.bf16 %v4395_v9, %v4393_v19  ;;  %5043 = vmatprep.subr.bf16.mxu0 %v16783_v36  ;;  %v16791_v48 = vld [vmem:[%s24437_s8 + $0x7c] ss:$12 sps:$4 sm:$0xff]   ;;  %v16811_v9 = vld [vmem:[%s24437_s8 + $0x4] ss:$12 sps:$4 sm:$0xff]  }
 0x2d2   :  { %v4371_v38 = vadd.f32 %v4361_v30, %v4224_v4  ;;  %v4390_v40 = vadd.f32 %v4377_v16, %v4370_v31  ;;  %v4397_v3 = vmax.f32 %v4389_v45, 0.0  ;;  %v16736_v16 = vld [vmem:[%s24437_s8 + $0x1d0] ss:$12 sps:$4 sm:$0xff]   ;;  %v16793_v30 = vld [vmem:[%s24437_s8 + $0x60] ss:$12 sps:$4 sm:$0xff]  }
 0x2d3   :  { %v16795_v4 = vld [vmem:[%s24437_s8 + $0x64] ss:$12 sps:$4 sm:$0xff]   ;;  %v16796_v20 = vld [vmem:[%s24437_s8 + $0x68] ss:$12 sps:$4 sm:$0xff]   ;;  %v16799_v31 = vld [vmem:[%s24437_s8 + $0x4c] ss:$12 sps:$4 sm:$0xff]  }
 0x2d4   :  { %v4391_v26 = vadd.f32 %v4381_v49, %v4371_v38  ;;  %v4398_v0 = vmax.f32 %v4390_v40, 0.0  ;;  %v16792_v49 = vld [vmem:[%s24437_s8 + $0x80] ss:$12 sps:$4 sm:$0xff]   ;;  %v16800_v45 = vld [vmem:[%s24437_s8 + $0x50] ss:$12 sps:$4 sm:$0xff]  }
 0x2d5   :  { %v16803_v38 = vld [vmem:[%s24437_s8 + $0x34] ss:$12 sps:$4 sm:$0xff]   ;;  %v16801_v40 = vld [vmem:[%s24437_s8 + $0x30] ss:$12 sps:$4 sm:$0xff]  }
 0x2d6   :  { %v4399_v13 = vmax.f32 %v4391_v26, 0.0  ;;  %v4403_v37 = vpack.c.bf16 %v4398_v0, %v4396_v51  ;;  %v16807_v26 = vld [vmem:[%s24437_s8 + $0x1c] ss:$12 sps:$4 sm:$0xff]   ;;  %v16805_v51 = vld [vmem:[%s24437_s8 + $0x18] ss:$12 sps:$4 sm:$0xff]  }
 0x2d7   :  { %v16808_v0 = vld [vmem:[%s24437_s8 + $0x20] ss:$12 sps:$4 sm:$0xff]   ;;  %v16813_v19 = vld [vmem:[%s24437_s8 + $0x108] ss:$12 sps:$4 sm:$0xff]  }
 0x2d8   :  { %v4404_v53 = vpack.c.bf16 %v4399_v13, %v4397_v3  ;;  %v16809_v3 = vld [vmem:[%s24437_s8] ss:$12 sps:$4 sm:$0xff]   ;;  %v16812_v13 = vld [vmem:[%s24437_s8 + $0x8] ss:$12 sps:$4 sm:$0xff]  }
 0x2d9   :  { %v16829_v17 = vld [vmem:[%s24437_s8 + $0x2e8] ss:$12 sps:$4 sm:$0xff]  }
 0x2da   :  { %4421 = vmatprep.subr.bf16.mxu1 %v4404_v53  ;;  %v16816_v53 = vld [vmem:[%s24437_s8 + $0x110] ss:$12 sps:$4 sm:$0xff]  }
 0x2db   :  { %4422 = vmatpush1.bf16.msra.mxu1 %v4403_v37  ;;  %v16815_v37 = vld [vmem:[%s24437_s8 + $0x10c] ss:$12 sps:$4 sm:$0xff]  }
 0x2dc   :  { %4423 = vmatprep.subr.bf16.mxu1 %v4402_v39  ;;  %v16819_v39 = vld [vmem:[%s24437_s8 + $0xf4] ss:$12 sps:$4 sm:$0xff]  }
 0x2df   :  { %4424 = vmatpush1.bf16.msra.mxu1 %v4401_v58 }
 0x2e0   :  { %4808 = vmatprep.subr.bf16.mxu1 %v24728_v54 }
 0x2e2   :  { %14109 = vmatmul.mubr.msk.bf16.vlgmr.msra.gmra.mxu1 %vm4405_vm8, %v4400_v63  ;;  %v16817_v63 = vld [vmem:[%s24437_s8 + $0xf0] ss:$12 sps:$4 sm:$0xff]  }
 0x2e3   :  { %4809 = vmatpush1.bf16.msra.mxu1 %v16736_v16  ;;  %v16820_v16 = vld [vmem:[%s24437_s8 + $0xf8] ss:$12 sps:$4 sm:$0xff]  }
 0x2e4   :  { %4810 = vmatprep.subr.bf16.mxu1 %v24728_v54 }
 0x2e7   :  { %4811 = vmatpush1.bf16.msra.mxu1 %v16740_v24  ;;  %v16823_v24 = vld [vmem:[%s24437_s8 + $0xdc] ss:$12 sps:$4 sm:$0xff]  }
 0x2e8   :  { %4812 = vmatprep.subr.bf16.mxu1 %v24728_v54 }
 0x2eb   :  { %4813 = vmatpush1.bf16.msra.mxu1 %v16744_v56  ;;  %v16821_v56 = vld [vmem:[%s24437_s8 + $0xd8] ss:$12 sps:$4 sm:$0xff]  }
 0x2ec   :  { %4814 = vmatprep.subr.bf16.mxu1 %v24728_v54 }
 0x2ef   :  { %4815 = vmatpush1.bf16.msra.mxu1 %v16748_v10  ;;  %v16824_v10 = vld [vmem:[%s24437_s8 + $0xe0] ss:$12 sps:$4 sm:$0xff]  }
 0x2f0   :  { %4816 = vmatprep.subr.bf16.mxu1 %v24728_v54 }
 0x2f3   :  { %4817 = vmatpush1.bf16.msra.mxu1 %v16752_v28  ;;  %v16827_v28 = vld [vmem:[%s24437_s8 + $0xc4] ss:$12 sps:$4 sm:$0xff]  }
 0x2f4   :  { %4818 = vmatprep.subr.bf16.mxu1 %v24728_v54 }
 0x2f7   :  { %4819 = vmatpush1.bf16.msra.mxu1 %v16756_v35 }
 0x2f8   :  { %4820 = vmatprep.subr.bf16.mxu1 %v24728_v54 }
 0x2fb   :  { %4821 = vmatpush1.bf16.msra.mxu1 %v16760_v43 }
 0x2fc   :  { %4822 = vmatprep.subr.bf16.mxu1 %v24728_v54 }
 0x2ff   :  { %4823 = vmatpush1.bf16.msra.mxu1 %v16764_v5  ;;  %v16825_v5 = vld [vmem:[%s24437_s8 + $0xc0] ss:$12 sps:$4 sm:$0xff]  }
 0x300   :  { %4832 = vmatprep.subr.bf16.mxu1 %v24728_v54 }
 0x303   :  { %4833 = vmatpush2.bf16.msra.mxu1 %v16768_v42  ;;  %v16828_v42 = vld [vmem:[%s24437_s8 + $0xc8] ss:$12 sps:$4 sm:$0xff]  }
 0x304   :  { %4834 = vmatprep.subr.bf16.mxu1 %v24728_v54 }
 0x307   :  { %4835 = vmatpush2.bf16.msra.mxu1 %v16772_v12  ;;  %v21033_v12 = vpop.permute.xlu0 %5130 }
 0x308   :  { %4836 = vmatprep.subr.bf16.mxu1 %v24728_v54 }
 0x30b   :  { %4837 = vmatpush2.bf16.msra.mxu1 %v16776_v47 }
 0x30c   :  { %4838 = vmatprep.subr.bf16.mxu1 %v24728_v54 }
 0x30f   :  { %4839 = vmatpush2.bf16.msra.mxu1 %v16780_v57  ;;  %v16832_v57 = vld [vmem:[%s24437_s8 + $0x2f0] ss:$12 sps:$4 sm:$0xff]  }
 0x310   :  { %5084 = vmatprep.subr.bf16.mxu1 %v24728_v54 }
 0x3a2   :  { %v20902_v8 = vpop.f32.mrf.mxu1 }
 0x3a3   :  { %v4510_v61 = vrot.slane %v20902_v8, 6  ;;  %v4450_v35 = vrot.slane %v20902_v8, 5 }
 0x3a4   :  { %v20905_v33 = vpop.f32.mrf.mxu1 }
 0x3a5   :  { %v4511_v1 = vrot.slane %v20905_v33, 6  ;;  %v4451_v34 = vrot.slane %v20905_v33, 5  ;;  %v4519_v14 = vmul.f32 %v4517_v15, %v4510_v61  ;;  %v5125_v43 = vrot.slane %v20905_v33, 7  ;;  %v16835_v61 = vld [vmem:[%s24437_s8 + $0x2d4] ss:$12 sps:$4 sm:$0xff]  }
 0x3a6   :  { %v4447_v52 = vpop.f32.mrf.mxu1  ;;  %v4458_v27 = vmul.f32 %v20909_v55, %v4450_v35  ;;  %v16885_v35 = vld [vmem:[%s24437_s8 + $0x3d8] ss:$12 sps:$4 sm:$0xff]  }
 0x3a7   :  { %v4520_v59 = vmul.f32 %v4517_v15, %v4511_v1  ;;  %v4459_v29 = vmul.f32 %v20909_v55, %v4451_v34  ;;  %v4521_v58 = vpack.c.bf16 %v4519_v14, %v4519_v14  ;;  %v5134_v47 = vmul.f32 %v21033_v12, %v5125_v43  ;;  %v16833_v15 = vld [vmem:[%s24437_s8 + $0x2d0] ss:$12 sps:$4 sm:$0xff]   ;;  %v16836_v1 = vld [vmem:[%s24437_s8 + $0x2d8] ss:$12 sps:$4 sm:$0xff]   ;;  %v16840_v52 = vld [vmem:[%s24437_s8 + $0x2c0] ss:$12 sps:$4 sm:$0xff]  }
 0x3a8   :  { %v4448_v21 = vpop.f32.mrf.mxu1  ;;  %v4460_v22 = vpack.c.bf16 %v4458_v27, %v4458_v27  ;;  %v16839_v34 = vld [vmem:[%s24437_s8 + $0x2bc] ss:$12 sps:$4 sm:$0xff]   ;;  %v16837_v14 = vld [vmem:[%s24437_s8 + $0x2b8] ss:$12 sps:$4 sm:$0xff]  }
 0x3a9   :  { %v4522_v7 = vpack.c.bf16 %v4520_v59, %v4520_v59  ;;  %v4461_v60 = vpack.c.bf16 %v4459_v29, %v4459_v29  ;;  %v5136_v36 = vpack.c.bf16 %v5134_v47, %v5134_v47  ;;  %v16843_v55 = vld [vmem:[%s24437_s8 + $0x2a4] ss:$12 sps:$4 sm:$0xff]   ;;  %v16841_v59 = vld [vmem:[%s24437_s8 + $0x2a0] ss:$12 sps:$4 sm:$0xff]   ;;  %v16844_v21 = vld [vmem:[%s24437_s8 + $0x2a8] ss:$12 sps:$4 sm:$0xff]  }
 0x3aa   :  { %v16847_v29 = vld [vmem:[%s24437_s8 + $0x28c] ss:$12 sps:$4 sm:$0xff]   ;;  %v16896_v47 = vld [vmem:[%s24437_s8 + $0x3b0] ss:$12 sps:$4 sm:$0xff]  }
 0x3ab   :  { %14195 = vmatprep.mubr.msk.bf16.mxu0 %vm787_vm2, %v4522_v7  ;;  %14196 = vmatprep.mubr.msk.bf16.mxu1 %vm787_vm2, %v4522_v7  ;;  %v16845_v7 = vld [vmem:[%s24437_s8 + $0x288] ss:$12 sps:$4 sm:$0xff]   ;;  %v16895_v27 = vld [vmem:[%s24437_s8 + $0x3ac] ss:$12 sps:$4 sm:$0xff]  }
 0x3ac   :  { %4800 = vmatmul.mubr.bf16.vlgmr.msra.gmra.mxu0 %v4521_v58  ;;  %4841 = vmatmul.mubr.bf16.vlgmr.msra.gmra.mxu1 %v4521_v58  ;;  %v16849_v58 = vld [vmem:[%s24437_s8 + $0x270] ss:$12 sps:$4 sm:$0xff]  }
 0x3ad   :  { %5044 = vmatpush1.bf16.msra.mxu0 %v16781_v23  ;;  %5085 = vmatpush1.bf16.msra.mxu1 %v16784_v44  ;;  %v16848_v23 = vld [vmem:[%s24437_s8 + $0x290] ss:$12 sps:$4 sm:$0xff]   ;;  %v16851_v44 = vld [vmem:[%s24437_s8 + $0x274] ss:$12 sps:$4 sm:$0xff]  }
 0x3ae   :  { %14233 = vmatprep.mubr.msk.bf16.mxu0 %vm787_vm2, %v4461_v60  ;;  %14234 = vmatprep.mubr.msk.bf16.mxu1 %vm787_vm2, %v4461_v60  ;;  %v16855_v60 = vld [vmem:[%s24437_s8 + $0x25c] ss:$12 sps:$4 sm:$0xff]  }
 0x3af   :  { %5045 = vmatprep.subr.bf16.mxu0 %v16787_v18  ;;  %5086 = vmatprep.subr.bf16.mxu1 %v24728_v54  ;;  %v16852_v18 = vld [vmem:[%s24437_s8 + $0x278] ss:$12 sps:$4 sm:$0xff]  }
 0x3b1   :  { %5046 = vmatpush1.bf16.msra.mxu0 %v16785_v25  ;;  %5087 = vmatpush1.bf16.msra.mxu1 %v16788_v2  ;;  %v16853_v25 = vld [vmem:[%s24437_s8 + $0x258] ss:$12 sps:$4 sm:$0xff]   ;;  %v16856_v2 = vld [vmem:[%s24437_s8 + $0x260] ss:$12 sps:$4 sm:$0xff]  }
 0x3b2   :  { %5047 = vmatprep.subr.bf16.mxu0 %v16791_v48  ;;  %5088 = vmatprep.subr.bf16.mxu1 %v24728_v54  ;;  %v16859_v48 = vld [vmem:[%s24437_s8 + $0x244] ss:$12 sps:$4 sm:$0xff]  }
 0x3b5   :  { %5048 = vmatpush1.bf16.msra.mxu0 %v16789_v46  ;;  %5089 = vmatpush1.bf16.msra.mxu1 %v16792_v49  ;;  %v16857_v46 = vld [vmem:[%s24437_s8 + $0x240] ss:$12 sps:$4 sm:$0xff]   ;;  %v16860_v49 = vld [vmem:[%s24437_s8 + $0x248] ss:$12 sps:$4 sm:$0xff]  }
 0x3b6   :  { %5049 = vmatprep.subr.bf16.mxu0 %v16795_v4  ;;  %5090 = vmatprep.subr.bf16.mxu1 %v24728_v54  ;;  %v16863_v4 = vld [vmem:[%s24437_s8 + $0x34c] ss:$12 sps:$4 sm:$0xff]  }
 0x3b9   :  { %5050 = vmatpush1.bf16.msra.mxu0 %v16793_v30  ;;  %5091 = vmatpush1.bf16.msra.mxu1 %v16796_v20  ;;  %v16861_v30 = vld [vmem:[%s24437_s8 + $0x348] ss:$12 sps:$4 sm:$0xff]   ;;  %v16864_v20 = vld [vmem:[%s24437_s8 + $0x350] ss:$12 sps:$4 sm:$0xff]  }
 0x3ba   :  { %5051 = vmatprep.subr.bf16.mxu0 %v16799_v31  ;;  %5092 = vmatprep.subr.bf16.mxu1 %v24728_v54  ;;  %v16867_v31 = vld [vmem:[%s24437_s8 + $0x334] ss:$12 sps:$4 sm:$0xff]  }
 0x3bd   :  { %5052 = vmatpush1.bf16.msra.mxu0 %v16797_v62  ;;  %5093 = vmatpush1.bf16.msra.mxu1 %v16800_v45  ;;  %v16865_v62 = vld [vmem:[%s24437_s8 + $0x330] ss:$12 sps:$4 sm:$0xff]   ;;  %v16868_v45 = vld [vmem:[%s24437_s8 + $0x338] ss:$12 sps:$4 sm:$0xff]  }
 0x3be   :  { %5053 = vmatprep.subr.bf16.mxu0 %v16803_v38  ;;  %5094 = vmatprep.subr.bf16.mxu1 %v24728_v54  ;;  %v16871_v38 = vld [vmem:[%s24437_s8 + $0x31c] ss:$12 sps:$4 sm:$0xff]  }
 0x3c1   :  { %5054 = vmatpush1.bf16.msra.mxu0 %v16801_v40  ;;  %5095 = vmatpush1.bf16.msra.mxu1 %v16804_v50  ;;  %v16869_v40 = vld [vmem:[%s24437_s8 + $0x318] ss:$12 sps:$4 sm:$0xff]   ;;  %v16872_v50 = vld [vmem:[%s24437_s8 + $0x320] ss:$12 sps:$4 sm:$0xff]  }
 0x3c2   :  { %5055 = vmatprep.subr.bf16.mxu0 %v16807_v26  ;;  %5096 = vmatprep.subr.bf16.mxu1 %v24728_v54  ;;  %v16875_v26 = vld [vmem:[%s24437_s8 + $0x304] ss:$12 sps:$4 sm:$0xff]  }
 0x3c5   :  { %5056 = vmatpush1.bf16.msra.mxu0 %v16805_v51  ;;  %5097 = vmatpush1.bf16.msra.mxu1 %v16808_v0  ;;  %v5124_v51 = vrot.slane %v20902_v8, 7  ;;  %v16873_v0 = vld [vmem:[%s24437_s8 + $0x300] ss:$12 sps:$4 sm:$0xff]  }
 0x3c6   :  { %5057 = vmatprep.subr.bf16.mxu0 %v16811_v9  ;;  %5098 = vmatprep.subr.bf16.mxu1 %v24728_v54  ;;  %v16876_v9 = vld [vmem:[%s24437_s8 + $0x308] ss:$12 sps:$4 sm:$0xff]  }
 0x3c9   :  { %5058 = vmatpush1.bf16.msra.mxu0 %v16809_v3  ;;  %5099 = vmatpush1.bf16.msra.mxu1 %v16812_v13  ;;  %v5133_v3 = vmul.f32 %v21033_v12, %v5124_v51  ;;  %v16879_v13 = vld [vmem:[%s24437_s8 + $0x40c] ss:$12 sps:$4 sm:$0xff]   ;;  %v16892_v12 = vld [vmem:[%s24437_s8 + $0x3c8] ss:$12 sps:$4 sm:$0xff]  }
 0x3ca   :  { %5067 = vmatprep.subr.bf16.mxu0 %v16815_v37  ;;  %5108 = vmatprep.subr.bf16.mxu1 %v24728_v54  ;;  %v21168_v37 = vpop.permute.xlu1 %5469 }
 0x3cd   :  { %5068 = vmatpush2.bf16.msra.mxu0 %v16813_v19  ;;  %5109 = vmatpush2.bf16.msra.mxu1 %v16816_v53  ;;  %v5473_v19 = vmul.f32 %v21168_v37, %v5125_v43  ;;  %v16877_v53 = vld [vmem:[%s24437_s8 + $0x408] ss:$12 sps:$4 sm:$0xff]   ;;  %v16888_v43 = vld [vmem:[%s24437_s8 + $0x3e0] ss:$12 sps:$4 sm:$0xff]  }
 0x3ce   :  { %5069 = vmatprep.subr.bf16.mxu0 %v16819_v39  ;;  %5110 = vmatprep.subr.bf16.mxu1 %v24728_v54  ;;  %v5135_v39 = vpack.c.bf16 %v5133_v3, %v5133_v3  ;;  %v16943_v3 = vld [vmem:[%s24437_s8 + $0x4cc] ss:$12 sps:$4 sm:$0xff]  }
 0x3d1   :  { %5070 = vmatpush2.bf16.msra.mxu0 %v16817_v63  ;;  %5111 = vmatpush2.bf16.msra.mxu1 %v16820_v16  ;;  %v16880_v63 = vld [vmem:[%s24437_s8 + $0x410] ss:$12 sps:$4 sm:$0xff]   ;;  %v16883_v16 = vld [vmem:[%s24437_s8 + $0x3f4] ss:$12 sps:$4 sm:$0xff]  }
 0x3d2   :  { %5071 = vmatprep.subr.bf16.mxu0 %v16823_v24  ;;  %5112 = vmatprep.subr.bf16.mxu1 %v24728_v54  ;;  %v5475_v24 = vpack.c.bf16 %v5473_v19, %v5473_v19  ;;  %v16947_v19 = vld [vmem:[%s24437_s8 + $0x4b4] ss:$12 sps:$4 sm:$0xff]  }
 0x3d5   :  { %5072 = vmatpush2.bf16.msra.mxu0 %v16821_v56  ;;  %5113 = vmatpush2.bf16.msra.mxu1 %v16824_v10  ;;  %v16881_v56 = vld [vmem:[%s24437_s8 + $0x3f0] ss:$12 sps:$4 sm:$0xff]   ;;  %v16884_v10 = vld [vmem:[%s24437_s8 + $0x3f8] ss:$12 sps:$4 sm:$0xff]  }
 0x3d6   :  { %5073 = vmatprep.subr.bf16.mxu0 %v16827_v28  ;;  %5114 = vmatprep.subr.bf16.mxu1 %v24728_v54  ;;  %v16887_v28 = vld [vmem:[%s24437_s8 + $0x3dc] ss:$12 sps:$4 sm:$0xff]  }
 0x3d9   :  { %5074 = vmatpush2.bf16.msra.mxu0 %v16825_v5  ;;  %5115 = vmatpush2.bf16.msra.mxu1 %v16828_v42  ;;  %v16891_v5 = vld [vmem:[%s24437_s8 + $0x3c4] ss:$12 sps:$4 sm:$0xff]   ;;  %v16889_v42 = vld [vmem:[%s24437_s8 + $0x3c0] ss:$12 sps:$4 sm:$0xff]  }
 0x3da   :  { %5381 = vmatprep.subr.bf16.mxu0 %v16831_v11  ;;  %5422 = vmatprep.subr.bf16.mxu1 %v24728_v54  ;;  %v16893_v11 = vld [vmem:[%s24437_s8 + $0x3a8] ss:$12 sps:$4 sm:$0xff]  }
 0x3dc   :  { %5076 = vmatmul.mubr.bf16.vlgmr.msra.gmra.mxu0 %v4460_v22  ;;  %5117 = vmatmul.mubr.bf16.vlgmr.msra.gmra.mxu1 %v4460_v22  ;;  %v16897_v22 = vld [vmem:[%s24437_s8 + $0x390] ss:$12 sps:$4 sm:$0xff]  }
 0x3dd   :  { %5382 = vmatpush1.bf16.msra.mxu0 %v16829_v17  ;;  %14320 = vmatprep.mubr.msk.bf16.mxu0 %vm787_vm2, %v5136_v36  ;;  %v16899_v17 = vld [vmem:[%s24437_s8 + $0x394] ss:$12 sps:$4 sm:$0xff]  }
 0x3de   :  { %5423 = vmatpush1.bf16.msra.mxu1 %v16832_v57  ;;  %14321 = vmatprep.mubr.msk.bf16.mxu1 %vm787_vm2, %v5136_v36  ;;  %v16900_v57 = vld [vmem:[%s24437_s8 + $0x398] ss:$12 sps:$4 sm:$0xff]   ;;  %v16903_v36 = vld [vmem:[%s24437_s8 + $0x37c] ss:$12 sps:$4 sm:$0xff]  }
 0x3df   :  { %5383 = vmatprep.subr.bf16.mxu0 %v16835_v61  ;;  %5424 = vmatprep.subr.bf16.mxu1 %v24728_v54  ;;  %v16901_v61 = vld [vmem:[%s24437_s8 + $0x378] ss:$12 sps:$4 sm:$0xff]  }
 0x3e1   :  { %5384 = vmatpush1.bf16.msra.mxu0 %v16833_v15  ;;  %v16904_v15 = vld [vmem:[%s24437_s8 + $0x380] ss:$12 sps:$4 sm:$0xff]  }
 0x3e2   :  { %5425 = vmatpush1.bf16.msra.mxu1 %v16836_v1  ;;  %5385 = vmatprep.subr.bf16.mxu0 %v16839_v34  ;;  %v16907_v1 = vld [vmem:[%s24437_s8 + $0x364] ss:$12 sps:$4 sm:$0xff]   ;;  %v16905_v34 = vld [vmem:[%s24437_s8 + $0x360] ss:$12 sps:$4 sm:$0xff]  }
 0x3e3   :  { %5426 = vmatprep.subr.bf16.mxu1 %v24728_v54 }
 0x3e5   :  { %5386 = vmatpush1.bf16.msra.mxu0 %v16837_v14  ;;  %v16908_v14 = vld [vmem:[%s24437_s8 + $0x368] ss:$12 sps:$4 sm:$0xff]  }
 0x3e6   :  { %5427 = vmatpush1.bf16.msra.mxu1 %v16840_v52  ;;  %5387 = vmatprep.subr.bf16.mxu0 %v16843_v55  ;;  %v16911_v52 = vld [vmem:[%s24437_s8 + $0x46c] ss:$12 sps:$4 sm:$0xff]   ;;  %v16909_v55 = vld [vmem:[%s24437_s8 + $0x468] ss:$12 sps:$4 sm:$0xff]  }
 0x3e7   :  { %5428 = vmatprep.subr.bf16.mxu1 %v24728_v54 }
 0x3e9   :  { %5388 = vmatpush1.bf16.msra.mxu0 %v16841_v59  ;;  %v16912_v59 = vld [vmem:[%s24437_s8 + $0x470] ss:$12 sps:$4 sm:$0xff]  }
 0x3ea   :  { %5429 = vmatpush1.bf16.msra.mxu1 %v16844_v21  ;;  %5389 = vmatprep.subr.bf16.mxu0 %v16847_v29  ;;  %v16915_v21 = vld [vmem:[%s24437_s8 + $0x454] ss:$12 sps:$4 sm:$0xff]   ;;  %v16913_v29 = vld [vmem:[%s24437_s8 + $0x450] ss:$12 sps:$4 sm:$0xff]  }
 0x3eb   :  { %5430 = vmatprep.subr.bf16.mxu1 %v24728_v54 }
 0x3ed   :  { %5390 = vmatpush1.bf16.msra.mxu0 %v16845_v7  ;;  %v16916_v7 = vld [vmem:[%s24437_s8 + $0x458] ss:$12 sps:$4 sm:$0xff]  }
 0x3ee   :  { %5431 = vmatpush1.bf16.msra.mxu1 %v16848_v23  ;;  %5391 = vmatprep.subr.bf16.mxu0 %v16851_v44  ;;  %v16919_v23 = vld [vmem:[%s24437_s8 + $0x43c] ss:$12 sps:$4 sm:$0xff]   ;;  %v16917_v44 = vld [vmem:[%s24437_s8 + $0x438] ss:$12 sps:$4 sm:$0xff]  }
 0x3ef   :  { %5432 = vmatprep.subr.bf16.mxu1 %v24728_v54 }
 0x3f1   :  { %5392 = vmatpush1.bf16.msra.mxu0 %v16849_v58  ;;  %v16920_v58 = vld [vmem:[%s24437_s8 + $0x440] ss:$12 sps:$4 sm:$0xff]  }
 0x3f2   :  { %5433 = vmatpush1.bf16.msra.mxu1 %v16852_v18  ;;  %5393 = vmatprep.subr.bf16.mxu0 %v16855_v60  ;;  %v16923_v18 = vld [vmem:[%s24437_s8 + $0x424] ss:$12 sps:$4 sm:$0xff]   ;;  %v16921_v60 = vld [vmem:[%s24437_s8 + $0x420] ss:$12 sps:$4 sm:$0xff]  }
 0x3f3   :  { %5434 = vmatprep.subr.bf16.mxu1 %v24728_v54 }
 0x3f5   :  { %5394 = vmatpush1.bf16.msra.mxu0 %v16853_v25  ;;  %v16924_v25 = vld [vmem:[%s24437_s8 + $0x428] ss:$12 sps:$4 sm:$0xff]  }
 0x3f6   :  { %5435 = vmatpush1.bf16.msra.mxu1 %v16856_v2  ;;  %5395 = vmatprep.subr.bf16.mxu0 %v16859_v48  ;;  %v5472_v2 = vmul.f32 %v21168_v37, %v5124_v51  ;;  %v16927_v48 = vld [vmem:[%s24437_s8 + $0x52c] ss:$12 sps:$4 sm:$0xff]   ;;  %v16939_v51 = vld [vmem:[%s24437_s8 + $0x4e4] ss:$12 sps:$4 sm:$0xff]  }
 0x3f7   :  { %5436 = vmatprep.subr.bf16.mxu1 %v24728_v54  ;;  %v16944_v37 = vld [vmem:[%s24437_s8 + $0x4d0] ss:$12 sps:$4 sm:$0xff]  }
 0x3f9   :  { %5396 = vmatpush1.bf16.msra.mxu0 %v16857_v46  ;;  %v21298_v46 = vpop.permute.xlu0 %5808 }
 0x3fa   :  { %5437 = vmatpush1.bf16.msra.mxu1 %v16860_v49  ;;  %5405 = vmatprep.subr.bf16.mxu0 %v16863_v4  ;;  %v5812_v49 = vmul.f32 %v21298_v46, %v20905_v33  ;;  %v16925_v4 = vld [vmem:[%s24437_s8 + $0x528] ss:$12 sps:$4 sm:$0xff]  }
 0x3fb   :  { %5446 = vmatprep.subr.bf16.mxu1 %v24728_v54 }
 0x3fd   :  { %5406 = vmatpush2.bf16.msra.mxu0 %v16861_v30  ;;  %v5474_v30 = vpack.c.bf16 %v5472_v2, %v5472_v2 }
 0x3fe   :  { %5447 = vmatpush2.bf16.msra.mxu1 %v16864_v20  ;;  %5407 = vmatprep.subr.bf16.mxu0 %v16867_v31  ;;  %v16928_v20 = vld [vmem:[%s24437_s8 + $0x530] ss:$12 sps:$4 sm:$0xff]   ;;  %v16931_v31 = vld [vmem:[%s24437_s8 + $0x514] ss:$12 sps:$4 sm:$0xff]  }
 0x3ff   :  { %5448 = vmatprep.subr.bf16.mxu1 %v24728_v54 }
 0x401   :  { %5408 = vmatpush2.bf16.msra.mxu0 %v16865_v62  ;;  %v5814_v62 = vpack.c.bf16 %v5812_v49, %v5812_v49 }
 0x402   :  { %5449 = vmatpush2.bf16.msra.mxu1 %v16868_v45  ;;  %5409 = vmatprep.subr.bf16.mxu0 %v16871_v38  ;;  %v16929_v45 = vld [vmem:[%s24437_s8 + $0x510] ss:$12 sps:$4 sm:$0xff]   ;;  %v16932_v38 = vld [vmem:[%s24437_s8 + $0x518] ss:$12 sps:$4 sm:$0xff]  }
 0x403   :  { %5450 = vmatprep.subr.bf16.mxu1 %v24728_v54 }
 0x405   :  { %5410 = vmatpush2.bf16.msra.mxu0 %v16869_v40  ;;  %v16935_v40 = vld [vmem:[%s24437_s8 + $0x4fc] ss:$12 sps:$4 sm:$0xff]  }
 0x406   :  { %5451 = vmatpush2.bf16.msra.mxu1 %v16872_v50  ;;  %5411 = vmatprep.subr.bf16.mxu0 %v16875_v26  ;;  %v16933_v50 = vld [vmem:[%s24437_s8 + $0x4f8] ss:$12 sps:$4 sm:$0xff]   ;;  %v16936_v26 = vld [vmem:[%s24437_s8 + $0x500] ss:$12 sps:$4 sm:$0xff]  }
 0x407   :  { %5452 = vmatprep.subr.bf16.mxu1 %v24728_v54 }
 0x409   :  { %5412 = vmatpush2.bf16.msra.mxu0 %v16873_v0  ;;  %v16937_v0 = vld [vmem:[%s24437_s8 + $0x4e0] ss:$12 sps:$4 sm:$0xff]  }
 0x40a   :  { %5453 = vmatpush2.bf16.msra.mxu1 %v16876_v9  ;;  %5720 = vmatprep.subr.bf16.mxu0 %v16879_v13  ;;  %v16940_v9 = vld [vmem:[%s24437_s8 + $0x4e8] ss:$12 sps:$4 sm:$0xff]  }
 0x40b   :  { %5761 = vmatprep.subr.bf16.mxu1 %v24728_v54  ;;  %v16941_v13 = vld [vmem:[%s24437_s8 + $0x4c8] ss:$12 sps:$4 sm:$0xff]  }
 0x40c   :  { %5414 = vmatmul.mubr.bf16.vlgmr.msra.gmra.mxu0 %v5135_v39 }
 0x40d   :  { %5455 = vmatmul.mubr.bf16.vlgmr.msra.gmra.mxu1 %v5135_v39  ;;  %5721 = vmatpush1.bf16.msra.mxu0 %v16877_v53  ;;  %v16945_v53 = vld [vmem:[%s24437_s8 + $0x4b0] ss:$12 sps:$4 sm:$0xff]   ;;  %v16948_v39 = vld [vmem:[%s24437_s8 + $0x4b8] ss:$12 sps:$4 sm:$0xff]  }
 0x40e   :  { %14407 = vmatprep.mubr.msk.bf16.mxu0 %vm787_vm2, %v5475_v24  ;;  %5762 = vmatpush1.bf16.msra.mxu1 %v16880_v63  ;;  %v16951_v63 = vld [vmem:[%s24437_s8 + $0x49c] ss:$12 sps:$4 sm:$0xff]  }
 0x40f   :  { %14408 = vmatprep.mubr.msk.bf16.mxu1 %vm787_vm2, %v5475_v24  ;;  %5722 = vmatprep.subr.bf16.mxu0 %v16883_v16  ;;  %v16949_v16 = vld [vmem:[%s24437_s8 + $0x498] ss:$12 sps:$4 sm:$0xff]   ;;  %v16952_v24 = vld [vmem:[%s24437_s8 + $0x4a0] ss:$12 sps:$4 sm:$0xff]  }
 0x410   :  { %5763 = vmatprep.subr.bf16.mxu1 %v24728_v54 }
 0x411   :  { %5723 = vmatpush1.bf16.msra.mxu0 %v16881_v56  ;;  %v16955_v56 = vld [vmem:[%s24437_s8 + $0x484] ss:$12 sps:$4 sm:$0xff]  }
 0x412   :  { %5764 = vmatpush1.bf16.msra.mxu1 %v16884_v10  ;;  %5724 = vmatprep.subr.bf16.mxu0 %v16887_v28  ;;  %v16953_v10 = vld [vmem:[%s24437_s8 + $0x480] ss:$12 sps:$4 sm:$0xff]   ;;  %v16956_v28 = vld [vmem:[%s24437_s8 + $0x488] ss:$12 sps:$4 sm:$0xff]  }
 0x413   :  { %5765 = vmatprep.subr.bf16.mxu1 %v24728_v54 }
 0x415   :  { %5725 = vmatpush1.bf16.msra.mxu0 %v16885_v35  ;;  %v16959_v35 = vld [vmem:[%s24437_s8 + $0x58c] ss:$12 sps:$4 sm:$0xff]  }
 0x416   :  { %5766 = vmatpush1.bf16.msra.mxu1 %v16888_v43  ;;  %5726 = vmatprep.subr.bf16.mxu0 %v16891_v5  ;;  %v16957_v43 = vld [vmem:[%s24437_s8 + $0x588] ss:$12 sps:$4 sm:$0xff]   ;;  %v16960_v5 = vld [vmem:[%s24437_s8 + $0x590] ss:$12 sps:$4 sm:$0xff]  }
 0x417   :  { %5767 = vmatprep.subr.bf16.mxu1 %v24728_v54 }
 0x419   :  { %5727 = vmatpush1.bf16.msra.mxu0 %v16889_v42  ;;  %v16963_v42 = vld [vmem:[%s24437_s8 + $0x574] ss:$12 sps:$4 sm:$0xff]  }
 0x41a   :  { %5768 = vmatpush1.bf16.msra.mxu1 %v16892_v12  ;;  %5728 = vmatprep.subr.bf16.mxu0 %v16895_v27  ;;  %v16961_v12 = vld [vmem:[%s24437_s8 + $0x570] ss:$12 sps:$4 sm:$0xff]   ;;  %v16964_v27 = vld [vmem:[%s24437_s8 + $0x578] ss:$12 sps:$4 sm:$0xff]  }
 0x41b   :  { %5769 = vmatprep.subr.bf16.mxu1 %v24728_v54 }
 0x41d   :  { %5729 = vmatpush1.bf16.msra.mxu0 %v16893_v11  ;;  %v16967_v11 = vld [vmem:[%s24437_s8 + $0x55c] ss:$12 sps:$4 sm:$0xff]  }
 0x41e   :  { %5770 = vmatpush1.bf16.msra.mxu1 %v16896_v47  ;;  %5730 = vmatprep.subr.bf16.mxu0 %v16899_v17  ;;  %v16965_v47 = vld [vmem:[%s24437_s8 + $0x558] ss:$12 sps:$4 sm:$0xff]   ;;  %v16968_v17 = vld [vmem:[%s24437_s8 + $0x560] ss:$12 sps:$4 sm:$0xff]  }
 0x41f   :  { %5771 = vmatprep.subr.bf16.mxu1 %v24728_v54 }
 0x421   :  { %5731 = vmatpush1.bf16.msra.mxu0 %v16897_v22  ;;  %v16971_v22 = vld [vmem:[%s24437_s8 + $0x544] ss:$12 sps:$4 sm:$0xff]  }
 0x422   :  { %5772 = vmatpush1.bf16.msra.mxu1 %v16900_v57  ;;  %5732 = vmatprep.subr.bf16.mxu0 %v16903_v36  ;;  %v6144_v57 = vrot.slane %v20905_v33, 1  ;;  %v16969_v36 = vld [vmem:[%s24437_s8 + $0x540] ss:$12 sps:$4 sm:$0xff]  }
 0x423   :  { %5773 = vmatprep.subr.bf16.mxu1 %v24728_v54 }
 0x425   :  { %5733 = vmatpush1.bf16.msra.mxu0 %v16901_v61  ;;  %v16972_v61 = vld [vmem:[%s24437_s8 + $0x548] ss:$12 sps:$4 sm:$0xff]  }
 0x426   :  { %5774 = vmatpush1.bf16.msra.mxu1 %v16904_v15  ;;  %5734 = vmatprep.subr.bf16.mxu0 %v16907_v1  ;;  %v5811_v15 = vmul.f32 %v21298_v46, %v20902_v8  ;;  %v16975_v1 = vld [vmem:[%s24437_s8 + $0x64c] ss:$12 sps:$4 sm:$0xff]  }
 0x427   :  { %5775 = vmatprep.subr.bf16.mxu1 %v24728_v54  ;;  %v16981_v46 = vld [vmem:[%s24437_s8 + $0x618] ss:$12 sps:$4 sm:$0xff]  }
 0x429   :  { %5735 = vmatpush1.bf16.msra.mxu0 %v16905_v34  ;;  %v21427_v34 = vpop.permute.xlu1 %6149 }
 0x42a   :  { %5776 = vmatpush1.bf16.msra.mxu1 %v16908_v14  ;;  %5744 = vmatprep.subr.bf16.mxu0 %v16911_v52  ;;  %v6153_v14 = vmul.f32 %v21427_v34, %v6144_v57  ;;  %v16973_v52 = vld [vmem:[%s24437_s8 + $0x648] ss:$12 sps:$4 sm:$0xff]  }
 0x42b   :  { %5785 = vmatprep.subr.bf16.mxu1 %v24728_v54 }
 0x42d   :  { %5745 = vmatpush2.bf16.msra.mxu0 %v16909_v55  ;;  %v5813_v55 = vpack.c.bf16 %v5811_v15, %v5811_v15  ;;  %v17027_v15 = vld [vmem:[%s24437_s8 + $0x754] ss:$12 sps:$4 sm:$0xff]  }
 0x42e   :  { %5786 = vmatpush2.bf16.msra.mxu1 %v16912_v59  ;;  %5746 = vmatprep.subr.bf16.mxu0 %v16915_v21  ;;  %v16976_v59 = vld [vmem:[%s24437_s8 + $0x650] ss:$12 sps:$4 sm:$0xff]   ;;  %v16979_v21 = vld [vmem:[%s24437_s8 + $0x634] ss:$12 sps:$4 sm:$0xff]  }
 0x42f   :  { %5787 = vmatprep.subr.bf16.mxu1 %v24728_v54 }
 0x431   :  { %5747 = vmatpush2.bf16.msra.mxu0 %v16913_v29 }
 0x432   :  { %5788 = vmatpush2.bf16.msra.mxu1 %v16916_v7  ;;  %5748 = vmatprep.subr.bf16.mxu0 %v16919_v23  ;;  %v6155_v23 = vpack.c.bf16 %v6153_v14, %v6153_v14 }
 0x433   :  { %5789 = vmatprep.subr.bf16.mxu1 %v24728_v54 }
 0x435   :  { %5749 = vmatpush2.bf16.msra.mxu0 %v16917_v44  ;;  %v16977_v44 = vld [vmem:[%s24437_s8 + $0x630] ss:$12 sps:$4 sm:$0xff]  }
 0x436   :  { %5790 = vmatpush2.bf16.msra.mxu1 %v16920_v58  ;;  %5750 = vmatprep.subr.bf16.mxu0 %v16923_v18 }
 0x437   :  { %5791 = vmatprep.subr.bf16.mxu1 %v24728_v54 }
 0x439   :  { %5751 = vmatpush2.bf16.msra.mxu0 %v16921_v60  ;;  %v16980_v60 = vld [vmem:[%s24437_s8 + $0x638] ss:$12 sps:$4 sm:$0xff]  }
 0x43a   :  { %5792 = vmatpush2.bf16.msra.mxu1 %v16924_v25  ;;  %6059 = vmatprep.subr.bf16.mxu0 %v16927_v48  ;;  %v16983_v25 = vld [vmem:[%s24437_s8 + $0x61c] ss:$12 sps:$4 sm:$0xff]  }
 0x43b   :  { %6100 = vmatprep.subr.bf16.mxu1 %v24728_v54 }
 0x43c   :  { %5753 = vmatmul.mubr.bf16.vlgmr.msra.gmra.mxu0 %v5474_v30 }
 0x43d   :  { %5794 = vmatmul.mubr.bf16.vlgmr.msra.gmra.mxu1 %v5474_v30  ;;  %6060 = vmatpush1.bf16.msra.mxu0 %v16925_v4  ;;  %v16984_v30 = vld [vmem:[%s24437_s8 + $0x620] ss:$12 sps:$4 sm:$0xff]  }
 0x43e   :  { %14494 = vmatprep.mubr.msk.bf16.mxu0 %vm787_vm2, %v5814_v62  ;;  %6101 = vmatpush1.bf16.msra.mxu1 %v16928_v20  ;;  %v16987_v20 = vld [vmem:[%s24437_s8 + $0x604] ss:$12 sps:$4 sm:$0xff]  }
 0x43f   :  { %14495 = vmatprep.mubr.msk.bf16.mxu1 %vm787_vm2, %v5814_v62  ;;  %6061 = vmatprep.subr.bf16.mxu0 %v16931_v31  ;;  %v16985_v31 = vld [vmem:[%s24437_s8 + $0x600] ss:$12 sps:$4 sm:$0xff]   ;;  %v16988_v62 = vld [vmem:[%s24437_s8 + $0x608] ss:$12 sps:$4 sm:$0xff]  }
 0x440   :  { %6102 = vmatprep.subr.bf16.mxu1 %v24728_v54 }
 0x441   :  { %6062 = vmatpush1.bf16.msra.mxu0 %v16929_v45  ;;  %v16991_v45 = vld [vmem:[%s24437_s8 + $0x5ec] ss:$12 sps:$4 sm:$0xff]  }
 0x442   :  { %6103 = vmatpush1.bf16.msra.mxu1 %v16932_v38  ;;  %6063 = vmatprep.subr.bf16.mxu0 %v16935_v40  ;;  %v16989_v38 = vld [vmem:[%s24437_s8 + $0x5e8] ss:$12 sps:$4 sm:$0xff]   ;;  %v16992_v40 = vld [vmem:[%s24437_s8 + $0x5f0] ss:$12 sps:$4 sm:$0xff]  }
 0x443   :  { %6104 = vmatprep.subr.bf16.mxu1 %v24728_v54 }
 0x445   :  { %6064 = vmatpush1.bf16.msra.mxu0 %v16933_v50  ;;  %v16995_v50 = vld [vmem:[%s24437_s8 + $0x5d4] ss:$12 sps:$4 sm:$0xff]  }
 0x446   :  { %6105 = vmatpush1.bf16.msra.mxu1 %v16936_v26  ;;  %6065 = vmatprep.subr.bf16.mxu0 %v16939_v51  ;;  %v16993_v26 = vld [vmem:[%s24437_s8 + $0x5d0] ss:$12 sps:$4 sm:$0xff]   ;;  %v16996_v51 = vld [vmem:[%s24437_s8 + $0x5d8] ss:$12 sps:$4 sm:$0xff]  }
 0x447   :  { %6106 = vmatprep.subr.bf16.mxu1 %v24728_v54 }
 0x449   :  { %6066 = vmatpush1.bf16.msra.mxu0 %v16937_v0  ;;  %v16999_v0 = vld [vmem:[%s24437_s8 + $0x5bc] ss:$12 sps:$4 sm:$0xff]  }
 0x44a   :  { %6107 = vmatpush1.bf16.msra.mxu1 %v16940_v9  ;;  %6067 = vmatprep.subr.bf16.mxu0 %v16943_v3  ;;  %v16997_v9 = vld [vmem:[%s24437_s8 + $0x5b8] ss:$12 sps:$4 sm:$0xff]   ;;  %v17000_v3 = vld [vmem:[%s24437_s8 + $0x5c0] ss:$12 sps:$4 sm:$0xff]  }
 0x44b   :  { %6108 = vmatprep.subr.bf16.mxu1 %v24728_v54 }
 0x44d   :  { %6068 = vmatpush1.bf16.msra.mxu0 %v16941_v13  ;;  %v17003_v13 = vld [vmem:[%s24437_s8 + $0x5a4] ss:$12 sps:$4 sm:$0xff]  }
 0x44e   :  { %6109 = vmatpush1.bf16.msra.mxu1 %v16944_v37  ;;  %6069 = vmatprep.subr.bf16.mxu0 %v16947_v19  ;;  %v17001_v37 = vld [vmem:[%s24437_s8 + $0x5a0] ss:$12 sps:$4 sm:$0xff]   ;;  %v17004_v19 = vld [vmem:[%s24437_s8 + $0x5a8] ss:$12 sps:$4 sm:$0xff]  }
 0x44f   :  { %6110 = vmatprep.subr.bf16.mxu1 %v24728_v54 }
 0x451   :  { %6070 = vmatpush1.bf16.msra.mxu0 %v16945_v53  ;;  %v17007_v53 = vld [vmem:[%s24437_s8 + $0x6ac] ss:$12 sps:$4 sm:$0xff]  }
 0x452   :  { %6111 = vmatpush1.bf16.msra.mxu1 %v16948_v39  ;;  %6071 = vmatprep.subr.bf16.mxu0 %v16951_v63  ;;  %v17005_v39 = vld [vmem:[%s24437_s8 + $0x6a8] ss:$12 sps:$4 sm:$0xff]   ;;  %v17008_v63 = vld [vmem:[%s24437_s8 + $0x6b0] ss:$12 sps:$4 sm:$0xff]  }
 0x453   :  { %6112 = vmatprep.subr.bf16.mxu1 %v24728_v54 }
 0x455   :  { %6072 = vmatpush1.bf16.msra.mxu0 %v16949_v16  ;;  %v17011_v16 = vld [vmem:[%s24437_s8 + $0x694] ss:$12 sps:$4 sm:$0xff]  }
 0x456   :  { %6113 = vmatpush1.bf16.msra.mxu1 %v16952_v24  ;;  %6073 = vmatprep.subr.bf16.mxu0 %v16955_v56  ;;  %v17009_v24 = vld [vmem:[%s24437_s8 + $0x690] ss:$12 sps:$4 sm:$0xff]   ;;  %v17012_v56 = vld [vmem:[%s24437_s8 + $0x698] ss:$12 sps:$4 sm:$0xff]  }
 0x457   :  { %6114 = vmatprep.subr.bf16.mxu1 %v24728_v54 }
 0x459   :  { %6074 = vmatpush1.bf16.msra.mxu0 %v16953_v10  ;;  %v17015_v10 = vld [vmem:[%s24437_s8 + $0x67c] ss:$12 sps:$4 sm:$0xff]  }
 0x45a   :  { %6115 = vmatpush1.bf16.msra.mxu1 %v16956_v28  ;;  %6083 = vmatprep.subr.bf16.mxu0 %v16959_v35  ;;  %v17013_v28 = vld [vmem:[%s24437_s8 + $0x678] ss:$12 sps:$4 sm:$0xff]   ;;  %v17016_v35 = vld [vmem:[%s24437_s8 + $0x680] ss:$12 sps:$4 sm:$0xff]  }
 0x45b   :  { %6124 = vmatprep.subr.bf16.mxu1 %v24728_v54 }
 0x45d   :  { %6084 = vmatpush2.bf16.msra.mxu0 %v16957_v43  ;;  %v17019_v43 = vld [vmem:[%s24437_s8 + $0x664] ss:$12 sps:$4 sm:$0xff]  }
 0x45e   :  { %6125 = vmatpush2.bf16.msra.mxu1 %v16960_v5  ;;  %6085 = vmatprep.subr.bf16.mxu0 %v16963_v42  ;;  %v6143_v5 = vrot.slane %v20902_v8, 1  ;;  %v17017_v42 = vld [vmem:[%s24437_s8 + $0x660] ss:$12 sps:$4 sm:$0xff]  }
 0x45f   :  { %6126 = vmatprep.subr.bf16.mxu1 %v24728_v54 }
 0x461   :  { %6086 = vmatpush2.bf16.msra.mxu0 %v16961_v12  ;;  %v17020_v12 = vld [vmem:[%s24437_s8 + $0x668] ss:$12 sps:$4 sm:$0xff]  }
 0x462   :  { %6127 = vmatpush2.bf16.msra.mxu1 %v16964_v27  ;;  %6087 = vmatprep.subr.bf16.mxu0 %v16967_v11  ;;  %v6152_v27 = vmul.f32 %v21427_v34, %v6143_v5  ;;  %v17023_v11 = vld [vmem:[%s24437_s8 + $0x76c] ss:$12 sps:$4 sm:$0xff]  }
 0x463   :  { %6128 = vmatprep.subr.bf16.mxu1 %v24728_v54 }
 0x465   :  { %6088 = vmatpush2.bf16.msra.mxu0 %v16965_v47  ;;  %v21564_v47 = vpop.permute.xlu0 %6488 }
 0x466   :  { %6129 = vmatpush2.bf16.msra.mxu1 %v16968_v17  ;;  %6089 = vmatprep.subr.bf16.mxu0 %v16971_v22  ;;  %v6492_v17 = vmul.f32 %v21564_v47, %v6144_v57  ;;  %v17021_v22 = vld [vmem:[%s24437_s8 + $0x768] ss:$12 sps:$4 sm:$0xff]  }
 0x467   :  { %6130 = vmatprep.subr.bf16.mxu1 %v24728_v54 }
 0x468   :  { %v6494_v34 = vpack.c.bf16 %v6492_v17, %v6492_v17 }
 0x469   :  { %6090 = vmatpush2.bf16.msra.mxu0 %v16969_v36  ;;  %v6154_v36 = vpack.c.bf16 %v6152_v27, %v6152_v27  ;;  %v17069_v27 = vld [vmem:[%s24437_s8 + $0x888] ss:$12 sps:$4 sm:$0xff]  }
 0x46a   :  { %6131 = vmatpush2.bf16.msra.mxu1 %v16972_v61  ;;  %6400 = vmatprep.subr.bf16.mxu0 %v16975_v1  ;;  %v17024_v61 = vld [vmem:[%s24437_s8 + $0x770] ss:$12 sps:$4 sm:$0xff]  }
 0x46b   :  { %6441 = vmatprep.subr.bf16.mxu1 %v24728_v54 }
 0x46c   :  { %6092 = vmatmul.mubr.bf16.vlgmr.msra.gmra.mxu0 %v5813_v55  ;;  %v21443_v29 = vpop.f32.mrf.mxu0  ;;  %v21445_v7 = vpop.f32.mrf.mxu1 }
 0x46d   :  { %6133 = vmatmul.mubr.bf16.vlgmr.msra.gmra.mxu1 %v5813_v55  ;;  %6401 = vmatpush1.bf16.msra.mxu0 %v16973_v52  ;;  %v17025_v55 = vld [vmem:[%s24437_s8 + $0x750] ss:$12 sps:$4 sm:$0xff]  }
 0x46e   :  { %14581 = vmatprep.mubr.msk.bf16.mxu0 %vm787_vm2, %v6155_v23  ;;  %6442 = vmatpush1.bf16.msra.mxu1 %v16976_v59  ;;  %v21451_v58 = vpop.f32.mrf.mxu0  ;;  %v4844_v18 = vpop.f32.mrf.mxu1 }
 0x46f   :  { %14582 = vmatprep.mubr.msk.bf16.mxu1 %vm787_vm2, %v6155_v23  ;;  %6402 = vmatprep.subr.bf16.mxu0 %v16979_v21  ;;  %v17028_v23 = vld [vmem:[%s24437_s8 + $0x758] ss:$12 sps:$4 sm:$0xff]  }
 0x470   :  { %6443 = vmatprep.subr.bf16.mxu1 %v24728_v54  ;;  %v4805_v2 = vpop.f32.mrf.mxu0  ;;  %v4845_v48 = vpop.f32.mrf.mxu1 }
 0x471   :  { %6403 = vmatpush1.bf16.msra.mxu0 %v16977_v44  ;;  %v17032_v48 = vld [vmem:[%s24437_s8 + $0x740] ss:$12 sps:$4 sm:$0xff]  }
 0x472   :  { %6444 = vmatpush1.bf16.msra.mxu1 %v16980_v60  ;;  %v4806_v49 = vpop.f32.mrf.mxu0  ;;  %v4846_v4 = vpop.f32.mrf.mxu1  ;;  %6404 = vmatprep.subr.bf16.mxu0 %v16983_v25  ;;  %v17029_v60 = vld [vmem:[%s24437_s8 + $0x738] ss:$12 sps:$4 sm:$0xff]  }
 0x473   :  { %6445 = vmatprep.subr.bf16.mxu1 %v24728_v54  ;;  %v17036_v49 = vld [vmem:[%s24437_s8 + $0x728] ss:$12 sps:$4 sm:$0xff]   ;;  %v17039_v4 = vld [vmem:[%s24437_s8 + $0x70c] ss:$12 sps:$4 sm:$0xff]  }
 0x475   :  { %6405 = vmatpush1.bf16.msra.mxu0 %v16981_v46  ;;  %v17033_v46 = vld [vmem:[%s24437_s8 + $0x720] ss:$12 sps:$4 sm:$0xff]  }
 0x476   :  { %6446 = vmatpush1.bf16.msra.mxu1 %v16984_v30  ;;  %6406 = vmatprep.subr.bf16.mxu0 %v16987_v20  ;;  %v17037_v30 = vld [vmem:[%s24437_s8 + $0x708] ss:$12 sps:$4 sm:$0xff]   ;;  %v17040_v20 = vld [vmem:[%s24437_s8 + $0x710] ss:$12 sps:$4 sm:$0xff]  }
 0x477   :  { %6447 = vmatprep.subr.bf16.mxu1 %v24728_v54 }
 0x479   :  { %6407 = vmatpush1.bf16.msra.mxu0 %v16985_v31  ;;  %v17043_v31 = vld [vmem:[%s24437_s8 + $0x6f4] ss:$12 sps:$4 sm:$0xff]  }
 0x47a   :  { %6448 = vmatpush1.bf16.msra.mxu1 %v16988_v62  ;;  %6408 = vmatprep.subr.bf16.mxu0 %v16991_v45  ;;  %v17041_v62 = vld [vmem:[%s24437_s8 + $0x6f0] ss:$12 sps:$4 sm:$0xff]   ;;  %v17044_v45 = vld [vmem:[%s24437_s8 + $0x6f8] ss:$12 sps:$4 sm:$0xff]  }
 0x47b   :  { %6449 = vmatprep.subr.bf16.mxu1 %v24728_v54 }
 0x47d   :  { %6409 = vmatpush1.bf16.msra.mxu0 %v16989_v38  ;;  %v17047_v38 = vld [vmem:[%s24437_s8 + $0x6dc] ss:$12 sps:$4 sm:$0xff]  }
 0x47e   :  { %6450 = vmatpush1.bf16.msra.mxu1 %v16992_v40  ;;  %6410 = vmatprep.subr.bf16.mxu0 %v16995_v50  ;;  %v17045_v40 = vld [vmem:[%s24437_s8 + $0x6d8] ss:$12 sps:$4 sm:$0xff]   ;;  %v17048_v50 = vld [vmem:[%s24437_s8 + $0x6e0] ss:$12 sps:$4 sm:$0xff]  }
 0x47f   :  { %6451 = vmatprep.subr.bf16.mxu1 %v24728_v54 }
 0x481   :  { %6411 = vmatpush1.bf16.msra.mxu0 %v16993_v26  ;;  %v17051_v26 = vld [vmem:[%s24437_s8 + $0x6c4] ss:$12 sps:$4 sm:$0xff]  }
 0x482   :  { %6452 = vmatpush1.bf16.msra.mxu1 %v16996_v51  ;;  %6412 = vmatprep.subr.bf16.mxu0 %v16999_v0  ;;  %v17049_v51 = vld [vmem:[%s24437_s8 + $0x6c0] ss:$12 sps:$4 sm:$0xff]   ;;  %v17052_v0 = vld [vmem:[%s24437_s8 + $0x6c8] ss:$12 sps:$4 sm:$0xff]  }
 0x483   :  { %6453 = vmatprep.subr.bf16.mxu1 %v24728_v54 }
 0x485   :  { %6413 = vmatpush1.bf16.msra.mxu0 %v16997_v9  ;;  %v17055_v9 = vld [vmem:[%s24437_s8 + $0x7cc] ss:$12 sps:$4 sm:$0xff]  }
 0x486   :  { %6454 = vmatpush1.bf16.msra.mxu1 %v17000_v3  ;;  %6414 = vmatprep.subr.bf16.mxu0 %v17003_v13  ;;  %v17053_v3 = vld [vmem:[%s24437_s8 + $0x7c8] ss:$12 sps:$4 sm:$0xff]   ;;  %v17056_v13 = vld [vmem:[%s24437_s8 + $0x7d0] ss:$12 sps:$4 sm:$0xff]  }
 0x487   :  { %6455 = vmatprep.subr.bf16.mxu1 %v24728_v54 }
 0x489   :  { %6415 = vmatpush1.bf16.msra.mxu0 %v17001_v37  ;;  %v17059_v37 = vld [vmem:[%s24437_s8 + $0x7b4] ss:$12 sps:$4 sm:$0xff]  }
 0x48a   :  { %6456 = vmatpush1.bf16.msra.mxu1 %v17004_v19  ;;  %6424 = vmatprep.subr.bf16.mxu0 %v17007_v53  ;;  %v17057_v19 = vld [vmem:[%s24437_s8 + $0x7b0] ss:$12 sps:$4 sm:$0xff]   ;;  %v17060_v53 = vld [vmem:[%s24437_s8 + $0x7b8] ss:$12 sps:$4 sm:$0xff]  }
 0x48b   :  { %6465 = vmatprep.subr.bf16.mxu1 %v24728_v54 }
 0x48d   :  { %6425 = vmatpush2.bf16.msra.mxu0 %v17005_v39  ;;  %v17063_v39 = vld [vmem:[%s24437_s8 + $0x79c] ss:$12 sps:$4 sm:$0xff]  }
 0x48e   :  { %6466 = vmatpush2.bf16.msra.mxu1 %v17008_v63  ;;  %6426 = vmatprep.subr.bf16.mxu0 %v17011_v16  ;;  %v17061_v63 = vld [vmem:[%s24437_s8 + $0x798] ss:$12 sps:$4 sm:$0xff]   ;;  %v17064_v16 = vld [vmem:[%s24437_s8 + $0x7a0] ss:$12 sps:$4 sm:$0xff]  }
 0x48f   :  { %6467 = vmatprep.subr.bf16.mxu1 %v24728_v54 }
 0x491   :  { %6427 = vmatpush2.bf16.msra.mxu0 %v17009_v24  ;;  %v17067_v24 = vld [vmem:[%s24437_s8 + $0x784] ss:$12 sps:$4 sm:$0xff]  }
 0x492   :  { %6468 = vmatpush2.bf16.msra.mxu1 %v17012_v56  ;;  %6428 = vmatprep.subr.bf16.mxu0 %v17015_v10  ;;  %v6824_v56 = vrot.slane %v20905_v33, 2  ;;  %v17065_v10 = vld [vmem:[%s24437_s8 + $0x780] ss:$12 sps:$4 sm:$0xff]  }
 0x493   :  { %6469 = vmatprep.subr.bf16.mxu1 %v24728_v54 }
 0x495   :  { %6429 = vmatpush2.bf16.msra.mxu0 %v17013_v28  ;;  %v17068_v28 = vld [vmem:[%s24437_s8 + $0x788] ss:$12 sps:$4 sm:$0xff]  }
 0x496   :  { %6470 = vmatpush2.bf16.msra.mxu1 %v17016_v35  ;;  %6430 = vmatprep.subr.bf16.mxu0 %v17019_v43  ;;  %v6491_v35 = vmul.f32 %v21564_v47, %v6143_v5  ;;  %v17071_v43 = vld [vmem:[%s24437_s8 + $0x88c] ss:$12 sps:$4 sm:$0xff]   ;;  %v17072_v5 = vld [vmem:[%s24437_s8 + $0x890] ss:$12 sps:$4 sm:$0xff]   ;;  %v17075_v47 = vld [vmem:[%s24437_s8 + $0x874] ss:$12 sps:$4 sm:$0xff]  }
 0x497   :  { %6471 = vmatprep.subr.bf16.mxu1 %v24728_v54 }
 0x499   :  { %6431 = vmatpush2.bf16.msra.mxu0 %v17017_v42  ;;  %v21704_v42 = vpop.permute.xlu1 %6829 }
 0x49a   :  { %6472 = vmatpush2.bf16.msra.mxu1 %v17020_v12  ;;  %6739 = vmatprep.subr.bf16.mxu0 %v17023_v11  ;;  %v6833_v12 = vmul.f32 %v21704_v42, %v6824_v56  ;;  %v6493_v11 = vpack.c.bf16 %v6491_v35, %v6491_v35  ;;  %v17119_v56 = vld [vmem:[%s24437_s8 + $0x9ac] ss:$12 sps:$4 sm:$0xff]  }
 0x49b   :  { %6780 = vmatprep.subr.bf16.mxu1 %v24728_v54 }
 0x49c   :  { %v5077_v1 = vpop.f32.mrf.mxu0  ;;  %v5118_v57 = vpop.f32.mrf.mxu1  ;;  %6433 = vmatmul.mubr.bf16.vlgmr.msra.gmra.mxu0 %v6154_v36 }
 0x49d   :  { %v21581_v14 = vadd.f32 %v5077_v1, %v21443_v29  ;;  %v21584_v52 = vadd.f32 %v5118_v57, %v21445_v7  ;;  %6474 = vmatmul.mubr.bf16.vlgmr.msra.gmra.mxu1 %v6154_v36  ;;  %6740 = vmatpush1.bf16.msra.mxu0 %v17021_v22  ;;  %v17031_v29 = vld [vmem:[%s24437_s8 + $0x73c] ss:$12 sps:$4 sm:$0xff]   ;;  %v6835_v22 = vpack.c.bf16 %v6833_v12, %v6833_v12 }
 0x49e   :  { %14668 = vmatprep.mubr.msk.bf16.mxu0 %vm787_vm2, %v6494_v34  ;;  %6781 = vmatpush1.bf16.msra.mxu1 %v17024_v61  ;;  %v5079_v59 = vpop.f32.mrf.mxu0  ;;  %v5120_v21 = vpop.f32.mrf.mxu1 }
 0x49f   :  { %14669 = vmatprep.mubr.msk.bf16.mxu1 %vm787_vm2, %v6494_v34  ;;  %v21598_v7 = vadd.f32 %v5079_v59, %v21451_v58  ;;  %6741 = vmatprep.subr.bf16.mxu0 %v17027_v15  ;;  %v17035_v58 = vld [vmem:[%s24437_s8 + $0x724] ss:$12 sps:$4 sm:$0xff]  }
 0x4a0   :  { %v5081_v44 = vpop.f32.mrf.mxu0  ;;  %v5121_v18 = vpop.f32.mrf.mxu1  ;;  %6782 = vmatprep.subr.bf16.mxu1 %v24728_v54  ;;  %v17073_v15 = vld [vmem:[%s24437_s8 + $0x870] ss:$12 sps:$4 sm:$0xff]   ;;  %v17076_v34 = vld [vmem:[%s24437_s8 + $0x878] ss:$12 sps:$4 sm:$0xff]  }
 0x4a1   :  { %6742 = vmatpush1.bf16.msra.mxu0 %v17025_v55  ;;  %v17080_v44 = vld [vmem:[%s24437_s8 + $0x860] ss:$12 sps:$4 sm:$0xff]  }
 0x4a2   :  { %6783 = vmatpush1.bf16.msra.mxu1 %v17028_v23  ;;  %v5082_v25 = vpop.f32.mrf.mxu0  ;;  %v5122_v2 = vpop.f32.mrf.mxu1  ;;  %6743 = vmatprep.subr.bf16.mxu0 %v17031_v29  ;;  %v17077_v23 = vld [vmem:[%s24437_s8 + $0x858] ss:$12 sps:$4 sm:$0xff]  }
 0x4a3   :  { %6784 = vmatprep.subr.bf16.mxu1 %v24728_v54  ;;  %v17084_v25 = vld [vmem:[%s24437_s8 + $0x848] ss:$12 sps:$4 sm:$0xff]   ;;  %v17087_v2 = vld [vmem:[%s24437_s8 + $0x82c] ss:$12 sps:$4 sm:$0xff]  }
 0x4a5   :  { %6744 = vmatpush1.bf16.msra.mxu0 %v17029_v60  ;;  %v17081_v60 = vld [vmem:[%s24437_s8 + $0x840] ss:$12 sps:$4 sm:$0xff]  }
 0x4a6   :  { %6785 = vmatpush1.bf16.msra.mxu1 %v17032_v48  ;;  %6745 = vmatprep.subr.bf16.mxu0 %v17035_v58  ;;  %v17085_v48 = vld [vmem:[%s24437_s8 + $0x828] ss:$12 sps:$4 sm:$0xff]   ;;  %v17088_v58 = vld [vmem:[%s24437_s8 + $0x830] ss:$12 sps:$4 sm:$0xff]  }
 0x4a7   :  { %6786 = vmatprep.subr.bf16.mxu1 %v24728_v54 }
 0x4a9   :  { %6746 = vmatpush1.bf16.msra.mxu0 %v17033_v46  ;;  %v17091_v46 = vld [vmem:[%s24437_s8 + $0x814] ss:$12 sps:$4 sm:$0xff]  }
 0x4aa   :  { %6787 = vmatpush1.bf16.msra.mxu1 %v17036_v49  ;;  %6747 = vmatprep.subr.bf16.mxu0 %v17039_v4  ;;  %v17089_v49 = vld [vmem:[%s24437_s8 + $0x810] ss:$12 sps:$4 sm:$0xff]   ;;  %v17092_v4 = vld [vmem:[%s24437_s8 + $0x818] ss:$12 sps:$4 sm:$0xff]  }
 0x4ab   :  { %6788 = vmatprep.subr.bf16.mxu1 %v24728_v54 }
 0x4ad   :  { %6748 = vmatpush1.bf16.msra.mxu0 %v17037_v30  ;;  %v17095_v30 = vld [vmem:[%s24437_s8 + $0x7fc] ss:$12 sps:$4 sm:$0xff]  }
 0x4ae   :  { %6789 = vmatpush1.bf16.msra.mxu1 %v17040_v20  ;;  %6749 = vmatprep.subr.bf16.mxu0 %v17043_v31  ;;  %v17093_v20 = vld [vmem:[%s24437_s8 + $0x7f8] ss:$12 sps:$4 sm:$0xff]   ;;  %v17096_v31 = vld [vmem:[%s24437_s8 + $0x800] ss:$12 sps:$4 sm:$0xff]  }
 0x4af   :  { %6790 = vmatprep.subr.bf16.mxu1 %v24728_v54 }
 0x4b1   :  { %6750 = vmatpush1.bf16.msra.mxu0 %v17041_v62  ;;  %v17099_v62 = vld [vmem:[%s24437_s8 + $0x7e4] ss:$12 sps:$4 sm:$0xff]  }
 0x4b2   :  { %6791 = vmatpush1.bf16.msra.mxu1 %v17044_v45  ;;  %6751 = vmatprep.subr.bf16.mxu0 %v17047_v38  ;;  %v17097_v45 = vld [vmem:[%s24437_s8 + $0x7e0] ss:$12 sps:$4 sm:$0xff]   ;;  %v17100_v38 = vld [vmem:[%s24437_s8 + $0x7e8] ss:$12 sps:$4 sm:$0xff]  }
 0x4b3   :  { %6792 = vmatprep.subr.bf16.mxu1 %v24728_v54 }
 0x4b5   :  { %6752 = vmatpush1.bf16.msra.mxu0 %v17045_v40  ;;  %v17103_v40 = vld [vmem:[%s24437_s8 + $0x8ec] ss:$12 sps:$4 sm:$0xff]  }
 0x4b6   :  { %6793 = vmatpush1.bf16.msra.mxu1 %v17048_v50  ;;  %6753 = vmatprep.subr.bf16.mxu0 %v17051_v26  ;;  %v17101_v50 = vld [vmem:[%s24437_s8 + $0x8e8] ss:$12 sps:$4 sm:$0xff]   ;;  %v17104_v26 = vld [vmem:[%s24437_s8 + $0x8f0] ss:$12 sps:$4 sm:$0xff]  }
 0x4b7   :  { %6794 = vmatprep.subr.bf16.mxu1 %v24728_v54 }
 0x4b9   :  { %6754 = vmatpush1.bf16.msra.mxu0 %v17049_v51  ;;  %v17107_v51 = vld [vmem:[%s24437_s8 + $0x8d4] ss:$12 sps:$4 sm:$0xff]  }
 0x4ba   :  { %6795 = vmatpush1.bf16.msra.mxu1 %v17052_v0  ;;  %6763 = vmatprep.subr.bf16.mxu0 %v17055_v9  ;;  %v17105_v0 = vld [vmem:[%s24437_s8 + $0x8d0] ss:$12 sps:$4 sm:$0xff]   ;;  %v17108_v9 = vld [vmem:[%s24437_s8 + $0x8d8] ss:$12 sps:$4 sm:$0xff]  }
 0x4bb   :  { %6804 = vmatprep.subr.bf16.mxu1 %v24728_v54 }
 0x4bd   :  { %6764 = vmatpush2.bf16.msra.mxu0 %v17053_v3  ;;  %v17111_v3 = vld [vmem:[%s24437_s8 + $0x8bc] ss:$12 sps:$4 sm:$0xff]  }
 0x4be   :  { %6805 = vmatpush2.bf16.msra.mxu1 %v17056_v13  ;;  %6765 = vmatprep.subr.bf16.mxu0 %v17059_v37  ;;  %v17109_v13 = vld [vmem:[%s24437_s8 + $0x8b8] ss:$12 sps:$4 sm:$0xff]   ;;  %v17112_v37 = vld [vmem:[%s24437_s8 + $0x8c0] ss:$12 sps:$4 sm:$0xff]  }
 0x4bf   :  { %6806 = vmatprep.subr.bf16.mxu1 %v24728_v54 }
 0x4c1   :  { %6766 = vmatpush2.bf16.msra.mxu0 %v17057_v19  ;;  %v17115_v19 = vld [vmem:[%s24437_s8 + $0x8a4] ss:$12 sps:$4 sm:$0xff]  }
 0x4c2   :  { %6807 = vmatpush2.bf16.msra.mxu1 %v17060_v53  ;;  %6767 = vmatprep.subr.bf16.mxu0 %v17063_v39  ;;  %v6823_v53 = vrot.slane %v20902_v8, 2  ;;  %v7165_v39 = vrot.slane %v20905_v33, 3 }
 0x4c3   :  { %6808 = vmatprep.subr.bf16.mxu1 %v24728_v54 }
 0x4c5   :  { %6768 = vmatpush2.bf16.msra.mxu0 %v17061_v63  ;;  %v17113_v63 = vld [vmem:[%s24437_s8 + $0x8a0] ss:$12 sps:$4 sm:$0xff]  }
 0x4c6   :  { %6809 = vmatpush2.bf16.msra.mxu1 %v17064_v16  ;;  %6769 = vmatprep.subr.bf16.mxu0 %v17067_v24  ;;  %v17116_v16 = vld [vmem:[%s24437_s8 + $0x8a8] ss:$12 sps:$4 sm:$0xff]   ;;  %v6832_v24 = vmul.f32 %v21704_v42, %v6823_v53 }
 0x4c7   :  { %6810 = vmatprep.subr.bf16.mxu1 %v24728_v54  ;;  %v17123_v42 = vld [vmem:[%s24437_s8 + $0x994] ss:$12 sps:$4 sm:$0xff]  }
 0x4c8   :  { %v6834_v35 = vpack.c.bf16 %v6832_v24, %v6832_v24 }
 0x4c9   :  { %6770 = vmatpush2.bf16.msra.mxu0 %v17065_v10  ;;  %v21841_v10 = vpop.permute.xlu0 %7170 }
 0x4ca   :  { %6811 = vmatpush2.bf16.msra.mxu1 %v17068_v28  ;;  %7080 = vmatprep.subr.bf16.mxu0 %v17071_v43  ;;  %v7174_v33 = vmul.f32 %v21841_v10, %v7165_v39  ;;  %v17117_v28 = vld [vmem:[%s24437_s8 + $0x9a8] ss:$12 sps:$4 sm:$0xff]   ;;  %v17120_v43 = vld [vmem:[%s24437_s8 + $0x9b0] ss:$12 sps:$4 sm:$0xff]  }
 0x4cb   :  { %7121 = vmatprep.subr.bf16.mxu1 %v24728_v54 }
 0x4cc   :  { %v5415_v17 = vpop.f32.mrf.mxu0  ;;  %6772 = vmatmul.mubr.bf16.vlgmr.msra.gmra.mxu0 %v6493_v11 }
 0x4cd   :  { %v21719_v36 = vadd.f32 %v5415_v17, %v21581_v14  ;;  %v5456_v61 = vpop.f32.mrf.mxu1  ;;  %6813 = vmatmul.mubr.bf16.vlgmr.msra.gmra.mxu1 %v6493_v11  ;;  %7081 = vmatpush1.bf16.msra.mxu0 %v17069_v27  ;;  %v17079_v14 = vld [vmem:[%s24437_s8 + $0x85c] ss:$12 sps:$4 sm:$0xff]   ;;  %v7176_v27 = vpack.c.bf16 %v7174_v33, %v7174_v33 }
 0x4ce   :  { %v21725_v1 = vadd.f32 %v5456_v61, %v21584_v52  ;;  %14755 = vmatprep.mubr.msk.bf16.mxu0 %vm787_vm2, %v6835_v22  ;;  %7122 = vmatpush1.bf16.msra.mxu1 %v17072_v5  ;;  %v5417_v57 = vpop.f32.mrf.mxu0  ;;  %v17124_v61 = vld [vmem:[%s24437_s8 + $0x998] ss:$12 sps:$4 sm:$0xff]  }
 0x4cf   :  { %14756 = vmatprep.mubr.msk.bf16.mxu1 %vm787_vm2, %v6835_v22  ;;  %v21736_v55 = vadd.f32 %v5417_v57, %v21598_v7  ;;  %v5458_v59 = vpop.f32.mrf.mxu1  ;;  %7082 = vmatprep.subr.bf16.mxu0 %v17075_v47  ;;  %v17083_v7 = vld [vmem:[%s24437_s8 + $0x844] ss:$12 sps:$4 sm:$0xff]  }
 0x4d0   :  { %v5419_v52 = vpop.f32.mrf.mxu0  ;;  %7123 = vmatprep.subr.bf16.mxu1 %v24728_v54  ;;  %v17121_v47 = vld [vmem:[%s24437_s8 + $0x990] ss:$12 sps:$4 sm:$0xff]  }
 0x4d1   :  { %v5459_v21 = vpop.f32.mrf.mxu1  ;;  %7083 = vmatpush1.bf16.msra.mxu0 %v17073_v15  ;;  %v17128_v52 = vld [vmem:[%s24437_s8 + $0x980] ss:$12 sps:$4 sm:$0xff]  }
 0x4d2   :  { %7124 = vmatpush1.bf16.msra.mxu1 %v17076_v34  ;;  %v5420_v29 = vpop.f32.mrf.mxu0  ;;  %7084 = vmatprep.subr.bf16.mxu0 %v17079_v14  ;;  %v17125_v14 = vld [vmem:[%s24437_s8 + $0x978] ss:$12 sps:$4 sm:$0xff]  }
 0x4d3   :  { %v5460_v18 = vpop.f32.mrf.mxu1  ;;  %7125 = vmatprep.subr.bf16.mxu1 %v24728_v54  ;;  %v17132_v29 = vld [vmem:[%s24437_s8 + $0x968] ss:$12 sps:$4 sm:$0xff]  }
 0x4d4   :  { %v17136_v18 = vld [vmem:[%s24437_s8 + $0x950] ss:$12 sps:$4 sm:$0xff]  }
 0x4d5   :  { %7085 = vmatpush1.bf16.msra.mxu0 %v17077_v23  ;;  %v17129_v23 = vld [vmem:[%s24437_s8 + $0x960] ss:$12 sps:$4 sm:$0xff]  }
 0x4d6   :  { %7126 = vmatpush1.bf16.msra.mxu1 %v17080_v44  ;;  %7086 = vmatprep.subr.bf16.mxu0 %v17083_v7  ;;  %v17135_v44 = vld [vmem:[%s24437_s8 + $0x94c] ss:$12 sps:$4 sm:$0xff]   ;;  %v17133_v7 = vld [vmem:[%s24437_s8 + $0x948] ss:$12 sps:$4 sm:$0xff]  }
 0x4d7   :  { %7127 = vmatprep.subr.bf16.mxu1 %v24728_v54 }
 0x4d9   :  { %7087 = vmatpush1.bf16.msra.mxu0 %v17081_v60  ;;  %v17139_v60 = vld [vmem:[%s24437_s8 + $0x934] ss:$12 sps:$4 sm:$0xff]  }
 0x4da   :  { %7128 = vmatpush1.bf16.msra.mxu1 %v17084_v25  ;;  %7088 = vmatprep.subr.bf16.mxu0 %v17087_v2  ;;  %v17137_v25 = vld [vmem:[%s24437_s8 + $0x930] ss:$12 sps:$4 sm:$0xff]   ;;  %v17140_v2 = vld [vmem:[%s24437_s8 + $0x938] ss:$12 sps:$4 sm:$0xff]  }
 0x4db   :  { %7129 = vmatprep.subr.bf16.mxu1 %v24728_v54 }
 0x4dd   :  { %7089 = vmatpush1.bf16.msra.mxu0 %v17085_v48  ;;  %v17143_v48 = vld [vmem:[%s24437_s8 + $0x91c] ss:$12 sps:$4 sm:$0xff]  }
 0x4de   :  { %7130 = vmatpush1.bf16.msra.mxu1 %v17088_v58  ;;  %7090 = vmatprep.subr.bf16.mxu0 %v17091_v46  ;;  %v17141_v58 = vld [vmem:[%s24437_s8 + $0x918] ss:$12 sps:$4 sm:$0xff]   ;;  %v17144_v46 = vld [vmem:[%s24437_s8 + $0x920] ss:$12 sps:$4 sm:$0xff]  }
 0x4df   :  { %7131 = vmatprep.subr.bf16.mxu1 %v24728_v54 }
 0x4e1   :  { %7091 = vmatpush1.bf16.msra.mxu0 %v17089_v49  ;;  %v17147_v49 = vld [vmem:[%s24437_s8 + $0x904] ss:$12 sps:$4 sm:$0xff]  }
 0x4e2   :  { %7132 = vmatpush1.bf16.msra.mxu1 %v17092_v4  ;;  %7092 = vmatprep.subr.bf16.mxu0 %v17095_v30  ;;  %v17145_v4 = vld [vmem:[%s24437_s8 + $0x900] ss:$12 sps:$4 sm:$0xff]   ;;  %v17148_v30 = vld [vmem:[%s24437_s8 + $0x908] ss:$12 sps:$4 sm:$0xff]  }
 0x4e3   :  { %7133 = vmatprep.subr.bf16.mxu1 %v24728_v54 }
 0x4e5   :  { %7093 = vmatpush1.bf16.msra.mxu0 %v17093_v20  ;;  %v17151_v20 = vld [vmem:[%s24437_s8 + $0xa0c] ss:$12 sps:$4 sm:$0xff]  }
 0x4e6   :  { %7134 = vmatpush1.bf16.msra.mxu1 %v17096_v31  ;;  %7094 = vmatprep.subr.bf16.mxu0 %v17099_v62  ;;  %v17149_v31 = vld [vmem:[%s24437_s8 + $0xa08] ss:$12 sps:$4 sm:$0xff]   ;;  %v17152_v62 = vld [vmem:[%s24437_s8 + $0xa10] ss:$12 sps:$4 sm:$0xff]  }
 0x4e7   :  { %7135 = vmatprep.subr.bf16.mxu1 %v24728_v54 }
 0x4e9   :  { %7095 = vmatpush1.bf16.msra.mxu0 %v17097_v45  ;;  %v17155_v45 = vld [vmem:[%s24437_s8 + $0x9f4] ss:$12 sps:$4 sm:$0xff]  }
 0x4ea   :  { %7136 = vmatpush1.bf16.msra.mxu1 %v17100_v38  ;;  %7104 = vmatprep.subr.bf16.mxu0 %v17103_v40  ;;  %v17153_v38 = vld [vmem:[%s24437_s8 + $0x9f0] ss:$12 sps:$4 sm:$0xff]   ;;  %v17156_v40 = vld [vmem:[%s24437_s8 + $0x9f8] ss:$12 sps:$4 sm:$0xff]  }
 0x4eb   :  { %7145 = vmatprep.subr.bf16.mxu1 %v24728_v54 }
 0x4ed   :  { %7105 = vmatpush2.bf16.msra.mxu0 %v17101_v50  ;;  %v17159_v50 = vld [vmem:[%s24437_s8 + $0x9dc] ss:$12 sps:$4 sm:$0xff]  }
 0x4ee   :  { %7146 = vmatpush2.bf16.msra.mxu1 %v17104_v26  ;;  %7106 = vmatprep.subr.bf16.mxu0 %v17107_v51  ;;  %v17157_v26 = vld [vmem:[%s24437_s8 + $0x9d8] ss:$12 sps:$4 sm:$0xff]   ;;  %v17160_v51 = vld [vmem:[%s24437_s8 + $0x9e0] ss:$12 sps:$4 sm:$0xff]  }
 0x4ef   :  { %7147 = vmatprep.subr.bf16.mxu1 %v24728_v54 }
 0x4f1   :  { %7107 = vmatpush2.bf16.msra.mxu0 %v17105_v0  ;;  %v17163_v0 = vld [vmem:[%s24437_s8 + $0x9c4] ss:$12 sps:$4 sm:$0xff]  }
 0x4f2   :  { %7148 = vmatpush2.bf16.msra.mxu1 %v17108_v9  ;;  %7108 = vmatprep.subr.bf16.mxu0 %v17111_v3  ;;  %v7164_v9 = vrot.slane %v20902_v8, 3  ;;  %v17161_v3 = vld [vmem:[%s24437_s8 + $0x9c0] ss:$12 sps:$4 sm:$0xff]   ;;  %v17165_v8 = vld [vmem:[%s24440_s11 + $0x1f0] ss:$8 sps:$4 sm:$0xff]  }
 0x4f3   :  { %7149 = vmatprep.subr.bf16.mxu1 %v24728_v54 }
 0x4f5   :  { %7109 = vmatpush2.bf16.msra.mxu0 %v17109_v13  ;;  %v17164_v13 = vld [vmem:[%s24437_s8 + $0x9c8] ss:$12 sps:$4 sm:$0xff]  }
 0x4f6   :  { %7150 = vmatpush2.bf16.msra.mxu1 %v17112_v37  ;;  %7110 = vmatprep.subr.bf16.mxu0 %v17115_v19  ;;  %v7173_v37 = vmul.f32 %v21841_v10, %v7164_v9  ;;  %v17167_v19 = vld [vmem:[%s24440_s11 + $0x1f4] ss:$8 sps:$4 sm:$0xff]   ;;  %v17210_v9 = vld [vmem:[%s24440_s11 + $0x240] ss:$8 sps:$4 sm:$0xff]  }
 0x4f7   :  { %7151 = vmatprep.subr.bf16.mxu1 %v24728_v54 }
 0x4f8   :  { %v7175_v53 = vpack.c.bf16 %v7173_v37, %v7173_v37  ;;  %v17219_v37 = vld [vmem:[%s24440_s11 + $0x2a0] ss:$8 sps:$4 sm:$0xff]  }
 0x4f9   :  { %7111 = vmatpush2.bf16.msra.mxu0 %v17113_v63 }
 0x4fa   :  { %7152 = vmatpush2.bf16.msra.mxu1 %v17116_v16  ;;  %7421 = vmatprep.subr.bf16.mxu0 %v17119_v56 }
 0x4fb   :  { %7462 = vmatprep.subr.bf16.mxu1 %v24728_v54 }
 0x4fc   :  { %v5754_v12 = vpop.f32.mrf.mxu0  ;;  %7113 = vmatmul.mubr.bf16.vlgmr.msra.gmra.mxu0 %v6834_v35 }
 0x4fd   :  { %v21856_v11 = vadd.f32 %v5754_v12, %v21719_v36  ;;  %v5795_v5 = vpop.f32.mrf.mxu1  ;;  %7154 = vmatmul.mubr.bf16.vlgmr.msra.gmra.mxu1 %v6834_v35  ;;  %7422 = vmatpush1.bf16.msra.mxu0 %v17117_v28  ;;  %v17127_v36 = vld [vmem:[%s24437_s8 + $0x97c] ss:$12 sps:$4 sm:$0xff]  }
 0x4fe   :  { %v21862_v17 = vadd.f32 %v5795_v5, %v21725_v1  ;;  %14842 = vmatprep.mubr.msk.bf16.mxu0 %vm787_vm2, %v7176_v27  ;;  %7463 = vmatpush1.bf16.msra.mxu1 %v17120_v43  ;;  %v5756_v22 = vpop.f32.mrf.mxu0  ;;  %v17168_v12 = vld [vmem:[%s24440_s11 + $0x1e0] ss:$8 sps:$4 sm:$0xff]   ;;  %v17173_v5 = vld [vmem:[%s24440_s11 + $0x1d4] ss:$8 sps:$4 sm:$0xff]  }
 0x4ff   :  { %14843 = vmatprep.mubr.msk.bf16.mxu1 %vm787_vm2, %v7176_v27  ;;  %v21873_v15 = vadd.f32 %v5756_v22, %v21736_v55  ;;  %v5797_v57 = vpop.f32.mrf.mxu1  ;;  %7423 = vmatprep.subr.bf16.mxu0 %v17123_v42  ;;  %v17131_v55 = vld [vmem:[%s24437_s8 + $0x964] ss:$12 sps:$4 sm:$0xff]   ;;  %v17179_v22 = vld [vmem:[%s24440_s11 + $0x1b4] ss:$8 sps:$4 sm:$0xff]  }
 0x500   :  { %v5758_v1 = vpop.f32.mrf.mxu0  ;;  %7464 = vmatprep.subr.bf16.mxu1 %v24728_v54  ;;  %v17170_v27 = vld [vmem:[%s24440_s11 + $0x1e4] ss:$8 sps:$4 sm:$0xff]   ;;  %v17177_v57 = vld [vmem:[%s24440_s11 + $0x1b0] ss:$8 sps:$4 sm:$0xff]  }
 0x501   :  { %v5798_v34 = vpop.f32.mrf.mxu1  ;;  %7424 = vmatpush1.bf16.msra.mxu0 %v17121_v47  ;;  %v17176_v47 = vld [vmem:[%s24440_s11 + $0x1c4] ss:$8 sps:$4 sm:$0xff]   ;;  %v17195_v1 = vld [vmem:[%s24440_s11 + $0x2e0] ss:$8 sps:$4 sm:$0xff]  }
 0x502   :  { %7465 = vmatpush1.bf16.msra.mxu1 %v17124_v61  ;;  %v5759_v59 = vpop.f32.mrf.mxu0  ;;  %7425 = vmatprep.subr.bf16.mxu0 %v17127_v36  ;;  %v17189_v61 = vld [vmem:[%s24440_s11 + $0x2f0] ss:$8 sps:$4 sm:$0xff]   ;;  %v17191_v36 = vld [vmem:[%s24440_s11 + $0x2f4] ss:$8 sps:$4 sm:$0xff]   ;;  %v17182_v34 = vld [vmem:[%s24440_s11 + $0x1a4] ss:$8 sps:$4 sm:$0xff]  }
 0x503   :  { %v5799_v21 = vpop.f32.mrf.mxu1  ;;  %7466 = vmatprep.subr.bf16.mxu1 %v24728_v54  ;;  %v17180_v59 = vld [vmem:[%s24440_s11 + $0x1a0] ss:$8 sps:$4 sm:$0xff]  }
 0x504   :  { %v17209_v21 = vld [vmem:[%s24440_s11 + $0x2c4] ss:$8 sps:$4 sm:$0xff]  }
 0x505   :  { %7426 = vmatpush1.bf16.msra.mxu0 %v17125_v14  ;;  %v17203_v14 = vld [vmem:[%s24440_s11 + $0x2d4] ss:$8 sps:$4 sm:$0xff]  }
 0x506   :  { %7467 = vmatpush1.bf16.msra.mxu1 %v17128_v52  ;;  %7427 = vmatprep.subr.bf16.mxu0 %v17131_v55  ;;  %v17201_v52 = vld [vmem:[%s24440_s11 + $0x2d0] ss:$8 sps:$4 sm:$0xff]   ;;  %v17185_v55 = vld [vmem:[%s24440_s11 + $0x194] ss:$8 sps:$4 sm:$0xff]  }
 0x507   :  { %7468 = vmatprep.subr.bf16.mxu1 %v24728_v54 }
 0x509   :  { %7428 = vmatpush1.bf16.msra.mxu0 %v17129_v23  ;;  %v17183_v23 = vld [vmem:[%s24440_s11 + $0x190] ss:$8 sps:$4 sm:$0xff]  }
 0x50a   :  { %7469 = vmatpush1.bf16.msra.mxu1 %v17132_v29  ;;  %7429 = vmatprep.subr.bf16.mxu0 %v17135_v44  ;;  %v17207_v29 = vld [vmem:[%s24440_s11 + $0x2c0] ss:$8 sps:$4 sm:$0xff]   ;;  %v17188_v44 = vld [vmem:[%s24440_s11 + $0x184] ss:$8 sps:$4 sm:$0xff]  }
 0x50b   :  { %7470 = vmatprep.subr.bf16.mxu1 %v24728_v54 }
 0x50d   :  { %7430 = vmatpush1.bf16.msra.mxu0 %v17133_v7  ;;  %v17215_v7 = vld [vmem:[%s24440_s11 + $0x2b4] ss:$8 sps:$4 sm:$0xff]  }
 0x50e   :  { %7471 = vmatpush1.bf16.msra.mxu1 %v17136_v18  ;;  %7431 = vmatprep.subr.bf16.mxu0 %v17139_v60  ;;  %v17186_v18 = vld [vmem:[%s24440_s11 + $0x180] ss:$8 sps:$4 sm:$0xff]   ;;  %v17213_v60 = vld [vmem:[%s24440_s11 + $0x2b0] ss:$8 sps:$4 sm:$0xff]  }
 0x50f   :  { %7472 = vmatprep.subr.bf16.mxu1 %v24728_v54 }
 0x511   :  { %7432 = vmatpush1.bf16.msra.mxu0 %v17137_v25  ;;  %v17194_v25 = vld [vmem:[%s24440_s11 + $0x274] ss:$8 sps:$4 sm:$0xff]  }
 0x512   :  { %7473 = vmatpush1.bf16.msra.mxu1 %v17140_v2  ;;  %7433 = vmatprep.subr.bf16.mxu0 %v17143_v48  ;;  %v17192_v2 = vld [vmem:[%s24440_s11 + $0x270] ss:$8 sps:$4 sm:$0xff]   ;;  %v17200_v48 = vld [vmem:[%s24440_s11 + $0x264] ss:$8 sps:$4 sm:$0xff]  }
 0x513   :  { %7474 = vmatprep.subr.bf16.mxu1 %v24728_v54 }
 0x515   :  { %7434 = vmatpush1.bf16.msra.mxu0 %v17141_v58 }
 0x516   :  { %7475 = vmatpush1.bf16.msra.mxu1 %v17144_v46  ;;  %7435 = vmatprep.subr.bf16.mxu0 %v17147_v49 }
 0x517   :  { %7476 = vmatprep.subr.bf16.mxu1 %v24728_v54 }
 0x519   :  { %7436 = vmatpush1.bf16.msra.mxu0 %v17145_v4 }
 0x51a   :  { %7477 = vmatpush1.bf16.msra.mxu1 %v17148_v30  ;;  %7445 = vmatprep.subr.bf16.mxu0 %v17151_v20  ;;  %v17198_v20 = vld [vmem:[%s24440_s11 + $0x260] ss:$8 sps:$4 sm:$0xff]  }
 0x51b   :  { %7486 = vmatprep.subr.bf16.mxu1 %v24728_v54 }
 0x51d   :  { %7446 = vmatpush2.bf16.msra.mxu0 %v17149_v31 }
 0x51e   :  { %7487 = vmatpush2.bf16.msra.mxu1 %v17152_v62  ;;  %7447 = vmatprep.subr.bf16.mxu0 %v17155_v45  ;;  %v17206_v45 = vld [vmem:[%s24440_s11 + $0x254] ss:$8 sps:$4 sm:$0xff]  }
 0x51f   :  { %7488 = vmatprep.subr.bf16.mxu1 %v24728_v54 }
 0x521   :  { %7448 = vmatpush2.bf16.msra.mxu0 %v17153_v38 }
 0x522   :  { %7489 = vmatpush2.bf16.msra.mxu1 %v17156_v40  ;;  %7449 = vmatprep.subr.bf16.mxu0 %v17159_v50 }
 0x523   :  { %7490 = vmatprep.subr.bf16.mxu1 %v24728_v54 }
 0x525   :  { %7450 = vmatpush2.bf16.msra.mxu0 %v17157_v26  ;;  %v17204_v26 = vld [vmem:[%s24440_s11 + $0x250] ss:$8 sps:$4 sm:$0xff]  }
 0x526   :  { %7491 = vmatpush2.bf16.msra.mxu1 %v17160_v51  ;;  %7451 = vmatprep.subr.bf16.mxu0 %v17163_v0  ;;  %v17212_v0 = vld [vmem:[%s24440_s11 + $0x244] ss:$8 sps:$4 sm:$0xff]  }
 0x527   :  { %7492 = vmatprep.subr.bf16.mxu1 %v24728_v54 }
 0x529   :  { %7452 = vmatpush2.bf16.msra.mxu0 %v17161_v3  ;;  %v17218_v3 = vld [vmem:[%s24440_s11 + $0x234] ss:$8 sps:$4 sm:$0xff]  }
 0x52a   :  { %7493 = vmatpush2.bf16.msra.mxu1 %v17164_v13  ;;  %7896 = vmatprep.subr.bf16.mxu0 %v17167_v19  ;;  %v17216_v13 = vld [vmem:[%s24440_s11 + $0x230] ss:$8 sps:$4 sm:$0xff]   ;;  %v17221_v19 = vld [vmem:[%s24440_s11 + $0x2a4] ss:$8 sps:$4 sm:$0xff]  }
 0x52b   :  { %7937 = vmatprep.subr.bf16.mxu1 %v17191_v36 }
 0x52c   :  { %v6093_v39 = vpop.f32.mrf.mxu0  ;;  %7454 = vmatmul.mubr.bf16.vlgmr.msra.gmra.mxu0 %v7175_v53 }
 0x52d   :  { %v21982_v63 = vadd.f32 %v6093_v39, %v21856_v11  ;;  %v6134_v16 = vpop.f32.mrf.mxu1  ;;  %7495 = vmatmul.mubr.bf16.vlgmr.msra.gmra.mxu1 %v7175_v53  ;;  %7897 = vmatpush1.bf16.msra.mxu0 %v17165_v8  ;;  %v17171_v11 = vld [vmem:[%s24440_s11 + $0x1d0] ss:$8 sps:$4 sm:$0xff]   ;;  %v17222_v8 = vld [vmem:[%s24440_s11 + $0x220] ss:$8 sps:$4 sm:$0xff]   ;;  %v17224_v53 = vld [vmem:[%s24440_s11 + $0x224] ss:$8 sps:$4 sm:$0xff]  }
 0x52e   :  { %v21985_v24 = vadd.f32 %v6134_v16, %v21862_v17  ;;  %v6095_v56 = vpop.f32.mrf.mxu0  ;;  %7969 = vmatprep.mubr.bf16.mxu1 %v24728_v54  ;;  %7898 = vmatprep.subr.bf16.mxu0 %v17170_v27  ;;  %v17174_v17 = vld [vmem:[%s24440_s11 + $0x1c0] ss:$8 sps:$4 sm:$0xff]   ;;  %v17227_v39 = vld [vmem:[%s24440_s11 + $0x294] ss:$8 sps:$4 sm:$0xff]   ;;  %v17225_v16 = vld [vmem:[%s24440_s11 + $0x290] ss:$8 sps:$4 sm:$0xff]  }
 0x52f   :  { %v21989_v10 = vadd.f32 %v6095_v56, %v21873_v15  ;;  %v6136_v33 = vpop.f32.mrf.mxu1  ;;  %v17197_v15 = vld [vmem:[%s24440_s11 + $0x2e4] ss:$8 sps:$4 sm:$0xff]   ;;  %7938 = vmatpush1.bf16.msra.mxu1 %v17189_v61 }
 0x530   :  { %v6097_v28 = vpop.f32.mrf.mxu0  ;;  %7939 = vmatprep.subr.bf16.mxu1 %v17197_v15  ;;  %v17233_v56 = vld [vmem:[%s24440_s11 + $0x284] ss:$8 sps:$4 sm:$0xff]   ;;  %v17231_v33 = vld [vmem:[%s24440_s11 + $0x280] ss:$8 sps:$4 sm:$0xff]  }
 0x531   :  { %v6137_v35 = vpop.f32.mrf.mxu1  ;;  %7899 = vmatpush1.bf16.msra.mxu0 %v17168_v12  ;;  %v17234_v28 = vld [vmem:[%s24440_s11 + $0x200] ss:$8 sps:$4 sm:$0xff]  }
 0x532   :  { %v6098_v43 = vpop.f32.mrf.mxu0  ;;  %7900 = vmatprep.subr.bf16.mxu0 %v17173_v5  ;;  %v17239_v35 = vld [vmem:[%s24440_s11 + $0x74] ss:$8 sps:$4 sm:$0xff]  }
 0x533   :  { %v6138_v42 = vpop.f32.mrf.mxu1  ;;  %7940 = vmatpush1.bf16.msra.mxu1 %v17195_v1  ;;  %v17242_v43 = vld [vmem:[%s24440_s11 + $0x174] ss:$8 sps:$4 sm:$0xff]  }
 0x534   :  { %7941 = vmatprep.subr.bf16.mxu1 %v17203_v14 }
 0x535   :  { %7901 = vmatpush1.bf16.msra.mxu0 %v17171_v11 }
 0x536   :  { %7902 = vmatprep.subr.bf16.mxu0 %v17176_v47 }
 0x537   :  { %7942 = vmatpush1.bf16.msra.mxu1 %v17201_v52 }
 0x538   :  { %7943 = vmatprep.subr.bf16.mxu1 %v17209_v21 }
 0x539   :  { %7903 = vmatpush1.bf16.msra.mxu0 %v17174_v17 }
 0x53a   :  { %7904 = vmatprep.subr.bf16.mxu0 %v17179_v22 }
 0x53b   :  { %7944 = vmatpush1.bf16.msra.mxu1 %v17207_v29  ;;  %v7517_v29 = vsub.s32 2, %v24717_v32 }
 0x53c   :  { %7945 = vmatprep.subr.bf16.mxu1 %v17215_v7 }
 0x53d   :  { %7905 = vmatpush1.bf16.msra.mxu0 %v17177_v57 }
 0x53e   :  { %7906 = vmatprep.subr.bf16.mxu0 %v17182_v34 }
 0x53f   :  { %7946 = vmatpush1.bf16.msra.mxu1 %v17213_v60 }
 0x540   :  { %7947 = vmatprep.subr.bf16.mxu1 %v17221_v19 }
 0x541   :  { %7907 = vmatpush1.bf16.msra.mxu0 %v17180_v59 }
 0x542   :  { %7908 = vmatprep.subr.bf16.mxu0 %v17185_v55 }
 0x543   :  { %7948 = vmatpush1.bf16.msra.mxu1 %v17219_v37 }
 0x544   :  { %7949 = vmatprep.subr.bf16.mxu1 %v17227_v39 }
 0x545   :  { %7909 = vmatpush1.bf16.msra.mxu0 %v17183_v23  ;;  %v7505_v23 = vld [vmem:[%s24438_s9] sm:$0x7] }
 0x546   :  { %7910 = vmatprep.subr.bf16.mxu0 %v17188_v44  ;;  %v7510_v7 = vrot.slane %v7505_v23, %v20804_v41 }
 0x547   :  { %7950 = vmatpush1.bf16.msra.mxu1 %v17225_v16 }
 0x548   :  { %7951 = vmatprep.subr.bf16.mxu1 %v17233_v56 }
 0x549   :  { %7911 = vmatpush1.bf16.msra.mxu0 %v17186_v18 }
 0x54a   :  { %7912 = vmatprep.subr.bf16.mxu0 %v17194_v25  ;;  %v7518_v25 = vrot.slane %v7505_v23, %v7517_v29  ;;  %v17278_v29 = vld [vmem:[%s24440_s11 + $0x114] ss:$8 sps:$4 sm:$0xff]  }
 0x54b   :  { %7952 = vmatpush1.bf16.msra.mxu1 %v17231_v33 }
 0x54c   :  { %8218 = vmatprep.subr.bf16.mxu1 %v17239_v35  ;;  %v17245_v35 = vld [vmem:[%s24440_s11 + $0x64] ss:$8 sps:$4 sm:$0xff]  }
 0x54d   :  { %7913 = vmatpush2.bf16.msra.mxu0 %v17192_v2 }
 0x54e   :  { %7914 = vmatprep.subr.bf16.mxu0 %v17200_v48 }
 0x551   :  { %7915 = vmatpush2.bf16.msra.mxu0 %v17198_v20 }
 0x552   :  { %7916 = vmatprep.subr.bf16.mxu0 %v17206_v45 }
 0x555   :  { %7917 = vmatpush2.bf16.msra.mxu0 %v17204_v26 }
 0x556   :  { %7918 = vmatprep.subr.bf16.mxu0 %v17212_v0 }
 0x559   :  { %7919 = vmatpush2.bf16.msra.mxu0 %v17210_v9 }
 0x55a   :  { %7920 = vmatprep.subr.bf16.mxu0 %v17218_v3 }
 0x55c   :  { %v6434_v58 = vpop.f32.mrf.mxu0 }
 0x55d   :  { %v6481_v46 = vadd.f32 %v6434_v58, %v21982_v63  ;;  %v6475_v49 = vpop.f32.mrf.mxu1  ;;  %7921 = vmatpush2.bf16.msra.mxu0 %v17216_v13  ;;  %v17230_v63 = vld [vmem:[%s24440_s11 + $0x214] ss:$8 sps:$4 sm:$0xff]   ;;  %v7599_v13 = vpop.permute.xlu1 %7598 }
 0x55e   :  { %v6483_v4 = vadd.f32 %v6475_v49, %v21985_v24  ;;  %v6436_v30 = vpop.f32.mrf.mxu0  ;;  %7922 = vmatprep.subr.bf16.mxu0 %v17224_v53  ;;  %v17228_v24 = vld [vmem:[%s24440_s11 + $0x210] ss:$8 sps:$4 sm:$0xff]  }
 0x55f   :  { %v6482_v31 = vadd.f32 %v6436_v30, %v21989_v10  ;;  %v6477_v62 = vpop.f32.mrf.mxu1  ;;  %v17236_v10 = vld [vmem:[%s24440_s11 + $0x204] ss:$8 sps:$4 sm:$0xff]  }
 0x560   :  { %v6438_v38 = vpop.f32.mrf.mxu0 }
 0x561   :  { %v6478_v40 = vpop.f32.mrf.mxu1  ;;  %7923 = vmatpush2.bf16.msra.mxu0 %v17222_v8  ;;  %v22154_v8 = vpop.permute.xlu0 %7534 }
 0x562   :  { %v6439_v50 = vpop.f32.mrf.mxu0  ;;  %7924 = vmatprep.subr.bf16.mxu0 %v17230_v63  ;;  %v17237_v63 = vld [vmem:[%s24440_s11 + $0x70] ss:$8 sps:$4 sm:$0xff]  }
 0x563   :  { %v6479_v51 = vpop.f32.mrf.mxu1 }
 0x565   :  { %7925 = vmatpush2.bf16.msra.mxu0 %v17228_v24 }
 0x566   :  { %7926 = vmatprep.subr.bf16.mxu0 %v17236_v10 }
 0x569   :  { %7927 = vmatpush2.bf16.msra.mxu0 %v17234_v28  ;;  %v17240_v28 = vld [vmem:[%s24440_s11 + $0x170] ss:$8 sps:$4 sm:$0xff]  }
 0x56a   :  { %8259 = vmatprep.subr.bf16.mxu0 %v17242_v43 }
 0x58c   :  { %v6773_v42 = vpop.f32.mrf.mxu0 }
 0x58d   :  { %v6820_v12 = vadd.f32 %v6773_v42, %v6481_v46  ;;  %v6814_v27 = vpop.f32.mrf.mxu1  ;;  %v7514_v46 = vrot.slane %v7505_v23, %v20829_v6  ;;  %v17248_v42 = vld [vmem:[%s24440_s11 + $0x164] ss:$8 sps:$4 sm:$0xff]   ;;  %v17270_v23 = vld [vmem:[%s24440_s11 + $0x120] ss:$8 sps:$4 sm:$0xff]  }
 0x58e   :  { %v6822_v11 = vadd.f32 %v6814_v27, %v6483_v4  ;;  %v6775_v5 = vpop.f32.mrf.mxu0  ;;  %v17251_v27 = vld [vmem:[%s24440_s11 + $0x54] ss:$8 sps:$4 sm:$0xff]  }
 0x58f   :  { %v6821_v47 = vadd.f32 %v6775_v5, %v6482_v31  ;;  %v6816_v17 = vpop.f32.mrf.mxu1  ;;  %v17254_v5 = vld [vmem:[%s24440_s11 + $0x154] ss:$8 sps:$4 sm:$0xff]  }
 0x590   :  { %v6777_v22 = vpop.f32.mrf.mxu0  ;;  %v17257_v17 = vld [vmem:[%s24440_s11 + $0x44] ss:$8 sps:$4 sm:$0xff]  }
 0x591   :  { %v6817_v61 = vpop.f32.mrf.mxu1  ;;  %v17252_v22 = vld [vmem:[%s24440_s11 + $0x150] ss:$8 sps:$4 sm:$0xff]  }
 0x592   :  { %v6778_v36 = vpop.f32.mrf.mxu0  ;;  %v17260_v61 = vld [vmem:[%s24440_s11 + $0x144] ss:$8 sps:$4 sm:$0xff]  }
 0x593   :  { %v6818_v15 = vpop.f32.mrf.mxu1  ;;  %v17255_v36 = vld [vmem:[%s24440_s11 + $0x40] ss:$8 sps:$4 sm:$0xff]  }
 0x594   :  { %v17263_v15 = vld [vmem:[%s24440_s11 + $0x34] ss:$8 sps:$4 sm:$0xff]  }
 0x5bc   :  { %v7114_v57 = vpop.f32.mrf.mxu0 }
 0x5bd   :  { %v7155_v1 = vpop.f32.mrf.mxu1  ;;  %v7161_v44 = vadd.f32 %v7114_v57, %v6820_v12  ;;  %v17243_v12 = vld [vmem:[%s24440_s11 + $0x60] ss:$8 sps:$4 sm:$0xff]  }
 0x5be   :  { %v7116_v34 = vpop.f32.mrf.mxu0  ;;  %v7163_v18 = vadd.f32 %v7155_v1, %v6822_v11  ;;  %v17246_v11 = vld [vmem:[%s24440_s11 + $0x160] ss:$8 sps:$4 sm:$0xff]   ;;  %v17266_v1 = vld [vmem:[%s24440_s11 + $0x134] ss:$8 sps:$4 sm:$0xff]  }
 0x5bf   :  { %v7157_v14 = vpop.f32.mrf.mxu1  ;;  %v7162_v2 = vadd.f32 %v7116_v34, %v6821_v47  ;;  %v17249_v47 = vld [vmem:[%s24440_s11 + $0x50] ss:$8 sps:$4 sm:$0xff]   ;;  %v17258_v57 = vld [vmem:[%s24440_s11 + $0x140] ss:$8 sps:$4 sm:$0xff]  }
 0x5c0   :  { %v7118_v59 = vpop.f32.mrf.mxu0  ;;  %v17261_v34 = vld [vmem:[%s24440_s11 + $0x30] ss:$8 sps:$4 sm:$0xff]   ;;  %v17269_v14 = vld [vmem:[%s24440_s11 + $0x24] ss:$8 sps:$4 sm:$0xff]  }
 0x5c1   :  { %v7158_v52 = vpop.f32.mrf.mxu1  ;;  %v17264_v59 = vld [vmem:[%s24440_s11 + $0x130] ss:$8 sps:$4 sm:$0xff]  }
 0x5c2   :  { %v7119_v55 = vpop.f32.mrf.mxu0  ;;  %v17272_v52 = vld [vmem:[%s24440_s11 + $0x124] ss:$8 sps:$4 sm:$0xff]  }
 0x5c3   :  { %v7159_v21 = vpop.f32.mrf.mxu1  ;;  %v17267_v55 = vld [vmem:[%s24440_s11 + $0x20] ss:$8 sps:$4 sm:$0xff]  }
 0x5c4   :  { %v17275_v21 = vld [vmem:[%s24440_s11 + $0x14] ss:$8 sps:$4 sm:$0xff]  }
 0x5ec   :  { %v7455_v60 = vpop.f32.mrf.mxu0 }
 0x5ed   :  { %v7502_v48 = vadd.f32 %v7455_v60, %v7161_v44  ;;  %v7496_v58 = vpop.f32.mrf.mxu1  ;;  %v17273_v44 = vld [vmem:[%s24440_s11 + $0x10] ss:$8 sps:$4 sm:$0xff]   ;;  %v17284_v60 = vld [vmem:[%s24440_s11 + $0x104] ss:$8 sps:$4 sm:$0xff]  }
 0x5ee   :  { %v7504_v49 = vadd.f32 %v7496_v58, %v7163_v18  ;;  %v7457_v4 = vpop.f32.mrf.mxu0  ;;  %v17276_v18 = vld [vmem:[%s24440_s11 + $0x110] ss:$8 sps:$4 sm:$0xff]   ;;  %v17287_v58 = vld [vmem:[%s24440_s11 + $0xf4] ss:$8 sps:$4 sm:$0xff]  }
 0x5ef   :  { %v7522_v30 = vadd.f32 %v7510_v7, %v7502_v48  ;;  %v7503_v20 = vadd.f32 %v7457_v4, %v7162_v2  ;;  %v7498_v31 = vpop.f32.mrf.mxu1  ;;  %v17281_v7 = vld [vmem:[%s24440_s11 + $0x4] ss:$8 sps:$4 sm:$0xff]   ;;  %v17279_v2 = vld [vmem:[%s24440_s11] ss:$8 sps:$4 sm:$0xff]  }
 0x5f0   :  { %v7524_v62 = vadd.f32 %v7518_v25, %v7504_v49  ;;  %v7459_v45 = vpop.f32.mrf.mxu0  ;;  %v22253_v49 = vpop.permute.xlu1 %8307 }
 0x5f1   :  { %v22144_v38 = vmax.f32 %v7522_v30, 0.0  ;;  %v7523_v32 = vadd.f32 %v7514_v46, %v7503_v20  ;;  %v7499_v40 = vpop.f32.mrf.mxu1  ;;  %v17282_v46 = vld [vmem:[%s24440_s11 + $0x100] ss:$8 sps:$4 sm:$0xff]   ;;  %v17290_v30 = vld [vmem:[%s24440_s11 + $0x374] ss:$8 sps:$4 sm:$0xff]  }
 0x5f2   :  { %v22146_v50 = vmax.f32 %v7524_v62, 0.0  ;;  %v7460_v26 = vpop.f32.mrf.mxu0  ;;  %v17285_v20 = vld [vmem:[%s24440_s11 + $0xf0] ss:$8 sps:$4 sm:$0xff]   ;;  %v17293_v62 = vld [vmem:[%s24440_s11 + $0xe4] ss:$8 sps:$4 sm:$0xff]  }
 0x5f3   :  { %v22148_v51 = vmax.f32 %v7523_v32, 0.0  ;;  %v7500_v0 = vpop.f32.mrf.mxu1  ;;  %v7591_v9 = vrot.slane %v22144_v38, 6  ;;  %v17288_v45 = vld [vmem:[%s24440_s11 + $0x370] ss:$8 sps:$4 sm:$0xff]   ;;  %v17296_v40 = vld [vmem:[%s24440_s11 + $0x364] ss:$8 sps:$4 sm:$0xff]  }
 0x5f4   :  { %v7593_v3 = vrot.slane %v22146_v50, 6  ;;  %v7530_v25 = vrot.slane %v22146_v50, 5  ;;  %v17291_v26 = vld [vmem:[%s24440_s11 + $0xe0] ss:$8 sps:$4 sm:$0xff]  }
 0x5f5   :  { %v7592_v37 = vrot.slane %v22148_v51, 6  ;;  %v7529_v19 = vrot.slane %v22148_v51, 5  ;;  %v7601_v39 = vmul.f32 %v7599_v13, %v7591_v9  ;;  %v8301_v48 = vrot.slane %v22148_v51, 7  ;;  %v17299_v9 = vld [vmem:[%s24440_s11 + $0xd4] ss:$8 sps:$4 sm:$0xff]  }
 0x5f6   :  { %v7603_v53 = vmul.f32 %v7599_v13, %v7593_v3  ;;  %v7539_v4 = vmul.f32 %v22154_v8, %v7530_v25  ;;  %v17294_v3 = vld [vmem:[%s24440_s11 + $0x360] ss:$8 sps:$4 sm:$0xff]  }
 0x5f7   :  { %v7602_v16 = vmul.f32 %v7599_v13, %v7592_v37  ;;  %v7538_v24 = vmul.f32 %v22154_v8, %v7529_v19  ;;  %v7604_v43 = vpack.c.bf16 %v7601_v39, %v7601_v39  ;;  %v8311_v31 = vmul.f32 %v22253_v49, %v8301_v48  ;;  %v17302_v13 = vld [vmem:[%s24440_s11 + $0x354] ss:$8 sps:$4 sm:$0xff]   ;;  %v17297_v37 = vld [vmem:[%s24440_s11 + $0xd0] ss:$8 sps:$4 sm:$0xff]   ;;  %v17305_v19 = vld [vmem:[%s24440_s11 + $0xc4] ss:$8 sps:$4 sm:$0xff]  }
 0x5f8   :  { %v7606_v56 = vpack.c.bf16 %v7603_v53, %v7603_v53  ;;  %v7542_v32 = vpack.c.bf16 %v7539_v4, %v7539_v4  ;;  %v17300_v53 = vld [vmem:[%s24440_s11 + $0x350] ss:$8 sps:$4 sm:$0xff]   ;;  %v17308_v39 = vld [vmem:[%s24440_s11 + $0x344] ss:$8 sps:$4 sm:$0xff]   ;;  %v17351_v25 = vld [vmem:[%s24440_s11 + $0x440] ss:$8 sps:$4 sm:$0xff]  }
 0x5f9   :  { %v7605_v10 = vpack.c.bf16 %v7602_v16, %v7602_v16  ;;  %v7541_v33 = vpack.c.bf16 %v7538_v24, %v7538_v24  ;;  %v8314_v0 = vpack.c.bf16 %v8311_v31, %v8311_v31  ;;  %v17311_v16 = vld [vmem:[%s24440_s11 + $0xb4] ss:$8 sps:$4 sm:$0xff]   ;;  %v17306_v24 = vld [vmem:[%s24440_s11 + $0x340] ss:$8 sps:$4 sm:$0xff]   ;;  %v17357_v4 = vld [vmem:[%s24440_s11 + $0x430] ss:$8 sps:$4 sm:$0xff]  }
 0x5fa   :  { %7970 = vmatmul.mubr.bf16.vlgmr.msra.gmra.mxu1 %v7606_v56  ;;  %v17314_v56 = vld [vmem:[%s24440_s11 + $0x334] ss:$8 sps:$4 sm:$0xff]   ;;  %v17368_v31 = vld [vmem:[%s24440_s11 + $0x3a4] ss:$8 sps:$4 sm:$0xff]  }
 0x5fb   :  { %8219 = vmatpush1.bf16.msra.mxu1 %v17237_v63  ;;  %7928 = vmatprep.mubr.bf16.mxu0 %v7605_v10  ;;  %v17303_v63 = vld [vmem:[%s24440_s11 + $0xc0] ss:$8 sps:$4 sm:$0xff]   ;;  %v17309_v10 = vld [vmem:[%s24440_s11 + $0xb0] ss:$8 sps:$4 sm:$0xff]  }
 0x5fc   :  { %8250 = vmatprep.mubr.bf16.mxu1 %v7541_v33  ;;  %7929 = vmatmul.mubr.bf16.vlgmr.msra.gmra.mxu0 %v7604_v43  ;;  %v17317_v33 = vld [vmem:[%s24440_s11 + $0xa4] ss:$8 sps:$4 sm:$0xff]   ;;  %v17315_v43 = vld [vmem:[%s24440_s11 + $0xa0] ss:$8 sps:$4 sm:$0xff]  }
 0x5fd   :  { %8220 = vmatprep.subr.bf16.mxu1 %v17245_v35  ;;  %8260 = vmatpush1.bf16.msra.mxu0 %v17240_v28  ;;  %v17312_v28 = vld [vmem:[%s24440_s11 + $0x330] ss:$8 sps:$4 sm:$0xff]   ;;  %v17320_v35 = vld [vmem:[%s24440_s11 + $0x324] ss:$8 sps:$4 sm:$0xff]  }
 0x5fe   :  { %8261 = vmatprep.subr.bf16.mxu0 %v17248_v42  ;;  %8291 = vmatprep.mubr.bf16.mxu0 %v24728_v54  ;;  %v17323_v42 = vld [vmem:[%s24440_s11 + $0x94] ss:$8 sps:$4 sm:$0xff]  }
 0x5ff   :  { %8221 = vmatpush1.bf16.msra.mxu1 %v17243_v12  ;;  %v17318_v12 = vld [vmem:[%s24440_s11 + $0x320] ss:$8 sps:$4 sm:$0xff]  }
 0x600   :  { %8222 = vmatprep.subr.bf16.mxu1 %v17251_v27  ;;  %v17326_v27 = vld [vmem:[%s24440_s11 + $0x314] ss:$8 sps:$4 sm:$0xff]  }
 0x601   :  { %8262 = vmatpush1.bf16.msra.mxu0 %v17246_v11  ;;  %v17321_v11 = vld [vmem:[%s24440_s11 + $0x90] ss:$8 sps:$4 sm:$0xff]  }
 0x602   :  { %8263 = vmatprep.subr.bf16.mxu0 %v17254_v5  ;;  %v17329_v5 = vld [vmem:[%s24440_s11 + $0x84] ss:$8 sps:$4 sm:$0xff]  }
 0x603   :  { %8223 = vmatpush1.bf16.msra.mxu1 %v17249_v47  ;;  %v7528_v47 = vrot.slane %v22144_v38, 5 }
 0x604   :  { %8224 = vmatprep.subr.bf16.mxu1 %v17257_v17  ;;  %v17324_v17 = vld [vmem:[%s24440_s11 + $0x310] ss:$8 sps:$4 sm:$0xff]  }
 0x605   :  { %8264 = vmatpush1.bf16.msra.mxu0 %v17252_v22  ;;  %v17332_v22 = vld [vmem:[%s24440_s11 + $0x304] ss:$8 sps:$4 sm:$0xff]  }
 0x606   :  { %8265 = vmatprep.subr.bf16.mxu0 %v17260_v61  ;;  %v17327_v61 = vld [vmem:[%s24440_s11 + $0x80] ss:$8 sps:$4 sm:$0xff]  }
 0x607   :  { %8225 = vmatpush1.bf16.msra.mxu1 %v17255_v36  ;;  %v7537_v36 = vmul.f32 %v22154_v8, %v7528_v47  ;;  %v17393_v47 = vld [vmem:[%s24440_s11 + $0x4d0] ss:$8 sps:$4 sm:$0xff]  }
 0x608   :  { %8226 = vmatprep.subr.bf16.mxu1 %v17263_v15  ;;  %v17335_v15 = vld [vmem:[%s24440_s11 + $0x474] ss:$8 sps:$4 sm:$0xff]  }
 0x609   :  { %8266 = vmatpush1.bf16.msra.mxu0 %v17258_v57  ;;  %v17330_v57 = vld [vmem:[%s24440_s11 + $0x300] ss:$8 sps:$4 sm:$0xff]   ;;  %v7540_v8 = vpack.c.bf16 %v7537_v36, %v7537_v36 }
 0x60a   :  { %8267 = vmatprep.subr.bf16.mxu0 %v17266_v1  ;;  %v17338_v1 = vld [vmem:[%s24440_s11 + $0x3f4] ss:$8 sps:$4 sm:$0xff]   ;;  %v17399_v36 = vld [vmem:[%s24440_s11 + $0x4c0] ss:$8 sps:$4 sm:$0xff]  }
 0x60b   :  { %8227 = vmatpush1.bf16.msra.mxu1 %v17261_v34  ;;  %v17333_v34 = vld [vmem:[%s24440_s11 + $0x470] ss:$8 sps:$4 sm:$0xff]  }
 0x60c   :  { %8228 = vmatprep.subr.bf16.mxu1 %v17269_v14  ;;  %v17341_v14 = vld [vmem:[%s24440_s11 + $0x464] ss:$8 sps:$4 sm:$0xff]  }
 0x60d   :  { %8268 = vmatpush1.bf16.msra.mxu0 %v17264_v59  ;;  %v17336_v59 = vld [vmem:[%s24440_s11 + $0x3f0] ss:$8 sps:$4 sm:$0xff]  }
 0x60e   :  { %8269 = vmatprep.subr.bf16.mxu0 %v17272_v52  ;;  %v17344_v52 = vld [vmem:[%s24440_s11 + $0x3e4] ss:$8 sps:$4 sm:$0xff]  }
 0x60f   :  { %8229 = vmatpush1.bf16.msra.mxu1 %v17267_v55  ;;  %v17339_v55 = vld [vmem:[%s24440_s11 + $0x460] ss:$8 sps:$4 sm:$0xff]  }
 0x610   :  { %8230 = vmatprep.subr.bf16.mxu1 %v17275_v21  ;;  %v17347_v21 = vld [vmem:[%s24440_s11 + $0x454] ss:$8 sps:$4 sm:$0xff]  }
 0x611   :  { %8270 = vmatpush1.bf16.msra.mxu0 %v17270_v23  ;;  %v17342_v23 = vld [vmem:[%s24440_s11 + $0x3e0] ss:$8 sps:$4 sm:$0xff]  }
 0x612   :  { %8271 = vmatprep.subr.bf16.mxu0 %v17278_v29  ;;  %v17350_v29 = vld [vmem:[%s24440_s11 + $0x3d4] ss:$8 sps:$4 sm:$0xff]  }
 0x613   :  { %8231 = vmatpush1.bf16.msra.mxu1 %v17273_v44  ;;  %v17345_v44 = vld [vmem:[%s24440_s11 + $0x450] ss:$8 sps:$4 sm:$0xff]  }
 0x614   :  { %8232 = vmatprep.subr.bf16.mxu1 %v17281_v7  ;;  %v17353_v7 = vld [vmem:[%s24440_s11 + $0x444] ss:$8 sps:$4 sm:$0xff]  }
 0x615   :  { %8272 = vmatpush1.bf16.msra.mxu0 %v17276_v18  ;;  %v17348_v18 = vld [vmem:[%s24440_s11 + $0x3d0] ss:$8 sps:$4 sm:$0xff]  }
 0x616   :  { %8273 = vmatprep.subr.bf16.mxu0 %v17284_v60  ;;  %v17356_v60 = vld [vmem:[%s24440_s11 + $0x3c4] ss:$8 sps:$4 sm:$0xff]  }
 0x617   :  { %8233 = vmatpush1.bf16.msra.mxu1 %v17279_v2  ;;  %v17359_v2 = vld [vmem:[%s24440_s11 + $0x434] ss:$8 sps:$4 sm:$0xff]  }
 0x618   :  { %8234 = vmatprep.subr.bf16.mxu1 %v17287_v58  ;;  %v17354_v58 = vld [vmem:[%s24440_s11 + $0x3c0] ss:$8 sps:$4 sm:$0xff]  }
 0x619   :  { %8274 = vmatpush1.bf16.msra.mxu0 %v17282_v46  ;;  %v17362_v46 = vld [vmem:[%s24440_s11 + $0x3b4] ss:$8 sps:$4 sm:$0xff]  }
 0x61a   :  { %8605 = vmatprep.subr.bf16.mxu0 %v17290_v30  ;;  %v17365_v30 = vld [vmem:[%s24440_s11 + $0x424] ss:$8 sps:$4 sm:$0xff]  }
 0x61b   :  { %8235 = vmatpush2.bf16.msra.mxu1 %v17285_v20  ;;  %v17360_v20 = vld [vmem:[%s24440_s11 + $0x3b0] ss:$8 sps:$4 sm:$0xff]  }
 0x61c   :  { %8292 = vmatmul.mubr.bf16.vlgmr.msra.gmra.mxu0 %v7542_v32  ;;  %8236 = vmatprep.subr.bf16.mxu1 %v17293_v62  ;;  %v17363_v62 = vld [vmem:[%s24440_s11 + $0x420] ss:$8 sps:$4 sm:$0xff]  }
 0x61d   :  { %8606 = vmatpush1.bf16.msra.mxu0 %v17288_v45  ;;  %8637 = vmatprep.mubr.bf16.mxu0 %v8314_v0  ;;  %v17371_v45 = vld [vmem:[%s24440_s11 + $0x414] ss:$8 sps:$4 sm:$0xff]   ;;  %v17366_v32 = vld [vmem:[%s24440_s11 + $0x3a0] ss:$8 sps:$4 sm:$0xff]   ;;  %v17377_v0 = vld [vmem:[%s24440_s11 + $0x404] ss:$8 sps:$4 sm:$0xff]  }
 0x61e   :  { %8607 = vmatprep.subr.bf16.mxu0 %v17296_v40  ;;  %v17374_v40 = vld [vmem:[%s24440_s11 + $0x394] ss:$8 sps:$4 sm:$0xff]  }
 0x61f   :  { %8237 = vmatpush2.bf16.msra.mxu1 %v17291_v26  ;;  %v17369_v26 = vld [vmem:[%s24440_s11 + $0x410] ss:$8 sps:$4 sm:$0xff]  }
 0x620   :  { %8238 = vmatprep.subr.bf16.mxu1 %v17299_v9  ;;  %v8302_v9 = vrot.slane %v22146_v50, 7 }
 0x621   :  { %8608 = vmatpush1.bf16.msra.mxu0 %v17294_v3  ;;  %v17372_v3 = vld [vmem:[%s24440_s11 + $0x390] ss:$8 sps:$4 sm:$0xff]  }
 0x622   :  { %8609 = vmatprep.subr.bf16.mxu0 %v17302_v13  ;;  %v17380_v13 = vld [vmem:[%s24440_s11 + $0x384] ss:$8 sps:$4 sm:$0xff]  }
 0x623   :  { %8239 = vmatpush2.bf16.msra.mxu1 %v17297_v37  ;;  %v8300_v37 = vrot.slane %v22144_v38, 7 }
 0x624   :  { %8240 = vmatprep.subr.bf16.mxu1 %v17305_v19  ;;  %v17375_v19 = vld [vmem:[%s24440_s11 + $0x400] ss:$8 sps:$4 sm:$0xff]  }
 0x625   :  { %8610 = vmatpush1.bf16.msra.mxu0 %v17300_v53  ;;  %v22450_v53 = vpop.permute.xlu0 %8693 }
 0x626   :  { %8611 = vmatprep.subr.bf16.mxu0 %v17308_v39  ;;  %v8312_v39 = vmul.f32 %v22253_v49, %v8302_v9 }
 0x627   :  { %8241 = vmatpush2.bf16.msra.mxu1 %v17303_v63  ;;  %v17383_v63 = vld [vmem:[%s24440_s11 + $0x4f4] ss:$8 sps:$4 sm:$0xff]  }
 0x628   :  { %8242 = vmatprep.subr.bf16.mxu1 %v17311_v16  ;;  %v17378_v16 = vld [vmem:[%s24440_s11 + $0x380] ss:$8 sps:$4 sm:$0xff]  }
 0x629   :  { %8612 = vmatpush1.bf16.msra.mxu0 %v17306_v24  ;;  %v8697_v24 = vmul.f32 %v22450_v53, %v8301_v48  ;;  %v17389_v48 = vld [vmem:[%s24440_s11 + $0x4e4] ss:$8 sps:$4 sm:$0xff]  }
 0x62a   :  { %8613 = vmatprep.subr.bf16.mxu0 %v17314_v56  ;;  %v8310_v56 = vmul.f32 %v22253_v49, %v8300_v37  ;;  %v17384_v49 = vld [vmem:[%s24440_s11 + $0x5f0] ss:$8 sps:$4 sm:$0xff]  }
 0x62b   :  { %8243 = vmatpush2.bf16.msra.mxu1 %v17309_v10  ;;  %v17386_v10 = vld [vmem:[%s24440_s11 + $0x5f4] ss:$8 sps:$4 sm:$0xff]  }
 0x62c   :  { %8244 = vmatprep.subr.bf16.mxu1 %v17317_v33  ;;  %v17381_v33 = vld [vmem:[%s24440_s11 + $0x4f0] ss:$8 sps:$4 sm:$0xff]  }
 0x62d   :  { %8614 = vmatpush1.bf16.msra.mxu0 %v17312_v28  ;;  %v8315_v28 = vpack.c.bf16 %v8312_v39, %v8312_v39  ;;  %v17444_v39 = vld [vmem:[%s24440_s11 + $0x650] ss:$8 sps:$4 sm:$0xff]  }
 0x62e   :  { %8615 = vmatprep.subr.bf16.mxu0 %v17320_v35  ;;  %v8700_v35 = vpack.c.bf16 %v8697_v24, %v8697_v24  ;;  %v17455_v24 = vld [vmem:[%s24440_s11 + $0x534] ss:$8 sps:$4 sm:$0xff]  }
 0x62f   :  { %8245 = vmatpush2.bf16.msra.mxu1 %v17315_v43  ;;  %v8313_v43 = vpack.c.bf16 %v8310_v56, %v8310_v56  ;;  %v17450_v56 = vld [vmem:[%s24440_s11 + $0x640] ss:$8 sps:$4 sm:$0xff]  }
 0x630   :  { %8246 = vmatprep.subr.bf16.mxu1 %v17323_v42  ;;  %v17392_v42 = vld [vmem:[%s24440_s11 + $0x5e4] ss:$8 sps:$4 sm:$0xff]  }
 0x631   :  { %8616 = vmatpush1.bf16.msra.mxu0 %v17318_v12  ;;  %v17387_v12 = vld [vmem:[%s24440_s11 + $0x4e0] ss:$8 sps:$4 sm:$0xff]  }
 0x632   :  { %8617 = vmatprep.subr.bf16.mxu0 %v17326_v27  ;;  %v17395_v27 = vld [vmem:[%s24440_s11 + $0x4d4] ss:$8 sps:$4 sm:$0xff]  }
 0x633   :  { %8247 = vmatpush2.bf16.msra.mxu1 %v17321_v11  ;;  %v17390_v11 = vld [vmem:[%s24440_s11 + $0x5e0] ss:$8 sps:$4 sm:$0xff]  }
 0x634   :  { %8248 = vmatprep.subr.bf16.mxu1 %v17329_v5  ;;  %v17398_v5 = vld [vmem:[%s24440_s11 + $0x5d4] ss:$8 sps:$4 sm:$0xff]  }
 0x635   :  { %8618 = vmatpush1.bf16.msra.mxu0 %v17324_v17  ;;  %v17401_v17 = vld [vmem:[%s24440_s11 + $0x4c4] ss:$8 sps:$4 sm:$0xff]  }
 0x636   :  { %8619 = vmatprep.subr.bf16.mxu0 %v17332_v22  ;;  %v17396_v22 = vld [vmem:[%s24440_s11 + $0x5d0] ss:$8 sps:$4 sm:$0xff]  }
 0x637   :  { %8249 = vmatpush2.bf16.msra.mxu1 %v17327_v61  ;;  %v17404_v61 = vld [vmem:[%s24440_s11 + $0x5c4] ss:$8 sps:$4 sm:$0xff]  }
 0x638   :  { %8646 = vmatprep.subr.bf16.mxu1 %v17335_v15  ;;  %v17407_v15 = vld [vmem:[%s24440_s11 + $0x4b4] ss:$8 sps:$4 sm:$0xff]  }
 0x639   :  { %8620 = vmatpush1.bf16.msra.mxu0 %v17330_v57  ;;  %v17402_v57 = vld [vmem:[%s24440_s11 + $0x5c0] ss:$8 sps:$4 sm:$0xff]  }
 0x63a   :  { %8251 = vmatmul.mubr.bf16.vlgmr.msra.gmra.mxu1 %v7540_v8  ;;  %8621 = vmatprep.subr.bf16.mxu0 %v17338_v1  ;;  %v17410_v1 = vld [vmem:[%s24440_s11 + $0x5b4] ss:$8 sps:$4 sm:$0xff]   ;;  %v17413_v8 = vld [vmem:[%s24440_s11 + $0x4a4] ss:$8 sps:$4 sm:$0xff]  }
 0x63b   :  { %8647 = vmatpush1.bf16.msra.mxu1 %v17333_v34  ;;  %8678 = vmatprep.mubr.bf16.mxu1 %v24728_v54  ;;  %v17405_v34 = vld [vmem:[%s24440_s11 + $0x4b0] ss:$8 sps:$4 sm:$0xff]  }
 0x63c   :  { %8648 = vmatprep.subr.bf16.mxu1 %v17341_v14  ;;  %v17408_v14 = vld [vmem:[%s24440_s11 + $0x5b0] ss:$8 sps:$4 sm:$0xff]  }
 0x63d   :  { %8622 = vmatpush2.bf16.msra.mxu0 %v17336_v59  ;;  %v17416_v59 = vld [vmem:[%s24440_s11 + $0x5a4] ss:$8 sps:$4 sm:$0xff]  }
 0x63e   :  { %8623 = vmatprep.subr.bf16.mxu0 %v17344_v52  ;;  %v17411_v52 = vld [vmem:[%s24440_s11 + $0x4a0] ss:$8 sps:$4 sm:$0xff]  }
 0x63f   :  { %8649 = vmatpush1.bf16.msra.mxu1 %v17339_v55  ;;  %v17419_v55 = vld [vmem:[%s24440_s11 + $0x494] ss:$8 sps:$4 sm:$0xff]  }
 0x640   :  { %8650 = vmatprep.subr.bf16.mxu1 %v17347_v21  ;;  %v17414_v21 = vld [vmem:[%s24440_s11 + $0x5a0] ss:$8 sps:$4 sm:$0xff]  }
 0x641   :  { %8624 = vmatpush2.bf16.msra.mxu0 %v17342_v23  ;;  %v17422_v23 = vld [vmem:[%s24440_s11 + $0x594] ss:$8 sps:$4 sm:$0xff]  }
 0x642   :  { %8625 = vmatprep.subr.bf16.mxu0 %v17350_v29  ;;  %v17417_v29 = vld [vmem:[%s24440_s11 + $0x490] ss:$8 sps:$4 sm:$0xff]  }
 0x643   :  { %8651 = vmatpush1.bf16.msra.mxu1 %v17345_v44  ;;  %v17425_v44 = vld [vmem:[%s24440_s11 + $0x484] ss:$8 sps:$4 sm:$0xff]  }
 0x644   :  { %8652 = vmatprep.subr.bf16.mxu1 %v17353_v7  ;;  %v17420_v7 = vld [vmem:[%s24440_s11 + $0x590] ss:$8 sps:$4 sm:$0xff]  }
 0x645   :  { %8626 = vmatpush2.bf16.msra.mxu0 %v17348_v18  ;;  %v17428_v18 = vld [vmem:[%s24440_s11 + $0x584] ss:$8 sps:$4 sm:$0xff]  }
 0x646   :  { %8627 = vmatprep.subr.bf16.mxu0 %v17356_v60  ;;  %v17423_v60 = vld [vmem:[%s24440_s11 + $0x480] ss:$8 sps:$4 sm:$0xff]  }
 0x647   :  { %8653 = vmatpush1.bf16.msra.mxu1 %v17351_v25  ;;  %v17431_v25 = vld [vmem:[%s24440_s11 + $0x574] ss:$8 sps:$4 sm:$0xff]  }
 0x648   :  { %8654 = vmatprep.subr.bf16.mxu1 %v17359_v2  ;;  %v17426_v2 = vld [vmem:[%s24440_s11 + $0x580] ss:$8 sps:$4 sm:$0xff]  }
 0x649   :  { %8628 = vmatpush2.bf16.msra.mxu0 %v17354_v58  ;;  %v22564_v58 = vpop.permute.xlu1 %9079 }
 0x64a   :  { %8629 = vmatprep.subr.bf16.mxu0 %v17362_v46  ;;  %v8698_v46 = vmul.f32 %v22450_v53, %v8302_v9  ;;  %v17438_v9 = vld [vmem:[%s24440_s11 + $0x660] ss:$8 sps:$4 sm:$0xff]  }
 0x64b   :  { %8655 = vmatpush1.bf16.msra.mxu1 %v17357_v4  ;;  %v17434_v4 = vld [vmem:[%s24440_s11 + $0x674] ss:$8 sps:$4 sm:$0xff]  }
 0x64c   :  { %8656 = vmatprep.subr.bf16.mxu1 %v17365_v30  ;;  %v17429_v30 = vld [vmem:[%s24440_s11 + $0x570] ss:$8 sps:$4 sm:$0xff]  }
 0x64d   :  { %8630 = vmatpush2.bf16.msra.mxu0 %v17360_v20  ;;  %v9083_v20 = vmul.f32 %v22564_v58, %v22148_v51 }
 0x64e   :  { %8631 = vmatprep.subr.bf16.mxu0 %v17368_v31  ;;  %v17437_v31 = vld [vmem:[%s24440_s11 + $0x564] ss:$8 sps:$4 sm:$0xff]  }
 0x64f   :  { %8657 = vmatpush1.bf16.msra.mxu1 %v17363_v62  ;;  %v17432_v62 = vld [vmem:[%s24440_s11 + $0x670] ss:$8 sps:$4 sm:$0xff]  }
 0x650   :  { %8658 = vmatprep.subr.bf16.mxu1 %v17371_v45  ;;  %v8701_v45 = vpack.c.bf16 %v8698_v46, %v8698_v46  ;;  %v17504_v46 = vld [vmem:[%s24440_s11 + $0x6b0] ss:$8 sps:$4 sm:$0xff]  }
 0x651   :  { %8632 = vmatpush2.bf16.msra.mxu0 %v17366_v32  ;;  %v17440_v32 = vld [vmem:[%s24440_s11 + $0x664] ss:$8 sps:$4 sm:$0xff]  }
 0x652   :  { %8633 = vmatprep.subr.bf16.mxu0 %v17374_v40  ;;  %v17435_v40 = vld [vmem:[%s24440_s11 + $0x560] ss:$8 sps:$4 sm:$0xff]  }
 0x653   :  { %8659 = vmatpush1.bf16.msra.mxu1 %v17369_v26  ;;  %v9086_v26 = vpack.c.bf16 %v9083_v20, %v9083_v20  ;;  %v17515_v20 = vld [vmem:[%s24440_s11 + $0x714] ss:$8 sps:$4 sm:$0xff]  }
 0x654   :  { %8660 = vmatprep.subr.bf16.mxu1 %v17377_v0  ;;  %v17443_v0 = vld [vmem:[%s24440_s11 + $0x554] ss:$8 sps:$4 sm:$0xff]  }
 0x655   :  { %8634 = vmatpush2.bf16.msra.mxu0 %v17372_v3  ;;  %v17446_v3 = vld [vmem:[%s24440_s11 + $0x654] ss:$8 sps:$4 sm:$0xff]  }
 0x656   :  { %8635 = vmatprep.subr.bf16.mxu0 %v17380_v13  ;;  %v17441_v13 = vld [vmem:[%s24440_s11 + $0x550] ss:$8 sps:$4 sm:$0xff]  }
 0x657   :  { %8661 = vmatpush1.bf16.msra.mxu1 %v17375_v19  ;;  %v17449_v19 = vld [vmem:[%s24440_s11 + $0x544] ss:$8 sps:$4 sm:$0xff]  }
 0x658   :  { %8991 = vmatprep.subr.bf16.mxu1 %v17383_v63  ;;  %v17452_v63 = vld [vmem:[%s24440_s11 + $0x644] ss:$8 sps:$4 sm:$0xff]  }
 0x659   :  { %8636 = vmatpush2.bf16.msra.mxu0 %v17378_v16  ;;  %v17447_v16 = vld [vmem:[%s24440_s11 + $0x540] ss:$8 sps:$4 sm:$0xff]  }
 0x65a   :  { %8679 = vmatmul.mubr.bf16.vlgmr.msra.gmra.mxu1 %v8315_v28  ;;  %9032 = vmatprep.subr.bf16.mxu0 %v17386_v10  ;;  %v17458_v10 = vld [vmem:[%s24440_s11 + $0x634] ss:$8 sps:$4 sm:$0xff]   ;;  %v17461_v28 = vld [vmem:[%s24440_s11 + $0x524] ss:$8 sps:$4 sm:$0xff]  }
 0x65b   :  { %8992 = vmatpush1.bf16.msra.mxu1 %v17381_v33  ;;  %9023 = vmatprep.mubr.bf16.mxu1 %v8700_v35  ;;  %v17453_v33 = vld [vmem:[%s24440_s11 + $0x530] ss:$8 sps:$4 sm:$0xff]   ;;  %v17464_v35 = vld [vmem:[%s24440_s11 + $0x624] ss:$8 sps:$4 sm:$0xff]  }
 0x65c   :  { %8638 = vmatmul.mubr.bf16.vlgmr.msra.gmra.mxu0 %v8313_v43  ;;  %8993 = vmatprep.subr.bf16.mxu1 %v17389_v48  ;;  %v17456_v48 = vld [vmem:[%s24440_s11 + $0x630] ss:$8 sps:$4 sm:$0xff]   ;;  %v17467_v43 = vld [vmem:[%s24440_s11 + $0x514] ss:$8 sps:$4 sm:$0xff]  }
 0x65d   :  { %9033 = vmatpush1.bf16.msra.mxu0 %v17384_v49  ;;  %9064 = vmatprep.mubr.bf16.mxu0 %v24728_v54  ;;  %v17459_v49 = vld [vmem:[%s24440_s11 + $0x520] ss:$8 sps:$4 sm:$0xff]  }
 0x65e   :  { %9034 = vmatprep.subr.bf16.mxu0 %v17392_v42  ;;  %v17462_v42 = vld [vmem:[%s24440_s11 + $0x620] ss:$8 sps:$4 sm:$0xff]  }
 0x65f   :  { %8994 = vmatpush1.bf16.msra.mxu1 %v17387_v12  ;;  %v17470_v12 = vld [vmem:[%s24440_s11 + $0x614] ss:$8 sps:$4 sm:$0xff]  }
 0x660   :  { %8995 = vmatprep.subr.bf16.mxu1 %v17395_v27  ;;  %v17465_v27 = vld [vmem:[%s24440_s11 + $0x510] ss:$8 sps:$4 sm:$0xff]  }
 0x661   :  { %9035 = vmatpush1.bf16.msra.mxu0 %v17390_v11  ;;  %v17473_v11 = vld [vmem:[%s24440_s11 + $0x504] ss:$8 sps:$4 sm:$0xff]  }
 0x662   :  { %9036 = vmatprep.subr.bf16.mxu0 %v17398_v5  ;;  %v17468_v5 = vld [vmem:[%s24440_s11 + $0x610] ss:$8 sps:$4 sm:$0xff]  }
 0x663   :  { %8996 = vmatpush1.bf16.msra.mxu1 %v17393_v47  ;;  %v17476_v47 = vld [vmem:[%s24440_s11 + $0x604] ss:$8 sps:$4 sm:$0xff]  }
 0x664   :  { %8997 = vmatprep.subr.bf16.mxu1 %v17401_v17  ;;  %v17471_v17 = vld [vmem:[%s24440_s11 + $0x500] ss:$8 sps:$4 sm:$0xff]  }
 0x665   :  { %9037 = vmatpush1.bf16.msra.mxu0 %v17396_v22  ;;  %v8696_v22 = vmul.f32 %v22450_v53, %v8300_v37  ;;  %v17485_v53 = vld [vmem:[%s24440_s11 + $0x764] ss:$8 sps:$4 sm:$0xff]  }
 0x666   :  { %9038 = vmatprep.subr.bf16.mxu0 %v17404_v61  ;;  %v17479_v61 = vld [vmem:[%s24440_s11 + $0x774] ss:$8 sps:$4 sm:$0xff]  }
 0x667   :  { %8998 = vmatpush1.bf16.msra.mxu1 %v17399_v36  ;;  %v17474_v36 = vld [vmem:[%s24440_s11 + $0x600] ss:$8 sps:$4 sm:$0xff]   ;;  %v8699_v37 = vpack.c.bf16 %v8696_v22, %v8696_v22  ;;  %v17542_v22 = vld [vmem:[%s24440_s11 + $0x8d4] ss:$8 sps:$4 sm:$0xff]  }
 0x668   :  { %8999 = vmatprep.subr.bf16.mxu1 %v17407_v15  ;;  %v17482_v15 = vld [vmem:[%s24440_s11 + $0x6f4] ss:$8 sps:$4 sm:$0xff]  }
 0x669   :  { %9039 = vmatpush1.bf16.msra.mxu0 %v17402_v57  ;;  %v17477_v57 = vld [vmem:[%s24440_s11 + $0x770] ss:$8 sps:$4 sm:$0xff]  }
 0x66a   :  { %9040 = vmatprep.subr.bf16.mxu0 %v17410_v1  ;;  %v17480_v1 = vld [vmem:[%s24440_s11 + $0x6f0] ss:$8 sps:$4 sm:$0xff]  }
 0x66b   :  { %9000 = vmatpush1.bf16.msra.mxu1 %v17405_v34  ;;  %v17488_v34 = vld [vmem:[%s24440_s11 + $0x6e4] ss:$8 sps:$4 sm:$0xff]  }
 0x66c   :  { %9001 = vmatprep.subr.bf16.mxu1 %v17413_v8  ;;  %v17483_v8 = vld [vmem:[%s24440_s11 + $0x760] ss:$8 sps:$4 sm:$0xff]  }
 0x66d   :  { %9041 = vmatpush1.bf16.msra.mxu0 %v17408_v14  ;;  %v17491_v14 = vld [vmem:[%s24440_s11 + $0x754] ss:$8 sps:$4 sm:$0xff]  }
 0x66e   :  { %9042 = vmatprep.subr.bf16.mxu0 %v17416_v59  ;;  %v17486_v59 = vld [vmem:[%s24440_s11 + $0x6e0] ss:$8 sps:$4 sm:$0xff]  }
 0x66f   :  { %9002 = vmatpush1.bf16.msra.mxu1 %v17411_v52  ;;  %v17494_v52 = vld [vmem:[%s24440_s11 + $0x6d4] ss:$8 sps:$4 sm:$0xff]  }
 0x670   :  { %9003 = vmatprep.subr.bf16.mxu1 %v17419_v55  ;;  %v17489_v55 = vld [vmem:[%s24440_s11 + $0x750] ss:$8 sps:$4 sm:$0xff]  }
 0x671   :  { %9043 = vmatpush1.bf16.msra.mxu0 %v17414_v21  ;;  %v17497_v21 = vld [vmem:[%s24440_s11 + $0x744] ss:$8 sps:$4 sm:$0xff]  }
 0x672   :  { %9044 = vmatprep.subr.bf16.mxu0 %v17422_v23  ;;  %v17492_v23 = vld [vmem:[%s24440_s11 + $0x6d0] ss:$8 sps:$4 sm:$0xff]  }
 0x673   :  { %9004 = vmatpush1.bf16.msra.mxu1 %v17417_v29  ;;  %v17500_v29 = vld [vmem:[%s24440_s11 + $0x6c4] ss:$8 sps:$4 sm:$0xff]  }
 0x674   :  { %9005 = vmatprep.subr.bf16.mxu1 %v17425_v44  ;;  %v17495_v44 = vld [vmem:[%s24440_s11 + $0x740] ss:$8 sps:$4 sm:$0xff]  }
 0x675   :  { %9045 = vmatpush1.bf16.msra.mxu0 %v17420_v7  ;;  %v17503_v7 = vld [vmem:[%s24440_s11 + $0x734] ss:$8 sps:$4 sm:$0xff]  }
 0x676   :  { %9046 = vmatprep.subr.bf16.mxu0 %v17428_v18  ;;  %v17498_v18 = vld [vmem:[%s24440_s11 + $0x6c0] ss:$8 sps:$4 sm:$0xff]  }
 0x677   :  { %9006 = vmatpush1.bf16.msra.mxu1 %v17423_v60  ;;  %v17506_v60 = vld [vmem:[%s24440_s11 + $0x6b4] ss:$8 sps:$4 sm:$0xff]  }
 0x678   :  { %9007 = vmatprep.subr.bf16.mxu1 %v17431_v25  ;;  %v17501_v25 = vld [vmem:[%s24440_s11 + $0x730] ss:$8 sps:$4 sm:$0xff]  }
 0x679   :  { %9047 = vmatpush1.bf16.msra.mxu0 %v17426_v2  ;;  %v17509_v2 = vld [vmem:[%s24440_s11 + $0x724] ss:$8 sps:$4 sm:$0xff]  }
 0x67a   :  { %9377 = vmatprep.subr.bf16.mxu0 %v17434_v4  ;;  %v17512_v4 = vld [vmem:[%s24440_s11 + $0x6a4] ss:$8 sps:$4 sm:$0xff]  }
 0x67b   :  { %9008 = vmatpush2.bf16.msra.mxu1 %v17429_v30  ;;  %v17507_v30 = vld [vmem:[%s24440_s11 + $0x720] ss:$8 sps:$4 sm:$0xff]  }
 0x67c   :  { %9065 = vmatmul.mubr.bf16.vlgmr.msra.gmra.mxu0 %v8701_v45  ;;  %9009 = vmatprep.subr.bf16.mxu1 %v17437_v31  ;;  %v17510_v31 = vld [vmem:[%s24440_s11 + $0x6a0] ss:$8 sps:$4 sm:$0xff]   ;;  %v17513_v45 = vld [vmem:[%s24440_s11 + $0x710] ss:$8 sps:$4 sm:$0xff]  }
 0x67d   :  { %9378 = vmatpush1.bf16.msra.mxu0 %v17432_v62  ;;  %9409 = vmatprep.mubr.bf16.mxu0 %v9086_v26  ;;  %v17518_v62 = vld [vmem:[%s24440_s11 + $0x694] ss:$8 sps:$4 sm:$0xff]   ;;  %v9462_v26 = vrot.slane %v22148_v51, 1 }
 0x67e   :  { %9379 = vmatprep.subr.bf16.mxu0 %v17440_v32  ;;  %v17521_v32 = vld [vmem:[%s24440_s11 + $0x704] ss:$8 sps:$4 sm:$0xff]  }
 0x67f   :  { %9010 = vmatpush2.bf16.msra.mxu1 %v17435_v40  ;;  %v17516_v40 = vld [vmem:[%s24440_s11 + $0x690] ss:$8 sps:$4 sm:$0xff]  }
 0x680   :  { %9011 = vmatprep.subr.bf16.mxu1 %v17443_v0  ;;  %v17524_v0 = vld [vmem:[%s24440_s11 + $0x684] ss:$8 sps:$4 sm:$0xff]  }
 0x681   :  { %9380 = vmatpush1.bf16.msra.mxu0 %v17438_v9  ;;  %v17519_v9 = vld [vmem:[%s24440_s11 + $0x700] ss:$8 sps:$4 sm:$0xff]  }
 0x682   :  { %9381 = vmatprep.subr.bf16.mxu0 %v17446_v3  ;;  %v22762_v3 = vpop.permute.xlu0 %9468 }
 0x683   :  { %9012 = vmatpush2.bf16.msra.mxu1 %v17441_v13  ;;  %v9084_v13 = vmul.f32 %v22564_v58, %v22146_v50 }
 0x684   :  { %9013 = vmatprep.subr.bf16.mxu1 %v17449_v19  ;;  %v17527_v19 = vld [vmem:[%s24440_s11 + $0x7f4] ss:$8 sps:$4 sm:$0xff]  }
 0x685   :  { %9382 = vmatpush1.bf16.msra.mxu0 %v17444_v39  ;;  %v17522_v39 = vld [vmem:[%s24440_s11 + $0x680] ss:$8 sps:$4 sm:$0xff]  }
 0x686   :  { %9383 = vmatprep.subr.bf16.mxu0 %v17452_v63  ;;  %v9472_v63 = vmul.f32 %v22762_v3, %v9462_v26 }
 0x687   :  { %9014 = vmatpush2.bf16.msra.mxu1 %v17447_v16  ;;  %v9082_v16 = vmul.f32 %v22564_v58, %v22144_v38  ;;  %v17528_v58 = vld [vmem:[%s24440_s11 + $0x8f0] ss:$8 sps:$4 sm:$0xff]  }
 0x688   :  { %9015 = vmatprep.subr.bf16.mxu1 %v17455_v24  ;;  %v17530_v24 = vld [vmem:[%s24440_s11 + $0x8f4] ss:$8 sps:$4 sm:$0xff]  }
 0x689   :  { %9384 = vmatpush1.bf16.msra.mxu0 %v17450_v56  ;;  %v17525_v56 = vld [vmem:[%s24440_s11 + $0x7f0] ss:$8 sps:$4 sm:$0xff]  }
 0x68a   :  { %9385 = vmatprep.subr.bf16.mxu0 %v17458_v10  ;;  %v9087_v10 = vpack.c.bf16 %v9084_v13, %v9084_v13  ;;  %v17581_v13 = vld [vmem:[%s24440_s11 + $0x864] ss:$8 sps:$4 sm:$0xff]  }
 0x68b   :  { %9016 = vmatpush2.bf16.msra.mxu1 %v17453_v33  ;;  %v17533_v33 = vld [vmem:[%s24440_s11 + $0x7e4] ss:$8 sps:$4 sm:$0xff]  }
 0x68c   :  { %9017 = vmatprep.subr.bf16.mxu1 %v17461_v28  ;;  %v9475_v28 = vpack.c.bf16 %v9472_v63, %v9472_v63  ;;  %v17584_v63 = vld [vmem:[%s24440_s11 + $0x964] ss:$8 sps:$4 sm:$0xff]  }
 0x68d   :  { %9386 = vmatpush1.bf16.msra.mxu0 %v17456_v48 }
 0x68e   :  { %9387 = vmatprep.subr.bf16.mxu0 %v17464_v35  ;;  %v9085_v35 = vpack.c.bf16 %v9082_v16, %v9082_v16 }
 0x68f   :  { %9018 = vmatpush2.bf16.msra.mxu1 %v17459_v49  ;;  %v17536_v49 = vld [vmem:[%s24440_s11 + $0x8e4] ss:$8 sps:$4 sm:$0xff]  }
 0x690   :  { %9019 = vmatprep.subr.bf16.mxu1 %v17467_v43  ;;  %v17531_v43 = vld [vmem:[%s24440_s11 + $0x7e0] ss:$8 sps:$4 sm:$0xff]  }
 0x691   :  { %9388 = vmatpush1.bf16.msra.mxu0 %v17462_v42 }
 0x692   :  { %9389 = vmatprep.subr.bf16.mxu0 %v17470_v12 }
 0x693   :  { %9020 = vmatpush2.bf16.msra.mxu1 %v17465_v27  ;;  %v17539_v27 = vld [vmem:[%s24440_s11 + $0x7d4] ss:$8 sps:$4 sm:$0xff]  }
 0x694   :  { %9021 = vmatprep.subr.bf16.mxu1 %v17473_v11 }
 0x695   :  { %9390 = vmatpush1.bf16.msra.mxu0 %v17468_v5  ;;  %v17534_v5 = vld [vmem:[%s24440_s11 + $0x8e0] ss:$8 sps:$4 sm:$0xff]  }
 0x696   :  { %9391 = vmatprep.subr.bf16.mxu0 %v17476_v47 }
 0x697   :  { %9022 = vmatpush2.bf16.msra.mxu1 %v17471_v17 }
 0x698   :  { %9418 = vmatprep.subr.bf16.mxu1 %v17479_v61 }
 0x699   :  { %9392 = vmatpush1.bf16.msra.mxu0 %v17474_v36  ;;  %v17537_v36 = vld [vmem:[%s24440_s11 + $0x7d0] ss:$8 sps:$4 sm:$0xff]  }
 0x69a   :  { %9024 = vmatmul.mubr.bf16.vlgmr.msra.gmra.mxu1 %v8699_v37  ;;  %9393 = vmatprep.subr.bf16.mxu0 %v17482_v15  ;;  %v17545_v37 = vld [vmem:[%s24440_s11 + $0x7c4] ss:$8 sps:$4 sm:$0xff]  }
 0x69b   :  { %9419 = vmatpush1.bf16.msra.mxu1 %v17477_v57  ;;  %9450 = vmatprep.mubr.bf16.mxu1 %v24728_v54 }
 0x69c   :  { %9420 = vmatprep.subr.bf16.mxu1 %v17485_v53  ;;  %v17540_v53 = vld [vmem:[%s24440_s11 + $0x8d0] ss:$8 sps:$4 sm:$0xff]  }
 0x69d   :  { %9394 = vmatpush2.bf16.msra.mxu0 %v17480_v1 }
 0x69e   :  { %9395 = vmatprep.subr.bf16.mxu0 %v17488_v34  ;;  %v17548_v34 = vld [vmem:[%s24440_s11 + $0x8c4] ss:$8 sps:$4 sm:$0xff]  }
 0x69f   :  { %9421 = vmatpush1.bf16.msra.mxu1 %v17483_v8  ;;  %v17543_v8 = vld [vmem:[%s24440_s11 + $0x7c0] ss:$8 sps:$4 sm:$0xff]  }
 0x6a0   :  { %9422 = vmatprep.subr.bf16.mxu1 %v17491_v14  ;;  %v17551_v14 = vld [vmem:[%s24440_s11 + $0x7b4] ss:$8 sps:$4 sm:$0xff]  }
 0x6a1   :  { %9396 = vmatpush2.bf16.msra.mxu0 %v17486_v59  ;;  %v17546_v59 = vld [vmem:[%s24440_s11 + $0x8c0] ss:$8 sps:$4 sm:$0xff]  }
 0x6a2   :  { %9397 = vmatprep.subr.bf16.mxu0 %v17494_v52  ;;  %v17554_v52 = vld [vmem:[%s24440_s11 + $0x8b4] ss:$8 sps:$4 sm:$0xff]  }
 0x6a3   :  { %9423 = vmatpush1.bf16.msra.mxu1 %v17489_v55  ;;  %v17549_v55 = vld [vmem:[%s24440_s11 + $0x7b0] ss:$8 sps:$4 sm:$0xff]  }
 0x6a4   :  { %9424 = vmatprep.subr.bf16.mxu1 %v17497_v21  ;;  %v17557_v21 = vld [vmem:[%s24440_s11 + $0x7a4] ss:$8 sps:$4 sm:$0xff]  }
 0x6a5   :  { %9398 = vmatpush2.bf16.msra.mxu0 %v17492_v23  ;;  %v17552_v23 = vld [vmem:[%s24440_s11 + $0x8b0] ss:$8 sps:$4 sm:$0xff]  }
 0x6a6   :  { %9399 = vmatprep.subr.bf16.mxu0 %v17500_v29  ;;  %v17560_v29 = vld [vmem:[%s24440_s11 + $0x8a4] ss:$8 sps:$4 sm:$0xff]  }
 0x6a7   :  { %9425 = vmatpush1.bf16.msra.mxu1 %v17495_v44  ;;  %v17555_v44 = vld [vmem:[%s24440_s11 + $0x7a0] ss:$8 sps:$4 sm:$0xff]  }
 0x6a8   :  { %9426 = vmatprep.subr.bf16.mxu1 %v17503_v7  ;;  %v17563_v7 = vld [vmem:[%s24440_s11 + $0x794] ss:$8 sps:$4 sm:$0xff]  }
 0x6a9   :  { %9400 = vmatpush2.bf16.msra.mxu0 %v17498_v18  ;;  %v17558_v18 = vld [vmem:[%s24440_s11 + $0x8a0] ss:$8 sps:$4 sm:$0xff]  }
 0x6aa   :  { %9401 = vmatprep.subr.bf16.mxu0 %v17506_v60  ;;  %v17566_v60 = vld [vmem:[%s24440_s11 + $0x894] ss:$8 sps:$4 sm:$0xff]  }
 0x6ab   :  { %9427 = vmatpush1.bf16.msra.mxu1 %v17501_v25  ;;  %v17561_v25 = vld [vmem:[%s24440_s11 + $0x790] ss:$8 sps:$4 sm:$0xff]  }
 0x6ac   :  { %9428 = vmatprep.subr.bf16.mxu1 %v17509_v2  ;;  %v17569_v2 = vld [vmem:[%s24440_s11 + $0x784] ss:$8 sps:$4 sm:$0xff]  }
 0x6ad   :  { %9402 = vmatpush2.bf16.msra.mxu0 %v17504_v46  ;;  %v17564_v46 = vld [vmem:[%s24440_s11 + $0x890] ss:$8 sps:$4 sm:$0xff]  }
 0x6ae   :  { %9403 = vmatprep.subr.bf16.mxu0 %v17512_v4  ;;  %v17572_v4 = vld [vmem:[%s24440_s11 + $0x884] ss:$8 sps:$4 sm:$0xff]  }
 0x6af   :  { %9429 = vmatpush1.bf16.msra.mxu1 %v17507_v30  ;;  %v9463_v30 = vrot.slane %v22146_v50, 1 }
 0x6b0   :  { %9430 = vmatprep.subr.bf16.mxu1 %v17515_v20  ;;  %v17567_v20 = vld [vmem:[%s24440_s11 + $0x780] ss:$8 sps:$4 sm:$0xff]  }
 0x6b1   :  { %9404 = vmatpush2.bf16.msra.mxu0 %v17510_v31  ;;  %v17575_v31 = vld [vmem:[%s24440_s11 + $0x874] ss:$8 sps:$4 sm:$0xff]  }
 0x6b2   :  { %9405 = vmatprep.subr.bf16.mxu0 %v17518_v62  ;;  %v17570_v62 = vld [vmem:[%s24440_s11 + $0x880] ss:$8 sps:$4 sm:$0xff]  }
 0x6b3   :  { %9431 = vmatpush1.bf16.msra.mxu1 %v17513_v45  ;;  %v22879_v45 = vpop.permute.xlu1 %9854 }
 0x6b4   :  { %9432 = vmatprep.subr.bf16.mxu1 %v17521_v32  ;;  %v9473_v32 = vmul.f32 %v22762_v3, %v9463_v30 }
 0x6b5   :  { %9406 = vmatpush2.bf16.msra.mxu0 %v17516_v40  ;;  %v17578_v40 = vld [vmem:[%s24440_s11 + $0x974] ss:$8 sps:$4 sm:$0xff]  }
 0x6b6   :  { %9407 = vmatprep.subr.bf16.mxu0 %v17524_v0  ;;  %v17573_v0 = vld [vmem:[%s24440_s11 + $0x870] ss:$8 sps:$4 sm:$0xff]  }
 0x6b7   :  { %9433 = vmatpush1.bf16.msra.mxu1 %v17519_v9  ;;  %v9858_v9 = vmul.f32 %v22879_v45, %v9462_v26  ;;  %v17579_v26 = vld [vmem:[%s24440_s11 + $0x860] ss:$8 sps:$4 sm:$0xff]  }
 0x6b8   :  { %9766 = vmatprep.subr.bf16.mxu1 %v17527_v19  ;;  %v17576_v19 = vld [vmem:[%s24440_s11 + $0x970] ss:$8 sps:$4 sm:$0xff]  }
 0x6b9   :  { %9408 = vmatpush2.bf16.msra.mxu0 %v17522_v39  ;;  %v9476_v39 = vpack.c.bf16 %v9473_v32, %v9473_v32  ;;  %v9861_v16 = vpack.c.bf16 %v9858_v9, %v9858_v9 }
 0x6ba   :  { %9451 = vmatmul.mubr.bf16.vlgmr.msra.gmra.mxu1 %v9087_v10  ;;  %v7971_v48 = vpop.f32.mrf.mxu1  ;;  %9807 = vmatprep.subr.bf16.mxu0 %v17530_v24  ;;  %v17582_v10 = vld [vmem:[%s24440_s11 + $0x960] ss:$8 sps:$4 sm:$0xff]  }
 0x6bb   :  { %9767 = vmatpush1.bf16.msra.mxu1 %v17525_v56  ;;  %9798 = vmatprep.mubr.bf16.mxu1 %v9475_v28  ;;  %v17587_v56 = vld [vmem:[%s24440_s11 + $0x854] ss:$8 sps:$4 sm:$0xff]  }
 0x6bc   :  { %v7973_v42 = vpop.f32.mrf.mxu1  ;;  %9410 = vmatmul.mubr.bf16.vlgmr.msra.gmra.mxu0 %v9085_v35  ;;  %v7930_v12 = vpop.f32.mrf.mxu0  ;;  %9768 = vmatprep.subr.bf16.mxu1 %v17533_v33  ;;  %v17590_v28 = vld [vmem:[%s24440_s11 + $0x954] ss:$8 sps:$4 sm:$0xff]   ;;  %v17593_v35 = vld [vmem:[%s24440_s11 + $0x844] ss:$8 sps:$4 sm:$0xff]  }
 0x6bd   :  { %v22798_v11 = vadd.f32 %v7971_v48, %v7930_v12  ;;  %9808 = vmatpush1.bf16.msra.mxu0 %v17528_v58  ;;  %9839 = vmatprep.mubr.bf16.mxu0 %v24728_v54  ;;  %v17585_v58 = vld [vmem:[%s24440_s11 + $0x850] ss:$8 sps:$4 sm:$0xff]   ;;  %v17591_v12 = vld [vmem:[%s24440_s11 + $0x840] ss:$8 sps:$4 sm:$0xff]  }
 0x6be   :  { %v7975_v47 = vpop.f32.mrf.mxu1  ;;  %v7932_v17 = vpop.f32.mrf.mxu0  ;;  %9809 = vmatprep.subr.bf16.mxu0 %v17536_v49  ;;  %v17588_v49 = vld [vmem:[%s24440_s11 + $0x950] ss:$8 sps:$4 sm:$0xff]  }
 0x6bf   :  { %9769 = vmatpush1.bf16.msra.mxu1 %v17531_v43  ;;  %v22807_v61 = vadd.f32 %v7973_v42, %v7932_v17  ;;  %v17596_v42 = vld [vmem:[%s24440_s11 + $0x944] ss:$8 sps:$4 sm:$0xff]   ;;  %v17602_v47 = vld [vmem:[%s24440_s11 + $0x934] ss:$8 sps:$4 sm:$0xff]   ;;  %v17597_v17 = vld [vmem:[%s24440_s11 + $0x830] ss:$8 sps:$4 sm:$0xff]  }
 0x6c0   :  { %v7976_v15 = vpop.f32.mrf.mxu1  ;;  %v7934_v57 = vpop.f32.mrf.mxu0  ;;  %9770 = vmatprep.subr.bf16.mxu1 %v17539_v27  ;;  %v17599_v27 = vld [vmem:[%s24440_s11 + $0x834] ss:$8 sps:$4 sm:$0xff]  }
 0x6c1   :  { %9810 = vmatpush1.bf16.msra.mxu0 %v17534_v5  ;;  %v17594_v5 = vld [vmem:[%s24440_s11 + $0x940] ss:$8 sps:$4 sm:$0xff]   ;;  %v17608_v15 = vld [vmem:[%s24440_s11 + $0x924] ss:$8 sps:$4 sm:$0xff]  }
 0x6c2   :  { %v7935_v1 = vpop.f32.mrf.mxu0  ;;  %9811 = vmatprep.subr.bf16.mxu0 %v17542_v22  ;;  %v17605_v22 = vld [vmem:[%s24440_s11 + $0x824] ss:$8 sps:$4 sm:$0xff]   ;;  %v17603_v57 = vld [vmem:[%s24440_s11 + $0x820] ss:$8 sps:$4 sm:$0xff]  }
 0x6c3   :  { %9771 = vmatpush1.bf16.msra.mxu1 %v17537_v36  ;;  %v17600_v36 = vld [vmem:[%s24440_s11 + $0x930] ss:$8 sps:$4 sm:$0xff]   ;;  %v17614_v1 = vld [vmem:[%s24440_s11 + $0x914] ss:$8 sps:$4 sm:$0xff]  }
 0x6c4   :  { %9772 = vmatprep.subr.bf16.mxu1 %v17545_v37  ;;  %v17611_v37 = vld [vmem:[%s24440_s11 + $0x814] ss:$8 sps:$4 sm:$0xff]  }
 0x6c5   :  { %9812 = vmatpush1.bf16.msra.mxu0 %v17540_v53  ;;  %v17606_v53 = vld [vmem:[%s24440_s11 + $0x920] ss:$8 sps:$4 sm:$0xff]  }
 0x6c6   :  { %9813 = vmatprep.subr.bf16.mxu0 %v17548_v34  ;;  %v17609_v34 = vld [vmem:[%s24440_s11 + $0x810] ss:$8 sps:$4 sm:$0xff]  }
 0x6c7   :  { %9773 = vmatpush1.bf16.msra.mxu1 %v17543_v8  ;;  %v17617_v8 = vld [vmem:[%s24440_s11 + $0x804] ss:$8 sps:$4 sm:$0xff]  }
 0x6c8   :  { %9774 = vmatprep.subr.bf16.mxu1 %v17551_v14  ;;  %v9461_v14 = vrot.slane %v22144_v38, 1 }
 0x6c9   :  { %9814 = vmatpush1.bf16.msra.mxu0 %v17546_v59  ;;  %v17612_v59 = vld [vmem:[%s24440_s11 + $0x910] ss:$8 sps:$4 sm:$0xff]  }
 0x6ca   :  { %9815 = vmatprep.subr.bf16.mxu0 %v17554_v52  ;;  %v17620_v52 = vld [vmem:[%s24440_s11 + $0x904] ss:$8 sps:$4 sm:$0xff]  }
 0x6cb   :  { %9775 = vmatpush1.bf16.msra.mxu1 %v17549_v55  ;;  %v17615_v55 = vld [vmem:[%s24440_s11 + $0x800] ss:$8 sps:$4 sm:$0xff]  }
 0x6cc   :  { %9776 = vmatprep.subr.bf16.mxu1 %v17557_v21  ;;  %v9471_v21 = vmul.f32 %v22762_v3, %v9461_v14 }
 0x6cd   :  { %9816 = vmatpush1.bf16.msra.mxu0 %v17552_v23  ;;  %v17623_v23 = vld [vmem:[%s24440_s11 + $0xa74] ss:$8 sps:$4 sm:$0xff]  }
 0x6ce   :  { %9817 = vmatprep.subr.bf16.mxu0 %v17560_v29  ;;  %v17618_v29 = vld [vmem:[%s24440_s11 + $0x900] ss:$8 sps:$4 sm:$0xff]   ;;  %v9474_v3 = vpack.c.bf16 %v9471_v21, %v9471_v21 }
 0x6cf   :  { %9777 = vmatpush1.bf16.msra.mxu1 %v17555_v44  ;;  %v17626_v44 = vld [vmem:[%s24440_s11 + $0x9f4] ss:$8 sps:$4 sm:$0xff]   ;;  %v17675_v21 = vld [vmem:[%s24440_s11 + $0xae0] ss:$8 sps:$4 sm:$0xff]  }
 0x6d0   :  { %9778 = vmatprep.subr.bf16.mxu1 %v17563_v7  ;;  %v17621_v7 = vld [vmem:[%s24440_s11 + $0xa70] ss:$8 sps:$4 sm:$0xff]  }
 0x6d1   :  { %9818 = vmatpush1.bf16.msra.mxu0 %v17558_v18  ;;  %v17629_v18 = vld [vmem:[%s24440_s11 + $0xa64] ss:$8 sps:$4 sm:$0xff]  }
 0x6d2   :  { %9819 = vmatprep.subr.bf16.mxu0 %v17566_v60  ;;  %v17624_v60 = vld [vmem:[%s24440_s11 + $0x9f0] ss:$8 sps:$4 sm:$0xff]  }
 0x6d3   :  { %9779 = vmatpush1.bf16.msra.mxu1 %v17561_v25 }
 0x6d4   :  { %9780 = vmatprep.subr.bf16.mxu1 %v17569_v2  ;;  %v17632_v2 = vld [vmem:[%s24440_s11 + $0x9e4] ss:$8 sps:$4 sm:$0xff]  }
 0x6d5   :  { %9820 = vmatpush1.bf16.msra.mxu0 %v17564_v46 }
 0x6d6   :  { %9821 = vmatprep.subr.bf16.mxu0 %v17572_v4  ;;  %v17627_v4 = vld [vmem:[%s24440_s11 + $0xa60] ss:$8 sps:$4 sm:$0xff]  }
 0x6d7   :  { %9781 = vmatpush1.bf16.msra.mxu1 %v17567_v20 }
 0x6d8   :  { %9782 = vmatprep.subr.bf16.mxu1 %v17575_v31  ;;  %v17635_v31 = vld [vmem:[%s24440_s11 + $0xa54] ss:$8 sps:$4 sm:$0xff]  }
 0x6d9   :  { %9822 = vmatpush1.bf16.msra.mxu0 %v17570_v62 }
 0x6da   :  { %10152 = vmatprep.subr.bf16.mxu0 %v17578_v40 }
 0x6db   :  { %9783 = vmatpush2.bf16.msra.mxu1 %v17573_v0  ;;  %v17638_v0 = vld [vmem:[%s24440_s11 + $0x9d4] ss:$8 sps:$4 sm:$0xff]  }
 0x6dc   :  { %v22905_v24 = vpop.f32.mrf.mxu0  ;;  %9840 = vmatmul.mubr.bf16.vlgmr.msra.gmra.mxu0 %v9476_v39  ;;  %9784 = vmatprep.subr.bf16.mxu1 %v17581_v13  ;;  %v17633_v13 = vld [vmem:[%s24440_s11 + $0xa50] ss:$8 sps:$4 sm:$0xff]  }
 0x6dd   :  { %10153 = vmatpush1.bf16.msra.mxu0 %v17576_v19  ;;  %10184 = vmatprep.mubr.bf16.mxu0 %v9861_v16  ;;  %v17641_v19 = vld [vmem:[%s24440_s11 + $0xa44] ss:$8 sps:$4 sm:$0xff]   ;;  %v17636_v39 = vld [vmem:[%s24440_s11 + $0x9d0] ss:$8 sps:$4 sm:$0xff]   ;;  %v17647_v16 = vld [vmem:[%s24440_s11 + $0xa34] ss:$8 sps:$4 sm:$0xff]  }
 0x6de   :  { %v22913_v33 = vpop.f32.mrf.mxu0  ;;  %10154 = vmatprep.subr.bf16.mxu0 %v17584_v63  ;;  %v17644_v63 = vld [vmem:[%s24440_s11 + $0x9c4] ss:$8 sps:$4 sm:$0xff]  }
 0x6df   :  { %9785 = vmatpush2.bf16.msra.mxu1 %v17579_v26  ;;  %v17639_v26 = vld [vmem:[%s24440_s11 + $0xa40] ss:$8 sps:$4 sm:$0xff]  }
 0x6e0   :  { %v8297_v48 = vpop.f32.mrf.mxu0  ;;  %9786 = vmatprep.subr.bf16.mxu1 %v17587_v56  ;;  %v17650_v56 = vld [vmem:[%s24440_s11 + $0x9b4] ss:$8 sps:$4 sm:$0xff]  }
 0x6e1   :  { %10155 = vmatpush1.bf16.msra.mxu0 %v17582_v10  ;;  %v17645_v10 = vld [vmem:[%s24440_s11 + $0xa30] ss:$8 sps:$4 sm:$0xff]   ;;  %v17651_v48 = vld [vmem:[%s24440_s11 + $0xa20] ss:$8 sps:$4 sm:$0xff]  }
 0x6e2   :  { %v8298_v43 = vpop.f32.mrf.mxu0  ;;  %10156 = vmatprep.subr.bf16.mxu0 %v17590_v28  ;;  %v17648_v28 = vld [vmem:[%s24440_s11 + $0x9b0] ss:$8 sps:$4 sm:$0xff]  }
 0x6e3   :  { %9787 = vmatpush2.bf16.msra.mxu1 %v17585_v58  ;;  %v17656_v58 = vld [vmem:[%s24440_s11 + $0x9a4] ss:$8 sps:$4 sm:$0xff]   ;;  %v17662_v43 = vld [vmem:[%s24440_s11 + $0x994] ss:$8 sps:$4 sm:$0xff]  }
 0x6e4   :  { %9788 = vmatprep.subr.bf16.mxu1 %v17593_v35  ;;  %v17659_v35 = vld [vmem:[%s24440_s11 + $0xa14] ss:$8 sps:$4 sm:$0xff]  }
 0x6e5   :  { %10157 = vmatpush1.bf16.msra.mxu0 %v17588_v49  ;;  %v17654_v49 = vld [vmem:[%s24440_s11 + $0x9a0] ss:$8 sps:$4 sm:$0xff]  }
 0x6e6   :  { %10158 = vmatprep.subr.bf16.mxu0 %v17596_v42  ;;  %v17657_v42 = vld [vmem:[%s24440_s11 + $0xa10] ss:$8 sps:$4 sm:$0xff]  }
 0x6e7   :  { %9789 = vmatpush2.bf16.msra.mxu1 %v17591_v12  ;;  %v17665_v12 = vld [vmem:[%s24440_s11 + $0xa04] ss:$8 sps:$4 sm:$0xff]  }
 0x6e8   :  { %9790 = vmatprep.subr.bf16.mxu1 %v17599_v27  ;;  %v17660_v27 = vld [vmem:[%s24440_s11 + $0x990] ss:$8 sps:$4 sm:$0xff]  }
 0x6e9   :  { %10159 = vmatpush1.bf16.msra.mxu0 %v17594_v5  ;;  %v10237_v5 = vrot.slane %v22148_v51, 2 }
 0x6ea   :  { %10160 = vmatprep.subr.bf16.mxu0 %v17602_v47  ;;  %v17668_v47 = vld [vmem:[%s24440_s11 + $0x984] ss:$8 sps:$4 sm:$0xff]  }
 0x6eb   :  { %9791 = vmatpush2.bf16.msra.mxu1 %v17597_v17  ;;  %v17663_v17 = vld [vmem:[%s24440_s11 + $0xa00] ss:$8 sps:$4 sm:$0xff]  }
 0x6ec   :  { %9792 = vmatprep.subr.bf16.mxu1 %v17605_v22  ;;  %v23091_v22 = vpop.permute.xlu0 %10243 }
 0x6ed   :  { %10161 = vmatpush1.bf16.msra.mxu0 %v17600_v36  ;;  %v9859_v36 = vmul.f32 %v22879_v45, %v9463_v30  ;;  %v17674_v30 = vld [vmem:[%s24440_s11 + $0xbf4] ss:$8 sps:$4 sm:$0xff]  }
 0x6ee   :  { %10162 = vmatprep.subr.bf16.mxu0 %v17608_v15  ;;  %v17671_v15 = vld [vmem:[%s24440_s11 + $0xaf4] ss:$8 sps:$4 sm:$0xff]  }
 0x6ef   :  { %9793 = vmatpush2.bf16.msra.mxu1 %v17603_v57  ;;  %v17666_v57 = vld [vmem:[%s24440_s11 + $0x980] ss:$8 sps:$4 sm:$0xff]  }
 0x6f0   :  { %9794 = vmatprep.subr.bf16.mxu1 %v17611_v37  ;;  %v10247_v37 = vmul.f32 %v23091_v22, %v10237_v5  ;;  %v23211_v5 = vpop.permute.xlu1 %10632 }
 0x6f1   :  { %10163 = vmatpush1.bf16.msra.mxu0 %v17606_v53  ;;  %v9857_v53 = vmul.f32 %v22879_v45, %v9461_v14  ;;  %v17672_v45 = vld [vmem:[%s24440_s11 + $0xbf0] ss:$8 sps:$4 sm:$0xff]  }
 0x6f2   :  { %10164 = vmatprep.subr.bf16.mxu0 %v17614_v1  ;;  %v17669_v1 = vld [vmem:[%s24440_s11 + $0xaf0] ss:$8 sps:$4 sm:$0xff]  }
 0x6f3   :  { %9795 = vmatpush2.bf16.msra.mxu1 %v17609_v34  ;;  %v9862_v34 = vpack.c.bf16 %v9859_v36, %v9859_v36 }
 0x6f4   :  { %9796 = vmatprep.subr.bf16.mxu1 %v17617_v8  ;;  %v17677_v8 = vld [vmem:[%s24440_s11 + $0xae4] ss:$8 sps:$4 sm:$0xff]  }
 0x6f5   :  { %10165 = vmatpush1.bf16.msra.mxu0 %v17612_v59  ;;  %v10250_v59 = vpack.c.bf16 %v10247_v37, %v10247_v37 }
 0x6f6   :  { %10166 = vmatprep.subr.bf16.mxu0 %v17620_v52  ;;  %v9860_v52 = vpack.c.bf16 %v9857_v53, %v9857_v53  ;;  %v17728_v53 = vld [vmem:[%s24440_s11 + $0xc64] ss:$8 sps:$4 sm:$0xff]  }
 0x6f7   :  { %9797 = vmatpush2.bf16.msra.mxu1 %v17615_v55  ;;  %v17680_v55 = vld [vmem:[%s24440_s11 + $0xbe4] ss:$8 sps:$4 sm:$0xff]  }
 0x6f8   :  { %10193 = vmatprep.subr.bf16.mxu1 %v17623_v23 }
 0x6f9   :  { %10167 = vmatpush1.bf16.msra.mxu0 %v17618_v29 }
 0x6fa   :  { %v8252_v25 = vpop.f32.mrf.mxu1  ;;  %9799 = vmatmul.mubr.bf16.vlgmr.msra.gmra.mxu1 %v9474_v3  ;;  %10168 = vmatprep.subr.bf16.mxu0 %v17626_v44  ;;  %v17683_v44 = vld [vmem:[%s24440_s11 + $0xad4] ss:$8 sps:$4 sm:$0xff]   ;;  %v17678_v3 = vld [vmem:[%s24440_s11 + $0xbe0] ss:$8 sps:$4 sm:$0xff]  }
 0x6fb   :  { %v8253_v46 = vadd.f32 %v8252_v25, %v22798_v11  ;;  %10194 = vmatpush1.bf16.msra.mxu1 %v17621_v7  ;;  %10225 = vmatprep.mubr.bf16.mxu1 %v24728_v54  ;;  %v17630_v11 = vld [vmem:[%s24440_s11 + $0x9e0] ss:$8 sps:$4 sm:$0xff]   ;;  %v17686_v25 = vld [vmem:[%s24440_s11 + $0xbd4] ss:$8 sps:$4 sm:$0xff]  }
 0x6fc   :  { %v8254_v20 = vpop.f32.mrf.mxu1  ;;  %10195 = vmatprep.subr.bf16.mxu1 %v17629_v18 }
 0x6fd   :  { %v23015_v62 = vadd.f32 %v22905_v24, %v8253_v46  ;;  %v8255_v32 = vadd.f32 %v8254_v20, %v22807_v61  ;;  %10169 = vmatpush2.bf16.msra.mxu0 %v17624_v60  ;;  %v17642_v24 = vld [vmem:[%s24440_s11 + $0x9c0] ss:$8 sps:$4 sm:$0xff]  }
 0x6fe   :  { %v8256_v40 = vpop.f32.mrf.mxu1  ;;  %10170 = vmatprep.subr.bf16.mxu0 %v17632_v2 }
 0x6ff   :  { %v23025_v9 = vadd.f32 %v22913_v33, %v8255_v32  ;;  %10196 = vmatpush1.bf16.msra.mxu1 %v17627_v4  ;;  %v17653_v33 = vld [vmem:[%s24440_s11 + $0xa24] ss:$8 sps:$4 sm:$0xff]   ;;  %v17681_v4 = vld [vmem:[%s24440_s11 + $0xad0] ss:$8 sps:$4 sm:$0xff]  }
 0x700   :  { %v8257_v61 = vpop.f32.mrf.mxu1  ;;  %10197 = vmatprep.subr.bf16.mxu1 %v17635_v31  ;;  %v17689_v32 = vld [vmem:[%s24440_s11 + $0xac4] ss:$8 sps:$4 sm:$0xff]  }
 0x701   :  { %10171 = vmatpush2.bf16.msra.mxu0 %v17630_v11  ;;  %v17690_v61 = vld [vmem:[%s24440_s11 + $0xbc0] ss:$8 sps:$4 sm:$0xff]  }
 0x702   :  { %10172 = vmatprep.subr.bf16.mxu0 %v17638_v0  ;;  %v17692_v0 = vld [vmem:[%s24440_s11 + $0xbc4] ss:$8 sps:$4 sm:$0xff]  }
 0x703   :  { %10198 = vmatpush1.bf16.msra.mxu1 %v17633_v13  ;;  %v17687_v13 = vld [vmem:[%s24440_s11 + $0xac0] ss:$8 sps:$4 sm:$0xff]  }
 0x704   :  { %10199 = vmatprep.subr.bf16.mxu1 %v17641_v19  ;;  %v17698_v19 = vld [vmem:[%s24440_s11 + $0xbb4] ss:$8 sps:$4 sm:$0xff]  }
 0x705   :  { %10173 = vmatpush2.bf16.msra.mxu0 %v17636_v39  ;;  %v17693_v39 = vld [vmem:[%s24440_s11 + $0xab0] ss:$8 sps:$4 sm:$0xff]  }
 0x706   :  { %10174 = vmatprep.subr.bf16.mxu0 %v17644_v63  ;;  %v17701_v63 = vld [vmem:[%s24440_s11 + $0xaa4] ss:$8 sps:$4 sm:$0xff]  }
 0x707   :  { %10200 = vmatpush1.bf16.msra.mxu1 %v17639_v26  ;;  %v17696_v26 = vld [vmem:[%s24440_s11 + $0xbb0] ss:$8 sps:$4 sm:$0xff]  }
 0x708   :  { %10201 = vmatprep.subr.bf16.mxu1 %v17647_v16  ;;  %v17704_v16 = vld [vmem:[%s24440_s11 + $0xba4] ss:$8 sps:$4 sm:$0xff]  }
 0x709   :  { %10175 = vmatpush2.bf16.msra.mxu0 %v17642_v24  ;;  %v17699_v24 = vld [vmem:[%s24440_s11 + $0xaa0] ss:$8 sps:$4 sm:$0xff]  }
 0x70a   :  { %10176 = vmatprep.subr.bf16.mxu0 %v17650_v56  ;;  %v17707_v56 = vld [vmem:[%s24440_s11 + $0xa94] ss:$8 sps:$4 sm:$0xff]  }
 0x70b   :  { %10202 = vmatpush1.bf16.msra.mxu1 %v17645_v10  ;;  %v17702_v10 = vld [vmem:[%s24440_s11 + $0xba0] ss:$8 sps:$4 sm:$0xff]  }
 0x70c   :  { %10203 = vmatprep.subr.bf16.mxu1 %v17653_v33  ;;  %v17710_v33 = vld [vmem:[%s24440_s11 + $0xb94] ss:$8 sps:$4 sm:$0xff]  }
 0x70d   :  { %10177 = vmatpush2.bf16.msra.mxu0 %v17648_v28  ;;  %v17705_v28 = vld [vmem:[%s24440_s11 + $0xa90] ss:$8 sps:$4 sm:$0xff]  }
 0x70e   :  { %10178 = vmatprep.subr.bf16.mxu0 %v17656_v58  ;;  %v17713_v58 = vld [vmem:[%s24440_s11 + $0xa84] ss:$8 sps:$4 sm:$0xff]  }
 0x70f   :  { %10204 = vmatpush1.bf16.msra.mxu1 %v17651_v48  ;;  %v17708_v48 = vld [vmem:[%s24440_s11 + $0xb90] ss:$8 sps:$4 sm:$0xff]  }
 0x710   :  { %10205 = vmatprep.subr.bf16.mxu1 %v17659_v35  ;;  %v17716_v35 = vld [vmem:[%s24440_s11 + $0xb84] ss:$8 sps:$4 sm:$0xff]  }
 0x711   :  { %10179 = vmatpush2.bf16.msra.mxu0 %v17654_v49  ;;  %v10238_v49 = vrot.slane %v22146_v50, 2 }
 0x712   :  { %10180 = vmatprep.subr.bf16.mxu0 %v17662_v43  ;;  %v17711_v43 = vld [vmem:[%s24440_s11 + $0xa80] ss:$8 sps:$4 sm:$0xff]  }
 0x713   :  { %10206 = vmatpush1.bf16.msra.mxu1 %v17657_v42  ;;  %v10626_v42 = vrot.slane %v22148_v51, 3  ;;  %v17717_v51 = vld [vmem:[%s24440_s11 + $0xb70] ss:$8 sps:$4 sm:$0xff]  }
 0x714   :  { %10207 = vmatprep.subr.bf16.mxu1 %v17665_v12  ;;  %v17719_v12 = vld [vmem:[%s24440_s11 + $0xb74] ss:$8 sps:$4 sm:$0xff]  }
 0x715   :  { %10181 = vmatpush2.bf16.msra.mxu0 %v17660_v27  ;;  %v17714_v27 = vld [vmem:[%s24440_s11 + $0xb80] ss:$8 sps:$4 sm:$0xff]   ;;  %v10636_v36 = vmul.f32 %v23211_v5, %v10626_v42 }
 0x716   :  { %10182 = vmatprep.subr.bf16.mxu0 %v17668_v47  ;;  %v10248_v47 = vmul.f32 %v23091_v22, %v10238_v49 }
 0x717   :  { %10208 = vmatpush1.bf16.msra.mxu1 %v17663_v17  ;;  %v17722_v17 = vld [vmem:[%s24440_s11 + $0xc74] ss:$8 sps:$4 sm:$0xff]  }
 0x718   :  { %10541 = vmatprep.subr.bf16.mxu1 %v17671_v15  ;;  %v17725_v15 = vld [vmem:[%s24440_s11 + $0xb64] ss:$8 sps:$4 sm:$0xff]   ;;  %v10251_v37 = vpack.c.bf16 %v10248_v47, %v10248_v47 }
 0x719   :  { %10183 = vmatpush2.bf16.msra.mxu0 %v17666_v57  ;;  %v17720_v57 = vld [vmem:[%s24440_s11 + $0xc70] ss:$8 sps:$4 sm:$0xff]  }
 0x71a   :  { %v8680_v14 = vpop.f32.mrf.mxu1  ;;  %10226 = vmatmul.mubr.bf16.vlgmr.msra.gmra.mxu1 %v9862_v34  ;;  %10582 = vmatprep.subr.bf16.mxu0 %v17674_v30  ;;  %v17723_v30 = vld [vmem:[%s24440_s11 + $0xb60] ss:$8 sps:$4 sm:$0xff]  }
 0x71b   :  { %10542 = vmatpush1.bf16.msra.mxu1 %v17669_v1  ;;  %10573 = vmatprep.mubr.bf16.mxu1 %v10250_v59  ;;  %v10639_v1 = vpack.c.bf16 %v10636_v36, %v10636_v36  ;;  %v17726_v59 = vld [vmem:[%s24440_s11 + $0xc60] ss:$8 sps:$4 sm:$0xff]  }
 0x71c   :  { %v8682_v23 = vpop.f32.mrf.mxu1  ;;  %v8639_v29 = vpop.f32.mrf.mxu0  ;;  %10185 = vmatmul.mubr.bf16.vlgmr.msra.gmra.mxu0 %v9860_v52  ;;  %10543 = vmatprep.subr.bf16.mxu1 %v17677_v8  ;;  %v17731_v8 = vld [vmem:[%s24440_s11 + $0xb54] ss:$8 sps:$4 sm:$0xff]   ;;  %v17729_v52 = vld [vmem:[%s24440_s11 + $0xb50] ss:$8 sps:$4 sm:$0xff]  }
 0x71d   :  { %v8681_v7 = vadd.f32 %v8680_v14, %v8639_v29  ;;  %10583 = vmatpush1.bf16.msra.mxu0 %v17672_v45  ;;  %10614 = vmatprep.mubr.bf16.mxu0 %v24728_v54  ;;  %v17734_v14 = vld [vmem:[%s24440_s11 + $0xc54] ss:$8 sps:$4 sm:$0xff]  }
 0x71e   :  { %v8684_v18 = vpop.f32.mrf.mxu1  ;;  %v8641_v60 = vpop.f32.mrf.mxu0  ;;  %10584 = vmatprep.subr.bf16.mxu0 %v17680_v55 }
 0x71f   :  { %v23135_v2 = vadd.f32 %v8681_v7, %v23015_v62  ;;  %v8683_v46 = vadd.f32 %v8682_v23, %v8641_v60  ;;  %10544 = vmatpush1.bf16.msra.mxu1 %v17675_v21  ;;  %v17684_v62 = vld [vmem:[%s24440_s11 + $0xbd0] ss:$8 sps:$4 sm:$0xff]   ;;  %v17737_v21 = vld [vmem:[%s24440_s11 + $0xb44] ss:$8 sps:$4 sm:$0xff]   ;;  %v17735_v7 = vld [vmem:[%s24440_s11 + $0xb40] ss:$8 sps:$4 sm:$0xff]  }
 0x720   :  { %v8685_v20 = vpop.f32.mrf.mxu1  ;;  %v8643_v31 = vpop.f32.mrf.mxu0  ;;  %10545 = vmatprep.subr.bf16.mxu1 %v17683_v44  ;;  %v17732_v23 = vld [vmem:[%s24440_s11 + $0xc50] ss:$8 sps:$4 sm:$0xff]   ;;  %v17740_v44 = vld [vmem:[%s24440_s11 + $0xc44] ss:$8 sps:$4 sm:$0xff]   ;;  %v17738_v18 = vld [vmem:[%s24440_s11 + $0xc40] ss:$8 sps:$4 sm:$0xff]  }
 0x721   :  { %v23144_v11 = vadd.f32 %v8683_v46, %v23025_v9  ;;  %10585 = vmatpush1.bf16.msra.mxu0 %v17678_v3  ;;  %v17695_v9 = vld [vmem:[%s24440_s11 + $0xab4] ss:$8 sps:$4 sm:$0xff]   ;;  %v17749_v46 = vld [vmem:[%s24440_s11 + $0xb24] ss:$8 sps:$4 sm:$0xff]   ;;  %v17747_v31 = vld [vmem:[%s24440_s11 + $0xb20] ss:$8 sps:$4 sm:$0xff]  }
 0x722   :  { %v8644_v40 = vpop.f32.mrf.mxu0  ;;  %10586 = vmatprep.subr.bf16.mxu0 %v17686_v25  ;;  %v17743_v3 = vld [vmem:[%s24440_s11 + $0xb34] ss:$8 sps:$4 sm:$0xff]   ;;  %v17741_v25 = vld [vmem:[%s24440_s11 + $0xb30] ss:$8 sps:$4 sm:$0xff]   ;;  %v17752_v20 = vld [vmem:[%s24440_s11 + $0xc24] ss:$8 sps:$4 sm:$0xff]  }
 0x723   :  { %10546 = vmatpush1.bf16.msra.mxu1 %v17681_v4  ;;  %v17746_v60 = vld [vmem:[%s24440_s11 + $0xc34] ss:$8 sps:$4 sm:$0xff]   ;;  %v17744_v4 = vld [vmem:[%s24440_s11 + $0xc30] ss:$8 sps:$4 sm:$0xff]  }
 0x724   :  { %10547 = vmatprep.subr.bf16.mxu1 %v17689_v32  ;;  %v17755_v32 = vld [vmem:[%s24440_s11 + $0xb14] ss:$8 sps:$4 sm:$0xff]  }
 0x725   :  { %10587 = vmatpush1.bf16.msra.mxu0 %v17684_v62  ;;  %v17750_v62 = vld [vmem:[%s24440_s11 + $0xc20] ss:$8 sps:$4 sm:$0xff]   ;;  %v17758_v40 = vld [vmem:[%s24440_s11 + $0xc14] ss:$8 sps:$4 sm:$0xff]  }
 0x726   :  { %10588 = vmatprep.subr.bf16.mxu0 %v17692_v0  ;;  %v17753_v0 = vld [vmem:[%s24440_s11 + $0xb10] ss:$8 sps:$4 sm:$0xff]  }
 0x727   :  { %10548 = vmatpush1.bf16.msra.mxu1 %v17687_v13  ;;  %v17761_v13 = vld [vmem:[%s24440_s11 + $0xb04] ss:$8 sps:$4 sm:$0xff]  }
 0x728   :  { %10549 = vmatprep.subr.bf16.mxu1 %v17695_v9  ;;  %v10236_v9 = vrot.slane %v22144_v38, 2 }
 0x729   :  { %10589 = vmatpush1.bf16.msra.mxu0 %v17690_v61  ;;  %v17756_v61 = vld [vmem:[%s24440_s11 + $0xc10] ss:$8 sps:$4 sm:$0xff]  }
 0x72a   :  { %10590 = vmatprep.subr.bf16.mxu0 %v17698_v19  ;;  %v17764_v19 = vld [vmem:[%s24440_s11 + $0xc04] ss:$8 sps:$4 sm:$0xff]  }
 0x72b   :  { %10550 = vmatpush1.bf16.msra.mxu1 %v17693_v39  ;;  %v17759_v39 = vld [vmem:[%s24440_s11 + $0xb00] ss:$8 sps:$4 sm:$0xff]  }
 0x72c   :  { %10551 = vmatprep.subr.bf16.mxu1 %v17701_v63  ;;  %v10246_v63 = vmul.f32 %v23091_v22, %v10236_v9 }
 0x72d   :  { %10591 = vmatpush1.bf16.msra.mxu0 %v17696_v26  ;;  %v17767_v26 = vld [vmem:[%s24440_s11 + $0xd74] ss:$8 sps:$4 sm:$0xff]  }
 0x72e   :  { %10592 = vmatprep.subr.bf16.mxu0 %v17704_v16  ;;  %v17762_v16 = vld [vmem:[%s24440_s11 + $0xc00] ss:$8 sps:$4 sm:$0xff]   ;;  %v10249_v22 = vpack.c.bf16 %v10246_v63, %v10246_v63  ;;  %v17813_v63 = vld [vmem:[%s24443_s14 + $0x170] ss:$8 sps:$4 sm:$0xff]  }
 0x72f   :  { %10552 = vmatpush1.bf16.msra.mxu1 %v17699_v24  ;;  %v17770_v24 = vld [vmem:[%s24440_s11 + $0xcf4] ss:$8 sps:$4 sm:$0xff]  }
 0x730   :  { %10553 = vmatprep.subr.bf16.mxu1 %v17707_v56  ;;  %v17765_v56 = vld [vmem:[%s24440_s11 + $0xd70] ss:$8 sps:$4 sm:$0xff]  }
 0x731   :  { %10593 = vmatpush1.bf16.msra.mxu0 %v17702_v10  ;;  %v17773_v10 = vld [vmem:[%s24440_s11 + $0xd64] ss:$8 sps:$4 sm:$0xff]  }
 0x732   :  { %10594 = vmatprep.subr.bf16.mxu0 %v17710_v33  ;;  %v17768_v33 = vld [vmem:[%s24440_s11 + $0xcf0] ss:$8 sps:$4 sm:$0xff]  }
 0x733   :  { %10554 = vmatpush1.bf16.msra.mxu1 %v17705_v28 }
 0x734   :  { %10555 = vmatprep.subr.bf16.mxu1 %v17713_v58  ;;  %v17776_v58 = vld [vmem:[%s24440_s11 + $0xce4] ss:$8 sps:$4 sm:$0xff]  }
 0x735   :  { %10595 = vmatpush1.bf16.msra.mxu0 %v17708_v48 }
 0x736   :  { %10596 = vmatprep.subr.bf16.mxu0 %v17716_v35  ;;  %v17771_v35 = vld [vmem:[%s24440_s11 + $0xd60] ss:$8 sps:$4 sm:$0xff]  }
 0x737   :  { %10556 = vmatpush1.bf16.msra.mxu1 %v17711_v43  ;;  %v17779_v43 = vld [vmem:[%s24440_s11 + $0xd54] ss:$8 sps:$4 sm:$0xff]  }
 0x738   :  { %10557 = vmatprep.subr.bf16.mxu1 %v17719_v12 }
 0x739   :  { %10597 = vmatpush1.bf16.msra.mxu0 %v17714_v27  ;;  %v17774_v27 = vld [vmem:[%s24440_s11 + $0xce0] ss:$8 sps:$4 sm:$0xff]  }
 0x73a   :  { %10930 = vmatprep.subr.bf16.mxu0 %v17722_v17  ;;  %v17782_v17 = vld [vmem:[%s24440_s11 + $0xcd4] ss:$8 sps:$4 sm:$0xff]  }
 0x73b   :  { %10558 = vmatpush2.bf16.msra.mxu1 %v17717_v51 }
 0x73c   :  { %v23233_v34 = vpop.f32.mrf.mxu0  ;;  %10615 = vmatmul.mubr.bf16.vlgmr.msra.gmra.mxu0 %v10251_v37  ;;  %10559 = vmatprep.subr.bf16.mxu1 %v17725_v15  ;;  %v17785_v15 = vld [vmem:[%s24440_s11 + $0xd44] ss:$8 sps:$4 sm:$0xff]   ;;  %v17783_v37 = vld [vmem:[%s24440_s11 + $0xd40] ss:$8 sps:$4 sm:$0xff]  }
 0x73d   :  { %10931 = vmatpush1.bf16.msra.mxu0 %v17720_v57  ;;  %10962 = vmatprep.mubr.bf16.mxu0 %v10639_v1  ;;  %v17780_v57 = vld [vmem:[%s24440_s11 + $0xcd0] ss:$8 sps:$4 sm:$0xff]   ;;  %v17794_v1 = vld [vmem:[%s24440_s11 + $0xcb4] ss:$8 sps:$4 sm:$0xff]  }
 0x73e   :  { %v23241_v45 = vpop.f32.mrf.mxu0  ;;  %10932 = vmatprep.subr.bf16.mxu0 %v17728_v53  ;;  %v17791_v53 = vld [vmem:[%s24440_s11 + $0xd34] ss:$8 sps:$4 sm:$0xff]  }
 0x73f   :  { %10560 = vmatpush2.bf16.msra.mxu1 %v17723_v30  ;;  %v17786_v30 = vld [vmem:[%s24440_s11 + $0xcc0] ss:$8 sps:$4 sm:$0xff]  }
 0x740   :  { %v9070_v55 = vpop.f32.mrf.mxu0  ;;  %10561 = vmatprep.subr.bf16.mxu1 %v17731_v8  ;;  %v17797_v8 = vld [vmem:[%s24440_s11 + $0xd24] ss:$8 sps:$4 sm:$0xff]  }
 0x741   :  { %10933 = vmatpush1.bf16.msra.mxu0 %v17726_v59  ;;  %v17792_v59 = vld [vmem:[%s24440_s11 + $0xcb0] ss:$8 sps:$4 sm:$0xff]   ;;  %v17798_v55 = vld [vmem:[%s24440_s11 + $0xca0] ss:$8 sps:$4 sm:$0xff]  }
 0x742   :  { %v9071_v29 = vpop.f32.mrf.mxu0  ;;  %10934 = vmatprep.subr.bf16.mxu0 %v17734_v14  ;;  %v17795_v14 = vld [vmem:[%s24440_s11 + $0xd20] ss:$8 sps:$4 sm:$0xff]  }
 0x743   :  { %10562 = vmatpush2.bf16.msra.mxu1 %v17729_v52  ;;  %v17803_v52 = vld [vmem:[%s24440_s11 + $0xd14] ss:$8 sps:$4 sm:$0xff]   ;;  %v17809_v29 = vld [vmem:[%s24440_s11 + $0xd04] ss:$8 sps:$4 sm:$0xff]  }
 0x744   :  { %10563 = vmatprep.subr.bf16.mxu1 %v17737_v21  ;;  %v17806_v21 = vld [vmem:[%s24440_s11 + $0xc94] ss:$8 sps:$4 sm:$0xff]  }
 0x745   :  { %10935 = vmatpush1.bf16.msra.mxu0 %v17732_v23  ;;  %v17801_v23 = vld [vmem:[%s24440_s11 + $0xd10] ss:$8 sps:$4 sm:$0xff]  }
 0x746   :  { %10936 = vmatprep.subr.bf16.mxu0 %v17740_v44  ;;  %v10627_v44 = vrot.slane %v22146_v50, 3 }
 0x747   :  { %10564 = vmatpush2.bf16.msra.mxu1 %v17735_v7  ;;  %v17804_v7 = vld [vmem:[%s24440_s11 + $0xc90] ss:$8 sps:$4 sm:$0xff]  }
 0x748   :  { %10565 = vmatprep.subr.bf16.mxu1 %v17743_v3  ;;  %v17812_v3 = vld [vmem:[%s24440_s11 + $0xc84] ss:$8 sps:$4 sm:$0xff]   ;;  %v10637_v50 = vmul.f32 %v23211_v5, %v10627_v44  ;;  %v17864_v44 = vld [vmem:[%s24443_s14 + $0xf0] ss:$8 sps:$4 sm:$0xff]  }
 0x749   :  { %10937 = vmatpush1.bf16.msra.mxu0 %v17738_v18  ;;  %v10625_v18 = vrot.slane %v22144_v38, 3 }
 0x74a   :  { %10938 = vmatprep.subr.bf16.mxu0 %v17746_v60  ;;  %v17807_v60 = vld [vmem:[%s24440_s11 + $0xd00] ss:$8 sps:$4 sm:$0xff]  }
 0x74b   :  { %10566 = vmatpush2.bf16.msra.mxu1 %v17741_v25  ;;  %v17810_v25 = vld [vmem:[%s24440_s11 + $0xc80] ss:$8 sps:$4 sm:$0xff]  }
 0x74c   :  { %10567 = vmatprep.subr.bf16.mxu1 %v17749_v46  ;;  %v10635_v46 = vmul.f32 %v23211_v5, %v10625_v18  ;;  %v17867_v18 = vld [vmem:[%s24443_s14 + $0x1e0] ss:$8 sps:$4 sm:$0xff]  }
 0x74d   :  { %10939 = vmatpush1.bf16.msra.mxu0 %v17744_v4  ;;  %v10640_v4 = vpack.c.bf16 %v10637_v50, %v10637_v50  ;;  %v17875_v50 = vld [vmem:[%s24443_s14 + $0x1d4] ss:$8 sps:$4 sm:$0xff]  }
 0x74e   :  { %10940 = vmatprep.subr.bf16.mxu0 %v17752_v20  ;;  %v10638_v20 = vpack.c.bf16 %v10635_v46, %v10635_v46  ;;  %v17873_v46 = vld [vmem:[%s24443_s14 + $0x1d0] ss:$8 sps:$4 sm:$0xff]  }
 0x74f   :  { %10568 = vmatpush2.bf16.msra.mxu1 %v17747_v31 }
 0x750   :  { %10569 = vmatprep.subr.bf16.mxu1 %v17755_v32 }
 0x751   :  { %10941 = vmatpush1.bf16.msra.mxu0 %v17750_v62 }
 0x752   :  { %10942 = vmatprep.subr.bf16.mxu0 %v17758_v40 }
 0x753   :  { %10570 = vmatpush2.bf16.msra.mxu1 %v17753_v0 }
 0x754   :  { %10571 = vmatprep.subr.bf16.mxu1 %v17761_v13 }
 0x755   :  { %10943 = vmatpush1.bf16.msra.mxu0 %v17756_v61 }
 0x756   :  { %10944 = vmatprep.subr.bf16.mxu0 %v17764_v19 }
 0x757   :  { %10572 = vmatpush2.bf16.msra.mxu1 %v17759_v39 }
 0x758   :  { %10971 = vmatprep.subr.bf16.mxu1 %v17767_v26  ;;  %v17815_v26 = vld [vmem:[%s24443_s14 + $0x174] ss:$8 sps:$4 sm:$0xff]  }
 0x759   :  { %10945 = vmatpush1.bf16.msra.mxu0 %v17762_v16  ;;  %v17816_v16 = vld [vmem:[%s24443_s14 + $0x70] ss:$8 sps:$4 sm:$0xff]  }
 0x75a   :  { %v9025_v28 = vpop.f32.mrf.mxu1  ;;  %10574 = vmatmul.mubr.bf16.vlgmr.msra.gmra.mxu1 %v10249_v22  ;;  %10946 = vmatprep.subr.bf16.mxu0 %v17770_v24  ;;  %v17818_v24 = vld [vmem:[%s24443_s14 + $0x74] ss:$8 sps:$4 sm:$0xff]   ;;  %v17824_v22 = vld [vmem:[%s24443_s14 + $0x64] ss:$8 sps:$4 sm:$0xff]  }
 0x75b   :  { %v9067_v48 = vadd.f32 %v23233_v34, %v9025_v28  ;;  %10972 = vmatpush1.bf16.msra.mxu1 %v17765_v56  ;;  %11003 = vmatprep.mubr.bf16.mxu1 %v24728_v54  ;;  %v17789_v34 = vld [vmem:[%s24440_s11 + $0xd30] ss:$8 sps:$4 sm:$0xff]   ;;  %v17821_v56 = vld [vmem:[%s24443_s14 + $0x164] ss:$8 sps:$4 sm:$0xff]   ;;  %v17827_v28 = vld [vmem:[%s24443_s14 + $0x154] ss:$8 sps:$4 sm:$0xff]  }
 0x75c   :  { %v9027_v49 = vpop.f32.mrf.mxu1  ;;  %10973 = vmatprep.subr.bf16.mxu1 %v17773_v10  ;;  %v17819_v10 = vld [vmem:[%s24443_s14 + $0x160] ss:$8 sps:$4 sm:$0xff]  }
 0x75d   :  { %v23341_v42 = vadd.f32 %v9067_v48, %v23135_v2  ;;  %v9069_v12 = vadd.f32 %v23241_v45, %v9027_v49  ;;  %10947 = vmatpush2.bf16.msra.mxu0 %v17768_v33  ;;  %v17777_v2 = vld [vmem:[%s24440_s11 + $0xd50] ss:$8 sps:$4 sm:$0xff]   ;;  %v17800_v45 = vld [vmem:[%s24440_s11 + $0xca4] ss:$8 sps:$4 sm:$0xff]   ;;  %v17822_v33 = vld [vmem:[%s24443_s14 + $0x60] ss:$8 sps:$4 sm:$0xff]  }
 0x75e   :  { %v9029_v47 = vpop.f32.mrf.mxu1  ;;  %10948 = vmatprep.subr.bf16.mxu0 %v17776_v58  ;;  %v17830_v58 = vld [vmem:[%s24443_s14 + $0x54] ss:$8 sps:$4 sm:$0xff]   ;;  %v17825_v48 = vld [vmem:[%s24443_s14 + $0x150] ss:$8 sps:$4 sm:$0xff]  }
 0x75f   :  { %v23351_v51 = vadd.f32 %v9069_v12, %v23144_v11  ;;  %10974 = vmatpush1.bf16.msra.mxu1 %v17771_v35  ;;  %v17788_v11 = vld [vmem:[%s24440_s11 + $0xcc4] ss:$8 sps:$4 sm:$0xff]   ;;  %v17828_v35 = vld [vmem:[%s24443_s14 + $0x50] ss:$8 sps:$4 sm:$0xff]   ;;  %v17834_v12 = vld [vmem:[%s24443_s14 + $0x40] ss:$8 sps:$4 sm:$0xff]  }
 0x760   :  { %v9030_v36 = vpop.f32.mrf.mxu1  ;;  %10975 = vmatprep.subr.bf16.mxu1 %v17779_v43  ;;  %v17831_v43 = vld [vmem:[%s24443_s14 + $0x140] ss:$8 sps:$4 sm:$0xff]   ;;  %v17836_v47 = vld [vmem:[%s24443_s14 + $0x44] ss:$8 sps:$4 sm:$0xff]  }
 0x761   :  { %10949 = vmatpush2.bf16.msra.mxu0 %v17774_v27  ;;  %v17842_v36 = vld [vmem:[%s24443_s14 + $0x34] ss:$8 sps:$4 sm:$0xff]  }
 0x762   :  { %10950 = vmatprep.subr.bf16.mxu0 %v17782_v17  ;;  %v17839_v17 = vld [vmem:[%s24443_s14 + $0x134] ss:$8 sps:$4 sm:$0xff]  }
 0x763   :  { %10976 = vmatpush1.bf16.msra.mxu1 %v17777_v2  ;;  %v17837_v2 = vld [vmem:[%s24443_s14 + $0x130] ss:$8 sps:$4 sm:$0xff]  }
 0x764   :  { %10977 = vmatprep.subr.bf16.mxu1 %v17785_v15  ;;  %v17840_v15 = vld [vmem:[%s24443_s14 + $0x30] ss:$8 sps:$4 sm:$0xff]  }
 0x765   :  { %10951 = vmatpush2.bf16.msra.mxu0 %v17780_v57  ;;  %v17845_v57 = vld [vmem:[%s24443_s14 + $0x124] ss:$8 sps:$4 sm:$0xff]  }
 0x766   :  { %10952 = vmatprep.subr.bf16.mxu0 %v17788_v11 }
 0x767   :  { %10978 = vmatpush1.bf16.msra.mxu1 %v17783_v37  ;;  %v17848_v37 = vld [vmem:[%s24443_s14 + $0x24] ss:$8 sps:$4 sm:$0xff]  }
 0x768   :  { %10979 = vmatprep.subr.bf16.mxu1 %v17791_v53  ;;  %v17843_v53 = vld [vmem:[%s24443_s14 + $0x120] ss:$8 sps:$4 sm:$0xff]  }
 0x769   :  { %10953 = vmatpush2.bf16.msra.mxu0 %v17786_v30  ;;  %v17846_v30 = vld [vmem:[%s24443_s14 + $0x20] ss:$8 sps:$4 sm:$0xff]  }
 0x76a   :  { %10954 = vmatprep.subr.bf16.mxu0 %v17794_v1  ;;  %v17851_v1 = vld [vmem:[%s24443_s14 + $0x114] ss:$8 sps:$4 sm:$0xff]  }
 0x76b   :  { %10980 = vmatpush1.bf16.msra.mxu1 %v17789_v34  ;;  %v17854_v34 = vld [vmem:[%s24443_s14 + $0x14] ss:$8 sps:$4 sm:$0xff]  }
 0x76c   :  { %10981 = vmatprep.subr.bf16.mxu1 %v17797_v8  ;;  %v17849_v8 = vld [vmem:[%s24443_s14 + $0x110] ss:$8 sps:$4 sm:$0xff]  }
 0x76d   :  { %10955 = vmatpush2.bf16.msra.mxu0 %v17792_v59  ;;  %v17852_v59 = vld [vmem:[%s24443_s14 + $0x10] ss:$8 sps:$4 sm:$0xff]  }
 0x76e   :  { %10956 = vmatprep.subr.bf16.mxu0 %v17800_v45  ;;  %v17857_v45 = vld [vmem:[%s24443_s14 + $0x104] ss:$8 sps:$4 sm:$0xff]  }
 0x76f   :  { %10982 = vmatpush1.bf16.msra.mxu1 %v17795_v14  ;;  %v17860_v14 = vld [vmem:[%s24443_s14 + $0x4] ss:$8 sps:$4 sm:$0xff]  }
 0x770   :  { %10983 = vmatprep.subr.bf16.mxu1 %v17803_v52  ;;  %v17855_v52 = vld [vmem:[%s24443_s14 + $0x100] ss:$8 sps:$4 sm:$0xff]  }
 0x771   :  { %10957 = vmatpush2.bf16.msra.mxu0 %v17798_v55  ;;  %v17858_v55 = vld [vmem:[%s24443_s14] ss:$8 sps:$4 sm:$0xff]  }
 0x772   :  { %10958 = vmatprep.subr.bf16.mxu0 %v17806_v21  ;;  %v17863_v21 = vld [vmem:[%s24443_s14 + $0x1f4] ss:$8 sps:$4 sm:$0xff]  }
 0x773   :  { %10984 = vmatpush1.bf16.msra.mxu1 %v17801_v23  ;;  %v17866_v23 = vld [vmem:[%s24443_s14 + $0xf4] ss:$8 sps:$4 sm:$0xff]  }
 0x774   :  { %10985 = vmatprep.subr.bf16.mxu1 %v17809_v29  ;;  %v17861_v29 = vld [vmem:[%s24443_s14 + $0x1f0] ss:$8 sps:$4 sm:$0xff]  }
 0x775   :  { %10959 = vmatpush2.bf16.msra.mxu0 %v17804_v7  ;;  %v17869_v7 = vld [vmem:[%s24443_s14 + $0x1e4] ss:$8 sps:$4 sm:$0xff]  }
 0x776   :  { %10960 = vmatprep.subr.bf16.mxu0 %v17812_v3  ;;  %v17872_v3 = vld [vmem:[%s24443_s14 + $0xe4] ss:$8 sps:$4 sm:$0xff]  }
 0x777   :  { %10986 = vmatpush1.bf16.msra.mxu1 %v17807_v60  ;;  %v17870_v60 = vld [vmem:[%s24443_s14 + $0xe0] ss:$8 sps:$4 sm:$0xff]  }
 0x778   :  { %11280 = vmatprep.subr.bf16.mxu1 %v17815_v26  ;;  %v17885_v26 = vld [vmem:[%s24443_s14 + $0x1b0] ss:$8 sps:$4 sm:$0xff]  }
 0x779   :  { %10961 = vmatpush2.bf16.msra.mxu0 %v17810_v25  ;;  %v17878_v25 = vld [vmem:[%s24443_s14 + $0xd4] ss:$8 sps:$4 sm:$0xff]  }
 0x77a   :  { %v9452_v38 = vpop.f32.mrf.mxu1  ;;  %11004 = vmatmul.mubr.bf16.vlgmr.msra.gmra.mxu1 %v10640_v4  ;;  %11481 = vmatprep.subr.bf16.mxu0 %v17818_v24  ;;  %v17876_v4 = vld [vmem:[%s24443_s14 + $0xd0] ss:$8 sps:$4 sm:$0xff]   ;;  %v17890_v24 = vld [vmem:[%s24443_s14 + $0xb4] ss:$8 sps:$4 sm:$0xff]  }
 0x77b   :  { %11281 = vmatpush1.bf16.msra.mxu1 %v17813_v63 }
 0x77c   :  { %v9454_v31 = vpop.f32.mrf.mxu1  ;;  %v9411_v32 = vpop.f32.mrf.mxu0  ;;  %10963 = vmatmul.mubr.bf16.vlgmr.msra.gmra.mxu0 %v10638_v20  ;;  %11282 = vmatprep.subr.bf16.mxu1 %v17821_v56  ;;  %v17881_v20 = vld [vmem:[%s24443_s14 + $0x1c4] ss:$8 sps:$4 sm:$0xff]   ;;  %v17891_v56 = vld [vmem:[%s24443_s14 + $0x1a0] ss:$8 sps:$4 sm:$0xff]  }
 0x77d   :  { %v9453_v62 = vadd.f32 %v9452_v38, %v9411_v32  ;;  %11482 = vmatpush1.bf16.msra.mxu0 %v17816_v16  ;;  %v17884_v32 = vld [vmem:[%s24443_s14 + $0xc4] ss:$8 sps:$4 sm:$0xff]   ;;  %v17888_v16 = vld [vmem:[%s24443_s14 + $0xb0] ss:$8 sps:$4 sm:$0xff]  }
 0x77e   :  { %v9456_v40 = vpop.f32.mrf.mxu1  ;;  %v9413_v0 = vpop.f32.mrf.mxu0  ;;  %11483 = vmatprep.subr.bf16.mxu0 %v17824_v22  ;;  %v17896_v22 = vld [vmem:[%s24443_s14 + $0xa4] ss:$8 sps:$4 sm:$0xff]  }
 0x77f   :  { %v23424_v13 = vadd.f32 %v9453_v62, %v23341_v42  ;;  %v9455_v9 = vadd.f32 %v9454_v31, %v9413_v0  ;;  %11283 = vmatpush1.bf16.msra.mxu1 %v17819_v10  ;;  %v17833_v42 = vld [vmem:[%s24443_s14 + $0x144] ss:$8 sps:$4 sm:$0xff]   ;;  %v17879_v40 = vld [vmem:[%s24443_s14 + $0x1c0] ss:$8 sps:$4 sm:$0xff]  }
 0x780   :  { %v9457_v61 = vpop.f32.mrf.mxu1  ;;  %v9415_v19 = vpop.f32.mrf.mxu0  ;;  %11284 = vmatprep.subr.bf16.mxu1 %v17827_v28  ;;  %v17894_v10 = vld [vmem:[%s24443_s14 + $0xa0] ss:$8 sps:$4 sm:$0xff]   ;;  %v17902_v28 = vld [vmem:[%s24443_s14 + $0x94] ss:$8 sps:$4 sm:$0xff]  }
 0x781   :  { %v23427_v5 = vadd.f32 %v9455_v9, %v23351_v51  ;;  %11484 = vmatpush1.bf16.msra.mxu0 %v17822_v33  ;;  %v17882_v61 = vld [vmem:[%s24443_s14 + $0xc0] ss:$8 sps:$4 sm:$0xff]   ;;  %v17899_v33 = vld [vmem:[%s24443_s14 + $0x194] ss:$8 sps:$4 sm:$0xff]  }
 0x782   :  { %v9416_v39 = vpop.f32.mrf.mxu0  ;;  %11485 = vmatprep.subr.bf16.mxu0 %v17830_v58  ;;  %v17897_v58 = vld [vmem:[%s24443_s14 + $0x190] ss:$8 sps:$4 sm:$0xff]  }
 0x783   :  { %11285 = vmatpush1.bf16.msra.mxu1 %v17825_v48  ;;  %v17900_v48 = vld [vmem:[%s24443_s14 + $0x90] ss:$8 sps:$4 sm:$0xff]  }
 0x784   :  { %11286 = vmatprep.subr.bf16.mxu1 %v17833_v42  ;;  %v17906_v42 = vld [vmem:[%s24443_s14 + $0x80] ss:$8 sps:$4 sm:$0xff]  }
 0x785   :  { %11486 = vmatpush1.bf16.msra.mxu0 %v17828_v35  ;;  %v17905_v35 = vld [vmem:[%s24443_s14 + $0x184] ss:$8 sps:$4 sm:$0xff]  }
 0x786   :  { %11487 = vmatprep.subr.bf16.mxu0 %v17836_v47 }
 0x787   :  { %11287 = vmatpush1.bf16.msra.mxu1 %v17831_v43  ;;  %v17903_v43 = vld [vmem:[%s24443_s14 + $0x180] ss:$8 sps:$4 sm:$0xff]  }
 0x788   :  { %11288 = vmatprep.subr.bf16.mxu1 %v17839_v17 }
 0x789   :  { %11488 = vmatpush1.bf16.msra.mxu0 %v17834_v12  ;;  %v17911_v12 = vld [vmem:[%s24443_s14 + $0x274] ss:$8 sps:$4 sm:$0xff]  }
 0x78a   :  { %11489 = vmatprep.subr.bf16.mxu0 %v17842_v36 }
 0x78b   :  { %11289 = vmatpush1.bf16.msra.mxu1 %v17837_v2 }
 0x78c   :  { %11290 = vmatprep.subr.bf16.mxu1 %v17845_v57 }
 0x78d   :  { %11490 = vmatpush1.bf16.msra.mxu0 %v17840_v15 }
 0x78e   :  { %11491 = vmatprep.subr.bf16.mxu0 %v17848_v37 }
 0x78f   :  { %11291 = vmatpush1.bf16.msra.mxu1 %v17843_v53 }
 0x790   :  { %11292 = vmatprep.subr.bf16.mxu1 %v17851_v1 }
 0x791   :  { %11492 = vmatpush1.bf16.msra.mxu0 %v17846_v30 }
 0x792   :  { %11493 = vmatprep.subr.bf16.mxu0 %v17854_v34 }
 0x793   :  { %11293 = vmatpush1.bf16.msra.mxu1 %v17849_v8 }
 0x794   :  { %11294 = vmatprep.subr.bf16.mxu1 %v17857_v45 }
 0x795   :  { %11494 = vmatpush1.bf16.msra.mxu0 %v17852_v59 }
 0x796   :  { %11495 = vmatprep.subr.bf16.mxu0 %v17860_v14 }
 0x797   :  { %11295 = vmatpush1.bf16.msra.mxu1 %v17855_v52 }
 0x798   :  { %11296 = vmatprep.subr.bf16.mxu1 %v17863_v21 }
 0x799   :  { %11496 = vmatpush1.bf16.msra.mxu0 %v17858_v55 }
 0x79a   :  { %11497 = vmatprep.subr.bf16.mxu0 %v17866_v23 }
 0x79b   :  { %11297 = vmatpush2.bf16.msra.mxu1 %v17861_v29 }
 0x79c   :  { %v23465_v49 = vpop.f32.mrf.mxu0  ;;  %11298 = vmatprep.subr.bf16.mxu1 %v17869_v7  ;;  %v11014_v7 = vld [vmem:[%s24441_s12] sm:$0x3] }
 0x79d   :  { %11498 = vmatpush2.bf16.msra.mxu0 %v17864_v44 }
 0x79e   :  { %v23476_v27 = vpop.f32.mrf.mxu0  ;;  %11499 = vmatprep.subr.bf16.mxu0 %v17872_v3 }
 0x79f   :  { %11299 = vmatpush2.bf16.msra.mxu1 %v17867_v18 }
 0x7a0   :  { %v9845_v51 = vpop.f32.mrf.mxu0  ;;  %11300 = vmatprep.subr.bf16.mxu1 %v17875_v50 }
 0x7a1   :  { %11500 = vmatpush2.bf16.msra.mxu0 %v17870_v60 }
 0x7a2   :  { %v9846_v11 = vpop.f32.mrf.mxu0  ;;  %11501 = vmatprep.subr.bf16.mxu0 %v17878_v25  ;;  %v11019_v25 = vrot.slane %v11014_v7, %v20804_v41 }
 0x7a3   :  { %11301 = vmatpush2.bf16.msra.mxu1 %v17873_v46 }
 0x7a4   :  { %11302 = vmatprep.subr.bf16.mxu1 %v17881_v20 }
 0x7a5   :  { %11502 = vmatpush2.bf16.msra.mxu0 %v17876_v4 }
 0x7a6   :  { %11503 = vmatprep.subr.bf16.mxu0 %v17884_v32  ;;  %v11023_v32 = vrot.slane %v11014_v7, %v20829_v6  ;;  %v17939_v7 = vld [vmem:[%s24443_s14 + $0x220] ss:$8 sps:$4 sm:$0xff]  }
 0x7a7   :  { %11303 = vmatpush2.bf16.msra.mxu1 %v17879_v40 }
 0x7a9   :  { %11504 = vmatpush2.bf16.msra.mxu0 %v17882_v61 }
 0x7aa   :  { %11505 = vmatprep.subr.bf16.mxu0 %v17890_v24 }
 0x7ad   :  { %11506 = vmatpush2.bf16.msra.mxu0 %v17888_v16 }
 0x7ae   :  { %11507 = vmatprep.subr.bf16.mxu0 %v17896_v22 }
 0x7b1   :  { %11508 = vmatpush2.bf16.msra.mxu0 %v17894_v10 }
 0x7b2   :  { %11509 = vmatprep.subr.bf16.mxu0 %v17902_v28 }
 0x7b5   :  { %11510 = vmatpush2.bf16.msra.mxu0 %v17900_v48 }
 0x7ba   :  { %v9800_v38 = vpop.f32.mrf.mxu1 }
 0x7bb   :  { %v9842_v31 = vadd.f32 %v23465_v49, %v9800_v38  ;;  %v17908_v49 = vld [vmem:[%s24443_s14 + $0x84] ss:$8 sps:$4 sm:$0xff]  }
 0x7bc   :  { %v9802_v62 = vpop.f32.mrf.mxu1  ;;  %11511 = vmatprep.subr.bf16.mxu0 %v17908_v49 }
 0x7bd   :  { %v9848_v0 = vadd.f32 %v9842_v31, %v23424_v13  ;;  %v9844_v9 = vadd.f32 %v23476_v27, %v9802_v62  ;;  %v17887_v13 = vld [vmem:[%s24443_s14 + $0x1b4] ss:$8 sps:$4 sm:$0xff]   ;;  %11512 = vmatpush2.bf16.msra.mxu0 %v17906_v42 }
 0x7be   :  { %v9804_v19 = vpop.f32.mrf.mxu1  ;;  %11304 = vmatprep.subr.bf16.mxu1 %v17887_v13  ;;  %v17914_v27 = vld [vmem:[%s24443_s14 + $0x374] ss:$8 sps:$4 sm:$0xff]  }
 0x7bf   :  { %v9849_v39 = vadd.f32 %v9844_v9, %v23427_v5  ;;  %v17893_v5 = vld [vmem:[%s24443_s14 + $0x1a4] ss:$8 sps:$4 sm:$0xff]   ;;  %11305 = vmatpush2.bf16.msra.mxu1 %v17885_v26  ;;  %11975 = vmatprep.subr.bf16.mxu0 %v17914_v27  ;;  %v11036_v19 = vpop.permute.xlu1 %11035  ;;  %v17909_v27 = vld [vmem:[%s24443_s14 + $0x270] ss:$8 sps:$4 sm:$0xff]  }
 0x7c0   :  { %v9805_v63 = vpop.f32.mrf.mxu1  ;;  %11306 = vmatprep.subr.bf16.mxu1 %v17893_v5 }
 0x7c3   :  { %11307 = vmatpush2.bf16.msra.mxu1 %v17891_v56  ;;  %v23649_v28 = vpop.permute.xlu1 %11775 }
 0x7c4   :  { %11308 = vmatprep.subr.bf16.mxu1 %v17899_v33 }
 0x7c7   :  { %11309 = vmatpush2.bf16.msra.mxu1 %v17897_v58 }
 0x7c8   :  { %11310 = vmatprep.subr.bf16.mxu1 %v17905_v35 }
 0x7cb   :  { %11311 = vmatpush2.bf16.msra.mxu1 %v17903_v43 }
 0x7cc   :  { %11728 = vmatprep.subr.bf16.mxu1 %v17911_v12 }
 0x7da   :  { %v10227_v47 = vpop.f32.mrf.mxu1 }
 0x7dc   :  { %v10229_v17 = vpop.f32.mrf.mxu1  ;;  %v10186_v51 = vpop.f32.mrf.mxu0 }
 0x7dd   :  { %v10228_v2 = vadd.f32 %v10227_v47, %v10186_v51  ;;  %v17912_v47 = vld [vmem:[%s24443_s14 + $0x370] ss:$8 sps:$4 sm:$0xff]  }
 0x7de   :  { %v10231_v36 = vpop.f32.mrf.mxu1  ;;  %v10188_v15 = vpop.f32.mrf.mxu0 }
 0x7df   :  { %v10234_v57 = vadd.f32 %v10228_v2, %v9848_v0  ;;  %v10230_v11 = vadd.f32 %v10229_v17, %v10188_v15  ;;  %v17917_v2 = vld [vmem:[%s24443_s14 + $0x264] ss:$8 sps:$4 sm:$0xff]  }
 0x7e0   :  { %v10232_v37 = vpop.f32.mrf.mxu1  ;;  %v10190_v53 = vpop.f32.mrf.mxu0  ;;  %v17920_v36 = vld [vmem:[%s24443_s14 + $0x364] ss:$8 sps:$4 sm:$0xff]  }
 0x7e1   :  { %v10235_v30 = vadd.f32 %v10230_v11, %v9849_v39  ;;  %v11081_v39 = vpop.permute.xlu0 %11080  ;;  %v17915_v11 = vld [vmem:[%s24443_s14 + $0x260] ss:$8 sps:$4 sm:$0xff]   ;;  %v17923_v53 = vld [vmem:[%s24443_s14 + $0x254] ss:$8 sps:$4 sm:$0xff]  }
 0x7e2   :  { %v10191_v1 = vpop.f32.mrf.mxu0  ;;  %v17918_v37 = vld [vmem:[%s24443_s14 + $0x360] ss:$8 sps:$4 sm:$0xff]  }
 0x7e3   :  { %v17921_v1 = vld [vmem:[%s24443_s14 + $0x250] ss:$8 sps:$4 sm:$0xff]  }
 0x7e5   :  { %v23651_v58 = vpop.permute.xlu0 %11528 }
 0x7fc   :  { %v10616_v34 = vpop.f32.mrf.mxu0 }
 0x7fe   :  { %v10618_v8 = vpop.f32.mrf.mxu0 }
 0x800   :  { %v10620_v59 = vpop.f32.mrf.mxu0 }
 0x801   :  { %v17932_v59 = vld [vmem:[%s24443_s14 + $0x344] ss:$8 sps:$4 sm:$0xff]  }
 0x802   :  { %v10621_v45 = vpop.f32.mrf.mxu0 }
 0x803   :  { %v17927_v45 = vld [vmem:[%s24443_s14 + $0x240] ss:$8 sps:$4 sm:$0xff]  }
 0x81a   :  { %v10575_v14 = vpop.f32.mrf.mxu1 }
 0x81b   :  { %v10617_v52 = vadd.f32 %v10616_v34, %v10575_v14  ;;  %v17924_v34 = vld [vmem:[%s24443_s14 + $0x350] ss:$8 sps:$4 sm:$0xff]   ;;  %v17930_v14 = vld [vmem:[%s24443_s14 + $0x340] ss:$8 sps:$4 sm:$0xff]  }
 0x81c   :  { %v10577_v55 = vpop.f32.mrf.mxu1 }
 0x81d   :  { %v10623_v21 = vadd.f32 %v10617_v52, %v10234_v57  ;;  %v10619_v3 = vadd.f32 %v10618_v8, %v10577_v55  ;;  %v17929_v8 = vld [vmem:[%s24443_s14 + $0x244] ss:$8 sps:$4 sm:$0xff]   ;;  %v17935_v52 = vld [vmem:[%s24443_s14 + $0x234] ss:$8 sps:$4 sm:$0xff]  }
 0x81e   :  { %v10579_v23 = vpop.f32.mrf.mxu1  ;;  %v17938_v55 = vld [vmem:[%s24443_s14 + $0x334] ss:$8 sps:$4 sm:$0xff]  }
 0x81f   :  { %v10624_v38 = vadd.f32 %v10619_v3, %v10235_v30  ;;  %v17926_v30 = vld [vmem:[%s24443_s14 + $0x354] ss:$8 sps:$4 sm:$0xff]   ;;  %v17936_v23 = vld [vmem:[%s24443_s14 + $0x330] ss:$8 sps:$4 sm:$0xff]   ;;  %v17942_v3 = vld [vmem:[%s24443_s14 + $0x320] ss:$8 sps:$4 sm:$0xff]  }
 0x820   :  { %v10580_v29 = vpop.f32.mrf.mxu1 }
 0x821   :  { %v17941_v29 = vld [vmem:[%s24443_s14 + $0x224] ss:$8 sps:$4 sm:$0xff]  }
 0x83a   :  { %v11005_v44 = vpop.f32.mrf.mxu1 }
 0x83c   :  { %v11007_v18 = vpop.f32.mrf.mxu1  ;;  %v10964_v60 = vpop.f32.mrf.mxu0 }
 0x83d   :  { %v11006_v50 = vadd.f32 %v11005_v44, %v10964_v60  ;;  %v17944_v44 = vld [vmem:[%s24443_s14 + $0x324] ss:$8 sps:$4 sm:$0xff]   ;;  %v17950_v60 = vld [vmem:[%s24443_s14 + $0x314] ss:$8 sps:$4 sm:$0xff]  }
 0x83e   :  { %v11009_v46 = vpop.f32.mrf.mxu1  ;;  %v10966_v4 = vpop.f32.mrf.mxu0 }
 0x83f   :  { %v11012_v20 = vadd.f32 %v11006_v50, %v10623_v21  ;;  %v11008_v31 = vadd.f32 %v11007_v18, %v10966_v4  ;;  %v17933_v21 = vld [vmem:[%s24443_s14 + $0x230] ss:$8 sps:$4 sm:$0xff]   ;;  %v17947_v18 = vld [vmem:[%s24443_s14 + $0x214] ss:$8 sps:$4 sm:$0xff]   ;;  %v17953_v46 = vld [vmem:[%s24443_s14 + $0x204] ss:$8 sps:$4 sm:$0xff]  }
 0x840   :  { %v11010_v62 = vpop.f32.mrf.mxu1  ;;  %v10968_v40 = vpop.f32.mrf.mxu0  ;;  %v17945_v50 = vld [vmem:[%s24443_s14 + $0x210] ss:$8 sps:$4 sm:$0xff]   ;;  %v17956_v4 = vld [vmem:[%s24443_s14 + $0x304] ss:$8 sps:$4 sm:$0xff]  }
 0x841   :  { %v11026_v0 = vadd.f32 %v11019_v25, %v11012_v20  ;;  %v11013_v9 = vadd.f32 %v11008_v31, %v10624_v38  ;;  %v17948_v25 = vld [vmem:[%s24443_s14 + $0x310] ss:$8 sps:$4 sm:$0xff]   ;;  %v17951_v38 = vld [vmem:[%s24443_s14 + $0x200] ss:$8 sps:$4 sm:$0xff]   ;;  %v17959_v31 = vld [vmem:[%s24443_s14 + $0x2f4] ss:$8 sps:$4 sm:$0xff]  }
 0x842   :  { %v10969_v61 = vpop.f32.mrf.mxu0  ;;  %v17954_v20 = vld [vmem:[%s24443_s14 + $0x300] ss:$8 sps:$4 sm:$0xff]   ;;  %v17957_v62 = vld [vmem:[%s24443_s14 + $0x2f0] ss:$8 sps:$4 sm:$0xff]  }
 0x843   :  { %v23640_v63 = vmax.f32 %v11026_v0, 0.0  ;;  %v11027_v26 = vadd.f32 %v11023_v32, %v11013_v9  ;;  %v17962_v32 = vld [vmem:[%s24443_s14 + $0x3f4] ss:$8 sps:$4 sm:$0xff]   ;;  %v17960_v40 = vld [vmem:[%s24443_s14 + $0x3f0] ss:$8 sps:$4 sm:$0xff]  }
 0x844   :  { %v17965_v0 = vld [vmem:[%s24443_s14 + $0x2e4] ss:$8 sps:$4 sm:$0xff]   ;;  %v17963_v61 = vld [vmem:[%s24443_s14 + $0x2e0] ss:$8 sps:$4 sm:$0xff]  }
 0x845   :  { %v23642_v13 = vmax.f32 %v11027_v26, 0.0  ;;  %v11074_v16 = vrot.slane %v23640_v63, 6  ;;  %v11030_v24 = vrot.slane %v23640_v63, 5  ;;  %v17968_v9 = vld [vmem:[%s24443_s14 + $0x3e4] ss:$8 sps:$4 sm:$0xff]  }
 0x846   :  { %v17974_v26 = vld [vmem:[%s24443_s14 + $0x3d4] ss:$8 sps:$4 sm:$0xff]  }
 0x847   :  { %v11075_v5 = vrot.slane %v23642_v13, 6  ;;  %v11031_v56 = vrot.slane %v23642_v13, 5  ;;  %v11083_v22 = vmul.f32 %v11081_v39, %v11074_v16  ;;  %v11038_v10 = vmul.f32 %v11036_v19, %v11030_v24  ;;  %v17969_v16 = vld [vmem:[%s24443_s14 + $0x2d0] ss:$8 sps:$4 sm:$0xff]  }
 0x848   :  { %v11523_v33 = vrot.slane %v23642_v13, 7  ;;  %v17972_v24 = vld [vmem:[%s24443_s14 + $0x3d0] ss:$8 sps:$4 sm:$0xff]  }
 0x849   :  { %v11084_v48 = vmul.f32 %v11081_v39, %v11075_v5  ;;  %v11039_v35 = vmul.f32 %v11036_v19, %v11031_v56  ;;  %v11085_v17 = vpack.c.bf16 %v11083_v22, %v11083_v22  ;;  %v11040_v51 = vpack.c.bf16 %v11038_v10, %v11038_v10  ;;  %v17966_v19 = vld [vmem:[%s24443_s14 + $0x3e0] ss:$8 sps:$4 sm:$0xff]   ;;  %v17971_v39 = vld [vmem:[%s24443_s14 + $0x2d4] ss:$8 sps:$4 sm:$0xff]   ;;  %v17977_v5 = vld [vmem:[%s24443_s14 + $0x2c4] ss:$8 sps:$4 sm:$0xff]  }
 0x84a   :  { %v11532_v49 = vmul.f32 %v23651_v58, %v11523_v33  ;;  %v11779_v43 = vmul.f32 %v23649_v28, %v11523_v33  ;;  %v17980_v56 = vld [vmem:[%s24443_s14 + $0x3c4] ss:$8 sps:$4 sm:$0xff]   ;;  %v17975_v22 = vld [vmem:[%s24443_s14 + $0x2c0] ss:$8 sps:$4 sm:$0xff]   ;;  %v17983_v33 = vld [vmem:[%s24443_s14 + $0x2b4] ss:$8 sps:$4 sm:$0xff]  }
 0x84b   :  { %v11086_v42 = vpack.c.bf16 %v11084_v48, %v11084_v48  ;;  %v11041_v12 = vpack.c.bf16 %v11039_v35, %v11039_v35  ;;  %v17978_v10 = vld [vmem:[%s24443_s14 + $0x3c0] ss:$8 sps:$4 sm:$0xff]   ;;  %v17986_v48 = vld [vmem:[%s24443_s14 + $0x3b4] ss:$8 sps:$4 sm:$0xff]   ;;  %v17981_v35 = vld [vmem:[%s24443_s14 + $0x2b0] ss:$8 sps:$4 sm:$0xff]  }
 0x84c   :  { %v11534_v15 = vpack.c.bf16 %v11532_v49, %v11532_v49  ;;  %v11781_v57 = vpack.c.bf16 %v11779_v43, %v11779_v43  ;;  %v17984_v49 = vld [vmem:[%s24443_s14 + $0x3b0] ss:$8 sps:$4 sm:$0xff]   ;;  %v17989_v43 = vld [vmem:[%s24443_s14 + $0x2a4] ss:$8 sps:$4 sm:$0xff]  }
 0x84d   :  { %11312 = vmatprep.mubr.bf16.mxu1 %v11086_v42  ;;  %11513 = vmatprep.mubr.bf16.mxu0 %v11041_v12  ;;  %v17992_v42 = vld [vmem:[%s24443_s14 + $0x3a4] ss:$8 sps:$4 sm:$0xff]   ;;  %v17987_v12 = vld [vmem:[%s24443_s14 + $0x2a0] ss:$8 sps:$4 sm:$0xff]  }
 0x84e   :  { %11313 = vmatmul.mubr.bf16.vlgmr.msra.gmra.mxu1 %v11085_v17  ;;  %11514 = vmatmul.mubr.bf16.vlgmr.msra.gmra.mxu0 %v11040_v51  ;;  %v17998_v17 = vld [vmem:[%s24443_s14 + $0x394] ss:$8 sps:$4 sm:$0xff]   ;;  %v17993_v51 = vld [vmem:[%s24443_s14 + $0x290] ss:$8 sps:$4 sm:$0xff]  }
 0x84f   :  { %11729 = vmatpush1.bf16.msra.mxu1 %v17909_v27  ;;  %11976 = vmatpush1.bf16.msra.mxu0 %v17912_v47  ;;  %v17990_v27 = vld [vmem:[%s24443_s14 + $0x3a0] ss:$8 sps:$4 sm:$0xff]   ;;  %v17995_v47 = vld [vmem:[%s24443_s14 + $0x294] ss:$8 sps:$4 sm:$0xff]  }
 0x850   :  { %11760 = vmatprep.mubr.bf16.mxu1 %v11534_v15  ;;  %12007 = vmatprep.mubr.bf16.mxu0 %v11781_v57  ;;  %v18004_v15 = vld [vmem:[%s24443_s14 + $0x384] ss:$8 sps:$4 sm:$0xff]   ;;  %v11522_v57 = vrot.slane %v23640_v63, 7 }
 0x851   :  { %11730 = vmatprep.subr.bf16.mxu1 %v17917_v2  ;;  %11977 = vmatprep.subr.bf16.mxu0 %v17920_v36  ;;  %v17996_v2 = vld [vmem:[%s24443_s14 + $0x390] ss:$8 sps:$4 sm:$0xff]   ;;  %v18001_v36 = vld [vmem:[%s24443_s14 + $0x284] ss:$8 sps:$4 sm:$0xff]  }
 0x853   :  { %11731 = vmatpush1.bf16.msra.mxu1 %v17915_v11  ;;  %11978 = vmatpush1.bf16.msra.mxu0 %v17918_v37  ;;  %v12266_v11 = vrot.slane %v23642_v13, 1  ;;  %v17999_v37 = vld [vmem:[%s24443_s14 + $0x280] ss:$8 sps:$4 sm:$0xff]  }
 0x854   :  { %11732 = vmatprep.subr.bf16.mxu1 %v17923_v53  ;;  %11979 = vmatprep.subr.bf16.mxu0 %v17926_v30  ;;  %v18002_v53 = vld [vmem:[%s24443_s14 + $0x380] ss:$8 sps:$4 sm:$0xff]   ;;  %v23843_v30 = vpop.permute.xlu0 %12022 }
 0x857   :  { %11733 = vmatpush1.bf16.msra.mxu1 %v17921_v1  ;;  %11980 = vmatpush1.bf16.msra.mxu0 %v17924_v34  ;;  %v11531_v1 = vmul.f32 %v23651_v58, %v11522_v57  ;;  %v11778_v34 = vmul.f32 %v23649_v28, %v11522_v57  ;;  %v18005_v28 = vld [vmem:[%s24443_s14 + $0x470] ss:$8 sps:$4 sm:$0xff]   ;;  %v18076_v57 = vld [vmem:[%s24443_s14 + $0x5c4] ss:$8 sps:$4 sm:$0xff]  }
 0x858   :  { %11734 = vmatprep.subr.bf16.mxu1 %v17929_v8  ;;  %11981 = vmatprep.subr.bf16.mxu0 %v17932_v59  ;;  %v18007_v8 = vld [vmem:[%s24443_s14 + $0x474] ss:$8 sps:$4 sm:$0xff]  }
 0x859   :  { %v18010_v59 = vld [vmem:[%s24443_s14 + $0x574] ss:$8 sps:$4 sm:$0xff]   ;;  %v11533_v58 = vpack.c.bf16 %v11531_v1, %v11531_v1 }
 0x85a   :  { %v18079_v1 = vld [vmem:[%s24443_s14 + $0x4b4] ss:$8 sps:$4 sm:$0xff]  }
 0x85b   :  { %11735 = vmatpush1.bf16.msra.mxu1 %v17927_v45  ;;  %11982 = vmatpush1.bf16.msra.mxu0 %v17930_v14  ;;  %v23853_v45 = vpop.permute.xlu1 %12271  ;;  %v12026_v14 = vmul.f32 %v23843_v30, %v23642_v13 }
 0x85c   :  { %11736 = vmatprep.subr.bf16.mxu1 %v17935_v52  ;;  %11983 = vmatprep.subr.bf16.mxu0 %v17938_v55  ;;  %v12275_v52 = vmul.f32 %v23853_v45, %v12266_v11  ;;  %v11780_v55 = vpack.c.bf16 %v11778_v34, %v11778_v34  ;;  %v18082_v34 = vld [vmem:[%s24443_s14 + $0x5b4] ss:$8 sps:$4 sm:$0xff]  }
 0x85f   :  { %11737 = vmatpush1.bf16.msra.mxu1 %v17933_v21  ;;  %11984 = vmatpush1.bf16.msra.mxu0 %v17936_v23  ;;  %v18008_v21 = vld [vmem:[%s24443_s14 + $0x570] ss:$8 sps:$4 sm:$0xff]   ;;  %v12028_v23 = vpack.c.bf16 %v12026_v14, %v12026_v14  ;;  %v18085_v14 = vld [vmem:[%s24443_s14 + $0x4a4] ss:$8 sps:$4 sm:$0xff]  }
 0x860   :  { %11738 = vmatprep.subr.bf16.mxu1 %v17941_v29  ;;  %11985 = vmatprep.subr.bf16.mxu0 %v17944_v44  ;;  %v18013_v29 = vld [vmem:[%s24443_s14 + $0x464] ss:$8 sps:$4 sm:$0xff]  }
 0x861   :  { %v18016_v44 = vld [vmem:[%s24443_s14 + $0x564] ss:$8 sps:$4 sm:$0xff]  }
 0x863   :  { %11739 = vmatpush1.bf16.msra.mxu1 %v17939_v7  ;;  %11986 = vmatpush1.bf16.msra.mxu0 %v17942_v3  ;;  %v12277_v7 = vpack.c.bf16 %v12275_v52, %v12275_v52  ;;  %v18011_v3 = vld [vmem:[%s24443_s14 + $0x460] ss:$8 sps:$4 sm:$0xff]   ;;  %v18088_v52 = vld [vmem:[%s24443_s14 + $0x5a4] ss:$8 sps:$4 sm:$0xff]  }
 0x864   :  { %11740 = vmatprep.subr.bf16.mxu1 %v17947_v18  ;;  %11987 = vmatprep.subr.bf16.mxu0 %v17950_v60  ;;  %v18014_v18 = vld [vmem:[%s24443_s14 + $0x560] ss:$8 sps:$4 sm:$0xff]   ;;  %v18019_v60 = vld [vmem:[%s24443_s14 + $0x454] ss:$8 sps:$4 sm:$0xff]  }
 0x867   :  { %11741 = vmatpush1.bf16.msra.mxu1 %v17945_v50  ;;  %11988 = vmatpush1.bf16.msra.mxu0 %v17948_v25  ;;  %v18022_v50 = vld [vmem:[%s24443_s14 + $0x554] ss:$8 sps:$4 sm:$0xff]   ;;  %v18017_v25 = vld [vmem:[%s24443_s14 + $0x450] ss:$8 sps:$4 sm:$0xff]  }
 0x868   :  { %11742 = vmatprep.subr.bf16.mxu1 %v17953_v46  ;;  %11989 = vmatprep.subr.bf16.mxu0 %v17956_v4  ;;  %v18020_v46 = vld [vmem:[%s24443_s14 + $0x550] ss:$8 sps:$4 sm:$0xff]   ;;  %v18025_v4 = vld [vmem:[%s24443_s14 + $0x444] ss:$8 sps:$4 sm:$0xff]  }
 0x86b   :  { %11743 = vmatpush1.bf16.msra.mxu1 %v17951_v38  ;;  %11990 = vmatpush1.bf16.msra.mxu0 %v17954_v20  ;;  %v18028_v38 = vld [vmem:[%s24443_s14 + $0x544] ss:$8 sps:$4 sm:$0xff]   ;;  %v18023_v20 = vld [vmem:[%s24443_s14 + $0x440] ss:$8 sps:$4 sm:$0xff]  }
 0x86c   :  { %11744 = vmatprep.subr.bf16.mxu1 %v17959_v31  ;;  %11991 = vmatprep.subr.bf16.mxu0 %v17962_v32  ;;  %v18026_v31 = vld [vmem:[%s24443_s14 + $0x540] ss:$8 sps:$4 sm:$0xff]   ;;  %v18031_v32 = vld [vmem:[%s24443_s14 + $0x434] ss:$8 sps:$4 sm:$0xff]  }
 0x86f   :  { %11745 = vmatpush2.bf16.msra.mxu1 %v17957_v62  ;;  %11992 = vmatpush2.bf16.msra.mxu0 %v17960_v40  ;;  %v18034_v62 = vld [vmem:[%s24443_s14 + $0x534] ss:$8 sps:$4 sm:$0xff]   ;;  %v18029_v40 = vld [vmem:[%s24443_s14 + $0x430] ss:$8 sps:$4 sm:$0xff]  }
 0x870   :  { %11746 = vmatprep.subr.bf16.mxu1 %v17965_v0  ;;  %11993 = vmatprep.subr.bf16.mxu0 %v17968_v9  ;;  %v18032_v0 = vld [vmem:[%s24443_s14 + $0x530] ss:$8 sps:$4 sm:$0xff]   ;;  %v18037_v9 = vld [vmem:[%s24443_s14 + $0x424] ss:$8 sps:$4 sm:$0xff]  }
 0x873   :  { %11747 = vmatpush2.bf16.msra.mxu1 %v17963_v61  ;;  %11994 = vmatpush2.bf16.msra.mxu0 %v17966_v19  ;;  %v18040_v61 = vld [vmem:[%s24443_s14 + $0x524] ss:$8 sps:$4 sm:$0xff]   ;;  %v18035_v19 = vld [vmem:[%s24443_s14 + $0x420] ss:$8 sps:$4 sm:$0xff]  }
 0x874   :  { %11748 = vmatprep.subr.bf16.mxu1 %v17971_v39  ;;  %11995 = vmatprep.subr.bf16.mxu0 %v17974_v26  ;;  %v18038_v39 = vld [vmem:[%s24443_s14 + $0x520] ss:$8 sps:$4 sm:$0xff]   ;;  %v18043_v26 = vld [vmem:[%s24443_s14 + $0x414] ss:$8 sps:$4 sm:$0xff]  }
 0x877   :  { %11749 = vmatpush2.bf16.msra.mxu1 %v17969_v16  ;;  %11996 = vmatpush2.bf16.msra.mxu0 %v17972_v24  ;;  %v18046_v16 = vld [vmem:[%s24443_s14 + $0x514] ss:$8 sps:$4 sm:$0xff]   ;;  %v18041_v24 = vld [vmem:[%s24443_s14 + $0x410] ss:$8 sps:$4 sm:$0xff]  }
 0x878   :  { %11750 = vmatprep.subr.bf16.mxu1 %v17977_v5  ;;  %11997 = vmatprep.subr.bf16.mxu0 %v17980_v56  ;;  %v18044_v5 = vld [vmem:[%s24443_s14 + $0x510] ss:$8 sps:$4 sm:$0xff]   ;;  %v18049_v56 = vld [vmem:[%s24443_s14 + $0x404] ss:$8 sps:$4 sm:$0xff]  }
 0x87b   :  { %11751 = vmatpush2.bf16.msra.mxu1 %v17975_v22  ;;  %11998 = vmatpush2.bf16.msra.mxu0 %v17978_v10  ;;  %v18052_v22 = vld [vmem:[%s24443_s14 + $0x504] ss:$8 sps:$4 sm:$0xff]   ;;  %v18047_v10 = vld [vmem:[%s24443_s14 + $0x400] ss:$8 sps:$4 sm:$0xff]  }
 0x87c   :  { %11752 = vmatprep.subr.bf16.mxu1 %v17983_v33  ;;  %11999 = vmatprep.subr.bf16.mxu0 %v17986_v48  ;;  %v18050_v33 = vld [vmem:[%s24443_s14 + $0x500] ss:$8 sps:$4 sm:$0xff]   ;;  %v18055_v48 = vld [vmem:[%s24443_s14 + $0x4f4] ss:$8 sps:$4 sm:$0xff]  }
 0x87f   :  { %11753 = vmatpush2.bf16.msra.mxu1 %v17981_v35  ;;  %12000 = vmatpush2.bf16.msra.mxu0 %v17984_v49  ;;  %v18058_v35 = vld [vmem:[%s24443_s14 + $0x5f4] ss:$8 sps:$4 sm:$0xff]   ;;  %v18053_v49 = vld [vmem:[%s24443_s14 + $0x4f0] ss:$8 sps:$4 sm:$0xff]  }
 0x880   :  { %11754 = vmatprep.subr.bf16.mxu1 %v17989_v43  ;;  %12001 = vmatprep.subr.bf16.mxu0 %v17992_v42  ;;  %v18056_v43 = vld [vmem:[%s24443_s14 + $0x5f0] ss:$8 sps:$4 sm:$0xff]   ;;  %v18061_v42 = vld [vmem:[%s24443_s14 + $0x4e4] ss:$8 sps:$4 sm:$0xff]  }
 0x883   :  { %11755 = vmatpush2.bf16.msra.mxu1 %v17987_v12  ;;  %12002 = vmatpush2.bf16.msra.mxu0 %v17990_v27  ;;  %v18064_v12 = vld [vmem:[%s24443_s14 + $0x5e4] ss:$8 sps:$4 sm:$0xff]   ;;  %v18059_v27 = vld [vmem:[%s24443_s14 + $0x4e0] ss:$8 sps:$4 sm:$0xff]  }
 0x884   :  { %11756 = vmatprep.subr.bf16.mxu1 %v17995_v47  ;;  %12003 = vmatprep.subr.bf16.mxu0 %v17998_v17  ;;  %v18062_v47 = vld [vmem:[%s24443_s14 + $0x5e0] ss:$8 sps:$4 sm:$0xff]   ;;  %v18067_v17 = vld [vmem:[%s24443_s14 + $0x4d4] ss:$8 sps:$4 sm:$0xff]  }
 0x887   :  { %11757 = vmatpush2.bf16.msra.mxu1 %v17993_v51  ;;  %12004 = vmatpush2.bf16.msra.mxu0 %v17996_v2  ;;  %v18070_v51 = vld [vmem:[%s24443_s14 + $0x5d4] ss:$8 sps:$4 sm:$0xff]   ;;  %v18065_v2 = vld [vmem:[%s24443_s14 + $0x4d0] ss:$8 sps:$4 sm:$0xff]  }
 0x888   :  { %11758 = vmatprep.subr.bf16.mxu1 %v18001_v36  ;;  %12005 = vmatprep.subr.bf16.mxu0 %v18004_v15  ;;  %v18068_v36 = vld [vmem:[%s24443_s14 + $0x5d0] ss:$8 sps:$4 sm:$0xff]   ;;  %v18073_v15 = vld [vmem:[%s24443_s14 + $0x4c4] ss:$8 sps:$4 sm:$0xff]  }
 0x88b   :  { %11759 = vmatpush2.bf16.msra.mxu1 %v17999_v37  ;;  %12006 = vmatpush2.bf16.msra.mxu0 %v18002_v53  ;;  %v18071_v37 = vld [vmem:[%s24443_s14 + $0x4c0] ss:$8 sps:$4 sm:$0xff]  }
 0x88c   :  { %12222 = vmatprep.subr.bf16.mxu1 %v18007_v8  ;;  %12471 = vmatprep.subr.bf16.mxu0 %v18010_v59  ;;  %v18074_v53 = vld [vmem:[%s24443_s14 + $0x5c0] ss:$8 sps:$4 sm:$0xff]   ;;  %v18077_v8 = vld [vmem:[%s24443_s14 + $0x4b0] ss:$8 sps:$4 sm:$0xff]  }
 0x88d   :  { %v18080_v59 = vld [vmem:[%s24443_s14 + $0x5b0] ss:$8 sps:$4 sm:$0xff]  }
 0x88e   :  { %11761 = vmatmul.mubr.bf16.vlgmr.msra.gmra.mxu1 %v11533_v58  ;;  %12008 = vmatmul.mubr.bf16.vlgmr.msra.gmra.mxu0 %v11780_v55  ;;  %v18086_v58 = vld [vmem:[%s24443_s14 + $0x5a0] ss:$8 sps:$4 sm:$0xff]   ;;  %v18091_v55 = vld [vmem:[%s24443_s14 + $0x494] ss:$8 sps:$4 sm:$0xff]  }
 0x88f   :  { %12223 = vmatpush1.bf16.msra.mxu1 %v18005_v28  ;;  %12254 = vmatprep.mubr.bf16.mxu1 %v12028_v23  ;;  %v18083_v28 = vld [vmem:[%s24443_s14 + $0x4a0] ss:$8 sps:$4 sm:$0xff]   ;;  %v18089_v23 = vld [vmem:[%s24443_s14 + $0x490] ss:$8 sps:$4 sm:$0xff]  }
 0x890   :  { %12472 = vmatpush1.bf16.msra.mxu0 %v18008_v21  ;;  %12503 = vmatprep.mubr.bf16.mxu0 %v12277_v7  ;;  %v18094_v21 = vld [vmem:[%s24443_s14 + $0x594] ss:$8 sps:$4 sm:$0xff]   ;;  %v18100_v7 = vld [vmem:[%s24443_s14 + $0x584] ss:$8 sps:$4 sm:$0xff]  }
 0x891   :  { %12224 = vmatprep.subr.bf16.mxu1 %v18013_v29  ;;  %12473 = vmatprep.subr.bf16.mxu0 %v18016_v44  ;;  %v18092_v29 = vld [vmem:[%s24443_s14 + $0x590] ss:$8 sps:$4 sm:$0xff]   ;;  %v18097_v44 = vld [vmem:[%s24443_s14 + $0x484] ss:$8 sps:$4 sm:$0xff]  }
 0x893   :  { %12225 = vmatpush1.bf16.msra.mxu1 %v18011_v3  ;;  %v12265_v3 = vrot.slane %v23640_v63, 1 }
 0x894   :  { %12474 = vmatpush1.bf16.msra.mxu0 %v18014_v18  ;;  %12226 = vmatprep.subr.bf16.mxu1 %v18019_v60  ;;  %v18095_v18 = vld [vmem:[%s24443_s14 + $0x480] ss:$8 sps:$4 sm:$0xff]   ;;  %v12762_v60 = vrot.slane %v23642_v13, 2 }
 0x895   :  { %12475 = vmatprep.subr.bf16.mxu0 %v18022_v50  ;;  %v18098_v50 = vld [vmem:[%s24443_s14 + $0x580] ss:$8 sps:$4 sm:$0xff]  }
 0x897   :  { %12227 = vmatpush1.bf16.msra.mxu1 %v18017_v25  ;;  %v12025_v25 = vmul.f32 %v23843_v30, %v23640_v63 }
 0x898   :  { %12476 = vmatpush1.bf16.msra.mxu0 %v18020_v46  ;;  %12228 = vmatprep.subr.bf16.mxu1 %v18025_v4  ;;  %v18103_v46 = vld [vmem:[%s24443_s14 + $0x674] ss:$8 sps:$4 sm:$0xff]   ;;  %v24053_v4 = vpop.permute.xlu0 %12518 }
 0x899   :  { %12477 = vmatprep.subr.bf16.mxu0 %v18028_v38  ;;  %v12274_v38 = vmul.f32 %v23853_v45, %v12265_v3  ;;  %v12522_v30 = vmul.f32 %v24053_v4, %v12266_v11  ;;  %v18104_v45 = vld [vmem:[%s24443_s14 + $0x770] ss:$8 sps:$4 sm:$0xff]   ;;  %v18109_v11 = vld [vmem:[%s24443_s14 + $0x664] ss:$8 sps:$4 sm:$0xff]  }
 0x89b   :  { %12229 = vmatpush1.bf16.msra.mxu1 %v18023_v20  ;;  %v18106_v20 = vld [vmem:[%s24443_s14 + $0x774] ss:$8 sps:$4 sm:$0xff]  }
 0x89c   :  { %12478 = vmatpush1.bf16.msra.mxu0 %v18026_v31  ;;  %12230 = vmatprep.subr.bf16.mxu1 %v18031_v32  ;;  %v24061_v31 = vpop.permute.xlu1 %12767  ;;  %v18101_v32 = vld [vmem:[%s24443_s14 + $0x670] ss:$8 sps:$4 sm:$0xff]  }
 0x89d   :  { %12479 = vmatprep.subr.bf16.mxu0 %v18034_v62  ;;  %v12771_v62 = vmul.f32 %v24061_v31, %v12762_v60  ;;  %v18167_v60 = vld [vmem:[%s24443_s14 + $0x6c0] ss:$8 sps:$4 sm:$0xff]  }
 0x89f   :  { %12231 = vmatpush1.bf16.msra.mxu1 %v18029_v40  ;;  %v12027_v40 = vpack.c.bf16 %v12025_v25, %v12025_v25  ;;  %v18175_v25 = vld [vmem:[%s24443_s14 + $0x6b4] ss:$8 sps:$4 sm:$0xff]  }
 0x8a0   :  { %12480 = vmatpush1.bf16.msra.mxu0 %v18032_v0  ;;  %12232 = vmatprep.subr.bf16.mxu1 %v18037_v9  ;;  %v12276_v0 = vpack.c.bf16 %v12274_v38, %v12274_v38  ;;  %v12524_v9 = vpack.c.bf16 %v12522_v30, %v12522_v30  ;;  %v18173_v38 = vld [vmem:[%s24443_s14 + $0x6b0] ss:$8 sps:$4 sm:$0xff]   ;;  %v18181_v30 = vld [vmem:[%s24443_s14 + $0x6a4] ss:$8 sps:$4 sm:$0xff]  }
 0x8a1   :  { %12481 = vmatprep.subr.bf16.mxu0 %v18040_v61  ;;  %v18112_v61 = vld [vmem:[%s24443_s14 + $0x764] ss:$8 sps:$4 sm:$0xff]  }
 0x8a3   :  { %12233 = vmatpush1.bf16.msra.mxu1 %v18035_v19  ;;  %v12773_v19 = vpack.c.bf16 %v12771_v62, %v12771_v62  ;;  %v18179_v62 = vld [vmem:[%s24443_s14 + $0x6a0] ss:$8 sps:$4 sm:$0xff]  }
 0x8a4   :  { %12482 = vmatpush1.bf16.msra.mxu0 %v18038_v39  ;;  %12234 = vmatprep.subr.bf16.mxu1 %v18043_v26  ;;  %v18107_v39 = vld [vmem:[%s24443_s14 + $0x660] ss:$8 sps:$4 sm:$0xff]  }
 0x8a5   :  { %12483 = vmatprep.subr.bf16.mxu0 %v18046_v16  ;;  %v18110_v26 = vld [vmem:[%s24443_s14 + $0x760] ss:$8 sps:$4 sm:$0xff]   ;;  %v18115_v16 = vld [vmem:[%s24443_s14 + $0x654] ss:$8 sps:$4 sm:$0xff]  }
 0x8a7   :  { %12235 = vmatpush1.bf16.msra.mxu1 %v18041_v24  ;;  %v18118_v24 = vld [vmem:[%s24443_s14 + $0x754] ss:$8 sps:$4 sm:$0xff]  }
 0x8a8   :  { %12484 = vmatpush1.bf16.msra.mxu0 %v18044_v5  ;;  %12236 = vmatprep.subr.bf16.mxu1 %v18049_v56  ;;  %v18113_v5 = vld [vmem:[%s24443_s14 + $0x650] ss:$8 sps:$4 sm:$0xff]  }
 0x8a9   :  { %12485 = vmatprep.subr.bf16.mxu0 %v18052_v22  ;;  %v18116_v56 = vld [vmem:[%s24443_s14 + $0x750] ss:$8 sps:$4 sm:$0xff]   ;;  %v18121_v22 = vld [vmem:[%s24443_s14 + $0x644] ss:$8 sps:$4 sm:$0xff]  }
 0x8ab   :  { %12237 = vmatpush1.bf16.msra.mxu1 %v18047_v10  ;;  %v18124_v10 = vld [vmem:[%s24443_s14 + $0x744] ss:$8 sps:$4 sm:$0xff]  }
 0x8ac   :  { %12486 = vmatpush1.bf16.msra.mxu0 %v18050_v33  ;;  %12238 = vmatprep.subr.bf16.mxu1 %v18055_v48  ;;  %v18119_v33 = vld [vmem:[%s24443_s14 + $0x640] ss:$8 sps:$4 sm:$0xff]  }
 0x8ad   :  { %12487 = vmatprep.subr.bf16.mxu0 %v18058_v35  ;;  %v18122_v48 = vld [vmem:[%s24443_s14 + $0x740] ss:$8 sps:$4 sm:$0xff]   ;;  %v18127_v35 = vld [vmem:[%s24443_s14 + $0x634] ss:$8 sps:$4 sm:$0xff]  }
 0x8af   :  { %12239 = vmatpush2.bf16.msra.mxu1 %v18053_v49  ;;  %v18130_v49 = vld [vmem:[%s24443_s14 + $0x734] ss:$8 sps:$4 sm:$0xff]  }
 0x8b0   :  { %12488 = vmatpush2.bf16.msra.mxu0 %v18056_v43  ;;  %12240 = vmatprep.subr.bf16.mxu1 %v18061_v42  ;;  %v18125_v43 = vld [vmem:[%s24443_s14 + $0x630] ss:$8 sps:$4 sm:$0xff]  }
 0x8b1   :  { %12489 = vmatprep.subr.bf16.mxu0 %v18064_v12  ;;  %v18128_v42 = vld [vmem:[%s24443_s14 + $0x730] ss:$8 sps:$4 sm:$0xff]   ;;  %v18133_v12 = vld [vmem:[%s24443_s14 + $0x624] ss:$8 sps:$4 sm:$0xff]  }
 0x8b3   :  { %12241 = vmatpush2.bf16.msra.mxu1 %v18059_v27  ;;  %v18136_v27 = vld [vmem:[%s24443_s14 + $0x724] ss:$8 sps:$4 sm:$0xff]  }
 0x8b4   :  { %12490 = vmatpush2.bf16.msra.mxu0 %v18062_v47  ;;  %12242 = vmatprep.subr.bf16.mxu1 %v18067_v17  ;;  %v18131_v47 = vld [vmem:[%s24443_s14 + $0x620] ss:$8 sps:$4 sm:$0xff]  }
 0x8b5   :  { %12491 = vmatprep.subr.bf16.mxu0 %v18070_v51  ;;  %v18134_v17 = vld [vmem:[%s24443_s14 + $0x720] ss:$8 sps:$4 sm:$0xff]   ;;  %v18139_v51 = vld [vmem:[%s24443_s14 + $0x614] ss:$8 sps:$4 sm:$0xff]  }
 0x8b7   :  { %12243 = vmatpush2.bf16.msra.mxu1 %v18065_v2  ;;  %v18142_v2 = vld [vmem:[%s24443_s14 + $0x714] ss:$8 sps:$4 sm:$0xff]  }
 0x8b8   :  { %12492 = vmatpush2.bf16.msra.mxu0 %v18068_v36  ;;  %12244 = vmatprep.subr.bf16.mxu1 %v18073_v15  ;;  %v18137_v36 = vld [vmem:[%s24443_s14 + $0x610] ss:$8 sps:$4 sm:$0xff]  }
 0x8b9   :  { %12493 = vmatprep.subr.bf16.mxu0 %v18076_v57  ;;  %v18140_v15 = vld [vmem:[%s24443_s14 + $0x710] ss:$8 sps:$4 sm:$0xff]   ;;  %v18145_v57 = vld [vmem:[%s24443_s14 + $0x604] ss:$8 sps:$4 sm:$0xff]  }
 0x8bb   :  { %12245 = vmatpush2.bf16.msra.mxu1 %v18071_v37  ;;  %v18148_v37 = vld [vmem:[%s24443_s14 + $0x704] ss:$8 sps:$4 sm:$0xff]  }
 0x8bc   :  { %12494 = vmatpush2.bf16.msra.mxu0 %v18074_v53  ;;  %12246 = vmatprep.subr.bf16.mxu1 %v18079_v1  ;;  %v18143_v53 = vld [vmem:[%s24443_s14 + $0x600] ss:$8 sps:$4 sm:$0xff]  }
 0x8bd   :  { %12495 = vmatprep.subr.bf16.mxu0 %v18082_v34  ;;  %v18146_v1 = vld [vmem:[%s24443_s14 + $0x700] ss:$8 sps:$4 sm:$0xff]   ;;  %v18151_v34 = vld [vmem:[%s24443_s14 + $0x6f4] ss:$8 sps:$4 sm:$0xff]  }
 0x8bf   :  { %12247 = vmatpush2.bf16.msra.mxu1 %v18077_v8  ;;  %v18154_v8 = vld [vmem:[%s24443_s14 + $0x7f4] ss:$8 sps:$4 sm:$0xff]  }
 0x8c0   :  { %12496 = vmatpush2.bf16.msra.mxu0 %v18080_v59  ;;  %12248 = vmatprep.subr.bf16.mxu1 %v18085_v14  ;;  %v18149_v59 = vld [vmem:[%s24443_s14 + $0x6f0] ss:$8 sps:$4 sm:$0xff]  }
 0x8c1   :  { %12497 = vmatprep.subr.bf16.mxu0 %v18088_v52  ;;  %v18152_v14 = vld [vmem:[%s24443_s14 + $0x7f0] ss:$8 sps:$4 sm:$0xff]   ;;  %v18157_v52 = vld [vmem:[%s24443_s14 + $0x6e4] ss:$8 sps:$4 sm:$0xff]  }
 0x8c3   :  { %12249 = vmatpush2.bf16.msra.mxu1 %v18083_v28  ;;  %v18160_v28 = vld [vmem:[%s24443_s14 + $0x7e4] ss:$8 sps:$4 sm:$0xff]  }
 0x8c4   :  { %12498 = vmatpush2.bf16.msra.mxu0 %v18086_v58  ;;  %12250 = vmatprep.subr.bf16.mxu1 %v18091_v55  ;;  %v18155_v58 = vld [vmem:[%s24443_s14 + $0x6e0] ss:$8 sps:$4 sm:$0xff]  }
 0x8c5   :  { %12499 = vmatprep.subr.bf16.mxu0 %v18094_v21  ;;  %v18158_v55 = vld [vmem:[%s24443_s14 + $0x7e0] ss:$8 sps:$4 sm:$0xff]   ;;  %v18163_v21 = vld [vmem:[%s24443_s14 + $0x6d4] ss:$8 sps:$4 sm:$0xff]  }
 0x8c7   :  { %12251 = vmatpush2.bf16.msra.mxu1 %v18089_v23  ;;  %v18166_v23 = vld [vmem:[%s24443_s14 + $0x7d4] ss:$8 sps:$4 sm:$0xff]  }
 0x8c8   :  { %12500 = vmatpush2.bf16.msra.mxu0 %v18092_v29  ;;  %12252 = vmatprep.subr.bf16.mxu1 %v18097_v44  ;;  %v18161_v29 = vld [vmem:[%s24443_s14 + $0x6d0] ss:$8 sps:$4 sm:$0xff]  }
 0x8c9   :  { %12501 = vmatprep.subr.bf16.mxu0 %v18100_v7  ;;  %v18164_v44 = vld [vmem:[%s24443_s14 + $0x7d0] ss:$8 sps:$4 sm:$0xff]   ;;  %v18169_v7 = vld [vmem:[%s24443_s14 + $0x6c4] ss:$8 sps:$4 sm:$0xff]  }
 0x8cb   :  { %12253 = vmatpush2.bf16.msra.mxu1 %v18095_v18  ;;  %v18172_v18 = vld [vmem:[%s24443_s14 + $0x7c4] ss:$8 sps:$4 sm:$0xff]  }
 0x8cc   :  { %12502 = vmatpush2.bf16.msra.mxu0 %v18098_v50  ;;  %12718 = vmatprep.subr.bf16.mxu1 %v18103_v46  ;;  %v18170_v50 = vld [vmem:[%s24443_s14 + $0x7c0] ss:$8 sps:$4 sm:$0xff]   ;;  %v18178_v46 = vld [vmem:[%s24443_s14 + $0x7b4] ss:$8 sps:$4 sm:$0xff]  }
 0x8cd   :  { %12967 = vmatprep.subr.bf16.mxu0 %v18106_v20  ;;  %v18176_v20 = vld [vmem:[%s24443_s14 + $0x7b0] ss:$8 sps:$4 sm:$0xff]  }
 0x8ce   :  { %12255 = vmatmul.mubr.bf16.vlgmr.msra.gmra.mxu1 %v12027_v40  ;;  %v18182_v40 = vld [vmem:[%s24443_s14 + $0x7a0] ss:$8 sps:$4 sm:$0xff]  }
 0x8cf   :  { %12504 = vmatmul.mubr.bf16.vlgmr.msra.gmra.mxu0 %v12276_v0  ;;  %12719 = vmatpush1.bf16.msra.mxu1 %v18101_v32  ;;  %v18184_v32 = vld [vmem:[%s24443_s14 + $0x7a4] ss:$8 sps:$4 sm:$0xff]   ;;  %v18190_v0 = vld [vmem:[%s24443_s14 + $0x794] ss:$8 sps:$4 sm:$0xff]  }
 0x8d0   :  { %12750 = vmatprep.mubr.bf16.mxu1 %v12524_v9  ;;  %12968 = vmatpush1.bf16.msra.mxu0 %v18104_v45  ;;  %v18187_v45 = vld [vmem:[%s24443_s14 + $0x694] ss:$8 sps:$4 sm:$0xff]   ;;  %v18188_v9 = vld [vmem:[%s24443_s14 + $0x790] ss:$8 sps:$4 sm:$0xff]  }
 0x8d1   :  { %12999 = vmatprep.mubr.bf16.mxu0 %v12773_v19  ;;  %12720 = vmatprep.subr.bf16.mxu1 %v18109_v11  ;;  %v18185_v11 = vld [vmem:[%s24443_s14 + $0x690] ss:$8 sps:$4 sm:$0xff]   ;;  %v18196_v19 = vld [vmem:[%s24443_s14 + $0x784] ss:$8 sps:$4 sm:$0xff]  }
 0x8d2   :  { %12969 = vmatprep.subr.bf16.mxu0 %v18112_v61  ;;  %v18193_v61 = vld [vmem:[%s24443_s14 + $0x684] ss:$8 sps:$4 sm:$0xff]  }
 0x8d3   :  { %12721 = vmatpush1.bf16.msra.mxu1 %v18107_v39  ;;  %v12761_v39 = vrot.slane %v23640_v63, 2 }
 0x8d4   :  { %12970 = vmatpush1.bf16.msra.mxu0 %v18110_v26  ;;  %12722 = vmatprep.subr.bf16.mxu1 %v18115_v16  ;;  %v13011_v26 = vrot.slane %v23642_v13, 3  ;;  %v18191_v16 = vld [vmem:[%s24443_s14 + $0x680] ss:$8 sps:$4 sm:$0xff]   ;;  %v24261_v13 = vpop.permute.xlu0 %13016 }
 0x8d5   :  { %12971 = vmatprep.subr.bf16.mxu0 %v18118_v24  ;;  %v18194_v24 = vld [vmem:[%s24443_s14 + $0x780] ss:$8 sps:$4 sm:$0xff]  }
 0x8d7   :  { %12723 = vmatpush1.bf16.msra.mxu1 %v18113_v5  ;;  %v12521_v5 = vmul.f32 %v24053_v4, %v12265_v3  ;;  %v18202_v3 = vld [vmem:[%s24443_s14 + $0x864] ss:$8 sps:$4 sm:$0xff]  }
 0x8d8   :  { %12972 = vmatpush1.bf16.msra.mxu0 %v18116_v56  ;;  %12724 = vmatprep.subr.bf16.mxu1 %v18121_v22  ;;  %v18199_v56 = vld [vmem:[%s24443_s14 + $0x874] ss:$8 sps:$4 sm:$0xff]   ;;  %v12770_v22 = vmul.f32 %v24061_v31, %v12761_v39 }
 0x8d9   :  { %12973 = vmatprep.subr.bf16.mxu0 %v18124_v10  ;;  %v13020_v10 = vmul.f32 %v24261_v13, %v13011_v26 }
 0x8da   :  { %v12772_v4 = vpack.c.bf16 %v12770_v22, %v12770_v22 }
 0x8db   :  { %12725 = vmatpush1.bf16.msra.mxu1 %v18119_v33  ;;  %v18197_v33 = vld [vmem:[%s24443_s14 + $0x870] ss:$8 sps:$4 sm:$0xff]  }
 0x8dc   :  { %12974 = vmatpush1.bf16.msra.mxu0 %v18122_v48  ;;  %12726 = vmatprep.subr.bf16.mxu1 %v18127_v35  ;;  %v12523_v48 = vpack.c.bf16 %v12521_v5, %v12521_v5 }
 0x8dd   :  { %12975 = vmatprep.subr.bf16.mxu0 %v18130_v49 }
 0x8df   :  { %12727 = vmatpush1.bf16.msra.mxu1 %v18125_v43  ;;  %v13022_v43 = vpack.c.bf16 %v13020_v10, %v13020_v10 }
 0x8e0   :  { %12976 = vmatpush1.bf16.msra.mxu0 %v18128_v42  ;;  %12728 = vmatprep.subr.bf16.mxu1 %v18133_v12  ;;  %v18200_v42 = vld [vmem:[%s24443_s14 + $0x860] ss:$8 sps:$4 sm:$0xff]  }
 0x8e1   :  { %12977 = vmatprep.subr.bf16.mxu0 %v18136_v27 }
 0x8e3   :  { %12729 = vmatpush1.bf16.msra.mxu1 %v18131_v47  ;;  %v18205_v47 = vld [vmem:[%s24443_s14 + $0x854] ss:$8 sps:$4 sm:$0xff]  }
 0x8e4   :  { %12978 = vmatpush1.bf16.msra.mxu0 %v18134_v17  ;;  %12730 = vmatprep.subr.bf16.mxu1 %v18139_v51 }
 0x8e5   :  { %12979 = vmatprep.subr.bf16.mxu0 %v18142_v2 }
 0x8e7   :  { %12731 = vmatpush1.bf16.msra.mxu1 %v18137_v36  ;;  %v18203_v36 = vld [vmem:[%s24443_s14 + $0x850] ss:$8 sps:$4 sm:$0xff]  }
 0x8e8   :  { %12980 = vmatpush1.bf16.msra.mxu0 %v18140_v15  ;;  %12732 = vmatprep.subr.bf16.mxu1 %v18145_v57 }
 0x8e9   :  { %12981 = vmatprep.subr.bf16.mxu0 %v18148_v37  ;;  %v18208_v37 = vld [vmem:[%s24443_s14 + $0x844] ss:$8 sps:$4 sm:$0xff]  }
 0x8eb   :  { %12733 = vmatpush1.bf16.msra.mxu1 %v18143_v53  ;;  %v18206_v53 = vld [vmem:[%s24443_s14 + $0x840] ss:$8 sps:$4 sm:$0xff]  }
 0x8ec   :  { %12982 = vmatpush1.bf16.msra.mxu0 %v18146_v1  ;;  %12734 = vmatprep.subr.bf16.mxu1 %v18151_v34  ;;  %v18209_v1 = vld [vmem:[%s24443_s14 + $0x830] ss:$8 sps:$4 sm:$0xff]   ;;  %v18214_v34 = vld [vmem:[%s24443_s14 + $0x824] ss:$8 sps:$4 sm:$0xff]  }
 0x8ed   :  { %12983 = vmatprep.subr.bf16.mxu0 %v18154_v8  ;;  %v18212_v8 = vld [vmem:[%s24443_s14 + $0x820] ss:$8 sps:$4 sm:$0xff]  }
 0x8ef   :  { %12735 = vmatpush2.bf16.msra.mxu1 %v18149_v59  ;;  %v18217_v59 = vld [vmem:[%s24443_s14 + $0x814] ss:$8 sps:$4 sm:$0xff]  }
 0x8f0   :  { %12984 = vmatpush2.bf16.msra.mxu0 %v18152_v14  ;;  %12736 = vmatprep.subr.bf16.mxu1 %v18157_v52  ;;  %v18215_v14 = vld [vmem:[%s24443_s14 + $0x810] ss:$8 sps:$4 sm:$0xff]   ;;  %v18220_v52 = vld [vmem:[%s24443_s14 + $0x804] ss:$8 sps:$4 sm:$0xff]  }
 0x8f1   :  { %12985 = vmatprep.subr.bf16.mxu0 %v18160_v28  ;;  %v18218_v28 = vld [vmem:[%s24443_s14 + $0x800] ss:$8 sps:$4 sm:$0xff]  }
 0x8f3   :  { %12737 = vmatpush2.bf16.msra.mxu1 %v18155_v58  ;;  %v18223_v58 = vld [vmem:[%s24443_s14 + $0x8f4] ss:$8 sps:$4 sm:$0xff]  }
 0x8f4   :  { %12986 = vmatpush2.bf16.msra.mxu0 %v18158_v55  ;;  %12738 = vmatprep.subr.bf16.mxu1 %v18163_v21  ;;  %v18221_v55 = vld [vmem:[%s24443_s14 + $0x8f0] ss:$8 sps:$4 sm:$0xff]   ;;  %v18226_v21 = vld [vmem:[%s24443_s14 + $0x8e4] ss:$8 sps:$4 sm:$0xff]  }
 0x8f5   :  { %12987 = vmatprep.subr.bf16.mxu0 %v18166_v23  ;;  %v18224_v23 = vld [vmem:[%s24443_s14 + $0x8e0] ss:$8 sps:$4 sm:$0xff]  }
 0x8f7   :  { %12739 = vmatpush2.bf16.msra.mxu1 %v18161_v29  ;;  %v18229_v29 = vld [vmem:[%s24443_s14 + $0x8d4] ss:$8 sps:$4 sm:$0xff]  }
 0x8f8   :  { %12988 = vmatpush2.bf16.msra.mxu0 %v18164_v44  ;;  %12740 = vmatprep.subr.bf16.mxu1 %v18169_v7  ;;  %v18227_v44 = vld [vmem:[%s24443_s14 + $0x8d0] ss:$8 sps:$4 sm:$0xff]   ;;  %v18232_v7 = vld [vmem:[%s24443_s14 + $0x8c4] ss:$8 sps:$4 sm:$0xff]  }
 0x8f9   :  { %12989 = vmatprep.subr.bf16.mxu0 %v18172_v18  ;;  %v18230_v18 = vld [vmem:[%s24443_s14 + $0x8c0] ss:$8 sps:$4 sm:$0xff]  }
 0x8fb   :  { %12741 = vmatpush2.bf16.msra.mxu1 %v18167_v60  ;;  %v18235_v60 = vld [vmem:[%s24443_s14 + $0x8b4] ss:$8 sps:$4 sm:$0xff]  }
 0x8fc   :  { %12990 = vmatpush2.bf16.msra.mxu0 %v18170_v50  ;;  %12742 = vmatprep.subr.bf16.mxu1 %v18175_v25  ;;  %v18233_v50 = vld [vmem:[%s24443_s14 + $0x8b0] ss:$8 sps:$4 sm:$0xff]   ;;  %v18238_v25 = vld [vmem:[%s24443_s14 + $0x8a4] ss:$8 sps:$4 sm:$0xff]  }
 0x8fd   :  { %12991 = vmatprep.subr.bf16.mxu0 %v18178_v46  ;;  %v18236_v46 = vld [vmem:[%s24443_s14 + $0x8a0] ss:$8 sps:$4 sm:$0xff]  }
 0x8ff   :  { %12743 = vmatpush2.bf16.msra.mxu1 %v18173_v38  ;;  %v18241_v38 = vld [vmem:[%s24443_s14 + $0x894] ss:$8 sps:$4 sm:$0xff]  }
 0x900   :  { %12992 = vmatpush2.bf16.msra.mxu0 %v18176_v20  ;;  %12744 = vmatprep.subr.bf16.mxu1 %v18181_v30  ;;  %v18239_v20 = vld [vmem:[%s24443_s14 + $0x890] ss:$8 sps:$4 sm:$0xff]   ;;  %v18244_v30 = vld [vmem:[%s24443_s14 + $0x884] ss:$8 sps:$4 sm:$0xff]  }
 0x901   :  { %12993 = vmatprep.subr.bf16.mxu0 %v18184_v32  ;;  %v13010_v32 = vrot.slane %v23640_v63, 3 }
 0x903   :  { %12745 = vmatpush2.bf16.msra.mxu1 %v18179_v62  ;;  %v18242_v62 = vld [vmem:[%s24443_s14 + $0x880] ss:$8 sps:$4 sm:$0xff]  }
 0x904   :  { %12994 = vmatpush2.bf16.msra.mxu0 %v18182_v40  ;;  %12746 = vmatprep.subr.bf16.mxu1 %v18187_v45  ;;  %v13019_v40 = vmul.f32 %v24261_v13, %v13010_v32  ;;  %v18252_v32 = vld [vmem:[%s24446_s17 + $0x20] sm:$0xff]  }
 0x905   :  { %12995 = vmatprep.subr.bf16.mxu0 %v18190_v0 }
 0x906   :  { %v13021_v45 = vpack.c.bf16 %v13019_v40, %v13019_v40  ;;  %v18254_v40 = vld [vmem:[%s24446_s17 + $0x18] sm:$0xff]  }
 0x907   :  { %12747 = vmatpush2.bf16.msra.mxu1 %v18185_v11 }
 0x908   :  { %12996 = vmatpush2.bf16.msra.mxu0 %v18188_v9  ;;  %12748 = vmatprep.subr.bf16.mxu1 %v18193_v61 }
 0x909   :  { %12997 = vmatprep.subr.bf16.mxu0 %v18196_v19 }
 0x90b   :  { %12749 = vmatpush2.bf16.msra.mxu1 %v18191_v16 }
 0x90c   :  { %12998 = vmatpush2.bf16.msra.mxu0 %v18194_v24  ;;  %13216 = vmatprep.subr.bf16.mxu1 %v18199_v56 }
 0x90e   :  { %12751 = vmatmul.mubr.bf16.vlgmr.msra.gmra.mxu1 %v12523_v48  ;;  %v11314_v35 = vpop.f32.mrf.mxu1  ;;  %v11515_v49 = vpop.f32.mrf.mxu0 }
 0x90f   :  { %13000 = vmatmul.mubr.bf16.vlgmr.msra.gmra.mxu0 %v12772_v4  ;;  %v24271_v31 = vadd.f32 %v11515_v49, %v11314_v35  ;;  %13217 = vmatpush1.bf16.msra.mxu1 %v18197_v33 }
 0x910   :  { %13248 = vmatprep.mubr.bf16.mxu1 %v13022_v43  ;;  %v11316_v12 = vpop.f32.mrf.mxu1  ;;  %v11517_v27 = vpop.f32.mrf.mxu0  ;;  %13218 = vmatprep.subr.bf16.mxu1 %v18202_v3 }
 0x911   :  { %v24279_v17 = vadd.f32 %v11517_v27, %v11316_v12  ;;  %13321 = vmatprep.mubr.bf16.mxu0 %v24728_v54  ;;  %v18211_v54 = vld [vmem:[%s24443_s14 + $0x834] ss:$8 sps:$4 sm:$0xff]  }
 0x912   :  { %v11318_v51 = vpop.f32.mrf.mxu1  ;;  %v11519_v2 = vpop.f32.mrf.mxu0 }
 0x913   :  { %13219 = vmatpush1.bf16.msra.mxu1 %v18200_v42 }
 0x914   :  { %v11319_v15 = vpop.f32.mrf.mxu1  ;;  %v11520_v57 = vpop.f32.mrf.mxu0  ;;  %13220 = vmatprep.subr.bf16.mxu1 %v18205_v47 }
 0x917   :  { %13221 = vmatpush1.bf16.msra.mxu1 %v18203_v36 }
 0x918   :  { %13222 = vmatprep.subr.bf16.mxu1 %v18208_v37  ;;  %v13259_v37 = vld [vmem:[%s24444_s15] sm:$0x3] }
 0x91b   :  { %13223 = vmatpush1.bf16.msra.mxu1 %v18206_v53 }
 0x91c   :  { %13224 = vmatprep.subr.bf16.mxu1 %v18211_v54 }
 0x91f   :  { %13225 = vmatpush1.bf16.msra.mxu1 %v18209_v1  ;;  %v13264_v1 = vrot.slane %v13259_v37, %v20804_v41  ;;  %v18245_v41 = vld [vmem:[%s24446_s17 + $0x78] sm:$0xff]  }
 0x920   :  { %13226 = vmatprep.subr.bf16.mxu1 %v18214_v34 }
 0x923   :  { %13227 = vmatpush1.bf16.msra.mxu1 %v18212_v8 }
 0x924   :  { %13228 = vmatprep.subr.bf16.mxu1 %v18217_v59 }
 0x927   :  { %13229 = vmatpush1.bf16.msra.mxu1 %v18215_v14  ;;  %v13268_v14 = vrot.slane %v13259_v37, %v20829_v6  ;;  %v13275_v6 = vld [vmem:[%s24445_s16] sm:$0x1] }
 0x928   :  { %13230 = vmatprep.subr.bf16.mxu1 %v18220_v52 }
 0x92b   :  { %13231 = vmatpush1.bf16.msra.mxu1 %v18218_v28 }
 0x92c   :  { %13232 = vmatprep.subr.bf16.mxu1 %v18223_v58 }
 0x92f   :  { %13233 = vmatpush2.bf16.msra.mxu1 %v18221_v55 }
 0x930   :  { %13234 = vmatprep.subr.bf16.mxu1 %v18226_v21 }
 0x933   :  { %13235 = vmatpush2.bf16.msra.mxu1 %v18224_v23 }
 0x934   :  { %13236 = vmatprep.subr.bf16.mxu1 %v18229_v29 }
 0x937   :  { %13237 = vmatpush2.bf16.msra.mxu1 %v18227_v44 }
 0x938   :  { %13238 = vmatprep.subr.bf16.mxu1 %v18232_v7 }
 0x93b   :  { %13239 = vmatpush2.bf16.msra.mxu1 %v18230_v18 }
 0x93c   :  { %13240 = vmatprep.subr.bf16.mxu1 %v18235_v60 }
 0x93f   :  { %13241 = vmatpush2.bf16.msra.mxu1 %v18233_v50  ;;  %v18246_v50 = vld [vmem:[%s24446_s17 + $0x38] sm:$0xff]  }
 0x940   :  { %13242 = vmatprep.subr.bf16.mxu1 %v18238_v25  ;;  %v18247_v25 = vld [vmem:[%s24446_s17 + $0x70] sm:$0xff]  }
 0x943   :  { %13243 = vmatpush2.bf16.msra.mxu1 %v18236_v46  ;;  %v18248_v46 = vld [vmem:[%s24446_s17 + $0x30] sm:$0xff]  }
 0x944   :  { %13244 = vmatprep.subr.bf16.mxu1 %v18241_v38  ;;  %v18249_v38 = vld [vmem:[%s24446_s17 + $0x68] sm:$0xff]  }
 0x947   :  { %13245 = vmatpush2.bf16.msra.mxu1 %v18239_v20  ;;  %v18250_v20 = vld [vmem:[%s24446_s17 + $0x28] sm:$0xff]  }
 0x948   :  { %13246 = vmatprep.subr.bf16.mxu1 %v18244_v30  ;;  %v18251_v30 = vld [vmem:[%s24446_s17 + $0x60] sm:$0xff]  }
 0x94b   :  { %13247 = vmatpush2.bf16.msra.mxu1 %v18242_v62  ;;  %v18253_v62 = vld [vmem:[%s24446_s17 + $0x58] sm:$0xff]  }
 0x94e   :  { %v11762_v0 = vpop.f32.mrf.mxu1  ;;  %v12009_v11 = vpop.f32.mrf.mxu0  ;;  %13249 = vmatmul.mubr.bf16.vlgmr.msra.gmra.mxu1 %v13021_v45  ;;  %v18255_v45 = vld [vmem:[%s24446_s17 + $0x50] sm:$0xff]  }
 0x94f   :  { %v11769_v9 = vadd.f32 %v11762_v0, %v24271_v31  ;;  %v18256_v0 = vld [vmem:[%s24446_s17 + $0x10] sm:$0xff]  }
 0x950   :  { %v11764_v61 = vpop.f32.mrf.mxu1  ;;  %v12011_v19 = vpop.f32.mrf.mxu0 }
 0x951   :  { %v12016_v39 = vadd.f32 %v12009_v11, %v11769_v9  ;;  %v11770_v63 = vadd.f32 %v11764_v61, %v24279_v17  ;;  %v18257_v11 = vld [vmem:[%s24446_s17 + $0x48] sm:$0xff]   ;;  %v18259_v61 = vld [vmem:[%s24446_s17 + $0x40] sm:$0xff]  }
 0x952   :  { %v11766_v26 = vpop.f32.mrf.mxu1  ;;  %v12013_v16 = vpop.f32.mrf.mxu0  ;;  %v18258_v9 = vld [vmem:[%s24446_s17 + $0x8] sm:$0xff]  }
 0x953   :  { %v12017_v24 = vadd.f32 %v12011_v19, %v11770_v63  ;;  %v18260_v19 = vld [vmem:[%s24446_s17] sm:$0xff]   ;;  %s18261_s17 = scalar_lea.vmem %s13515_s21, 32 }
 0x954   :  { %v11767_v5 = vpop.f32.mrf.mxu1  ;;  %v12014_v56 = vpop.f32.mrf.mxu0  ;;  %p18262_p0 = scmp.ne.s32.totalorder %s13515_s21, %s18261_s17  ;;  %p18267_p2 = scmp.lt.s32.totalorder %s18261_s17, %s18261_s17 }
 0x956   :  { %p18268_p3 = por %p18267_p2, %p18266_p1 }
 0x958   :  { %p18269_p4 = pnand %p18268_p3, %p18262_p0 }
 0x98e   :  { %v12256_v22 = vpop.f32.mrf.mxu1 }
 0x98f   :  { %v12263_v10 = vadd.f32 %v12256_v22, %v12016_v39  ;;  %v12505_v13 = vpop.f32.mrf.mxu0 }
 0x990   :  { %v12258_v33 = vpop.f32.mrf.mxu1 }
 0x991   :  { %v12512_v48 = vadd.f32 %v12505_v13, %v12263_v10  ;;  %v12264_v3 = vadd.f32 %v12258_v33, %v12017_v24  ;;  %v12507_v4 = vpop.f32.mrf.mxu0  ;;  %v16222_v10 = vld [vmem:[%s24447_s18] ss:$0 sm:$0xff] }
 0x992   :  { %v12260_v35 = vpop.f32.mrf.mxu1 }
 0x993   :  { %v12513_v49 = vadd.f32 %v12507_v4, %v12264_v3  ;;  %v12509_v43 = vpop.f32.mrf.mxu0 }
 0x994   :  { %v12261_v31 = vpop.f32.mrf.mxu1 }
 0x995   :  { %v12510_v42 = vpop.f32.mrf.mxu0 }
 0x9ce   :  { %v12752_v12 = vpop.f32.mrf.mxu1 }
 0x9cf   :  { %v13001_v27 = vpop.f32.mrf.mxu0  ;;  %v12759_v57 = vadd.f32 %v12752_v12, %v12512_v48 }
 0x9d0   :  { %v12754_v47 = vpop.f32.mrf.mxu1 }
 0x9d1   :  { %v13003_v17 = vpop.f32.mrf.mxu0  ;;  %v12760_v53 = vadd.f32 %v12754_v47, %v12513_v49  ;;  %v13008_v54 = vadd.f32 %v13001_v27, %v12759_v57 }
 0x9d2   :  { %v12756_v51 = vpop.f32.mrf.mxu1 }
 0x9d3   :  { %v13005_v2 = vpop.f32.mrf.mxu0  ;;  %v13009_v8 = vadd.f32 %v13003_v17, %v12760_v53 }
 0x9d4   :  { %v12757_v36 = vpop.f32.mrf.mxu1 }
 0x9d5   :  { %v13006_v15 = vpop.f32.mrf.mxu0 }
 0xa0e   :  { %v13250_v34 = vpop.f32.mrf.mxu1 }
 0xa0f   :  { %v13257_v59 = vadd.f32 %v13250_v34, %v13008_v54 }
 0xa10   :  { %v13252_v52 = vpop.f32.mrf.mxu1 }
 0xa11   :  { %v13271_v28 = vadd.f32 %v13264_v1, %v13257_v59  ;;  %v13258_v58 = vadd.f32 %v13252_v52, %v13009_v8 }
 0xa12   :  { %v13254_v55 = vpop.f32.mrf.mxu1 }
 0xa13   :  { %v13273_v21 = vmax.f32 %v13271_v28, 0.0  ;;  %v13272_v23 = vadd.f32 %v13268_v14, %v13258_v58 }
 0xa14   :  { %v13255_v29 = vpop.f32.mrf.mxu1 }
 0xa15   :  { %v13276_v44 = vpack.c.bf16 %v13273_v21, %v13273_v21  ;;  %v13274_v7 = vmax.f32 %v13272_v23, 0.0 }
 0xa17   :  { %v13277_v18 = vpack.c.bf16 %v13274_v7, %v13274_v7  ;;  %v13284_v60 = vsel %vm13282_vm9, %v13276_v44, 0 }
 0xa19   :  { %16220 = vmatprep.subr.msk.bf16.mxu0 %vm13282_vm9, %v13277_v18 }
 0xa1a   :  { %13304 = vmatpush1.bf16.msra.mxu0 %v13284_v60 }
 0xa1b   :  { %16319 = vmatprep.subr.bf16.mxu0 %v18245_v41 }
 0xa1d   :  { %16221 = vmatmul.mubr.msk.bf16.vlgmr.msra.gmra.mxu0 %vm13278_vm10, %v13275_v6 }
 0xa1e   :  { %16320 = vmatpush3.bf16.msra.mxu0 %v18246_v50 }
 0xa1f   :  { %16321 = vmatprep.subr.bf16.mxu0 %v18247_v25 }
 0xa22   :  { %16322 = vmatpush3.bf16.msra.mxu0 %v18248_v46 }
 0xa23   :  { %16323 = vmatprep.subr.bf16.mxu0 %v18249_v38 }
 0xa26   :  { %16324 = vmatpush3.bf16.msra.mxu0 %v18250_v20 }
 0xa27   :  { %16325 = vmatprep.subr.bf16.mxu0 %v18251_v30 }
 0xa2a   :  { %16326 = vmatpush3.bf16.msra.mxu0 %v18252_v32 }
 0xa2b   :  { %16327 = vmatprep.subr.bf16.mxu0 %v18253_v62 }
 0xa2e   :  { %16328 = vmatpush3.bf16.msra.mxu0 %v18254_v40 }
 0xa2f   :  { %16329 = vmatprep.subr.bf16.mxu0 %v18255_v45 }
 0xa32   :  { %16330 = vmatpush3.bf16.msra.mxu0 %v18256_v0 }
 0xa33   :  { %16331 = vmatprep.subr.bf16.mxu0 %v18257_v11 }
 0xa36   :  { %16332 = vmatpush3.bf16.msra.mxu0 %v18258_v9 }
 0xa37   :  { %16333 = vmatprep.subr.bf16.mxu0 %v18259_v61 }
 0xa3a   :  { %16334 = vmatpush3.bf16.msra.mxu0 %v18260_v19 }
 0xadd   :  { %v13323_v39 = vpop.f32.mrf.mxu0 }
 0xade   :  { %v13330_v16 = vpack.c.bf16 %v13323_v39, %v13323_v39 }
 0xadf   :  { %v13325_v63 = vpop.f32.mrf.mxu0 }
 0xae0   :  { %v13331_v26 = vpack.c.bf16 %v13325_v63, %v13325_v63 }
 0xae1   :  { %v13327_v24 = vpop.f32.mrf.mxu0 }
 0xae2   :  { %13499 = vmatprep.mubr.bf16.mxu0 %v13331_v26 }
 0xae3   :  { %13500 = vmatmul.mubr.bf16.vlgmr.msra.gmra.mxu0 %v13330_v16  ;;  %v13328_v5 = vpop.f32.mrf.mxu0 }
 0xba3   :  { %v16335_v56 = vpop.f32.mrf.mxu0 }
 0xba5   :  { %v16336_v22 = vpop.f32.mrf.mxu0 }
 0xba6   :  { %v16337_v13 = vadd.f32 %v16336_v22, %v16335_v56 }
 0xba7   :  { %v16338_v33 = vpop.f32.mrf.mxu0 }
 0xba8   :  { %v13502_v48 = vadd.f32 %v16337_v13, %v16222_v10 }
 0xba9   :  { %v16339_v3 = vpop.f32.mrf.mxu0 }
 0xbaa   :  { %13507 = vst [vmem:[#allocation2] sm:$0x3] %v13502_v48 }
 0xbab   :  { %18272 = shalt.err (!%p18269_p4)
}
 0xbac   :  { %13517 = dma.vmem_to_hbm [thread:$0]  %s13515_s21, 32, %s24448_s19, [#allocation3]  }
 0xbad   :  { %18281 = dma.done.wait [#allocation3], 32  }
 0xbae   :  { %18282 = vsyncadd [#allocation3], 4294967264 }
 0xbaf   :  { %13521 = vsyncpa [#allocation3], 1 }

</bundles_post_ra>
